<compile_context>
chip_gen: v7x
topology: tpu7x:2x2x1
jax: 0.10.0
libtpu: 0.0.40
codegen_flags: <defaults>
</compile_context>

<pallas_src>
import functools
import math

import jax
import jax.numpy as jnp
from jax import lax
from jax.experimental import pallas as pl
from jax.experimental.pallas import tpu as pltpu


# ----------------------------- kernel helpers -----------------------------

def _mm(a, b):
    """(M, K) @ (K, N) matmul with f32 accumulation (operands usually bf16)."""
    return lax.dot_general(
        a, b, (((1,), (0,)), ((), ())), preferred_element_type=jnp.float32
    )


def _layernorm(x, gamma, beta, eps=1e-5):
    mean = jnp.mean(x, axis=-1, keepdims=True)
    xc = x - mean
    var = jnp.mean(xc * xc, axis=-1, keepdims=True)
    return xc * lax.rsqrt(var + eps) * gamma + beta


def _softmax(x, axis):
    m = jnp.max(x, axis=axis, keepdims=True)
    e = jnp.exp(x - m)
    return e * pl.reciprocal(jnp.sum(e, axis=axis, keepdims=True), approx=True)


def _l2_normalize(x, eps=1e-12):
    n = jnp.sqrt(jnp.sum(x * x, axis=-1, keepdims=True))
    return x * pl.reciprocal(jnp.maximum(n, eps), approx=True)


def _gelu_exact(x):
    # matches torch.nn.GELU() (erf formulation), computed in f32
    return 0.5 * x * (1.0 + lax.erf(x / math.sqrt(2.0)))


# ------------------------------- the kernel -------------------------------

def block_kernel(
    x_ref, g1_ref, b1_ref, wqkv_ref, wproj_ref, bproj_ref,
    g2_ref, b2_ref, rwn_ref, w1_ref, w2_ref, o_ref,
    *, num_heads, num_experts, slots_per_expert,
):
    Nb, L, D = x_ref.shape
    hd = D // num_heads
    M = Nb * L
    spe = slots_per_expert
    bf16 = jnp.bfloat16

    x = x_ref[...]                                   # (Nb, L, D) f32
    xf = x.reshape(M, D)                             # fold batch into M

    # ---- norm1 + multi-head self-attention ----
    xn = _layernorm(xf, g1_ref[...], b1_ref[...])    # f32 stats
    xn_bf = xn.astype(bf16)

    # ONE full-width fused QKV projection: (M, D) @ (D, 3D).
    # (attn scale is pre-folded into the Q weight columns host-side)
    qkv = _mm(xn_bf, wqkv_ref[...])                  # (M, 3D) f32
    qkv_bf = qkv.astype(bf16)                        # single cast for q/k/v
    q_full = qkv_bf[:, 0:D]
    k_full = qkv_bf[:, D:2 * D]
    v_full = qkv_bf[:, 2 * D:3 * D]

    heads = []
    for h in range(num_heads):                       # static (H == 4)
        q = q_full[:, h * hd:(h + 1) * hd].reshape(Nb, L, hd)
        k = k_full[:, h * hd:(h + 1) * hd].reshape(Nb, L, hd)
        v = v_full[:, h * hd:(h + 1) * hd].reshape(Nb, L, hd)
        s = jnp.einsum("nle,nme->nlm", q, k,
                       preferred_element_type=jnp.float32)
        p = _softmax(s, axis=-1)                     # f32
        oh = jnp.einsum("nlm,nme->nle", p.astype(bf16), v,
                        preferred_element_type=jnp.float32)
        heads.append(oh.astype(bf16))                # bf16 before lane concat

    # heads contiguous along lanes -> ONE full-width projection matmul (K = D)
    o_all = jnp.concatenate(heads, axis=-1).reshape(M, D)
    attend = _mm(o_all, wproj_ref[...]) + bproj_ref[...]
    x1 = xf + attend                                 # (M, D) f32 residual

    # ---- norm2 + soft-MoE MLP ----
    z = _layernorm(x1, g2_ref[...], b2_ref[...])     # (M, D) f32
    zn = _l2_normalize(z)

    z3 = z.reshape(Nb, L, D)
    zn3 = zn.reshape(Nb, L, D)
    # rwn is already L2-normalized * scale (hoisted host-side), bf16.
    # logits[n, l, s] == reference logits[n, s, l]
    # TODO(synk): a lane-dense (Nb, S, L) logits layout would make both
    # softmaxes denser, but needs an explicit minor-dim transpose; the
    # tensors are tiny so we keep the proven (Nb, L, S) layout.
    logits = lax.dot_general(
        zn3.astype(bf16), rwn_ref[...],
        (((2,), (1,)), ((), ())), preferred_element_type=jnp.float32)
    dispatch = _softmax(logits, axis=1)              # softmax over tokens
    combine = _softmax(logits, axis=2)               # softmax over slots

    # single fused dispatch matmul over ALL slots
    zd = jnp.einsum("nls,nld->nsd", dispatch.astype(bf16), z3.astype(bf16),
                    preferred_element_type=jnp.float32)   # (Nb, S, D)

    # ---- expert MLP: batched over the expert axis (2 dot_generals total) ----
    zd_bf = zd.astype(bf16)
    zd_stack = jnp.stack(
        [zd_bf[:, e * spe:(e + 1) * spe, :].reshape(Nb * spe, D)
         for e in range(num_experts)], axis=0)       # (E, Nb*spe, D) bf16
    h1 = jnp.einsum("emd,edh->emh", zd_stack, w1_ref[...],
                    preferred_element_type=jnp.float32)   # (E, Nb*spe, hidden)
    h1 = _gelu_exact(h1)
    out_e = jnp.einsum("emh,ehd->emd", h1.astype(bf16), w2_ref[...],
                       preferred_element_type=jnp.float32)  # (E, Nb*spe, D)
    out_all = jnp.concatenate(
        [out_e[e].reshape(Nb, spe, D) for e in range(num_experts)],
        axis=1)                                      # (Nb, S, D)

    # single fused combine matmul over ALL slots (K = S)
    zc = jnp.einsum("nls,nsd->nld", combine.astype(bf16), out_all.astype(bf16),
                    preferred_element_type=jnp.float32)   # (Nb, L, D)

    o_ref[...] = x1.reshape(Nb, L, D) + zc


# ------------------------------ host wrapper ------------------------------

def prepare_block_params(p, *, num_heads):
    """Pre-transpose weights to K-major layouts, fold constants, cast to bf16."""
    D = p["wproj"].shape[0]
    hd = D // num_heads
    bf16 = jnp.bfloat16
    attn_scale = 1.0 / math.sqrt(hd)

    # wqkv is (3D, D) row-major [Q; K; V]; transpose to (D, 3D) K-major and
    # fold the attention scale into the Q output columns.
    wqkv_t = jnp.transpose(p["wqkv"])
    col_scale = jnp.concatenate(
        [jnp.full((D,), attn_scale, jnp.float32),
         jnp.ones((2 * D,), jnp.float32)])
    wqkv_t = wqkv_t * col_scale[None, :]

    # Router weight: L2-normalize and apply the learned scale host-side.
    rw = p["rw"]
    rwn = p["rs"].reshape(()) * rw / jnp.maximum(
        jnp.linalg.norm(rw, axis=-1, keepdims=True), 1e-12)

    return dict(
        g1=p["g1"], b1=p["b1"],
        wqkv_t=wqkv_t.astype(bf16),                              # (D, 3D)
        wproj_t=jnp.transpose(p["wproj"]).astype(bf16),          # (D, D)
        bproj=p["bproj"],
        g2=p["g2"], b2=p["b2"],
        rwn=rwn.astype(bf16),                                    # (S, D)
        w1_t=jnp.transpose(p["w1"], (0, 2, 1)).astype(bf16),     # (E, D, hidden)
        w2_t=jnp.transpose(p["w2"], (0, 2, 1)).astype(bf16),     # (E, hidden, D)
    )


def block_forward(x, pp, *, num_heads, num_experts, slots_per_expert,
                  batch_block=None):
    N, L, D = x.shape
    hidden = pp["w1_t"].shape[2]
    slots = num_experts * slots_per_expert

    if batch_block is None:
        # Fold batch into the matmul M dimension: target Nb*L <= 256 rows so
        # the 256-wide MXU on v6e/v7x is filled and per-grid-step overhead is
        # amortized.  On v7x (2 TensorCores) one may prefer the largest Nb
        # that still keeps grid = N // Nb >= 2.
        batch_block = 1
        for d in range(1, N + 1):
            if N % d == 0 and d * L <= 256:
                batch_block = d
    Nb = batch_block
    assert N % Nb == 0 and D % num_heads == 0

    kernel = functools.partial(
        block_kernel, num_heads=num_heads, num_experts=num_experts,
        slots_per_expert=slots_per_expert)

    def full(shape):
        return pl.BlockSpec(shape, lambda n, _nd=len(shape): (0,) * _nd)

    # NOTE: at scaled-up sizes, weight specs should additionally be
    # single-buffered (pipeline_mode=pl.Buffered(1)) and expert weights tiled
    # over a grid axis; at these toy sizes they fit comfortably in VMEM.
    return pl.pallas_call(
        kernel,
        out_shape=jax.ShapeDtypeStruct((N, L, D), jnp.float32),
        grid=(N // Nb,),
        in_specs=[
            pl.BlockSpec((Nb, L, D), lambda n: (n, 0, 0)),        # x
            full((1, D)), full((1, D)),                           # norm1
            full((D, 3 * D)),                                     # fused qkv^T
            full((D, D)), full((1, D)),                           # wproj_t, bproj
            full((1, D)), full((1, D)),                           # norm2
            full((slots, D)),                                     # router (pre-normed)
            full((num_experts, D, hidden)),                       # expert fc1^T
            full((num_experts, hidden, D)),                       # expert fc2^T
        ],
        out_specs=pl.BlockSpec((Nb, L, D), lambda n: (n, 0, 0)),
        compiler_params=pltpu.CompilerParams(
            dimension_semantics=("parallel",),
            # 32 MiB: within default scoped limits on v6e/v7x and leaves
            # headroom on v7x's 64 MiB physical VMEM; actual use is a few MiB.
            vmem_limit_bytes=32 * 1024 * 1024),
    )(
        x, pp["g1"], pp["b1"], pp["wqkv_t"], pp["wproj_t"], pp["bproj"],
        pp["g2"], pp["b2"], pp["rwn"], pp["w1_t"], pp["w2_t"],
    )


def stage_forward(x, params, *, num_heads, num_experts, slots_per_expert):
    # TODO(synk): attention maps / dispatch weights ("state") are not exported
    # from the fused kernel; only per-block features are returned here.
    state = {}
    for ii, p in enumerate(params):
        pp = prepare_block_params(p, num_heads=num_heads)
        x = block_forward(x, pp, num_heads=num_heads,
                          num_experts=num_experts,
                          slots_per_expert=slots_per_expert)
        state[f"blocks.{ii}.features"] = x
    return x, state


# ------------------------- deterministic parameters -----------------------

def make_block_params(key, dim, num_heads, num_experts, slots_per_expert,
                      mlp_ratio=4.0):
    hidden = int(dim * mlp_ratio)
    slots = num_experts * slots_per_expert
    ks = jax.random.split(key, 6)
    std = 0.02
    return dict(
        g1=jnp.ones((1, dim), jnp.float32),
        b1=jnp.zeros((1, dim), jnp.float32),
        wqkv=(std * jax.random.normal(ks[0], (3 * dim, dim))).astype(jnp.float32),
        wproj=(std * jax.random.normal(ks[1], (dim, dim))).astype(jnp.float32),
        bproj=(std * jax.random.normal(ks[2], (1, dim))).astype(jnp.float32),
        g2=jnp.ones((1, dim), jnp.float32),
        b2=jnp.zeros((1, dim), jnp.float32),
        rw=(std * jax.random.normal(ks[3], (slots, dim))).astype(jnp.float32),
        rs=jnp.ones((1, 1), jnp.float32),
        w1=(std * jax.random.normal(ks[4], (num_experts, hidden, dim))).astype(jnp.float32),
        w2=(std * jax.random.normal(ks[5], (num_experts, dim, hidden))).astype(jnp.float32),
    )


# ----------------------------- pure-JAX reference --------------------------

def block_reference(x, p, *, num_heads, num_experts, slots_per_expert):
    N, L, D = x.shape
    hd = D // num_heads

    def ln(v, g, b, eps=1e-5):
        m = v.mean(-1, keepdims=True)
        var = ((v - m) ** 2).mean(-1, keepdims=True)
        return (v - m) / jnp.sqrt(var + eps) * g.reshape(-1) + b.reshape(-1)

    xn = ln(x, p["g1"], p["b1"])
    qkv = jnp.einsum("nld,ed->nle", xn, p["wqkv"])
    qkv = qkv.reshape(N, L, 3, num_heads, hd).transpose(2, 0, 3, 1, 4)
    q, k, v = qkv[0], qkv[1], qkv[2]
    attn = jax.nn.softmax(
        jnp.einsum("nhld,nhmd->nhlm", q, k) / math.sqrt(hd), axis=-1)
    o = jnp.einsum("nhlm,nhmd->nhld", attn, v).transpose(0, 2, 1, 3).reshape(N, L, D)
    attend = jnp.einsum("nld,ed->nle", o, p["wproj"]) + p["bproj"].reshape(-1)
    x1 = x + attend

    z = ln(x1, p["g2"], p["b2"])
    zn = z / jnp.maximum(jnp.linalg.norm(z, axis=-1, keepdims=True), 1e-12)
    rw = p["rw"]
    rwn = p["rs"].reshape(()) * rw / jnp.maximum(
        jnp.linalg.norm(rw, axis=-1, keepdims=True), 1e-12)
    logits = jnp.einsum("sd,nld->nsl", rwn, zn)
    dispatch = jax.nn.softmax(logits, axis=-1)
    combine = jax.nn.softmax(logits.transpose(0, 2, 1), axis=-1)
    zd = jnp.einsum("nsl,nld->nsd", dispatch, z)

    E, spe = num_experts, slots_per_expert
    zd_e = zd.reshape(N, E, spe, D)
    h1 = jnp.einsum("nesd,ehd->nesh", zd_e, p["w1"])
    h1 = 0.5 * h1 * (1.0 + lax.erf(h1 / math.sqrt(2.0)))
    mlp_out = jnp.einsum("nesh,edh->nesd", h1, p["w2"]).reshape(N, E * spe, D)
    zc = jnp.einsum("nls,nsd->nld", combine, mlp_out)
    return x1 + zc


# ---------------------------------- main -----------------------------------

if __name__ == "__main__":
    key = jax.random.PRNGKey(0)
    N, L, D = 4, 64, 128
    num_heads, num_experts, spe, depth = 4, 4, 2, 2

    kx, kp = jax.random.split(key)
    x = jax.random.normal(kx, (N, L, D), jnp.float32)
    params = [make_block_params(k, D, num_heads, num_experts, spe)
              for k in jax.random.split(kp, depth)]

    out, _state = stage_forward(
        x, params, num_heads=num_heads, num_experts=num_experts,
        slots_per_expert=spe)
    out = jax.block_until_ready(out)

    ref = x
    for p in params:
        ref = block_reference(ref, p, num_heads=num_heads,
                              num_experts=num_experts, slots_per_expert=spe)
    ref = jax.block_until_ready(ref)

    max_err = float(jnp.max(jnp.abs(out - ref)))
    assert out.shape == (N, L, D)
    # bf16 matmul operands vs. the f32 reference -> loosened tolerance
    assert jnp.allclose(out, ref, atol=2e-2, rtol=2e-2), f"max_err={max_err}"
    print("KERNEL_OK")
</pallas_src>

<mosaic_0001>
module attributes {stable_mosaic.version = 11 : i64} {
  func.func @block_kernel(%arg0: i32, %arg1: memref<4x64x128xf32, #tpu.memory_space<vmem>>, %arg2: memref<1x128xf32, #tpu.memory_space<vmem>>, %arg3: memref<1x128xf32, #tpu.memory_space<vmem>>, %arg4: memref<128x384xbf16, #tpu.memory_space<vmem>>, %arg5: memref<128x128xbf16, #tpu.memory_space<vmem>>, %arg6: memref<1x128xf32, #tpu.memory_space<vmem>>, %arg7: memref<1x128xf32, #tpu.memory_space<vmem>>, %arg8: memref<1x128xf32, #tpu.memory_space<vmem>>, %arg9: memref<8x128xbf16, #tpu.memory_space<vmem>>, %arg10: memref<4x128x512xbf16, #tpu.memory_space<vmem>>, %arg11: memref<4x512x128xbf16, #tpu.memory_space<vmem>>, %arg12: memref<4x64x128xf32, #tpu.memory_space<vmem>>) attributes {dimension_semantics = [#tpu.dimension_semantics<parallel>], iteration_bounds = array<i64: 1>, scalar_prefetch = 0 : i64, scratch_operands = 0 : i64, tpu.core_type = #tpu.core_type<tc>, window_params = [{transform_indices = @transform_0, window_bounds = array<i64: 4, 64, 128>}, {pipeline_mode = #tpu.pipeline_mode<synchronous>, transform_indices = @transform_1, window_bounds = array<i64: 1, 128>}, {pipeline_mode = #tpu.pipeline_mode<synchronous>, transform_indices = @transform_2, window_bounds = array<i64: 1, 128>}, {pipeline_mode = #tpu.pipeline_mode<synchronous>, transform_indices = @transform_3, window_bounds = array<i64: 128, 384>}, {pipeline_mode = #tpu.pipeline_mode<synchronous>, transform_indices = @transform_4, window_bounds = array<i64: 128, 128>}, {pipeline_mode = #tpu.pipeline_mode<synchronous>, transform_indices = @transform_5, window_bounds = array<i64: 1, 128>}, {pipeline_mode = #tpu.pipeline_mode<synchronous>, transform_indices = @transform_6, window_bounds = array<i64: 1, 128>}, {pipeline_mode = #tpu.pipeline_mode<synchronous>, transform_indices = @transform_7, window_bounds = array<i64: 1, 128>}, {pipeline_mode = #tpu.pipeline_mode<synchronous>, transform_indices = @transform_8, window_bounds = array<i64: 8, 128>}, {pipeline_mode = #tpu.pipeline_mode<synchronous>, transform_indices = @transform_9, window_bounds = array<i64: 4, 128, 512>}, {pipeline_mode = #tpu.pipeline_mode<synchronous>, transform_indices = @transform_10, window_bounds = array<i64: 4, 512, 128>}, {transform_indices = @transform_11, window_bounds = array<i64: 4, 64, 128>}]} {
    %c0 = arith.constant 0 : index
    %c0_0 = arith.constant 0 : index
    %c0_1 = arith.constant 0 : index
    %0 = vector.load %arg1[%c0, %c0_0, %c0_1] : memref<4x64x128xf32, #tpu.memory_space<vmem>>, vector<4x64x128xf32>
    %1 = vector.shape_cast %0 : vector<4x64x128xf32> to vector<256x128xf32>
    %c0_2 = arith.constant 0 : index
    %c0_3 = arith.constant 0 : index
    %2 = vector.load %arg2[%c0_2, %c0_3] : memref<1x128xf32, #tpu.memory_space<vmem>>, vector<1x128xf32>
    %c0_4 = arith.constant 0 : index
    %c0_5 = arith.constant 0 : index
    %3 = vector.load %arg3[%c0_4, %c0_5] : memref<1x128xf32, #tpu.memory_space<vmem>>, vector<1x128xf32>
    %cst = arith.constant dense<0.000000e+00> : vector<256xf32>
    %4 = vector.multi_reduction <add>, %1, %cst [1] : vector<256x128xf32> to vector<256xf32>
    %5 = vector.shape_cast %4 : vector<256xf32> to vector<256x1xf32>
    %cst_6 = arith.constant 1.280000e+02 : f32
    %6 = vector.broadcast %cst_6 : f32 to vector<256x1xf32>
    %7 = arith.divf %5, %6 : vector<256x1xf32>
    %8 = vector.broadcast %7 : vector<256x1xf32> to vector<256x128xf32>
    %9 = arith.subf %1, %8 : vector<256x128xf32>
    %10 = arith.mulf %9, %9 : vector<256x128xf32>
    %cst_7 = arith.constant dense<0.000000e+00> : vector<256xf32>
    %11 = vector.multi_reduction <add>, %10, %cst_7 [1] : vector<256x128xf32> to vector<256xf32>
    %12 = vector.shape_cast %11 : vector<256xf32> to vector<256x1xf32>
    %cst_8 = arith.constant 1.280000e+02 : f32
    %13 = vector.broadcast %cst_8 : f32 to vector<256x1xf32>
    %14 = arith.divf %12, %13 : vector<256x1xf32>
    %cst_9 = arith.constant 9.99999974E-6 : f32
    %15 = vector.broadcast %cst_9 : f32 to vector<256x1xf32>
    %16 = arith.addf %14, %15 : vector<256x1xf32>
    %17 = math.rsqrt %16 : vector<256x1xf32>
    %18 = vector.broadcast %17 : vector<256x1xf32> to vector<256x128xf32>
    %19 = arith.mulf %9, %18 : vector<256x128xf32>
    %20 = vector.broadcast %2 : vector<1x128xf32> to vector<256x128xf32>
    %21 = arith.mulf %19, %20 : vector<256x128xf32>
    %22 = vector.broadcast %3 : vector<1x128xf32> to vector<256x128xf32>
    %23 = arith.addf %21, %22 : vector<256x128xf32>
    %24 = arith.truncf %23 : vector<256x128xf32> to vector<256x128xbf16>
    %c0_10 = arith.constant 0 : index
    %c0_11 = arith.constant 0 : index
    %25 = vector.load %arg4[%c0_10, %c0_11] : memref<128x384xbf16, #tpu.memory_space<vmem>>, vector<128x384xbf16>
    %cst_12 = arith.constant dense<0.000000e+00> : vector<256x384xf32>
    %26 = tpu.matmul %24, %25, %cst_12 {dimension_numbers = #tpu.dot_dimension_numbers<[1], [0], [0], [1], [0, 0, 1, 1], [], []>} : vector<256x128xbf16>, vector<128x384xbf16>, vector<256x384xf32> -> vector<256x384xf32>
    %27 = arith.truncf %26 : vector<256x384xf32> to vector<256x384xbf16>
    %28 = vector.extract_strided_slice %27 {offsets = [0, 0], sizes = [256, 128], strides = [1, 1]} : vector<256x384xbf16> to vector<256x128xbf16>
    %29 = vector.extract_strided_slice %27 {offsets = [0, 128], sizes = [256, 128], strides = [1, 1]} : vector<256x384xbf16> to vector<256x128xbf16>
    %30 = vector.extract_strided_slice %27 {offsets = [0, 256], sizes = [256, 128], strides = [1, 1]} : vector<256x384xbf16> to vector<256x128xbf16>
    %31 = vector.extract_strided_slice %28 {offsets = [0, 0], sizes = [256, 32], strides = [1, 1]} : vector<256x128xbf16> to vector<256x32xbf16>
    %32 = vector.shape_cast %31 : vector<256x32xbf16> to vector<4x64x32xbf16>
    %33 = vector.extract_strided_slice %29 {offsets = [0, 0], sizes = [256, 32], strides = [1, 1]} : vector<256x128xbf16> to vector<256x32xbf16>
    %34 = vector.shape_cast %33 : vector<256x32xbf16> to vector<4x64x32xbf16>
    %35 = vector.extract_strided_slice %30 {offsets = [0, 0], sizes = [256, 32], strides = [1, 1]} : vector<256x128xbf16> to vector<256x32xbf16>
    %36 = vector.shape_cast %35 : vector<256x32xbf16> to vector<4x64x32xbf16>
    "tpu.trace_start"() <{level = 10 : i32, message = "nle,nme->nlm"}> : () -> ()
    %cst_13 = arith.constant dense<0.000000e+00> : vector<4x64x64xf32>
    %37 = tpu.matmul %32, %34, %cst_13 {dimension_numbers = #tpu.dot_dimension_numbers<[2], [2], [1], [1], [0, 0, 0, 1, 1, 1], [0], [0]>} : vector<4x64x32xbf16>, vector<4x64x32xbf16>, vector<4x64x64xf32> -> vector<4x64x64xf32>
    "tpu.trace_stop"() : () -> ()
    %cst_14 = arith.constant dense<0xFF800000> : vector<4x64xf32>
    %38 = vector.multi_reduction <maximumf>, %37, %cst_14 [2] : vector<4x64x64xf32> to vector<4x64xf32>
    %39 = vector.shape_cast %38 : vector<4x64xf32> to vector<4x64x1xf32>
    %40 = vector.broadcast %39 : vector<4x64x1xf32> to vector<4x64x64xf32>
    %41 = arith.subf %37, %40 : vector<4x64x64xf32>
    %42 = math.exp %41 : vector<4x64x64xf32>
    %cst_15 = arith.constant dense<0.000000e+00> : vector<4x64xf32>
    %43 = vector.multi_reduction <add>, %42, %cst_15 [2] : vector<4x64x64xf32> to vector<4x64xf32>
    %44 = vector.shape_cast %43 : vector<4x64xf32> to vector<4x64x1xf32>
    %45 = tpu.reciprocal %44 {approx = true} : vector<4x64x1xf32> -> vector<4x64x1xf32>
    %46 = vector.broadcast %45 : vector<4x64x1xf32> to vector<4x64x64xf32>
    %47 = arith.mulf %42, %46 : vector<4x64x64xf32>
    %48 = arith.truncf %47 : vector<4x64x64xf32> to vector<4x64x64xbf16>
    "tpu.trace_start"() <{level = 10 : i32, message = "nlm,nme->nle"}> : () -> ()
    %cst_16 = arith.constant dense<0.000000e+00> : vector<4x64x32xf32>
    %49 = tpu.matmul %48, %36, %cst_16 {dimension_numbers = #tpu.dot_dimension_numbers<[2], [1], [1], [2], [0, 0, 0, 1, 1, 2], [0], [0]>} : vector<4x64x64xbf16>, vector<4x64x32xbf16>, vector<4x64x32xf32> -> vector<4x64x32xf32>
    "tpu.trace_stop"() : () -> ()
    %50 = arith.truncf %49 : vector<4x64x32xf32> to vector<4x64x32xbf16>
    %51 = vector.extract_strided_slice %28 {offsets = [0, 32], sizes = [256, 32], strides = [1, 1]} : vector<256x128xbf16> to vector<256x32xbf16>
    %52 = vector.shape_cast %51 : vector<256x32xbf16> to vector<4x64x32xbf16>
    %53 = vector.extract_strided_slice %29 {offsets = [0, 32], sizes = [256, 32], strides = [1, 1]} : vector<256x128xbf16> to vector<256x32xbf16>
    %54 = vector.shape_cast %53 : vector<256x32xbf16> to vector<4x64x32xbf16>
    %55 = vector.extract_strided_slice %30 {offsets = [0, 32], sizes = [256, 32], strides = [1, 1]} : vector<256x128xbf16> to vector<256x32xbf16>
    %56 = vector.shape_cast %55 : vector<256x32xbf16> to vector<4x64x32xbf16>
    "tpu.trace_start"() <{level = 10 : i32, message = "nle,nme->nlm"}> : () -> ()
    %cst_17 = arith.constant dense<0.000000e+00> : vector<4x64x64xf32>
    %57 = tpu.matmul %52, %54, %cst_17 {dimension_numbers = #tpu.dot_dimension_numbers<[2], [2], [1], [1], [0, 0, 0, 1, 1, 1], [0], [0]>} : vector<4x64x32xbf16>, vector<4x64x32xbf16>, vector<4x64x64xf32> -> vector<4x64x64xf32>
    "tpu.trace_stop"() : () -> ()
    %cst_18 = arith.constant dense<0xFF800000> : vector<4x64xf32>
    %58 = vector.multi_reduction <maximumf>, %57, %cst_18 [2] : vector<4x64x64xf32> to vector<4x64xf32>
    %59 = vector.shape_cast %58 : vector<4x64xf32> to vector<4x64x1xf32>
    %60 = vector.broadcast %59 : vector<4x64x1xf32> to vector<4x64x64xf32>
    %61 = arith.subf %57, %60 : vector<4x64x64xf32>
    %62 = math.exp %61 : vector<4x64x64xf32>
    %cst_19 = arith.constant dense<0.000000e+00> : vector<4x64xf32>
    %63 = vector.multi_reduction <add>, %62, %cst_19 [2] : vector<4x64x64xf32> to vector<4x64xf32>
    %64 = vector.shape_cast %63 : vector<4x64xf32> to vector<4x64x1xf32>
    %65 = tpu.reciprocal %64 {approx = true} : vector<4x64x1xf32> -> vector<4x64x1xf32>
    %66 = vector.broadcast %65 : vector<4x64x1xf32> to vector<4x64x64xf32>
    %67 = arith.mulf %62, %66 : vector<4x64x64xf32>
    %68 = arith.truncf %67 : vector<4x64x64xf32> to vector<4x64x64xbf16>
    "tpu.trace_start"() <{level = 10 : i32, message = "nlm,nme->nle"}> : () -> ()
    %cst_20 = arith.constant dense<0.000000e+00> : vector<4x64x32xf32>
    %69 = tpu.matmul %68, %56, %cst_20 {dimension_numbers = #tpu.dot_dimension_numbers<[2], [1], [1], [2], [0, 0, 0, 1, 1, 2], [0], [0]>} : vector<4x64x64xbf16>, vector<4x64x32xbf16>, vector<4x64x32xf32> -> vector<4x64x32xf32>
    "tpu.trace_stop"() : () -> ()
    %70 = arith.truncf %69 : vector<4x64x32xf32> to vector<4x64x32xbf16>
    %71 = vector.extract_strided_slice %28 {offsets = [0, 64], sizes = [256, 32], strides = [1, 1]} : vector<256x128xbf16> to vector<256x32xbf16>
    %72 = vector.shape_cast %71 : vector<256x32xbf16> to vector<4x64x32xbf16>
    %73 = vector.extract_strided_slice %29 {offsets = [0, 64], sizes = [256, 32], strides = [1, 1]} : vector<256x128xbf16> to vector<256x32xbf16>
    %74 = vector.shape_cast %73 : vector<256x32xbf16> to vector<4x64x32xbf16>
    %75 = vector.extract_strided_slice %30 {offsets = [0, 64], sizes = [256, 32], strides = [1, 1]} : vector<256x128xbf16> to vector<256x32xbf16>
    %76 = vector.shape_cast %75 : vector<256x32xbf16> to vector<4x64x32xbf16>
    "tpu.trace_start"() <{level = 10 : i32, message = "nle,nme->nlm"}> : () -> ()
    %cst_21 = arith.constant dense<0.000000e+00> : vector<4x64x64xf32>
    %77 = tpu.matmul %72, %74, %cst_21 {dimension_numbers = #tpu.dot_dimension_numbers<[2], [2], [1], [1], [0, 0, 0, 1, 1, 1], [0], [0]>} : vector<4x64x32xbf16>, vector<4x64x32xbf16>, vector<4x64x64xf32> -> vector<4x64x64xf32>
    "tpu.trace_stop"() : () -> ()
    %cst_22 = arith.constant dense<0xFF800000> : vector<4x64xf32>
    %78 = vector.multi_reduction <maximumf>, %77, %cst_22 [2] : vector<4x64x64xf32> to vector<4x64xf32>
    %79 = vector.shape_cast %78 : vector<4x64xf32> to vector<4x64x1xf32>
    %80 = vector.broadcast %79 : vector<4x64x1xf32> to vector<4x64x64xf32>
    %81 = arith.subf %77, %80 : vector<4x64x64xf32>
    %82 = math.exp %81 : vector<4x64x64xf32>
    %cst_23 = arith.constant dense<0.000000e+00> : vector<4x64xf32>
    %83 = vector.multi_reduction <add>, %82, %cst_23 [2] : vector<4x64x64xf32> to vector<4x64xf32>
    %84 = vector.shape_cast %83 : vector<4x64xf32> to vector<4x64x1xf32>
    %85 = tpu.reciprocal %84 {approx = true} : vector<4x64x1xf32> -> vector<4x64x1xf32>
    %86 = vector.broadcast %85 : vector<4x64x1xf32> to vector<4x64x64xf32>
    %87 = arith.mulf %82, %86 : vector<4x64x64xf32>
    %88 = arith.truncf %87 : vector<4x64x64xf32> to vector<4x64x64xbf16>
    "tpu.trace_start"() <{level = 10 : i32, message = "nlm,nme->nle"}> : () -> ()
    %cst_24 = arith.constant dense<0.000000e+00> : vector<4x64x32xf32>
    %89 = tpu.matmul %88, %76, %cst_24 {dimension_numbers = #tpu.dot_dimension_numbers<[2], [1], [1], [2], [0, 0, 0, 1, 1, 2], [0], [0]>} : vector<4x64x64xbf16>, vector<4x64x32xbf16>, vector<4x64x32xf32> -> vector<4x64x32xf32>
    "tpu.trace_stop"() : () -> ()
    %90 = arith.truncf %89 : vector<4x64x32xf32> to vector<4x64x32xbf16>
    %91 = vector.extract_strided_slice %28 {offsets = [0, 96], sizes = [256, 32], strides = [1, 1]} : vector<256x128xbf16> to vector<256x32xbf16>
    %92 = vector.shape_cast %91 : vector<256x32xbf16> to vector<4x64x32xbf16>
    %93 = vector.extract_strided_slice %29 {offsets = [0, 96], sizes = [256, 32], strides = [1, 1]} : vector<256x128xbf16> to vector<256x32xbf16>
    %94 = vector.shape_cast %93 : vector<256x32xbf16> to vector<4x64x32xbf16>
    %95 = vector.extract_strided_slice %30 {offsets = [0, 96], sizes = [256, 32], strides = [1, 1]} : vector<256x128xbf16> to vector<256x32xbf16>
    %96 = vector.shape_cast %95 : vector<256x32xbf16> to vector<4x64x32xbf16>
    "tpu.trace_start"() <{level = 10 : i32, message = "nle,nme->nlm"}> : () -> ()
    %cst_25 = arith.constant dense<0.000000e+00> : vector<4x64x64xf32>
    %97 = tpu.matmul %92, %94, %cst_25 {dimension_numbers = #tpu.dot_dimension_numbers<[2], [2], [1], [1], [0, 0, 0, 1, 1, 1], [0], [0]>} : vector<4x64x32xbf16>, vector<4x64x32xbf16>, vector<4x64x64xf32> -> vector<4x64x64xf32>
    "tpu.trace_stop"() : () -> ()
    %cst_26 = arith.constant dense<0xFF800000> : vector<4x64xf32>
    %98 = vector.multi_reduction <maximumf>, %97, %cst_26 [2] : vector<4x64x64xf32> to vector<4x64xf32>
    %99 = vector.shape_cast %98 : vector<4x64xf32> to vector<4x64x1xf32>
    %100 = vector.broadcast %99 : vector<4x64x1xf32> to vector<4x64x64xf32>
    %101 = arith.subf %97, %100 : vector<4x64x64xf32>
    %102 = math.exp %101 : vector<4x64x64xf32>
    %cst_27 = arith.constant dense<0.000000e+00> : vector<4x64xf32>
    %103 = vector.multi_reduction <add>, %102, %cst_27 [2] : vector<4x64x64xf32> to vector<4x64xf32>
    %104 = vector.shape_cast %103 : vector<4x64xf32> to vector<4x64x1xf32>
    %105 = tpu.reciprocal %104 {approx = true} : vector<4x64x1xf32> -> vector<4x64x1xf32>
    %106 = vector.broadcast %105 : vector<4x64x1xf32> to vector<4x64x64xf32>
    %107 = arith.mulf %102, %106 : vector<4x64x64xf32>
    %108 = arith.truncf %107 : vector<4x64x64xf32> to vector<4x64x64xbf16>
    "tpu.trace_start"() <{level = 10 : i32, message = "nlm,nme->nle"}> : () -> ()
    %cst_28 = arith.constant dense<0.000000e+00> : vector<4x64x32xf32>
    %109 = tpu.matmul %108, %96, %cst_28 {dimension_numbers = #tpu.dot_dimension_numbers<[2], [1], [1], [2], [0, 0, 0, 1, 1, 2], [0], [0]>} : vector<4x64x64xbf16>, vector<4x64x32xbf16>, vector<4x64x32xf32> -> vector<4x64x32xf32>
    "tpu.trace_stop"() : () -> ()
    %110 = arith.truncf %109 : vector<4x64x32xf32> to vector<4x64x32xbf16>
    %111 = tpu.concatenate %50, %70, %90, %110 in 2 : vector<4x64x32xbf16>, vector<4x64x32xbf16>, vector<4x64x32xbf16>, vector<4x64x32xbf16> -> vector<4x64x128xbf16>
    %112 = vector.shape_cast %111 : vector<4x64x128xbf16> to vector<256x128xbf16>
    %c0_29 = arith.constant 0 : index
    %c0_30 = arith.constant 0 : index
    %113 = vector.load %arg5[%c0_29, %c0_30] : memref<128x128xbf16, #tpu.memory_space<vmem>>, vector<128x128xbf16>
    %cst_31 = arith.constant dense<0.000000e+00> : vector<256x128xf32>
    %114 = tpu.matmul %112, %113, %cst_31 {dimension_numbers = #tpu.dot_dimension_numbers<[1], [0], [0], [1], [0, 0, 1, 1], [], []>} : vector<256x128xbf16>, vector<128x128xbf16>, vector<256x128xf32> -> vector<256x128xf32>
    %c0_32 = arith.constant 0 : index
    %c0_33 = arith.constant 0 : index
    %115 = vector.load %arg6[%c0_32, %c0_33] : memref<1x128xf32, #tpu.memory_space<vmem>>, vector<1x128xf32>
    %116 = vector.broadcast %115 : vector<1x128xf32> to vector<256x128xf32>
    %117 = arith.addf %114, %116 : vector<256x128xf32>
    %118 = arith.addf %1, %117 : vector<256x128xf32>
    %c0_34 = arith.constant 0 : index
    %c0_35 = arith.constant 0 : index
    %119 = vector.load %arg7[%c0_34, %c0_35] : memref<1x128xf32, #tpu.memory_space<vmem>>, vector<1x128xf32>
    %c0_36 = arith.constant 0 : index
    %c0_37 = arith.constant 0 : index
    %120 = vector.load %arg8[%c0_36, %c0_37] : memref<1x128xf32, #tpu.memory_space<vmem>>, vector<1x128xf32>
    %cst_38 = arith.constant dense<0.000000e+00> : vector<256xf32>
    %121 = vector.multi_reduction <add>, %118, %cst_38 [1] : vector<256x128xf32> to vector<256xf32>
    %122 = vector.shape_cast %121 : vector<256xf32> to vector<256x1xf32>
    %cst_39 = arith.constant 1.280000e+02 : f32
    %123 = vector.broadcast %cst_39 : f32 to vector<256x1xf32>
    %124 = arith.divf %122, %123 : vector<256x1xf32>
    %125 = vector.broadcast %124 : vector<256x1xf32> to vector<256x128xf32>
    %126 = arith.subf %118, %125 : vector<256x128xf32>
    %127 = arith.mulf %126, %126 : vector<256x128xf32>
    %cst_40 = arith.constant dense<0.000000e+00> : vector<256xf32>
    %128 = vector.multi_reduction <add>, %127, %cst_40 [1] : vector<256x128xf32> to vector<256xf32>
    %129 = vector.shape_cast %128 : vector<256xf32> to vector<256x1xf32>
    %cst_41 = arith.constant 1.280000e+02 : f32
    %130 = vector.broadcast %cst_41 : f32 to vector<256x1xf32>
    %131 = arith.divf %129, %130 : vector<256x1xf32>
    %cst_42 = arith.constant 9.99999974E-6 : f32
    %132 = vector.broadcast %cst_42 : f32 to vector<256x1xf32>
    %133 = arith.addf %131, %132 : vector<256x1xf32>
    %134 = math.rsqrt %133 : vector<256x1xf32>
    %135 = vector.broadcast %134 : vector<256x1xf32> to vector<256x128xf32>
    %136 = arith.mulf %126, %135 : vector<256x128xf32>
    %137 = vector.broadcast %119 : vector<1x128xf32> to vector<256x128xf32>
    %138 = arith.mulf %136, %137 : vector<256x128xf32>
    %139 = vector.broadcast %120 : vector<1x128xf32> to vector<256x128xf32>
    %140 = arith.addf %138, %139 : vector<256x128xf32>
    %141 = arith.mulf %140, %140 : vector<256x128xf32>
    %cst_43 = arith.constant dense<0.000000e+00> : vector<256xf32>
    %142 = vector.multi_reduction <add>, %141, %cst_43 [1] : vector<256x128xf32> to vector<256xf32>
    %143 = vector.shape_cast %142 : vector<256xf32> to vector<256x1xf32>
    %144 = math.sqrt %143 : vector<256x1xf32>
    %cst_44 = arith.constant 9.99999996E-13 : f32
    %145 = vector.broadcast %cst_44 : f32 to vector<256x1xf32>
    %146 = arith.maximumf %144, %145 : vector<256x1xf32>
    %147 = tpu.reciprocal %146 {approx = true} : vector<256x1xf32> -> vector<256x1xf32>
    %148 = vector.broadcast %147 : vector<256x1xf32> to vector<256x128xf32>
    %149 = arith.mulf %140, %148 : vector<256x128xf32>
    %150 = vector.shape_cast %140 : vector<256x128xf32> to vector<4x64x128xf32>
    %151 = vector.shape_cast %149 : vector<256x128xf32> to vector<4x64x128xf32>
    %152 = arith.truncf %151 : vector<4x64x128xf32> to vector<4x64x128xbf16>
    %c0_45 = arith.constant 0 : index
    %c0_46 = arith.constant 0 : index
    %153 = vector.load %arg9[%c0_45, %c0_46] : memref<8x128xbf16, #tpu.memory_space<vmem>>, vector<8x128xbf16>
    %cst_47 = arith.constant dense<0.000000e+00> : vector<4x64x8xf32>
    %154 = tpu.matmul %152, %153, %cst_47 {dimension_numbers = #tpu.dot_dimension_numbers<[2], [1], [0, 1], [0], [0, 0, 0, 1, 1, 0], [], []>} : vector<4x64x128xbf16>, vector<8x128xbf16>, vector<4x64x8xf32> -> vector<4x64x8xf32>
    %cst_48 = arith.constant dense<0xFF800000> : vector<4x8xf32>
    %155 = vector.multi_reduction <maximumf>, %154, %cst_48 [1] : vector<4x64x8xf32> to vector<4x8xf32>
    %156 = vector.shape_cast %155 : vector<4x8xf32> to vector<4x1x8xf32>
    %157 = vector.broadcast %156 : vector<4x1x8xf32> to vector<4x64x8xf32>
    %158 = arith.subf %154, %157 : vector<4x64x8xf32>
    %159 = math.exp %158 : vector<4x64x8xf32>
    %cst_49 = arith.constant dense<0.000000e+00> : vector<4x8xf32>
    %160 = vector.multi_reduction <add>, %159, %cst_49 [1] : vector<4x64x8xf32> to vector<4x8xf32>
    %161 = vector.shape_cast %160 : vector<4x8xf32> to vector<4x1x8xf32>
    %162 = tpu.reciprocal %161 {approx = true} : vector<4x1x8xf32> -> vector<4x1x8xf32>
    %163 = vector.broadcast %162 : vector<4x1x8xf32> to vector<4x64x8xf32>
    %164 = arith.mulf %159, %163 : vector<4x64x8xf32>
    %cst_50 = arith.constant dense<0xFF800000> : vector<4x64xf32>
    %165 = vector.multi_reduction <maximumf>, %154, %cst_50 [2] : vector<4x64x8xf32> to vector<4x64xf32>
    %166 = vector.shape_cast %165 : vector<4x64xf32> to vector<4x64x1xf32>
    %167 = vector.broadcast %166 : vector<4x64x1xf32> to vector<4x64x8xf32>
    %168 = arith.subf %154, %167 : vector<4x64x8xf32>
    %169 = math.exp %168 : vector<4x64x8xf32>
    %cst_51 = arith.constant dense<0.000000e+00> : vector<4x64xf32>
    %170 = vector.multi_reduction <add>, %169, %cst_51 [2] : vector<4x64x8xf32> to vector<4x64xf32>
    %171 = vector.shape_cast %170 : vector<4x64xf32> to vector<4x64x1xf32>
    %172 = tpu.reciprocal %171 {approx = true} : vector<4x64x1xf32> -> vector<4x64x1xf32>
    %173 = vector.broadcast %172 : vector<4x64x1xf32> to vector<4x64x8xf32>
    %174 = arith.mulf %169, %173 : vector<4x64x8xf32>
    %175 = arith.truncf %164 : vector<4x64x8xf32> to vector<4x64x8xbf16>
    %176 = arith.truncf %150 : vector<4x64x128xf32> to vector<4x64x128xbf16>
    "tpu.trace_start"() <{level = 10 : i32, message = "nls,nld->nsd"}> : () -> ()
    %cst_52 = arith.constant dense<0.000000e+00> : vector<4x8x128xf32>
    %177 = tpu.matmul %175, %176, %cst_52 {dimension_numbers = #tpu.dot_dimension_numbers<[1], [1], [2], [2], [0, 0, 0, 2, 1, 2], [0], [0]>} : vector<4x64x8xbf16>, vector<4x64x128xbf16>, vector<4x8x128xf32> -> vector<4x8x128xf32>
    "tpu.trace_stop"() : () -> ()
    %178 = arith.truncf %177 : vector<4x8x128xf32> to vector<4x8x128xbf16>
    %179 = vector.extract_strided_slice %178 {offsets = [0, 0, 0], sizes = [4, 2, 128], strides = [1, 1, 1]} : vector<4x8x128xbf16> to vector<4x2x128xbf16>
    %180 = vector.shape_cast %179 : vector<4x2x128xbf16> to vector<8x128xbf16>
    %181 = vector.extract_strided_slice %178 {offsets = [0, 2, 0], sizes = [4, 2, 128], strides = [1, 1, 1]} : vector<4x8x128xbf16> to vector<4x2x128xbf16>
    %182 = vector.shape_cast %181 : vector<4x2x128xbf16> to vector<8x128xbf16>
    %183 = vector.extract_strided_slice %178 {offsets = [0, 4, 0], sizes = [4, 2, 128], strides = [1, 1, 1]} : vector<4x8x128xbf16> to vector<4x2x128xbf16>
    %184 = vector.shape_cast %183 : vector<4x2x128xbf16> to vector<8x128xbf16>
    %185 = vector.extract_strided_slice %178 {offsets = [0, 6, 0], sizes = [4, 2, 128], strides = [1, 1, 1]} : vector<4x8x128xbf16> to vector<4x2x128xbf16>
    %186 = vector.shape_cast %185 : vector<4x2x128xbf16> to vector<8x128xbf16>
    %187 = vector.shape_cast %180 : vector<8x128xbf16> to vector<1x8x128xbf16>
    %188 = vector.shape_cast %182 : vector<8x128xbf16> to vector<1x8x128xbf16>
    %189 = vector.shape_cast %184 : vector<8x128xbf16> to vector<1x8x128xbf16>
    %190 = vector.shape_cast %186 : vector<8x128xbf16> to vector<1x8x128xbf16>
    %191 = tpu.concatenate %187, %188, %189, %190 in 0 : vector<1x8x128xbf16>, vector<1x8x128xbf16>, vector<1x8x128xbf16>, vector<1x8x128xbf16> -> vector<4x8x128xbf16>
    %c0_53 = arith.constant 0 : index
    %c0_54 = arith.constant 0 : index
    %c0_55 = arith.constant 0 : index
    %192 = vector.load %arg10[%c0_53, %c0_54, %c0_55] : memref<4x128x512xbf16, #tpu.memory_space<vmem>>, vector<4x128x512xbf16>
    "tpu.trace_start"() <{level = 10 : i32, message = "emd,edh->emh"}> : () -> ()
    %cst_56 = arith.constant dense<0.000000e+00> : vector<4x8x512xf32>
    %193 = tpu.matmul %191, %192, %cst_56 {dimension_numbers = #tpu.dot_dimension_numbers<[2], [1], [1], [2], [0, 0, 0, 1, 1, 2], [0], [0]>} : vector<4x8x128xbf16>, vector<4x128x512xbf16>, vector<4x8x512xf32> -> vector<4x8x512xf32>
    "tpu.trace_stop"() : () -> ()
    %cst_57 = arith.constant 5.000000e-01 : f32
    %194 = vector.broadcast %cst_57 : f32 to vector<4x8x512xf32>
    %195 = arith.mulf %194, %193 : vector<4x8x512xf32>
    %cst_58 = arith.constant 1.41421354 : f32
    %196 = vector.broadcast %cst_58 : f32 to vector<4x8x512xf32>
    %197 = arith.divf %193, %196 : vector<4x8x512xf32>
    %198 = math.erf %197 : vector<4x8x512xf32>
    %cst_59 = arith.constant 1.000000e+00 : f32
    %199 = vector.broadcast %cst_59 : f32 to vector<4x8x512xf32>
    %200 = arith.addf %199, %198 : vector<4x8x512xf32>
    %201 = arith.mulf %195, %200 : vector<4x8x512xf32>
    %202 = arith.truncf %201 : vector<4x8x512xf32> to vector<4x8x512xbf16>
    %c0_60 = arith.constant 0 : index
    %c0_61 = arith.constant 0 : index
    %c0_62 = arith.constant 0 : index
    %203 = vector.load %arg11[%c0_60, %c0_61, %c0_62] : memref<4x512x128xbf16, #tpu.memory_space<vmem>>, vector<4x512x128xbf16>
    "tpu.trace_start"() <{level = 10 : i32, message = "emh,ehd->emd"}> : () -> ()
    %cst_63 = arith.constant dense<0.000000e+00> : vector<4x8x128xf32>
    %204 = tpu.matmul %202, %203, %cst_63 {dimension_numbers = #tpu.dot_dimension_numbers<[2], [1], [1], [2], [0, 0, 0, 1, 1, 2], [0], [0]>} : vector<4x8x512xbf16>, vector<4x512x128xbf16>, vector<4x8x128xf32> -> vector<4x8x128xf32>
    "tpu.trace_stop"() : () -> ()
    %205 = vector.extract_strided_slice %204 {offsets = [0, 0, 0], sizes = [1, 8, 128], strides = [1, 1, 1]} : vector<4x8x128xf32> to vector<1x8x128xf32>
    %206 = vector.shape_cast %205 : vector<1x8x128xf32> to vector<8x128xf32>
    %207 = vector.shape_cast %206 : vector<8x128xf32> to vector<4x2x128xf32>
    %208 = vector.extract_strided_slice %204 {offsets = [1, 0, 0], sizes = [1, 8, 128], strides = [1, 1, 1]} : vector<4x8x128xf32> to vector<1x8x128xf32>
    %209 = vector.shape_cast %208 : vector<1x8x128xf32> to vector<8x128xf32>
    %210 = vector.shape_cast %209 : vector<8x128xf32> to vector<4x2x128xf32>
    %211 = vector.extract_strided_slice %204 {offsets = [2, 0, 0], sizes = [1, 8, 128], strides = [1, 1, 1]} : vector<4x8x128xf32> to vector<1x8x128xf32>
    %212 = vector.shape_cast %211 : vector<1x8x128xf32> to vector<8x128xf32>
    %213 = vector.shape_cast %212 : vector<8x128xf32> to vector<4x2x128xf32>
    %214 = vector.extract_strided_slice %204 {offsets = [3, 0, 0], sizes = [1, 8, 128], strides = [1, 1, 1]} : vector<4x8x128xf32> to vector<1x8x128xf32>
    %215 = vector.shape_cast %214 : vector<1x8x128xf32> to vector<8x128xf32>
    %216 = vector.shape_cast %215 : vector<8x128xf32> to vector<4x2x128xf32>
    %217 = tpu.concatenate %207, %210, %213, %216 in 1 : vector<4x2x128xf32>, vector<4x2x128xf32>, vector<4x2x128xf32>, vector<4x2x128xf32> -> vector<4x8x128xf32>
    %218 = arith.truncf %174 : vector<4x64x8xf32> to vector<4x64x8xbf16>
    %219 = arith.truncf %217 : vector<4x8x128xf32> to vector<4x8x128xbf16>
    "tpu.trace_start"() <{level = 10 : i32, message = "nls,nsd->nld"}> : () -> ()
    %cst_64 = arith.constant dense<0.000000e+00> : vector<4x64x128xf32>
    %220 = tpu.matmul %218, %219, %cst_64 {dimension_numbers = #tpu.dot_dimension_numbers<[2], [1], [1], [2], [0, 0, 0, 1, 1, 2], [0], [0]>} : vector<4x64x8xbf16>, vector<4x8x128xbf16>, vector<4x64x128xf32> -> vector<4x64x128xf32>
    "tpu.trace_stop"() : () -> ()
    %221 = vector.shape_cast %118 : vector<256x128xf32> to vector<4x64x128xf32>
    %222 = arith.addf %221, %220 : vector<4x64x128xf32>
    %c0_65 = arith.constant 0 : index
    %c0_66 = arith.constant 0 : index
    %c0_67 = arith.constant 0 : index
    %223 = vector.load %arg12[%c0_65, %c0_66, %c0_67] : memref<4x64x128xf32, #tpu.memory_space<vmem>>, vector<4x64x128xf32>
    tpu.vector_store %arg12[%c0_65, %c0_66, %c0_67], %222 {strides = array<i32>} : memref<4x64x128xf32, #tpu.memory_space<vmem>>, vector<4x64x128xf32>,
    return
  }
  func.func @transform_0(%arg0: i32) -> (i32, i32, i32) {
    %c0_i32 = arith.constant 0 : i32
    %c0_i32_0 = arith.constant 0 : i32
    %c0_i32_1 = arith.constant 0 : i32
    return %arg0, %c0_i32, %c0_i32_0 : i32, i32, i32
  }
  func.func @transform_1(%arg0: i32) -> (i32, i32) {
    %c0_i32 = arith.constant 0 : i32
    %c0_i32_0 = arith.constant 0 : i32
    %c0_i32_1 = arith.constant 0 : i32
    return %c0_i32, %c0_i32_0 : i32, i32
  }
  func.func @transform_2(%arg0: i32) -> (i32, i32) {
    %c0_i32 = arith.constant 0 : i32
    %c0_i32_0 = arith.constant 0 : i32
    %c0_i32_1 = arith.constant 0 : i32
    return %c0_i32, %c0_i32_0 : i32, i32
  }
  func.func @transform_3(%arg0: i32) -> (i32, i32) {
    %c0_i32 = arith.constant 0 : i32
    %c0_i32_0 = arith.constant 0 : i32
    %c0_i32_1 = arith.constant 0 : i32
    return %c0_i32, %c0_i32_0 : i32, i32
  }
  func.func @transform_4(%arg0: i32) -> (i32, i32) {
    %c0_i32 = arith.constant 0 : i32
    %c0_i32_0 = arith.constant 0 : i32
    %c0_i32_1 = arith.constant 0 : i32
    return %c0_i32, %c0_i32_0 : i32, i32
  }
  func.func @transform_5(%arg0: i32) -> (i32, i32) {
    %c0_i32 = arith.constant 0 : i32
    %c0_i32_0 = arith.constant 0 : i32
    %c0_i32_1 = arith.constant 0 : i32
    return %c0_i32, %c0_i32_0 : i32, i32
  }
  func.func @transform_6(%arg0: i32) -> (i32, i32) {
    %c0_i32 = arith.constant 0 : i32
    %c0_i32_0 = arith.constant 0 : i32
    %c0_i32_1 = arith.constant 0 : i32
    return %c0_i32, %c0_i32_0 : i32, i32
  }
  func.func @transform_7(%arg0: i32) -> (i32, i32) {
    %c0_i32 = arith.constant 0 : i32
    %c0_i32_0 = arith.constant 0 : i32
    %c0_i32_1 = arith.constant 0 : i32
    return %c0_i32, %c0_i32_0 : i32, i32
  }
  func.func @transform_8(%arg0: i32) -> (i32, i32) {
    %c0_i32 = arith.constant 0 : i32
    %c0_i32_0 = arith.constant 0 : i32
    %c0_i32_1 = arith.constant 0 : i32
    return %c0_i32, %c0_i32_0 : i32, i32
  }
  func.func @transform_9(%arg0: i32) -> (i32, i32, i32) {
    %c0_i32 = arith.constant 0 : i32
    %c0_i32_0 = arith.constant 0 : i32
    %c0_i32_1 = arith.constant 0 : i32
    %c0_i32_2 = arith.constant 0 : i32
    return %c0_i32, %c0_i32_0, %c0_i32_1 : i32, i32, i32
  }
  func.func @transform_10(%arg0: i32) -> (i32, i32, i32) {
    %c0_i32 = arith.constant 0 : i32
    %c0_i32_0 = arith.constant 0 : i32
    %c0_i32_1 = arith.constant 0 : i32
    %c0_i32_2 = arith.constant 0 : i32
    return %c0_i32, %c0_i32_0, %c0_i32_1 : i32, i32, i32
  }
  func.func @transform_11(%arg0: i32) -> (i32, i32, i32) {
    %c0_i32 = arith.constant 0 : i32
    %c0_i32_0 = arith.constant 0 : i32
    %c0_i32_1 = arith.constant 0 : i32
    return %arg0, %c0_i32, %c0_i32_0 : i32, i32, i32
  }
}

</mosaic_0001>

<bundles_post_ra>
// kernel: tpu_custom_call.1
= control target key start
LH: loop header
LB: loop body
LE: loop exit
PB: predicated region body
PF: predicated region fallthrough
CT: control target
= control target key end

     0   :  { %16 = vsyncpa [#allocation3], 0  ;;  %s19833_s0 = inlined_call_operand.hbm [shape: f32[4,64,128], index: 0, kind: input, shape index: {}]   ;;  %s19834_s1 = inlined_call_operand.vmem [shape: f32[1,128], index: 1, kind: input, shape index: {}]   ;;  %s19835_s2 = inlined_call_operand.vmem [shape: f32[1,128], index: 2, kind: input, shape index: {}]   ;;  %s19836_s3 = inlined_call_operand.hbm [shape: bf16[128,384], index: 3, kind: input, shape index: {}]   ;;  %s19837_s4 = inlined_call_operand.hbm [shape: bf16[128,128], index: 4, kind: input, shape index: {}]   ;;  %s19838_s5 = inlined_call_operand.vmem [shape: f32[1,128], index: 5, kind: input, shape index: {}]   ;;  %s19839_s6 = inlined_call_operand.vmem [shape: f32[1,128], index: 6, kind: input, shape index: {}]   ;;  %s19840_s7 = inlined_call_operand.vmem [shape: f32[1,128], index: 7, kind: input, shape index: {}]   ;;  %s19841_s8 = inlined_call_operand.vmem [shape: bf16[8,128], index: 8, kind: input, shape index: {}]   ;;  %s19842_s9 = inlined_call_operand.hbm [shape: bf16[4,128,512], index: 9, kind: input, shape index: {}]   ;;  %s19843_s10 = inlined_call_operand.hbm [shape: bf16[4,512,128], index: 10, kind: input, shape index: {}]   ;;  %s19844_s11 = inlined_call_operand.hbm [shape: f32[4,64,128], index: 11, kind: output, shape index: {}]  }
   0x1   :  { %17 = vsyncpa [#allocation6], 0 }
   0x2   :  { %18 = vsyncpa [#allocation9], 0 }
   0x3   :  { %19 = vsyncpa [#allocation4], 0  ;;  %s14899_s17 = smov [#allocation5]   ;;  %s14759_s21 = scalar_lea.hbm %s19836_s3, 3072 }
   0x4   :  { %s41_s18 = sshll.u32 %s14899_s17, 4  ;;  %p14760_p0 = scmp.ne.s32.totalorder %s19836_s3, %s14759_s21  ;;  %s42_s18 = int_to_ptr.vmem [resolvable:$true] %s41_s18 }
   0x5   :  { %p14763_p1 = scmp.lt.u32.totalorder %s14759_s21, %s19836_s3 }
   0x7   :  { %p14765_p2 = pnand %p14763_p1, %p14760_p0 }
   0x9   :  { %14768 = shalt.err (!%p14765_p2)
}
   0xa   :  { %s14769_s26 = scalar_lea.vmem %s42_s18, 3072  ;;  %p14774_p4 = scmp.lt.s32.totalorder %s42_s18, %s42_s18 }
   0xb   :  { %p14770_p3 = scmp.ne.s32.totalorder %s42_s18, %s14769_s26  ;;  %p14775_p5 = scmp.lt.s32.totalorder %s14769_s26, %s14769_s26 }
   0xd   :  { %p14776_p6 = por %p14775_p5, %p14774_p4 }
   0xf   :  { %p14777_p7 = pnand %p14776_p6, %p14770_p3 }
  0x11   :  { %14780 = shalt.err (!%p14777_p7)
}
  0x12   :  { %s14900_s27 = smov 192   ;;  %s14901_s28 = smov 12  }
  0x13   :  { %47 = dma.hbm_to_vmem [thread:$0]  %s19836_s3, 3072, %s42_s18, [#allocation6], %s14900_s27, %s14900_s27, %s14901_s28  }
  0x14   :  { %s14902_s12 = smov [#allocation8]   ;;  %s14781_s16 = scalar_lea.hbm %s19842_s9, 16384 }
  0x15   :  { %s73_s13 = sshll.u32 %s14902_s12, 4  ;;  %p14782_p8 = scmp.ne.s32.totalorder %s19842_s9, %s14781_s16  ;;  %s74_s13 = int_to_ptr.vmem [resolvable:$true] %s73_s13 }
  0x16   :  { %p14785_p9 = scmp.lt.u32.totalorder %s14781_s16, %s19842_s9 }
  0x18   :  { %p14787_p10 = pnand %p14785_p9, %p14782_p8 }
  0x1a   :  { %14790 = shalt.err (!%p14787_p10)
}
  0x1b   :  { %s14791_s22 = scalar_lea.vmem %s74_s13, 16384  ;;  %p14796_p12 = scmp.lt.s32.totalorder %s74_s13, %s74_s13 }
  0x1c   :  { %p14792_p11 = scmp.ne.s32.totalorder %s74_s13, %s14791_s22  ;;  %p14797_p13 = scmp.lt.s32.totalorder %s14791_s22, %s14791_s22 }
  0x1e   :  { %p14798_p0 = por %p14797_p13, %p14796_p12 }
  0x20   :  { %p14799_p1 = pnand %p14798_p0, %p14792_p11 }
  0x22   :  { %14802 = shalt.err (!%p14799_p1)
}
  0x23   :  { %s14903_s3 = smov 256   ;;  %s14904_s18 = smov 16  }
  0x24   :  { %79 = dma.hbm_to_vmem [thread:$0]  %s19842_s9, 16384, %s74_s13, [#allocation9], %s14903_s3, %s14903_s3, %s14904_s18  }
  0x25   :  { %s14905_s25 = smov [#allocation2]   ;;  %s14803_s29 = scalar_lea.hbm %s19833_s0, 4096 }
  0x26   :  { %s25_s26 = sshll.u32 %s14905_s25, 4  ;;  %p14804_p2 = scmp.ne.s32.totalorder %s19833_s0, %s14803_s29  ;;  %s26_s26 = int_to_ptr.vmem [resolvable:$true] %s25_s26 }
  0x27   :  { %p14807_p3 = scmp.lt.u32.totalorder %s14803_s29, %s19833_s0 }
  0x29   :  { %p14809_p4 = pnand %p14807_p3, %p14804_p2 }
  0x2b   :  { %14812 = shalt.err (!%p14809_p4)
}
  0x2c   :  { %s14813_s16 = scalar_lea.vmem %s26_s26, 4096  ;;  %p14818_p6 = scmp.lt.s32.totalorder %s26_s26, %s26_s26 }
  0x2d   :  { %p14814_p5 = scmp.ne.s32.totalorder %s26_s26, %s14813_s16  ;;  %p14819_p7 = scmp.lt.s32.totalorder %s14813_s16, %s14813_s16 }
  0x2f   :  { %p14820_p8 = por %p14819_p7, %p14818_p6 }
  0x31   :  { %p14821_p9 = pnand %p14820_p8, %p14814_p5 }
  0x33   :  { %14824 = shalt.err (!%p14821_p9)
}
  0x34   :  { %s14906_s9 = smov 128   ;;  %s14907_s13 = smov 8  }
  0x35   :  { %31 = dma.hbm_to_vmem [thread:$0]  %s19833_s0, 4096, %s26_s26, [#allocation3], %s14906_s9, %s14906_s9, %s14907_s13  }
  0x36   :  { %s14908_s20 = smov [#allocation7]   ;;  %s14825_s18 = scalar_lea.hbm %s19837_s4, 1024 }
  0x37   :  { %s53_s21 = sshll.u32 %s14908_s20, 4  ;;  %p14826_p10 = scmp.ne.s32.totalorder %s19837_s4, %s14825_s18  ;;  %s54_s21 = int_to_ptr.vmem [resolvable:$true] %s53_s21 }
  0x38   :  { %p14829_p11 = scmp.lt.u32.totalorder %s14825_s18, %s19837_s4 }
  0x3a   :  { %p14831_p12 = pnand %p14829_p11, %p14826_p10 }
  0x3c   :  { %14834 = shalt.err (!%p14831_p12)
}
  0x3d   :  { %s14835_s28 = scalar_lea.vmem %s54_s21, 1024  ;;  %p14840_p0 = scmp.lt.s32.totalorder %s54_s21, %s54_s21 }
  0x3e   :  { %p14836_p13 = scmp.ne.s32.totalorder %s54_s21, %s14835_s28  ;;  %p14841_p1 = scmp.lt.s32.totalorder %s14835_s28, %s14835_s28 }
  0x40   :  { %p14842_p2 = por %p14841_p1, %p14840_p0 }
  0x42   :  { %p14843_p3 = pnand %p14842_p2, %p14836_p13 }
  0x44   :  { %14846 = shalt.err (!%p14843_p3)
}
  0x45   :  { %s14909_s0 = smov 64   ;;  %s14910_s26 = smov 4  }
  0x46   :  { %59 = dma.hbm_to_vmem [thread:$0]  %s19837_s4, 1024, %s54_s21, [#allocation6], %s14909_s0, %s14909_s0, %s14910_s26  }
  0x47   :  { %s14911_s12 = smov [#allocation10]   ;;  %s14847_s17 = scalar_lea.hbm %s19843_s10, 16384 }
  0x48   :  { %s85_s14 = sshll.u32 %s14911_s12, 4  ;;  %p14848_p4 = scmp.ne.s32.totalorder %s19843_s10, %s14847_s17  ;;  %s86_s14 = int_to_ptr.vmem [resolvable:$true] %s85_s14 }
  0x49   :  { %p14851_p5 = scmp.lt.u32.totalorder %s14847_s17, %s19843_s10 }
  0x4b   :  { %p14853_p6 = pnand %p14851_p5, %p14848_p4 }
  0x4d   :  { %14856 = shalt.err (!%p14853_p6)
}
  0x4e   :  { %s14857_s18 = scalar_lea.vmem %s86_s14, 16384  ;;  %p14862_p8 = scmp.lt.s32.totalorder %s86_s14, %s86_s14 }
  0x4f   :  { %p14858_p7 = scmp.ne.s32.totalorder %s86_s14, %s14857_s18  ;;  %p14863_p9 = scmp.lt.s32.totalorder %s14857_s18, %s14857_s18 }
  0x51   :  { %p14864_p10 = por %p14863_p9, %p14862_p8 }
  0x53   :  { %p14865_p11 = pnand %p14864_p10, %p14858_p7 }
  0x55   :  { %14868 = shalt.err (!%p14865_p11)
}
  0x56   :  { %91 = dma.hbm_to_vmem [thread:$0]  %s19843_s10, 16384, %s86_s14, [#allocation9], %s14909_s0, %s14909_s0, %s14910_s26  }
  0x57   :  { %14891 = dma.done.wait [#allocation3], 4096  }
  0x58   :  { %14892 = vsyncadd [#allocation3], 4294963200 }
  0x59   :  { %14893 = dma.done.wait [#allocation6], 4096  }
  0x5a   :  { %14894 = vsyncadd [#allocation6], 4294963200 }
  0x5b   :  { %14895 = dma.done.wait [#allocation9], 32768  }
  0x5c   :  { %14896 = vsyncadd [#allocation9], 4294934528  ;;  %v108_v0 = vld [vmem:[#allocation2] sm:$0xff]  ;;  %v110_v1 = vld [vmem:[#allocation2 + $0x10] sm:$0xff]  ;;  %vm1149_vm0 = vcmask 261120   ;;  %vm1506_vm1 = vcmask 523264  }
  0x5d   :  { %142 = vadd.xlane.f32.xlu0 %v108_v0  ;;  %146 = vadd.xlane.f32.xlu1 %v110_v1  ;;  %v109_v2 = vld [vmem:[#allocation2 + $0x8] sm:$0xff]  ;;  %v111_v3 = vld [vmem:[#allocation2 + $0x18] sm:$0xff]  ;;  %v15047_v4 = vld [vmem:[#allocation2 + $0x20] sm:$0xff]  ;;  %s14914_s25 = smov 32   ;;  %vm5951_vm2 = vcmask 785408  }
  0x5e   :  { %v15049_v5 = vld [vmem:[#allocation2 + $0x28] sm:$0xff]  ;;  %v15051_v6 = vld [vmem:[#allocation2 + $0x30] sm:$0xff]  ;;  %v115_v7 = vld [vmem:[#allocation2 + $0x38] sm:$0xff] }
  0x5f   :  { %v116_v8 = vld [vmem:[#allocation2 + $0x40] sm:$0xff]  ;;  %v117_v9 = vld [vmem:[#allocation2 + $0x48] sm:$0xff]  ;;  %v118_v10 = vld [vmem:[#allocation2 + $0x50] sm:$0xff] }
  0x60   :  { %v119_v11 = vld [vmem:[#allocation2 + $0x58] sm:$0xff]  ;;  %v120_v12 = vld [vmem:[#allocation2 + $0x60] sm:$0xff]  ;;  %v121_v13 = vld [vmem:[#allocation2 + $0x68] sm:$0xff] }
  0x61   :  { %144 = vadd.xlane.f32.xlu0 %v109_v2  ;;  %148 = vadd.xlane.f32.xlu1 %v111_v3  ;;  %v122_v14 = vld [vmem:[#allocation2 + $0x70] sm:$0xff]  ;;  %v123_v15 = vld [vmem:[#allocation2 + $0x78] sm:$0xff]  ;;  %v124_v16 = vld [vmem:[#allocation2 + $0x80] sm:$0xff] }
  0x62   :  { %v125_v17 = vld [vmem:[#allocation2 + $0x88] sm:$0xff]  ;;  %v126_v18 = vld [vmem:[#allocation2 + $0x90] sm:$0xff]  ;;  %v127_v19 = vld [vmem:[#allocation2 + $0x98] sm:$0xff] }
  0x63   :  { %v13354_v20 = vld [vmem:[#allocation5 + $0x4] ss:$12 sps:$4 sm:$0xff]   ;;  %v13356_v21 = vld [vmem:[#allocation5] ss:$12 sps:$4 sm:$0xff]   ;;  %v13357_v22 = vld [vmem:[#allocation5 + $0x1c] ss:$12 sps:$4 sm:$0xff]  }
  0x64   :  { %747 = vmatprep.subr.bf16.mxu0 %v13354_v20  ;;  %v15060_v33 = vld [vmem:[#allocation2 + $0xa0] sm:$0xff]  ;;  %v15068_v39 = vld [vmem:[#allocation2 + $0xa8] sm:$0xff]  ;;  %v15081_v46 = vld [vmem:[#allocation2 + $0xb0] sm:$0xff] }
  0x65   :  { %150 = vadd.xlane.f32.xlu0 %v15047_v4  ;;  %152 = vadd.xlane.f32.xlu1 %v15049_v5  ;;  %v13359_v51 = vld [vmem:[#allocation5 + $0x18] ss:$12 sps:$4 sm:$0xff]   ;;  %v13360_v54 = vld [vmem:[#allocation5 + $0x34] ss:$12 sps:$4 sm:$0xff]   ;;  %v13363_v59 = vld [vmem:[#allocation5 + $0x30] ss:$12 sps:$4 sm:$0xff]  }
  0x66   :  { %748 = vmatpush1.bf16.msra.mxu0 %v13356_v21  ;;  %v15089_v52 = vld [vmem:[#allocation2 + $0xb8] sm:$0xff]  ;;  %v13362_v55 = vld [vmem:[#allocation5 + $0x8] ss:$12 sps:$4 sm:$0xff]   ;;  %v15097_v60 = vld [vmem:[#allocation2 + $0xc0] sm:$0xff] }
  0x67   :  { %749 = vmatprep.subr.bf16.mxu0 %v13357_v22  ;;  %12532 = vmatprep.subr.bf16.mxu1 %v13362_v55  ;;  %v13364_v62 = vld [vmem:[#allocation5 + $0x4c] ss:$12 sps:$4 sm:$0xff]  }
  0x68   :  { %12533 = vmatpush3.bf16.msra.mxu1 %v13362_v55  ;;  %v13366_v63 = vld [vmem:[#allocation5 + $0x20] ss:$12 sps:$4 sm:$0xff]  }
  0x69   :  { %154 = vadd.xlane.f32.xlu0 %v15051_v6  ;;  %156 = vadd.xlane.f32.xlu1 %v115_v7  ;;  %v14716_v22 = vld [vmem:[#allocation2 + $0x48] sm:$0xff] }
  0x6a   :  { %750 = vmatpush1.bf16.msra.mxu0 %v13359_v51  ;;  %12534 = vmatprep.subr.bf16.mxu1 %v13366_v63  ;;  %v13383_v51 = vld [vmem:[#allocation5 + $0xa8] ss:$12 sps:$4 sm:$0xff]  }
  0x6b   :  { %751 = vmatprep.subr.bf16.mxu0 %v13360_v54 }
  0x6c   :  { %12535 = vmatpush3.bf16.msra.mxu1 %v13366_v63 }
  0x6d   :  { %158 = vadd.xlane.f32.xlu0 %v116_v8  ;;  %160 = vadd.xlane.f32.xlu1 %v117_v9  ;;  %v13368_v8 = vld [vmem:[#allocation5 + $0x64] ss:$12 sps:$4 sm:$0xff]  }
  0x6e   :  { %752 = vmatpush1.bf16.msra.mxu0 %v13363_v59  ;;  %v13370_v9 = vld [vmem:[#allocation5 + $0x38] ss:$12 sps:$4 sm:$0xff]  }
  0x6f   :  { %753 = vmatprep.subr.bf16.mxu0 %v13364_v62  ;;  %12536 = vmatprep.subr.bf16.mxu1 %v13370_v9  ;;  %v14719_v62 = vld [vmem:[#allocation2 + $0x60] sm:$0xff] }
  0x70   :  { %12537 = vmatpush3.bf16.msra.mxu1 %v13370_v9 }
  0x71   :  { %162 = vadd.xlane.f32.xlu0 %v118_v10  ;;  %164 = vadd.xlane.f32.xlu1 %v119_v11 }
  0x75   :  { %166 = vadd.xlane.f32.xlu0 %v120_v12  ;;  %168 = vadd.xlane.f32.xlu1 %v121_v13  ;;  %v14715_v12 = vld [vmem:[#allocation2 + $0x40] sm:$0xff] }
  0x79   :  { %170 = vadd.xlane.f32.xlu0 %v122_v14  ;;  %172 = vadd.xlane.f32.xlu1 %v123_v15  ;;  %v13371_v14 = vld [vmem:[#allocation5 + $0x60] ss:$12 sps:$4 sm:$0xff]   ;;  %v15111_v15 = vld [vmem:[#allocation2 + $0xd0] sm:$0xff] }
  0x7d   :  { %174 = vadd.xlane.f32.xlu0 %v124_v16  ;;  %176 = vadd.xlane.f32.xlu1 %v125_v17 }
  0x81   :  { %178 = vadd.xlane.f32.xlu0 %v126_v18  ;;  %180 = vadd.xlane.f32.xlu1 %v127_v19  ;;  %v13372_v18 = vld [vmem:[#allocation5 + $0x7c] ss:$12 sps:$4 sm:$0xff]  }
  0x82   :  { %v13374_v19 = vld [vmem:[#allocation5 + $0x50] ss:$12 sps:$4 sm:$0xff]  }
  0x83   :  { %12538 = vmatprep.subr.bf16.mxu1 %v13374_v19 }
  0x84   :  { %12539 = vmatpush3.bf16.msra.mxu1 %v13374_v19 }
  0xea   :  { %v143_v23 = vpop.xlane.xlu0 %142  ;;  %v147_v24 = vpop.xlane.xlu1 %146 }
  0xeb   :  { %v207_v25 = vmul.f32 0.0078125, %v143_v23  ;;  %v209_v26 = vmul.f32 0.0078125, %v147_v24  ;;  %v13375_v24 = vld [vmem:[#allocation5 + $0x78] ss:$12 sps:$4 sm:$0xff]  }
  0xed   :  { %v15056_v27 = vsub.f32 %v108_v0, %v207_v25  ;;  %v15064_v35 = vsub.f32 %v110_v1, %v209_v26  ;;  %v15118_v25 = vld [vmem:[#allocation2 + $0xd8] sm:$0xff] }
  0xee   :  { %v145_v28 = vpop.xlane.xlu0 %144  ;;  %v149_v29 = vpop.xlane.xlu1 %148 }
  0xef   :  { %v208_v30 = vmul.f32 0.0078125, %v145_v28  ;;  %v271_v31 = vmul.f32 %v15056_v27, %v15056_v27  ;;  %v210_v32 = vmul.f32 0.0078125, %v149_v29  ;;  %v273_v40 = vmul.f32 %v15064_v35, %v15064_v35  ;;  %v13376_v28 = vld [vmem:[#allocation5 + $0x94] ss:$12 sps:$4 sm:$0xff]  }
  0xf0   :  { %v13378_v29 = vld [vmem:[#allocation5 + $0x68] ss:$12 sps:$4 sm:$0xff]  }
  0xf1   :  { %303 = vadd.xlane.f32.xlu0 %v271_v31  ;;  %v15062_v34 = vsub.f32 %v109_v2, %v208_v30  ;;  %v15073_v41 = vsub.f32 %v111_v3, %v210_v32  ;;  %v14714_v2 = vld [vmem:[#allocation2 + $0x38] sm:$0xff]  ;;  %v14717_v32 = vld [vmem:[#allocation2 + $0x50] sm:$0xff]  ;;  %12540 = vmatprep.subr.bf16.mxu1 %v13378_v29 }
  0xf2   :  { %v151_v36 = vpop.xlane.xlu0 %150  ;;  %v153_v42 = vpop.xlane.xlu1 %152  ;;  %12541 = vmatpush3.bf16.msra.mxu1 %v13378_v29 }
  0xf3   :  { %v272_v37 = vmul.f32 %v15062_v34, %v15062_v34  ;;  %v211_v38 = vmul.f32 0.0078125, %v151_v36  ;;  %v274_v43 = vmul.f32 %v15073_v41, %v15073_v41  ;;  %v212_v44 = vmul.f32 0.0078125, %v153_v42  ;;  %v13380_v42 = vld [vmem:[#allocation5 + $0xac] ss:$12 sps:$4 sm:$0xff]  }
  0xf5   :  { %182 = vadd.xlane.f32.xlu0 %v15060_v33  ;;  %305 = vadd.xlane.f32.xlu1 %v272_v37  ;;  %v15079_v45 = vsub.f32 %v15047_v4, %v211_v38  ;;  %v15087_v50 = vsub.f32 %v15049_v5, %v212_v44  ;;  %v13367_v4 = vld [vmem:[#allocation5 + $0x48] ss:$12 sps:$4 sm:$0xff]   ;;  %v13379_v37 = vld [vmem:[#allocation5 + $0x90] ss:$12 sps:$4 sm:$0xff]   ;;  %v15125_v38 = vld [vmem:[#allocation2 + $0xe0] sm:$0xff] }
  0xf6   :  { %v155_v47 = vpop.xlane.xlu0 %154  ;;  %v157_v53 = vpop.xlane.xlu1 %156  ;;  %v15104_v5 = vld [vmem:[#allocation2 + $0xc8] sm:$0xff]  ;;  %754 = vmatpush1.bf16.msra.mxu0 %v13367_v4 }
  0xf7   :  { %v275_v48 = vmul.f32 %v15079_v45, %v15079_v45  ;;  %v213_v49 = vmul.f32 0.0078125, %v155_v47  ;;  %v276_v56 = vmul.f32 %v15087_v50, %v15087_v50  ;;  %v214_v57 = vmul.f32 0.0078125, %v157_v53  ;;  %755 = vmatprep.subr.bf16.mxu0 %v13368_v8  ;;  %v15132_v53 = vld [vmem:[#allocation2 + $0xe8] sm:$0xff]  ;;  %v13385_v8 = vld [vmem:[#allocation5 + $0xb0] ss:$12 sps:$4 sm:$0xff]  }
  0xf8   :  { %v14720_v4 = vld [vmem:[#allocation2 + $0x68] sm:$0xff] }
  0xf9   :  { %307 = vadd.xlane.f32.xlu0 %v273_v40  ;;  %184 = vadd.xlane.f32.xlu1 %v15068_v39  ;;  %v15095_v58 = vsub.f32 %v15051_v6, %v213_v49  ;;  %v15102_v3 = vsub.f32 %v14714_v2, %v214_v57  ;;  %v13384_v57 = vld [vmem:[#allocation5 + $0x98] ss:$12 sps:$4 sm:$0xff]  }
  0xfa   :  { %v159_v61 = vpop.xlane.xlu0 %158  ;;  %v161_v6 = vpop.xlane.xlu1 %160  ;;  %756 = vmatpush1.bf16.msra.mxu0 %v13371_v14  ;;  %v15149_v14 = vld [vmem:[#allocation2 + $0xf8] sm:$0xff] }
  0xfb   :  { %v277_v0 = vmul.f32 %v15095_v58, %v15095_v58  ;;  %v215_v1 = vmul.f32 0.0078125, %v159_v61  ;;  %v278_v10 = vmul.f32 %v15102_v3, %v15102_v3  ;;  %v216_v11 = vmul.f32 0.0078125, %v161_v6  ;;  %757 = vmatprep.subr.bf16.mxu0 %v13372_v18  ;;  %v14722_v18 = vld [vmem:[#allocation2 + $0x78] sm:$0xff] }
  0xfd   :  { %186 = vadd.xlane.f32.xlu0 %v15081_v46  ;;  %309 = vadd.xlane.f32.xlu1 %v274_v43  ;;  %v15109_v13 = vsub.f32 %v14715_v12, %v215_v1  ;;  %v15116_v23 = vsub.f32 %v14716_v22, %v216_v11  ;;  %v13382_v43 = vld [vmem:[#allocation5 + $0x80] ss:$12 sps:$4 sm:$0xff]   ;;  %v19845_v1 = vmov 0   ;;  %v14721_v11 = vld [vmem:[#allocation2 + $0x70] sm:$0xff] }
  0xfe   :  { %v163_v7 = vpop.xlane.xlu0 %162  ;;  %v165_v16 = vpop.xlane.xlu1 %164  ;;  %758 = vmatpush1.bf16.msra.mxu0 %v13375_v24  ;;  %12542 = vmatprep.subr.bf16.mxu1 %v13382_v43  ;;  %v14723_v24 = vld [vmem:[#allocation2 + $0x80] sm:$0xff] }
  0xff   :  { %v279_v20 = vmul.f32 %v15109_v13, %v15109_v13  ;;  %v217_v21 = vmul.f32 0.0078125, %v163_v7  ;;  %v280_v30 = vmul.f32 %v15116_v23, %v15116_v23  ;;  %v218_v31 = vmul.f32 0.0078125, %v165_v16  ;;  %759 = vmatprep.subr.bf16.mxu0 %v13376_v28  ;;  %12543 = vmatpush3.bf16.msra.mxu1 %v13382_v43 }
 0x100   :  { %779 = vmatprep.mubr.bf16.mxu0 %v19845_v1  ;;  %12544 = vmatprep.subr.bf16.mxu1 %v13384_v57 }
 0x101   :  { %188 = vadd.xlane.f32.xlu1 %v15089_v52  ;;  %311 = vadd.xlane.f32.xlu0 %v275_v48  ;;  %v15123_v36 = vsub.f32 %v14717_v32, %v217_v21  ;;  %v14718_v48 = vld [vmem:[#allocation2 + $0x58] sm:$0xff]  ;;  %v14724_v32 = vld [vmem:[#allocation2 + $0x88] sm:$0xff] }
 0x102   :  { %v167_v17 = vpop.xlane.xlu0 %166  ;;  %v169_v26 = vpop.xlane.xlu1 %168  ;;  %760 = vmatpush1.bf16.msra.mxu0 %v13379_v37  ;;  %v15130_v49 = vsub.f32 %v14718_v48, %v218_v31 }
 0x103   :  { %v281_v44 = vmul.f32 %v15123_v36, %v15123_v36  ;;  %v219_v47 = vmul.f32 0.0078125, %v167_v17  ;;  %761 = vmatprep.subr.bf16.mxu0 %v13380_v42  ;;  %v220_v55 = vmul.f32 0.0078125, %v169_v26  ;;  %12545 = vmatpush3.bf16.msra.mxu1 %v13384_v57 }
 0x104   :  { %v282_v59 = vmul.f32 %v15130_v49, %v15130_v49  ;;  %12546 = vmatprep.subr.bf16.mxu1 %v13385_v8 }
 0x105   :  { %313 = vadd.xlane.f32.xlu1 %v276_v56  ;;  %190 = vadd.xlane.f32.xlu0 %v15097_v60  ;;  %v15137_v63 = vsub.f32 %v14719_v62, %v219_v47  ;;  %v15142_v6 = vsub.f32 %v14720_v4, %v220_v55  ;;  %v14726_v47 = vld [vmem:[#allocation2 + $0x98] sm:$0xff] }
 0x106   :  { %v171_v40 = vpop.xlane.xlu0 %170  ;;  %v173_v54 = vpop.xlane.xlu1 %172  ;;  %762 = vmatpush1.bf16.msra.mxu0 %v13383_v51 }
 0x107   :  { %v221_v61 = vmul.f32 0.0078125, %v171_v40  ;;  %v222_v2 = vmul.f32 0.0078125, %v173_v54  ;;  %v283_v9 = vmul.f32 %v15137_v63, %v15137_v63  ;;  %12547 = vmatpush3.bf16.msra.mxu1 %v13385_v8  ;;  %v284_v17 = vmul.f32 %v15142_v6, %v15142_v6  ;;  %v14725_v40 = vld [vmem:[#allocation2 + $0x90] sm:$0xff] }
 0x109   :  { %192 = vadd.xlane.f32.xlu1 %v15104_v5  ;;  %315 = vadd.xlane.f32.xlu0 %v277_v0  ;;  %v15139_v0 = vld [vmem:[#allocation2 + $0xf0] sm:$0xff]  ;;  %v15147_v12 = vsub.f32 %v14721_v11, %v221_v61  ;;  %v15153_v19 = vsub.f32 %v14722_v18, %v222_v2 }
 0x10a   :  { %v175_v56 = vpop.xlane.xlu0 %174  ;;  %v177_v7 = vpop.xlane.xlu1 %176 }
 0x10b   :  { %v224_v21 = vmul.f32 0.0078125, %v177_v7  ;;  %v286_v29 = vmul.f32 %v15153_v19, %v15153_v19 }
 0x10d   :  { %317 = vadd.xlane.f32.xlu1 %v278_v10  ;;  %194 = vadd.xlane.f32.xlu0 %v15111_v15  ;;  %v223_v10 = vmul.f32 0.0078125, %v175_v56  ;;  %v15164_v37 = vsub.f32 %v14724_v32, %v224_v21 }
 0x10e   :  { %v179_v16 = vpop.xlane.xlu0 %178  ;;  %v181_v28 = vpop.xlane.xlu1 %180 }
 0x10f   :  { %v225_v22 = vmul.f32 0.0078125, %v179_v16  ;;  %v15158_v26 = vsub.f32 %v14723_v24, %v223_v10  ;;  %v226_v31 = vmul.f32 0.0078125, %v181_v28  ;;  %v288_v43 = vmul.f32 %v15164_v37, %v15164_v37 }
 0x111   :  { %196 = vadd.xlane.f32.xlu1 %v15118_v25  ;;  %319 = vadd.xlane.f32.xlu0 %v279_v20  ;;  %v285_v20 = vmul.f32 %v15147_v12, %v15147_v12  ;;  %v15166_v42 = vsub.f32 %v14725_v40, %v225_v22  ;;  %v15172_v48 = vsub.f32 %v14726_v47, %v226_v31 }
 0x113   :  { %v290_v51 = vmul.f32 %v15172_v48, %v15172_v48 }
 0x115   :  { %321 = vadd.xlane.f32.xlu1 %v280_v30  ;;  %198 = vadd.xlane.f32.xlu0 %v15125_v38  ;;  %v287_v30 = vmul.f32 %v15158_v26, %v15158_v26 }
 0x119   :  { %200 = vadd.xlane.f32.xlu1 %v15132_v53  ;;  %323 = vadd.xlane.f32.xlu0 %v281_v44  ;;  %v289_v44 = vmul.f32 %v15166_v42, %v15166_v42 }
 0x11d   :  { %325 = vadd.xlane.f32.xlu1 %v282_v59  ;;  %202 = vadd.xlane.f32.xlu0 %v15139_v0 }
 0x121   :  { %204 = vadd.xlane.f32.xlu1 %v15149_v14  ;;  %327 = vadd.xlane.f32.xlu0 %v283_v9 }
 0x125   :  { %329 = vadd.xlane.f32.xlu1 %v284_v17  ;;  %331 = vadd.xlane.f32.xlu0 %v285_v20 }
 0x129   :  { %333 = vadd.xlane.f32.xlu1 %v286_v29  ;;  %335 = vadd.xlane.f32.xlu0 %v287_v30 }
 0x12d   :  { %337 = vadd.xlane.f32.xlu1 %v288_v43  ;;  %339 = vadd.xlane.f32.xlu0 %v289_v44  ;;  %v15195_v44 = vld [vmem:[%s19834_s1] ss:$0 sm:$0xff] }
 0x131   :  { %341 = vadd.xlane.f32.xlu1 %v290_v51 }
 0x17e   :  { %v304_v54 = vpop.xlane.xlu0 %303 }
 0x17f   :  { %v367_v55 = vmul.f32 0.0078125, %v304_v54 }
 0x181   :  { %v399_v56 = vadd.f32 1e-05, %v367_v55 }
 0x182   :  { %v306_v57 = vpop.xlane.xlu1 %305  ;;  %v183_v59 = vpop.xlane.xlu0 %182 }
 0x183   :  { %13714 = vrsqrt.f32 %v399_v56  ;;  %v368_v61 = vmul.f32 0.0078125, %v306_v57  ;;  %v227_v62 = vmul.f32 0.0078125, %v183_v59 }
 0x185   :  { %v400_v2 = vadd.f32 1e-05, %v368_v61  ;;  %v15177_v4 = vsub.f32 %v15060_v33, %v227_v62  ;;  %v15207_v62 = vld [vmem:[%s19835_s2] ss:$0 sm:$0xff]  ;;  %s14913_s2 = smov 96  }
 0x186   :  { %v185_v7 = vpop.xlane.xlu1 %184  ;;  %v308_v8 = vpop.xlane.xlu0 %307 }
 0x187   :  { %13716 = vrsqrt.f32 %v400_v2  ;;  %v228_v9 = vmul.f32 0.0078125, %v185_v7  ;;  %v369_v10 = vmul.f32 0.0078125, %v308_v8  ;;  %v291_v11 = vmul.f32 %v15177_v4, %v15177_v4 }
 0x189   :  { %v401_v16 = vadd.f32 1e-05, %v369_v10  ;;  %343 = vadd.xlane.f32.xlu0 %v291_v11  ;;  %v15182_v17 = vsub.f32 %v15068_v39, %v228_v9 }
 0x18a   :  { %v310_v18 = vpop.xlane.xlu1 %309  ;;  %v187_v20 = vpop.xlane.xlu0 %186 }
 0x18b   :  { %13718 = vrsqrt.f32 %v401_v16  ;;  %v370_v21 = vmul.f32 0.0078125, %v310_v18  ;;  %v229_v22 = vmul.f32 0.0078125, %v187_v20  ;;  %v292_v33 = vmul.f32 %v15182_v17, %v15182_v17 }
 0x18d   :  { %v13715_v24 = vpop.eup %13714  ;;  %v402_v28 = vadd.f32 1e-05, %v370_v21  ;;  %345 = vadd.xlane.f32.xlu1 %v292_v33  ;;  %v15187_v29 = vsub.f32 %v15081_v46, %v229_v22 }
 0x18e   :  { %v189_v30 = vpop.xlane.xlu1 %188  ;;  %v312_v31 = vpop.xlane.xlu0 %311  ;;  %v463_v32 = vmul.f32 %v13715_v24, %v15056_v27 }
 0x18f   :  { %13720 = vrsqrt.f32 %v402_v28  ;;  %v230_v39 = vmul.f32 0.0078125, %v189_v30  ;;  %v371_v40 = vmul.f32 0.0078125, %v312_v31  ;;  %v293_v43 = vmul.f32 %v15187_v29, %v15187_v29 }
 0x190   :  { %v501_v56 = vmul.f32 %v15195_v44, %v463_v32 }
 0x191   :  { %v13717_v47 = vpop.eup %13716  ;;  %v403_v51 = vadd.f32 1e-05, %v371_v40  ;;  %347 = vadd.xlane.f32.xlu0 %v293_v43  ;;  %v15198_v46 = vsub.f32 %v15089_v52, %v230_v39 }
 0x192   :  { %v314_v54 = vpop.xlane.xlu1 %313  ;;  %v191_v55 = vpop.xlane.xlu0 %190  ;;  %v464_v27 = vmul.f32 %v13717_v47, %v15062_v34  ;;  %v539_v10 = vadd.f32 %v15207_v62, %v501_v56 }
 0x193   :  { %13722 = vrsqrt.f32 %v403_v51  ;;  %v372_v57 = vmul.f32 0.0078125, %v314_v54  ;;  %v231_v59 = vmul.f32 0.0078125, %v191_v55  ;;  %v294_v61 = vmul.f32 %v15198_v46, %v15198_v46 }
 0x194   :  { %v502_v52 = vmul.f32 %v15195_v44, %v464_v27 }
 0x195   :  { %v13719_v2 = vpop.eup %13718  ;;  %v404_v7 = vadd.f32 1e-05, %v372_v57  ;;  %349 = vadd.xlane.f32.xlu1 %v294_v61  ;;  %v15211_v34 = vsub.f32 %v15097_v60, %v231_v59 }
 0x196   :  { %v193_v8 = vpop.xlane.xlu1 %192  ;;  %v316_v9 = vpop.xlane.xlu0 %315  ;;  %v540_v11 = vadd.f32 %v15207_v62, %v502_v52  ;;  %v465_v16 = vmul.f32 %v13719_v2, %v15064_v35 }
 0x197   :  { %13724 = vrsqrt.f32 %v404_v7  ;;  %v232_v18 = vmul.f32 0.0078125, %v193_v8  ;;  %v373_v20 = vmul.f32 0.0078125, %v316_v9  ;;  %v295_v21 = vmul.f32 %v15211_v34, %v15211_v34 }
 0x198   :  { %v571_v22 = vpack.c.bf16 %v540_v11, %v539_v10  ;;  %v503_v35 = vmul.f32 %v15195_v44, %v465_v16 }
 0x199   :  { %v13721_v33 = vpop.eup %13720  ;;  %v405_v24 = vadd.f32 1e-05, %v373_v20  ;;  %351 = vadd.xlane.f32.xlu0 %v295_v21  ;;  %v15219_v60 = vsub.f32 %v15104_v5, %v232_v18 }
 0x19a   :  { %v318_v28 = vpop.xlane.xlu1 %317  ;;  %780 = vmatmul.mubr.bf16.vlgmr.msra.gmra.mrb[0].mxu0 %v571_v22  ;;  %12548 = vmatprep.mubr.bf16.mxu1 %v571_v22  ;;  %v195_v30 = vpop.xlane.xlu0 %194  ;;  %v466_v31 = vmul.f32 %v13721_v33, %v15073_v41  ;;  %v541_v55 = vadd.f32 %v15207_v62, %v503_v35 }
 0x19b   :  { %13726 = vrsqrt.f32 %v405_v24  ;;  %v374_v32 = vmul.f32 0.0078125, %v318_v28  ;;  %v233_v39 = vmul.f32 0.0078125, %v195_v30  ;;  %v296_v40 = vmul.f32 %v15219_v60, %v15219_v60  ;;  %789 = vmatprep.mubr.bf16.mxu0 %v19845_v1 }
 0x19c   :  { %v504_v43 = vmul.f32 %v15195_v44, %v466_v31 }
 0x19d   :  { %v13723_v5 = vpop.eup %13722  ;;  %v406_v47 = vadd.f32 1e-05, %v374_v32  ;;  %353 = vadd.xlane.f32.xlu1 %v296_v40  ;;  %v15228_v51 = vsub.f32 %v15111_v15, %v233_v39 }
 0x19e   :  { %v197_v54 = vpop.xlane.xlu1 %196  ;;  %v320_v41 = vpop.xlane.xlu0 %319  ;;  %v542_v27 = vadd.f32 %v15207_v62, %v504_v43  ;;  %v467_v56 = vmul.f32 %v13723_v5, %v15079_v45 }
 0x19f   :  { %13728 = vrsqrt.f32 %v406_v47  ;;  %v234_v57 = vmul.f32 0.0078125, %v197_v54  ;;  %v375_v59 = vmul.f32 0.0078125, %v320_v41  ;;  %v297_v61 = vmul.f32 %v15228_v51, %v15228_v51 }
 0x1a0   :  { %v572_v52 = vpack.c.bf16 %v542_v27, %v541_v55  ;;  %v505_v45 = vmul.f32 %v15195_v44, %v467_v56 }
 0x1a1   :  { %v13725_v2 = vpop.eup %13724  ;;  %v407_v7 = vadd.f32 1e-05, %v375_v59  ;;  %355 = vadd.xlane.f32.xlu0 %v297_v61  ;;  %v15236_v15 = vsub.f32 %v15118_v25, %v234_v57 }
 0x1a2   :  { %v322_v8 = vpop.xlane.xlu1 %321  ;;  %790 = vmatmul.mubr.bf16.gmra.mrb[4].mxu0 %v572_v52  ;;  %12549 = vmatmul.mubr.bf16.vlgmr.msra.gmra.mrb[0].mxu1 %v572_v52  ;;  %v199_v9 = vpop.xlane.xlu0 %198  ;;  %v468_v10 = vmul.f32 %v13725_v2, %v15087_v50  ;;  %v543_v24 = vadd.f32 %v15207_v62, %v505_v45 }
 0x1a3   :  { %13730 = vrsqrt.f32 %v407_v7  ;;  %v376_v11 = vmul.f32 0.0078125, %v322_v8  ;;  %v235_v16 = vmul.f32 0.0078125, %v199_v9  ;;  %v298_v18 = vmul.f32 %v15236_v15, %v15236_v15  ;;  %799 = vmatprep.mubr.bf16.mxu0 %v19845_v1 }
 0x1a4   :  { %v506_v20 = vmul.f32 %v15195_v44, %v468_v10 }
 0x1a5   :  { %v13727_v25 = vpop.eup %13726  ;;  %v408_v21 = vadd.f32 1e-05, %v376_v11  ;;  %357 = vadd.xlane.f32.xlu1 %v298_v18  ;;  %v15245_v22 = vsub.f32 %v15125_v38, %v235_v16 }
 0x1a6   :  { %v201_v33 = vpop.xlane.xlu1 %200  ;;  %v324_v50 = vpop.xlane.xlu0 %323  ;;  %v544_v28 = vadd.f32 %v15207_v62, %v506_v20  ;;  %v469_v30 = vmul.f32 %v13727_v25, %v15095_v58 }
 0x1a7   :  { %13732 = vrsqrt.f32 %v408_v21  ;;  %v236_v31 = vmul.f32 0.0078125, %v201_v33  ;;  %v377_v35 = vmul.f32 0.0078125, %v324_v50  ;;  %v299_v32 = vmul.f32 %v15245_v22, %v15245_v22 }
 0x1a8   :  { %v573_v39 = vpack.c.bf16 %v544_v28, %v543_v24  ;;  %v507_v58 = vmul.f32 %v15195_v44, %v469_v30 }
 0x1a9   :  { %v13729_v40 = vpop.eup %13728  ;;  %v409_v43 = vadd.f32 1e-05, %v377_v35  ;;  %359 = vadd.xlane.f32.xlu0 %v299_v32  ;;  %v15253_v38 = vsub.f32 %v15132_v53, %v236_v31 }
 0x1aa   :  { %v326_v5 = vpop.xlane.xlu1 %325  ;;  %800 = vmatmul.mubr.bf16.gmra.mrb[8].mxu0 %v573_v39  ;;  %12552 = vmatprep.mubr.bf16.mxu1 %v573_v39  ;;  %v203_v47 = vpop.xlane.xlu0 %202  ;;  %v470_v54 = vmul.f32 %v13729_v40, %v15102_v3  ;;  %v545_v52 = vadd.f32 %v15207_v62, %v507_v58 }
 0x1ab   :  { %13734 = vrsqrt.f32 %v409_v43  ;;  %v378_v41 = vmul.f32 0.0078125, %v326_v5  ;;  %v237_v55 = vmul.f32 0.0078125, %v203_v47  ;;  %v300_v27 = vmul.f32 %v15253_v38, %v15253_v38  ;;  %809 = vmatprep.mubr.bf16.mxu0 %v19845_v1 }
 0x1ac   :  { %v508_v56 = vmul.f32 %v15195_v44, %v470_v54 }
 0x1ad   :  { %v13731_v53 = vpop.eup %13730  ;;  %v410_v57 = vadd.f32 1e-05, %v378_v41  ;;  %361 = vadd.xlane.f32.xlu1 %v300_v27  ;;  %v15262_v59 = vsub.f32 %v15139_v0, %v237_v55 }
 0x1ae   :  { %v205_v61 = vpop.xlane.xlu1 %204  ;;  %v328_v3 = vpop.xlane.xlu0 %327  ;;  %v546_v2 = vadd.f32 %v15207_v62, %v508_v56  ;;  %v471_v7 = vmul.f32 %v13731_v53, %v15109_v13 }
 0x1af   :  { %13736 = vrsqrt.f32 %v410_v57  ;;  %v238_v8 = vmul.f32 0.0078125, %v205_v61  ;;  %v379_v9 = vmul.f32 0.0078125, %v328_v3  ;;  %v301_v10 = vmul.f32 %v15262_v59, %v15262_v59 }
 0x1b0   :  { %v574_v45 = vpack.c.bf16 %v546_v2, %v545_v52  ;;  %v509_v13 = vmul.f32 %v15195_v44, %v471_v7 }
 0x1b1   :  { %v13733_v11 = vpop.eup %13732  ;;  %v411_v16 = vadd.f32 1e-05, %v379_v9  ;;  %363 = vadd.xlane.f32.xlu0 %v301_v10  ;;  %v15270_v0 = vsub.f32 %v15149_v14, %v238_v8 }
 0x1b2   :  { %v330_v18 = vpop.xlane.xlu1 %329  ;;  %810 = vmatmul.mubr.bf16.gmra.mrb[12].mxu0 %v574_v45  ;;  %12553 = vmatmul.mubr.bf16.gmra.mrb[4].mxu1 %v574_v45  ;;  %v332_v20 = vpop.xlane.xlu0 %331  ;;  %v472_v25 = vmul.f32 %v13733_v11, %v15116_v23  ;;  %v547_v23 = vadd.f32 %v15207_v62, %v509_v13 }
 0x1b3   :  { %13738 = vrsqrt.f32 %v411_v16  ;;  %v380_v21 = vmul.f32 0.0078125, %v330_v18  ;;  %v381_v33 = vmul.f32 0.0078125, %v332_v20  ;;  %v302_v50 = vmul.f32 %v15270_v0, %v15270_v0  ;;  %819 = vmatprep.mubr.bf16.mxu0 %v19845_v1 }
 0x1b4   :  { %v510_v24 = vmul.f32 %v15195_v44, %v472_v25 }
 0x1b5   :  { %v13735_v14 = vpop.eup %13734  ;;  %v412_v28 = vadd.f32 1e-05, %v380_v21  ;;  %v413_v30 = vadd.f32 1e-05, %v381_v33  ;;  %365 = vadd.xlane.f32.xlu1 %v302_v50 }
 0x1b6   :  { %v334_v31 = vpop.xlane.xlu1 %333  ;;  %v336_v35 = vpop.xlane.xlu0 %335  ;;  %v548_v32 = vadd.f32 %v15207_v62, %v510_v24  ;;  %v473_v39 = vmul.f32 %v13735_v14, %v15123_v36 }
 0x1b7   :  { %13740 = vrsqrt.f32 %v412_v28  ;;  %v382_v40 = vmul.f32 0.0078125, %v334_v31  ;;  %v383_v43 = vmul.f32 0.0078125, %v336_v35 }
 0x1b8   :  { %13742 = vrsqrt.f32 %v413_v30  ;;  %v575_v5 = vpack.c.bf16 %v548_v32, %v547_v23  ;;  %v511_v56 = vmul.f32 %v15195_v44, %v473_v39 }
 0x1b9   :  { %v13737_v47 = vpop.eup %13736  ;;  %v414_v54 = vadd.f32 1e-05, %v382_v40  ;;  %v415_v58 = vadd.f32 1e-05, %v383_v43 }
 0x1ba   :  { %v338_v41 = vpop.xlane.xlu1 %337  ;;  %820 = vmatmul.mubr.bf16.gmra.mrb[16].mxu0 %v575_v5  ;;  %12556 = vmatprep.mubr.bf16.mxu1 %v575_v5  ;;  %v340_v55 = vpop.xlane.xlu0 %339  ;;  %v474_v27 = vmul.f32 %v13737_v47, %v15130_v49  ;;  %v549_v7 = vadd.f32 %v15207_v62, %v511_v56 }
 0x1bb   :  { %13744 = vrsqrt.f32 %v414_v54  ;;  %v384_v53 = vmul.f32 0.0078125, %v338_v41  ;;  %v385_v57 = vmul.f32 0.0078125, %v340_v55  ;;  %829 = vmatprep.mubr.bf16.mxu0 %v19845_v1 }
 0x1bc   :  { %13746 = vrsqrt.f32 %v415_v58  ;;  %v512_v36 = vmul.f32 %v15195_v44, %v474_v27 }
 0x1bd   :  { %v13739_v61 = vpop.eup %13738  ;;  %v416_v3 = vadd.f32 1e-05, %v384_v53  ;;  %v417_v52 = vadd.f32 1e-05, %v385_v57 }
 0x1be   :  { %v342_v2 = vpop.xlane.xlu1 %341  ;;  %v550_v8 = vadd.f32 %v15207_v62, %v512_v36  ;;  %v475_v49 = vmul.f32 %v13739_v61, %v15137_v63 }
 0x1bf   :  { %13748 = vrsqrt.f32 %v416_v3  ;;  %v386_v9 = vmul.f32 0.0078125, %v342_v2 }
 0x1c0   :  { %13750 = vrsqrt.f32 %v417_v52  ;;  %v576_v10 = vpack.c.bf16 %v550_v8, %v549_v7  ;;  %v513_v20 = vmul.f32 %v15195_v44, %v475_v49 }
 0x1c1   :  { %v13741_v45 = vpop.eup %13740  ;;  %v418_v11 = vadd.f32 1e-05, %v386_v9 }
 0x1c2   :  { %v13743_v16 = vpop.eup %13742  ;;  %830 = vmatmul.mubr.bf16.gmra.mrb[20].mxu0 %v576_v10  ;;  %12557 = vmatmul.mubr.bf16.gmra.mrb[8].mxu1 %v576_v10  ;;  %v476_v18 = vmul.f32 %v13741_v45, %v15142_v6  ;;  %v551_v50 = vadd.f32 %v15207_v62, %v513_v20 }
 0x1c3   :  { %13752 = vrsqrt.f32 %v418_v11  ;;  %839 = vmatprep.mubr.bf16.mxu0 %v19845_v1  ;;  %v477_v25 = vmul.f32 %v13743_v16, %v15147_v12 }
 0x1c4   :  { %v514_v63 = vmul.f32 %v15195_v44, %v476_v18 }
 0x1c5   :  { %v13745_v13 = vpop.eup %13744  ;;  %v515_v21 = vmul.f32 %v15195_v44, %v477_v25 }
 0x1c6   :  { %v13747_v33 = vpop.eup %13746  ;;  %v552_v24 = vadd.f32 %v15207_v62, %v514_v63  ;;  %v478_v14 = vmul.f32 %v13745_v13, %v15153_v19 }
 0x1c7   :  { %v479_v6 = vmul.f32 %v13747_v33, %v15158_v26  ;;  %v553_v12 = vadd.f32 %v15207_v62, %v515_v21 }
 0x1c8   :  { %v577_v28 = vpack.c.bf16 %v552_v24, %v551_v50  ;;  %v516_v30 = vmul.f32 %v15195_v44, %v478_v14 }
 0x1c9   :  { %v13749_v31 = vpop.eup %13748  ;;  %v517_v39 = vmul.f32 %v15195_v44, %v479_v6 }
 0x1ca   :  { %v13751_v35 = vpop.eup %13750  ;;  %840 = vmatmul.mubr.bf16.gmra.mrb[24].mxu0 %v577_v28  ;;  %12560 = vmatprep.mubr.bf16.mxu1 %v577_v28  ;;  %v554_v23 = vadd.f32 %v15207_v62, %v516_v30  ;;  %v480_v32 = vmul.f32 %v13749_v31, %v15164_v37 }
 0x1cb   :  { %849 = vmatprep.mubr.bf16.mxu0 %v19845_v1  ;;  %v481_v19 = vmul.f32 %v13751_v35, %v15166_v42  ;;  %v555_v5 = vadd.f32 %v15207_v62, %v517_v39 }
 0x1cc   :  { %v578_v26 = vpack.c.bf16 %v554_v23, %v553_v12  ;;  %v518_v40 = vmul.f32 %v15195_v44, %v480_v32 }
 0x1cd   :  { %v13753_v43 = vpop.eup %13752  ;;  %v519_v58 = vmul.f32 %v15195_v44, %v481_v19 }
 0x1ce   :  { %12561 = vmatmul.mubr.bf16.gmra.mrb[12].mxu1 %v578_v26  ;;  %v556_v47 = vadd.f32 %v15207_v62, %v518_v40  ;;  %v482_v54 = vmul.f32 %v13753_v43, %v15172_v48 }
 0x1cf   :  { %v557_v42 = vadd.f32 %v15207_v62, %v519_v58 }
 0x1d0   :  { %v579_v37 = vpack.c.bf16 %v556_v47, %v555_v5  ;;  %v520_v41 = vmul.f32 %v15195_v44, %v482_v54 }
 0x1d2   :  { %850 = vmatmul.mubr.bf16.gmra.mrb[28].mxu0 %v578_v26  ;;  %12564 = vmatprep.mubr.bf16.mxu1 %v579_v37  ;;  %v558_v55 = vadd.f32 %v15207_v62, %v520_v41 }
 0x1d3   :  { %859 = vmatprep.mubr.bf16.mxu0 %v19845_v1 }
 0x1d4   :  { %v580_v27 = vpack.c.bf16 %v558_v55, %v557_v42 }
 0x1d6   :  { %12565 = vmatmul.mubr.bf16.gmra.mrb[16].mxu1 %v580_v27 }
 0x1da   :  { %860 = vmatmul.mubr.bf16.gmra.mrb[32].mxu0 %v579_v37 }
 0x1db   :  { %869 = vmatprep.mubr.bf16.mxu0 %v19845_v1 }
 0x1e2   :  { %870 = vmatmul.mubr.bf16.gmra.mrb[36].mxu0 %v580_v27 }
 0x1e3   :  { %879 = vmatprep.mubr.bf16.mxu0 %v19845_v1 }
 0x216   :  { %v344_v48 = vpop.xlane.xlu0 %343 }
 0x217   :  { %v387_v56 = vmul.f32 0.0078125, %v344_v48 }
 0x219   :  { %v419_v53 = vadd.f32 1e-05, %v387_v56 }
 0x21a   :  { %v346_v57 = vpop.xlane.xlu1 %345 }
 0x21b   :  { %13754 = vrsqrt.f32 %v419_v53  ;;  %v388_v36 = vmul.f32 0.0078125, %v346_v57 }
 0x21d   :  { %v420_v61 = vadd.f32 1e-05, %v388_v36 }
 0x21e   :  { %v348_v3 = vpop.xlane.xlu0 %347 }
 0x21f   :  { %13756 = vrsqrt.f32 %v420_v61  ;;  %v389_v52 = vmul.f32 0.0078125, %v348_v3 }
 0x221   :  { %v421_v2 = vadd.f32 1e-05, %v389_v52 }
 0x222   :  { %v350_v7 = vpop.xlane.xlu1 %349 }
 0x223   :  { %13758 = vrsqrt.f32 %v421_v2  ;;  %v390_v8 = vmul.f32 0.0078125, %v350_v7 }
 0x225   :  { %v13755_v49 = vpop.eup %13754  ;;  %v422_v9 = vadd.f32 1e-05, %v390_v8 }
 0x226   :  { %v352_v10 = vpop.xlane.xlu0 %351  ;;  %v483_v45 = vmul.f32 %v13755_v49, %v15177_v4 }
 0x227   :  { %13760 = vrsqrt.f32 %v422_v9  ;;  %v391_v11 = vmul.f32 0.0078125, %v352_v10 }
 0x228   :  { %v521_v63 = vmul.f32 %v15195_v44, %v483_v45 }
 0x229   :  { %v13757_v16 = vpop.eup %13756  ;;  %v423_v18 = vadd.f32 1e-05, %v391_v11 }
 0x22a   :  { %v354_v20 = vpop.xlane.xlu1 %353  ;;  %v484_v25 = vmul.f32 %v13757_v16, %v15182_v17  ;;  %v559_v14 = vadd.f32 %v15207_v62, %v521_v63 }
 0x22b   :  { %13762 = vrsqrt.f32 %v423_v18  ;;  %v392_v13 = vmul.f32 0.0078125, %v354_v20 }
 0x22c   :  { %v522_v21 = vmul.f32 %v15195_v44, %v484_v25 }
 0x22d   :  { %v13759_v33 = vpop.eup %13758  ;;  %v424_v50 = vadd.f32 1e-05, %v392_v13 }
 0x22e   :  { %v356_v24 = vpop.xlane.xlu0 %355  ;;  %v560_v4 = vadd.f32 %v15207_v62, %v522_v21  ;;  %v485_v6 = vmul.f32 %v13759_v33, %v15187_v29 }
 0x22f   :  { %13764 = vrsqrt.f32 %v424_v50  ;;  %v393_v28 = vmul.f32 0.0078125, %v356_v24 }
 0x230   :  { %v581_v30 = vpack.c.bf16 %v560_v4, %v559_v14  ;;  %v523_v23 = vmul.f32 %v15195_v44, %v485_v6 }
 0x231   :  { %v13761_v31 = vpop.eup %13760  ;;  %v425_v17 = vadd.f32 1e-05, %v393_v28 }
 0x232   :  { %v358_v12 = vpop.xlane.xlu1 %357  ;;  %880 = vmatmul.mubr.bf16.gmra.mrb[40].mxu0 %v581_v30  ;;  %12568 = vmatprep.mubr.bf16.mxu1 %v581_v30  ;;  %v486_v35 = vmul.f32 %v13761_v31, %v15198_v46  ;;  %v561_v40 = vadd.f32 %v15207_v62, %v523_v23 }
 0x233   :  { %13766 = vrsqrt.f32 %v425_v17  ;;  %v394_v32 = vmul.f32 0.0078125, %v358_v12  ;;  %889 = vmatprep.mubr.bf16.mxu0 %v19845_v1 }
 0x234   :  { %v524_v39 = vmul.f32 %v15195_v44, %v486_v35 }
 0x235   :  { %v13763_v19 = vpop.eup %13762  ;;  %v426_v29 = vadd.f32 1e-05, %v394_v32 }
 0x236   :  { %v360_v26 = vpop.xlane.xlu0 %359  ;;  %v562_v43 = vadd.f32 %v15207_v62, %v524_v39  ;;  %v487_v5 = vmul.f32 %v13763_v19, %v15211_v34 }
 0x237   :  { %13768 = vrsqrt.f32 %v426_v29  ;;  %v395_v47 = vmul.f32 0.0078125, %v360_v26 }
 0x238   :  { %v582_v46 = vpack.c.bf16 %v562_v43, %v561_v40  ;;  %v525_v42 = vmul.f32 %v15195_v44, %v487_v5 }
 0x239   :  { %v13765_v54 = vpop.eup %13764  ;;  %v427_v58 = vadd.f32 1e-05, %v395_v47 }
 0x23a   :  { %v362_v37 = vpop.xlane.xlu1 %361  ;;  %890 = vmatmul.mubr.bf16.gmra.mrb[44].mxu0 %v582_v46  ;;  %12569 = vmatmul.mubr.bf16.gmra.mrb[20].mxu1 %v582_v46  ;;  %v488_v41 = vmul.f32 %v13765_v54, %v15219_v60  ;;  %v563_v53 = vadd.f32 %v15207_v62, %v525_v42 }
 0x23b   :  { %13770 = vrsqrt.f32 %v427_v58  ;;  %v396_v55 = vmul.f32 0.0078125, %v362_v37  ;;  %899 = vmatprep.mubr.bf16.mxu0 %v19845_v1 }
 0x23c   :  { %v526_v27 = vmul.f32 %v15195_v44, %v488_v41 }
 0x23d   :  { %v13767_v48 = vpop.eup %13766  ;;  %v428_v34 = vadd.f32 1e-05, %v396_v55 }
 0x23e   :  { %v364_v56 = vpop.xlane.xlu0 %363  ;;  %v564_v57 = vadd.f32 %v15207_v62, %v526_v27  ;;  %v489_v36 = vmul.f32 %v13767_v48, %v15228_v51 }
 0x23f   :  { %13772 = vrsqrt.f32 %v428_v34  ;;  %v397_v61 = vmul.f32 0.0078125, %v364_v56 }
 0x240   :  { %v583_v60 = vpack.c.bf16 %v564_v57, %v563_v53  ;;  %v527_v8 = vmul.f32 %v15195_v44, %v489_v36 }
 0x241   :  { %v13769_v3 = vpop.eup %13768  ;;  %v429_v52 = vadd.f32 1e-05, %v397_v61 }
 0x242   :  { %v366_v2 = vpop.xlane.xlu1 %365  ;;  %900 = vmatmul.mubr.bf16.gmra.mrb[48].mxu0 %v583_v60  ;;  %12572 = vmatprep.mubr.bf16.mxu1 %v583_v60  ;;  %v490_v7 = vmul.f32 %v13769_v3, %v15236_v15  ;;  %v565_v45 = vadd.f32 %v15207_v62, %v527_v8 }
 0x243   :  { %13774 = vrsqrt.f32 %v429_v52  ;;  %v398_v49 = vmul.f32 0.0078125, %v366_v2  ;;  %909 = vmatprep.mubr.bf16.mxu0 %v19845_v1 }
 0x244   :  { %v528_v9 = vmul.f32 %v15195_v44, %v490_v7 }
 0x245   :  { %v13771_v10 = vpop.eup %13770  ;;  %v430_v51 = vadd.f32 1e-05, %v398_v49 }
 0x246   :  { %v566_v11 = vadd.f32 %v15207_v62, %v528_v9  ;;  %v491_v16 = vmul.f32 %v13771_v10, %v15245_v22 }
 0x247   :  { %13776 = vrsqrt.f32 %v430_v51 }
 0x248   :  { %v584_v18 = vpack.c.bf16 %v566_v11, %v565_v45  ;;  %v529_v25 = vmul.f32 %v15195_v44, %v491_v16 }
 0x249   :  { %v13773_v20 = vpop.eup %13772 }
 0x24a   :  { %910 = vmatmul.mubr.bf16.gmra.mrb[52].mxu0 %v584_v18  ;;  %12573 = vmatmul.mubr.bf16.gmra.mrb[24].mxu1 %v584_v18  ;;  %v492_v15 = vmul.f32 %v13773_v20, %v15253_v38  ;;  %v567_v21 = vadd.f32 %v15207_v62, %v529_v25 }
 0x24b   :  { %919 = vmatprep.mubr.bf16.mxu0 %v19845_v1 }
 0x24c   :  { %v530_v63 = vmul.f32 %v15195_v44, %v492_v15 }
 0x24d   :  { %v13775_v13 = vpop.eup %13774 }
 0x24e   :  { %v568_v33 = vadd.f32 %v15207_v62, %v530_v63  ;;  %v493_v22 = vmul.f32 %v13775_v13, %v15262_v59 }
 0x250   :  { %v585_v50 = vpack.c.bf16 %v568_v33, %v567_v21  ;;  %v531_v38 = vmul.f32 %v15195_v44, %v493_v22 }
 0x251   :  { %v13777_v24 = vpop.eup %13776 }
 0x252   :  { %920 = vmatmul.mubr.bf16.gmra.mrb[56].mxu0 %v585_v50  ;;  %12576 = vmatprep.mubr.bf16.mxu1 %v585_v50  ;;  %v494_v14 = vmul.f32 %v13777_v24, %v15270_v0  ;;  %v569_v6 = vadd.f32 %v15207_v62, %v531_v38 }
 0x253   :  { %929 = vmatprep.mubr.bf16.mxu0 %v19845_v1 }
 0x254   :  { %v532_v4 = vmul.f32 %v15195_v44, %v494_v14 }
 0x256   :  { %v570_v28 = vadd.f32 %v15207_v62, %v532_v4 }
 0x258   :  { %v586_v30 = vpack.c.bf16 %v570_v28, %v569_v6 }
 0x25a   :  { %930 = vmatmul.mubr.bf16.gmra.mrb[60].mxu0 %v586_v30  ;;  %12577 = vmatmul.mubr.bf16.gmra.mrb[28].mxu1 %v586_v30 }
 0x26d   :  { %v781_v59 = vpop.f32.mrb[0].mxu0 }
 0x26e   :  { %v783_v31 = vpop.f32.mrb[1].mxu0 }
 0x26f   :  { %v785_v17 = vpop.f32.mrb[2].mxu0 }
 0x270   :  { %v15357_v12 = vpack.c.bf16 %v785_v17, %v781_v59  ;;  %v787_v0 = vpop.f32.mrb[3].mxu0 }
 0x271   :  { %v15359_v35 = vpack.c.bf16 %v787_v0, %v783_v31 }
 0x272   :  { %20136 = vst [vmem:[#allocation16_spill] sm:$0xff] %v15357_v12  ;;  %2203 = vrot.lane.b32.xlu0 %v15357_v12, %s14913_s2  ;;  %12588 = vmatprep.mubr.msk.bf16.mxu1 %vm1149_vm0, %v15357_v12 }
 0x273   :  { %20137 = vst [vmem:[#allocation17_spill] sm:$0xff] %v15359_v35  ;;  %13264 = vmatprep.subr.msk.bf16.mxu1 %vm1149_vm0, %v15359_v35  ;;  %v1163_v44 = vsel %vm1149_vm0, %v15359_v35, 0 }
 0x274   :  { %12581 = vmatpush3.bf16.xpose.msra.mxu1 %v1163_v44 }
 0x275   :  { %v791_v62 = vpop.f32.mrb[4].mxu0  ;;  %v12550_v23 = vpop.f32.mrb[0].mxu1 }
 0x276   :  { %v793_v32 = vpop.f32.mrb[5].mxu0  ;;  %v974_v39 = vpop.f32.mrb[1].mxu1  ;;  %2215 = vrot.lane.b32.xlu0 %v15359_v35, %s14913_s2 }
 0x277   :  { %v795_v19 = vpop.f32.mrb[6].mxu0  ;;  %v12551_v29 = vpop.f32.mrb[2].mxu1 }
 0x278   :  { %v15371_v26 = vpack.c.bf16 %v795_v19, %v791_v62  ;;  %v15373_v40 = vpack.c.bf16 %v12551_v29, %v12550_v23  ;;  %v797_v43 = vpop.f32.mrb[7].mxu0  ;;  %v977_v5 = vpop.f32.mrb[3].mxu1 }
 0x279   :  { %v15375_v47 = vpack.c.bf16 %v797_v43, %v793_v32  ;;  %v15377_v46 = vpack.c.bf16 %v977_v5, %v974_v39 }
 0x27a   :  { %20138 = vst [vmem:[#allocation18_spill] sm:$0xff] %v15373_v40 }
 0x27b   :  { %20139 = vst [vmem:[#allocation19_spill] sm:$0xff] %v15375_v47  ;;  %20140 = vst [vmem:[#allocation20_spill] sm:$0xff] %v15377_v46  ;;  %2217 = vrot.lane.b32.xlu1 %v15375_v47, %s14913_s2  ;;  %13265 = vmatprep.subr.msk.bf16.mxu1 %vm1149_vm0, %v15375_v47  ;;  %v1166_v54 = vsel %vm1149_vm0, %v15375_v47, 0 }
 0x27c   :  { %12583 = vmatpush3.bf16.xpose.msra.mxu1 %v1166_v54 }
 0x27d   :  { %v801_v58 = vpop.f32.mrb[8].mxu0 }
 0x27e   :  { %v803_v37 = vpop.f32.mrb[9].mxu0 }
 0x27f   :  { %v805_v41 = vpop.f32.mrb[10].mxu0 }
 0x280   :  { %v15385_v42 = vpack.c.bf16 %v805_v41, %v801_v58  ;;  %v807_v55 = vpop.f32.mrb[11].mxu0 }
 0x281   :  { %v15387_v27 = vpack.c.bf16 %v807_v55, %v803_v37 }
 0x282   :  { %20141 = vst [vmem:[#allocation21_spill] sm:$0xff] %v15385_v42 }
 0x283   :  { %20142 = vst [vmem:[#allocation22_spill] sm:$0xff] %v15387_v27  ;;  %13266 = vmatprep.subr.msk.bf16.mxu1 %vm1149_vm0, %v15387_v27  ;;  %2219 = vrot.lane.b32.xlu0 %v15387_v27, %s14913_s2  ;;  %v1169_v48 = vsel %vm1149_vm0, %v15387_v27, 0 }
 0x284   :  { %12585 = vmatpush3.bf16.xpose.msra.mxu1 %v1169_v48 }
 0x285   :  { %v811_v34 = vpop.f32.mrb[12].mxu0  ;;  %v12554_v56 = vpop.f32.mrb[4].mxu1 }
 0x286   :  { %v813_v53 = vpop.f32.mrb[13].mxu0  ;;  %v990_v57 = vpop.f32.mrb[5].mxu1 }
 0x287   :  { %v815_v36 = vpop.f32.mrb[14].mxu0  ;;  %v12555_v61 = vpop.f32.mrb[6].mxu1 }
 0x288   :  { %v15395_v60 = vpack.c.bf16 %v815_v36, %v811_v34  ;;  %v15397_v3 = vpack.c.bf16 %v12555_v61, %v12554_v56  ;;  %v817_v52 = vpop.f32.mrb[15].mxu0  ;;  %v993_v2 = vpop.f32.mrb[7].mxu1 }
 0x289   :  { %v15399_v7 = vpack.c.bf16 %v817_v52, %v813_v53  ;;  %v15401_v8 = vpack.c.bf16 %v993_v2, %v990_v57 }
 0x28a   :  { %20143 = vst [vmem:[#allocation23_spill] sm:$0xff] %v15395_v60  ;;  %20144 = vst [vmem:[#allocation24_spill] sm:$0xff] %v15397_v3 }
 0x28b   :  { %20145 = vst [vmem:[#allocation25_spill] sm:$0xff] %v15399_v7  ;;  %20146 = vst [vmem:[#allocation26_spill] sm:$0xff] %v15401_v8  ;;  %2221 = vrot.lane.b32.xlu1 %v15399_v7, %s14913_s2  ;;  %13267 = vmatprep.subr.msk.bf16.mxu1 %vm1149_vm0, %v15399_v7  ;;  %v1172_v49 = vsel %vm1149_vm0, %v15399_v7, 0 }
 0x28c   :  { %12587 = vmatpush3.bf16.xpose.msra.mxu1 %v1172_v49 }
 0x28d   :  { %v821_v9 = vpop.f32.mrb[16].mxu0 }
 0x28e   :  { %v823_v10 = vpop.f32.mrb[17].mxu0 }
 0x28f   :  { %v825_v51 = vpop.f32.mrb[18].mxu0 }
 0x290   :  { %v15409_v45 = vpack.c.bf16 %v825_v51, %v821_v9  ;;  %v827_v11 = vpop.f32.mrb[19].mxu0 }
 0x291   :  { %v15411_v16 = vpack.c.bf16 %v827_v11, %v823_v10 }
 0x293   :  { %20147 = vst [vmem:[#allocation27_spill] sm:$0xff] %v15411_v16  ;;  %2328 = vrot.lane.b32.xlu1 %v15411_v16, %s14913_s2  ;;  %12589 = vmatmul.mubr.msk.bf16.vlgmr.msra.gmra.mrb[32].mxu1 %vm1149_vm0, %v15371_v26  ;;  %v1252_v18 = vsel %vm1149_vm0, %v15411_v16, 0 }
 0x294   :  { %13268 = vmatprep.subr.msk.bf16.mxu1 %vm1149_vm0, %v15411_v16  ;;  %12592 = vmatprep.mubr.msk.bf16.mxu1 %vm1149_vm0, %v15385_v42 }
 0x295   :  { %12597 = vmatpush3.bf16.xpose.msra.mxu1 %v1252_v18  ;;  %v831_v20 = vpop.f32.mrb[20].mxu0  ;;  %v12558_v15 = vpop.f32.mrb[8].mxu1 }
 0x296   :  { %v833_v25 = vpop.f32.mrb[21].mxu0  ;;  %v1006_v63 = vpop.f32.mrb[9].mxu1 }
 0x297   :  { %v835_v13 = vpop.f32.mrb[22].mxu0  ;;  %v12559_v21 = vpop.f32.mrb[10].mxu1 }
 0x298   :  { %v15423_v33 = vpack.c.bf16 %v835_v13, %v831_v20  ;;  %v15425_v22 = vpack.c.bf16 %v12559_v21, %v12558_v15  ;;  %v837_v50 = vpop.f32.mrb[23].mxu0  ;;  %v1009_v24 = vpop.f32.mrb[11].mxu1 }
 0x299   :  { %v15427_v14 = vpack.c.bf16 %v837_v50, %v833_v25  ;;  %v15429_v38 = vpack.c.bf16 %v1009_v24, %v1006_v63 }
 0x29a   :  { %20148 = vst [vmem:[#allocation28_spill] sm:$0xff] %v15425_v22 }
 0x29b   :  { %20149 = vst [vmem:[#allocation29_spill] sm:$0xff] %v15427_v14  ;;  %20150 = vst [vmem:[#allocation30_spill] sm:$0xff] %v15429_v38  ;;  %2330 = vrot.lane.b32.xlu1 %v15427_v14, %s14913_s2  ;;  %12593 = vmatmul.mubr.msk.bf16.gmra.mrb[36].mxu1 %vm1149_vm0, %v15395_v60  ;;  %v1255_v4 = vsel %vm1149_vm0, %v15427_v14, 0 }
 0x29c   :  { %13269 = vmatprep.subr.msk.bf16.mxu1 %vm1149_vm0, %v15427_v14  ;;  %12604 = vmatprep.mubr.msk.bf16.mxu1 %vm1149_vm0, %v15409_v45 }
 0x29d   :  { %12599 = vmatpush3.bf16.xpose.msra.mxu1 %v1255_v4  ;;  %v841_v6 = vpop.f32.mrb[24].mxu0 }
 0x29e   :  { %v843_v28 = vpop.f32.mrb[25].mxu0 }
 0x29f   :  { %v845_v30 = vpop.f32.mrb[26].mxu0 }
 0x2a0   :  { %v15441_v59 = vpack.c.bf16 %v845_v30, %v841_v6  ;;  %v847_v31 = vpop.f32.mrb[27].mxu0 }
 0x2a1   :  { %v15443_v17 = vpack.c.bf16 %v847_v31, %v843_v28  ;;  %v12562_v0 = vpop.f32.mrb[12].mxu1 }
 0x2a2   :  { %20151 = vst [vmem:[#allocation31_spill] sm:$0xff] %v15441_v59  ;;  %v1022_v44 = vpop.f32.mrb[13].mxu1 }
 0x2a3   :  { %20152 = vst [vmem:[#allocation32_spill] sm:$0xff] %v15443_v17  ;;  %2332 = vrot.lane.b32.xlu1 %v15443_v17, %s14913_s2  ;;  %v12563_v62 = vpop.f32.mrb[14].mxu1  ;;  %13270 = vmatprep.subr.msk.bf16.mxu1 %vm1149_vm0, %v15443_v17  ;;  %v1258_v23 = vsel %vm1149_vm0, %v15443_v17, 0 }
 0x2a4   :  { %v15451_v32 = vpack.c.bf16 %v12563_v62, %v12562_v0  ;;  %v1025_v39 = vpop.f32.mrb[15].mxu1 }
 0x2a5   :  { %v15453_v19 = vpack.c.bf16 %v1025_v39, %v1022_v44  ;;  %12601 = vmatpush3.bf16.xpose.msra.mxu1 %v1258_v23  ;;  %v851_v29 = vpop.f32.mrb[28].mxu0 }
 0x2a6   :  { %20153 = vst [vmem:[#allocation33_spill] sm:$0xff] %v15451_v32  ;;  %v853_v43 = vpop.f32.mrb[29].mxu0 }
 0x2a7   :  { %20154 = vst [vmem:[#allocation34_spill] sm:$0xff] %v15453_v19  ;;  %v855_v5 = vpop.f32.mrb[30].mxu0 }
 0x2a8   :  { %v15455_v54 = vpack.c.bf16 %v855_v5, %v851_v29  ;;  %v857_v58 = vpop.f32.mrb[31].mxu0 }
 0x2a9   :  { %v15457_v37 = vpack.c.bf16 %v857_v58, %v853_v43  ;;  %v12566_v41 = vpop.f32.mrb[16].mxu1 }
 0x2aa   :  { %20155 = vst [vmem:[#allocation35_spill] sm:$0xff] %v15455_v54  ;;  %v1038_v55 = vpop.f32.mrb[17].mxu1 }
 0x2ab   :  { %v12567_v48 = vpop.f32.mrb[18].mxu1  ;;  %13271 = vmatprep.subr.msk.bf16.mxu1 %vm1149_vm0, %v15457_v37  ;;  %v1261_v34 = vsel %vm1149_vm0, %v15457_v37, 0 }
 0x2ac   :  { %v15463_v56 = vpack.c.bf16 %v12567_v48, %v12566_v41  ;;  %v1041_v53 = vpop.f32.mrb[19].mxu1 }
 0x2ad   :  { %v15465_v57 = vpack.c.bf16 %v1041_v53, %v1038_v55  ;;  %12603 = vmatpush3.bf16.xpose.msra.mxu1 %v1261_v34  ;;  %v861_v36 = vpop.f32.mrb[32].mxu0 }
 0x2ae   :  { %20156 = vst [vmem:[#allocation36_spill] sm:$0xff] %v15463_v56  ;;  %v863_v61 = vpop.f32.mrb[33].mxu0 }
 0x2af   :  { %20157 = vst [vmem:[#allocation37_spill] sm:$0xff] %v15465_v57  ;;  %v865_v52 = vpop.f32.mrb[34].mxu0 }
 0x2b0   :  { %v15467_v2 = vpack.c.bf16 %v865_v52, %v861_v36  ;;  %v867_v49 = vpop.f32.mrb[35].mxu0 }
 0x2b1   :  { %v15469_v9 = vpack.c.bf16 %v867_v49, %v863_v61 }
 0x2b2   :  { %20158 = vst [vmem:[#allocation38_spill] sm:$0xff] %v15467_v2  ;;  %12620 = vmatprep.mubr.msk.bf16.mxu0 %vm1149_vm0, %v15467_v2 }
 0x2b3   :  { %13272 = vmatprep.subr.msk.bf16.mxu0 %vm1149_vm0, %v15469_v9  ;;  %v1341_v10 = vsel %vm1149_vm0, %v15469_v9, 0 }
 0x2b4   :  { %12605 = vmatmul.mubr.msk.bf16.vlgmr.msra.gmra.mrb[40].mxu1 %vm1149_vm0, %v15423_v33  ;;  %12613 = vmatpush3.bf16.xpose.msra.mxu0 %v1341_v10 }
 0x2b5   :  { %12608 = vmatprep.mubr.msk.bf16.mxu1 %vm1149_vm0, %v15441_v59  ;;  %v871_v51 = vpop.f32.mrb[36].mxu0 }
 0x2b6   :  { %v873_v11 = vpop.f32.mrb[37].mxu0 }
 0x2b7   :  { %v875_v18 = vpop.f32.mrb[38].mxu0 }
 0x2b8   :  { %v15481_v20 = vpack.c.bf16 %v875_v18, %v871_v51  ;;  %v877_v15 = vpop.f32.mrb[39].mxu0 }
 0x2b9   :  { %v15483_v25 = vpack.c.bf16 %v877_v15, %v873_v11 }
 0x2ba   :  { %20159 = vst [vmem:[#allocation39_spill] sm:$0xff] %v15481_v20 }
 0x2bb   :  { %13273 = vmatprep.subr.msk.bf16.mxu0 %vm1149_vm0, %v15483_v25  ;;  %v1344_v63 = vsel %vm1149_vm0, %v15483_v25, 0 }
 0x2bc   :  { %12609 = vmatmul.mubr.msk.bf16.gmra.mrb[44].mxu1 %vm1149_vm0, %v15455_v54  ;;  %12615 = vmatpush3.bf16.xpose.msra.mxu0 %v1344_v63 }
 0x2ed   :  { %v15647_v14 = vpop.permute.xlu1 %2217 }
 0x2ee   :  { %20177 = vst [vmem:[#allocation57_spill] sm:$0xff] %v15647_v14 }
 0x305   :  { %v881_v13 = vpop.f32.mrb[40].mxu0 }
 0x306   :  { %v883_v21 = vpop.f32.mrb[41].mxu0 }
 0x307   :  { %v885_v50 = vpop.f32.mrb[42].mxu0 }
 0x308   :  { %v15491_v24 = vpack.c.bf16 %v885_v50, %v881_v13  ;;  %v887_v4 = vpop.f32.mrb[43].mxu0 }
 0x309   :  { %v15493_v6 = vpack.c.bf16 %v887_v4, %v883_v21 }
 0x30a   :  { %20160 = vst [vmem:[#allocation40_spill] sm:$0xff] %v15491_v24 }
 0x30b   :  { %13274 = vmatprep.subr.msk.bf16.mxu0 %vm1149_vm0, %v15493_v6  ;;  %v1347_v28 = vsel %vm1149_vm0, %v15493_v6, 0 }
 0x30c   :  { %12617 = vmatpush3.bf16.xpose.msra.mxu0 %v1347_v28 }
 0x30d   :  { %v891_v30 = vpop.f32.mrb[44].mxu0  ;;  %v12570_v31 = vpop.f32.mrb[20].mxu1 }
 0x30e   :  { %v893_v0 = vpop.f32.mrb[45].mxu0  ;;  %v1054_v44 = vpop.f32.mrb[21].mxu1 }
 0x30f   :  { %v895_v62 = vpop.f32.mrb[46].mxu0  ;;  %v12571_v39 = vpop.f32.mrb[22].mxu1 }
 0x310   :  { %v15499_v23 = vpack.c.bf16 %v895_v62, %v891_v30  ;;  %v897_v29 = vpop.f32.mrb[47].mxu0  ;;  %v15501_v43 = vpack.c.bf16 %v12571_v39, %v12570_v31  ;;  %v1057_v58 = vpop.f32.mrb[23].mxu1 }
 0x311   :  { %v15503_v5 = vpack.c.bf16 %v897_v29, %v893_v0  ;;  %v15505_v41 = vpack.c.bf16 %v1057_v58, %v1054_v44 }
 0x312   :  { %20161 = vst [vmem:[#allocation41_spill] sm:$0xff] %v15499_v23  ;;  %20162 = vst [vmem:[#allocation42_spill] sm:$0xff] %v15501_v43 }
 0x313   :  { %20163 = vst [vmem:[#allocation43_spill] sm:$0xff] %v15503_v5  ;;  %20164 = vst [vmem:[#allocation44_spill] sm:$0xff] %v15505_v41  ;;  %13275 = vmatprep.subr.msk.bf16.mxu0 %vm1149_vm0, %v15503_v5  ;;  %v1350_v55 = vsel %vm1149_vm0, %v15503_v5, 0 }
 0x314   :  { %12619 = vmatpush3.bf16.xpose.msra.mxu0 %v1350_v55 }
 0x315   :  { %v901_v48 = vpop.f32.mrb[48].mxu0  ;;  %12644 = vmatprep.subr.bf16.mxu0 %v15377_v46 }
 0x316   :  { %v903_v34 = vpop.f32.mrb[49].mxu0 }
 0x317   :  { %v905_v53 = vpop.f32.mrb[50].mxu0 }
 0x318   :  { %v15512_v36 = vpack.c.bf16 %v905_v53, %v901_v48  ;;  %v907_v61 = vpop.f32.mrb[51].mxu0 }
 0x319   :  { %v15514_v52 = vpack.c.bf16 %v907_v61, %v903_v34 }
 0x31a   :  { %20165 = vst [vmem:[#allocation45_spill] sm:$0xff] %v15512_v36  ;;  %12636 = vmatprep.mubr.msk.bf16.mxu1 %vm1149_vm0, %v15512_v36 }
 0x31b   :  { %20166 = vst [vmem:[#allocation46_spill] sm:$0xff] %v15514_v52  ;;  %12621 = vmatmul.mubr.msk.bf16.vlgmr.msra.gmra.mrb[64].mxu0 %vm1149_vm0, %v15481_v20  ;;  %13276 = vmatprep.subr.msk.bf16.mxu1 %vm1149_vm0, %v15514_v52  ;;  %v1430_v49 = vsel %vm1149_vm0, %v15514_v52, 0 }
 0x31c   :  { %12624 = vmatprep.mubr.msk.bf16.mxu0 %vm1149_vm0, %v15491_v24  ;;  %12629 = vmatpush3.bf16.xpose.msra.mxu1 %v1430_v49 }
 0x31d   :  { %12645 = vmatpush3.bf16.msra.mxu0 %v15377_v46  ;;  %v911_v10 = vpop.f32.mrb[52].mxu0  ;;  %v12574_v51 = vpop.f32.mrb[24].mxu1 }
 0x31e   :  { %12646 = vmatprep.subr.bf16.mxu0 %v15373_v40  ;;  %v913_v11 = vpop.f32.mrb[53].mxu0  ;;  %v1070_v18 = vpop.f32.mrb[25].mxu1 }
 0x31f   :  { %v915_v15 = vpop.f32.mrb[54].mxu0  ;;  %v12575_v63 = vpop.f32.mrb[26].mxu1 }
 0x320   :  { %v15528_v13 = vpack.c.bf16 %v915_v15, %v911_v10  ;;  %v15530_v21 = vpack.c.bf16 %v12575_v63, %v12574_v51  ;;  %v917_v50 = vpop.f32.mrb[55].mxu0  ;;  %v1073_v4 = vpop.f32.mrb[27].mxu1 }
 0x321   :  { %v15532_v28 = vpack.c.bf16 %v917_v50, %v913_v11  ;;  %v15534_v30 = vpack.c.bf16 %v1073_v4, %v1070_v18  ;;  %12647 = vmatpush3.bf16.msra.mxu0 %v15373_v40 }
 0x322   :  { %20167 = vst [vmem:[#allocation47_spill] sm:$0xff] %v15528_v13  ;;  %20168 = vst [vmem:[#allocation48_spill] sm:$0xff] %v15530_v21  ;;  %12648 = vmatprep.subr.bf16.mxu0 %v15401_v8 }
 0x323   :  { %20169 = vst [vmem:[#allocation49_spill] sm:$0xff] %v15532_v28  ;;  %20170 = vst [vmem:[#allocation50_spill] sm:$0xff] %v15534_v30  ;;  %12625 = vmatmul.mubr.msk.bf16.gmra.mrb[68].mxu0 %vm1149_vm0, %v15499_v23  ;;  %13277 = vmatprep.subr.msk.bf16.mxu1 %vm1149_vm0, %v15532_v28  ;;  %v1433_v31 = vsel %vm1149_vm0, %v15532_v28, 0 }
 0x324   :  { %12631 = vmatpush3.bf16.xpose.msra.mxu1 %v1433_v31 }
 0x325   :  { %12649 = vmatpush3.bf16.msra.mxu0 %v15401_v8  ;;  %v921_v0 = vpop.f32.mrb[56].mxu0 }
 0x326   :  { %12650 = vmatprep.subr.bf16.mxu0 %v15397_v3  ;;  %v923_v44 = vpop.f32.mrb[57].mxu0 }
 0x327   :  { %v925_v62 = vpop.f32.mrb[58].mxu0 }
 0x328   :  { %v15546_v39 = vpack.c.bf16 %v925_v62, %v921_v0  ;;  %v927_v29 = vpop.f32.mrb[59].mxu0 }
 0x329   :  { %v15548_v58 = vpack.c.bf16 %v927_v29, %v923_v44  ;;  %12651 = vmatpush3.bf16.msra.mxu0 %v15397_v3 }
 0x32a   :  { %20171 = vst [vmem:[#allocation51_spill] sm:$0xff] %v15546_v39  ;;  %12676 = vmatprep.subr.bf16.mxu0 %v15465_v57 }
 0x32b   :  { %20172 = vst [vmem:[#allocation52_spill] sm:$0xff] %v15548_v58  ;;  %13278 = vmatprep.subr.msk.bf16.mxu1 %vm1149_vm0, %v15548_v58  ;;  %v1436_v55 = vsel %vm1149_vm0, %v15548_v58, 0 }
 0x32c   :  { %12633 = vmatpush3.bf16.xpose.msra.mxu1 %v1436_v55 }
 0x32d   :  { %v931_v48 = vpop.f32.mrb[60].mxu0  ;;  %v12578_v34 = vpop.f32.mrb[28].mxu1 }
 0x32e   :  { %v933_v53 = vpop.f32.mrb[61].mxu0  ;;  %v1086_v61 = vpop.f32.mrb[29].mxu1 }
 0x32f   :  { %v935_v49 = vpop.f32.mrb[62].mxu0  ;;  %v12579_v10 = vpop.f32.mrb[30].mxu1 }
 0x330   :  { %v15556_v51 = vpack.c.bf16 %v935_v49, %v931_v48  ;;  %v15558_v11 = vpack.c.bf16 %v12579_v10, %v12578_v34  ;;  %v937_v18 = vpop.f32.mrb[63].mxu0  ;;  %v1089_v15 = vpop.f32.mrb[31].mxu1 }
 0x331   :  { %v15560_v63 = vpack.c.bf16 %v937_v18, %v933_v53  ;;  %v15562_v50 = vpack.c.bf16 %v1089_v15, %v1086_v61 }
 0x332   :  { %20173 = vst [vmem:[#allocation53_spill] sm:$0xff] %v15556_v51  ;;  %20174 = vst [vmem:[#allocation54_spill] sm:$0xff] %v15558_v11 }
 0x333   :  { %20175 = vst [vmem:[#allocation55_spill] sm:$0xff] %v15560_v63  ;;  %20176 = vst [vmem:[#allocation56_spill] sm:$0xff] %v15562_v50  ;;  %13279 = vmatprep.subr.msk.bf16.mxu1 %vm1149_vm0, %v15560_v63  ;;  %v1439_v4 = vsel %vm1149_vm0, %v15560_v63, 0 }
 0x334   :  { %12635 = vmatpush3.bf16.xpose.msra.mxu1 %v1439_v4 }
 0x335   :  { %12660 = vmatprep.subr.bf16.mxu1 %v15429_v38 }
 0x33b   :  { %12637 = vmatmul.mubr.msk.bf16.vlgmr.msra.gmra.mrb[48].mxu1 %vm1149_vm0, %v15528_v13 }
 0x33c   :  { %12640 = vmatprep.mubr.msk.bf16.mxu1 %vm1149_vm0, %v15546_v39  ;;  %12661 = vmatpush3.bf16.msra.mxu1 %v15429_v38 }
 0x33d   :  { %12662 = vmatprep.subr.bf16.mxu1 %v15425_v22 }
 0x340   :  { %12663 = vmatpush3.bf16.msra.mxu1 %v15425_v22 }
 0x341   :  { %12664 = vmatprep.subr.bf16.mxu1 %v15453_v19 }
 0x343   :  { %12641 = vmatmul.mubr.msk.bf16.gmra.mrb[52].mxu1 %vm1149_vm0, %v15556_v51 }
 0x344   :  { %12665 = vmatpush3.bf16.msra.mxu1 %v15453_v19 }
 0x345   :  { %12666 = vmatprep.subr.bf16.mxu1 %v15451_v32 }
 0x348   :  { %12667 = vmatpush3.bf16.msra.mxu1 %v15451_v32  ;;  %v15661_v32 = vpop.permute.xlu0 %2203 }
 0x349   :  { %12692 = vmatprep.subr.bf16.mxu1 %v15534_v30  ;;  %20178 = vst [vmem:[#allocation58_spill] sm:$0xff] %v15661_v32 }
 0x34c   :  { %v15677_v40 = vpop.permute.xlu0 %2215 }
 0x350   :  { %v15689_v46 = vpop.permute.xlu0 %2219 }
 0x351   :  { %20181 = vst [vmem:[#allocation61_spill] sm:$0xff] %v15689_v46 }
 0x366   :  { %v15583_v31 = vpop.f32.mrb[32].mxu1 }
 0x367   :  { %v15585_v0 = vpop.f32.mrb[33].mxu1  ;;  %v1513_v44 = vsel %vm1506_vm1, %v15583_v31, -inf }
 0x368   :  { %1514 = vmax.xlane.f32.xlu0 %v1513_v44  ;;  %v15589_v62 = vpop.f32.mrb[34].mxu1  ;;  %v1507_v48 = vsel %vm1506_vm1, %v15585_v0, -inf }
 0x369   :  { %v15591_v29 = vpop.f32.mrb[35].mxu1  ;;  %v1516_v55 = vsel %vm1506_vm1, %v15589_v62, -inf }
 0x36a   :  { %1517 = vmax.xlane.f32.xlu1 %v1516_v55  ;;  %v1510_v34 = vsel %vm1506_vm1, %v15591_v29, -inf }
 0x36c   :  { %1508 = vmax.xlane.f32.xlu0 %v1507_v48 }
 0x36e   :  { %1511 = vmax.xlane.f32.xlu1 %v1510_v34  ;;  %v15599_v53 = vpop.f32.mrb[36].mxu1 }
 0x36f   :  { %v15601_v61 = vpop.f32.mrb[37].mxu1  ;;  %v1525_v49 = vsel %vm1506_vm1, %v15599_v53, -inf }
 0x370   :  { %1526 = vmax.xlane.f32.xlu0 %v1525_v49  ;;  %v15605_v10 = vpop.f32.mrb[38].mxu1  ;;  %v1519_v4 = vsel %vm1506_vm1, %v15601_v61, -inf }
 0x371   :  { %v15607_v18 = vpop.f32.mrb[39].mxu1  ;;  %v1528_v15 = vsel %vm1506_vm1, %v15605_v10, -inf }
 0x372   :  { %1529 = vmax.xlane.f32.xlu1 %v1528_v15  ;;  %v1522_v44 = vsel %vm1506_vm1, %v15607_v18, -inf }
 0x374   :  { %1520 = vmax.xlane.f32.xlu0 %v1519_v4 }
 0x376   :  { %1523 = vmax.xlane.f32.xlu1 %v1522_v44 }
 0x387   :  { %v15615_v55 = vpop.f32.mrb[40].mxu1 }
 0x388   :  { %v15617_v48 = vpop.f32.mrb[41].mxu1  ;;  %v1537_v34 = vsel %vm1506_vm1, %v15615_v55, -inf }
 0x389   :  { %1538 = vmax.xlane.f32.xlu0 %v1537_v34  ;;  %v15621_v49 = vpop.f32.mrb[42].mxu1  ;;  %v1531_v4 = vsel %vm1506_vm1, %v15617_v48, -inf }
 0x38a   :  { %v15623_v1 = vpop.f32.mrb[43].mxu1  ;;  %v1540_v15 = vsel %vm1506_vm1, %v15621_v49, -inf }
 0x38b   :  { %1541 = vmax.xlane.f32.xlu1 %v1540_v15  ;;  %v1534_v44 = vsel %vm1506_vm1, %v15623_v1, -inf }
 0x38d   :  { %1532 = vmax.xlane.f32.xlu0 %v1531_v4 }
 0x38f   :  { %1535 = vmax.xlane.f32.xlu1 %v1534_v44  ;;  %v15631_v12 = vpop.f32.mrb[44].mxu1 }
 0x390   :  { %v15633_v27 = vpop.f32.mrb[45].mxu1  ;;  %v1549_v34 = vsel %vm1506_vm1, %v15631_v12, -inf }
 0x391   :  { %1550 = vmax.xlane.f32.xlu0 %v1549_v34  ;;  %v15637_v47 = vpop.f32.mrb[46].mxu1  ;;  %v1543_v4 = vsel %vm1506_vm1, %v15633_v27, -inf }
 0x392   :  { %v15639_v17 = vpop.f32.mrb[47].mxu1  ;;  %v1552_v15 = vsel %vm1506_vm1, %v15637_v47, -inf }
 0x393   :  { %1553 = vmax.xlane.f32.xlu1 %v1552_v15  ;;  %v1546_v44 = vsel %vm1506_vm1, %v15639_v17, -inf }
 0x395   :  { %1544 = vmax.xlane.f32.xlu0 %v1543_v4 }
 0x397   :  { %1547 = vmax.xlane.f32.xlu1 %v1546_v44  ;;  %v15663_v44 = vpop.permute.xlu1 %2221 }
 0x398   :  { %20179 = vst [vmem:[#allocation59_spill] sm:$0xff] %v15663_v44 }
 0x3ee   :  { %v15649_v7 = vpop.f32.mrb[64].mxu0 }
 0x3ef   :  { %v15651_v34 = vpop.f32.mrb[65].mxu0  ;;  %v1561_v16 = vsel %vm1506_vm1, %v15649_v7, -inf }
 0x3f0   :  { %1562 = vmax.xlane.f32.xlu0 %v1561_v16  ;;  %v15655_v35 = vpop.f32.mrb[66].mxu0  ;;  %v1555_v22 = vsel %vm1506_vm1, %v15651_v34, -inf  ;;  %v15669_v16 = vpop.permute.xlu1 %2328 }
 0x3f1   :  { %v15657_v15 = vpop.f32.mrb[67].mxu0  ;;  %v1564_v4 = vsel %vm1506_vm1, %v15655_v35, -inf }
 0x3f2   :  { %1565 = vmax.xlane.f32.xlu1 %v1564_v4  ;;  %v1558_v19 = vsel %vm1506_vm1, %v15657_v15, -inf }
 0x3f4   :  { %1556 = vmax.xlane.f32.xlu0 %v1555_v22  ;;  %v15685_v38 = vpop.permute.xlu1 %2330 }
 0x3f5   :  { %20180 = vst [vmem:[#allocation60_spill] sm:$0xff] %v15685_v38  ;;  %v1515_v39 = vpop.xlane.xlu0 %1514 }
 0x3f6   :  { %1559 = vmax.xlane.f32.xlu1 %v1558_v19  ;;  %v15671_v3 = vpop.f32.mrb[68].mxu0  ;;  %v1605_v36 = vsub.f32 %v15583_v31, %v1515_v39 }
 0x3f7   :  { %v15673_v14 = vpop.f32.mrb[69].mxu0  ;;  %v1573_v32 = vsel %vm1506_vm1, %v15671_v3, -inf }
 0x3f8   :  { %1574 = vmax.xlane.f32.xlu0 %v1573_v32  ;;  %v15679_v4 = vpop.f32.mrb[70].mxu0  ;;  %v1567_v19 = vsel %vm1506_vm1, %v15673_v14, -inf  ;;  %v15693_v32 = vpop.permute.xlu1 %2332  ;;  %v1639_v13 = vmul.f32 1.442695, %v1605_v36 }
 0x3f9   :  { %v15681_v44 = vpop.f32.mrb[71].mxu0  ;;  %v1576_v22 = vsel %vm1506_vm1, %v15679_v4, -inf  ;;  %20182 = vst [vmem:[#allocation62_spill] sm:$0xff] %v15693_v32  ;;  %v1509_v24 = vpop.xlane.xlu0 %1508 }
 0x3fa   :  { %1577 = vmax.xlane.f32.xlu1 %v1576_v22  ;;  %v1570_v8 = vsel %vm1506_vm1, %v15681_v44, -inf  ;;  %v1603_v54 = vsub.f32 %v15585_v0, %v1509_v24  ;;  %13778 = vpow2.f32 %v1639_v13 }
 0x3fc   :  { %1568 = vmax.xlane.f32.xlu0 %v1567_v19  ;;  %v1518_v51 = vpop.xlane.xlu1 %1517  ;;  %v1635_v24 = vmul.f32 1.442695, %v1603_v54 }
 0x3fd   :  { %v1606_v22 = vsub.f32 %v15589_v62, %v1518_v51  ;;  %v1527_v38 = vpop.xlane.xlu0 %1526 }
 0x3fe   :  { %1571 = vmax.xlane.f32.xlu1 %v1570_v8  ;;  %v1609_v51 = vsub.f32 %v15599_v53, %v1527_v38 }
 0x3ff   :  { %v1641_v32 = vmul.f32 1.442695, %v1606_v22 }
 0x400   :  { %v1512_v23 = vpop.xlane.xlu1 %1511 }
 0x401   :  { %v1604_v58 = vsub.f32 %v15591_v29, %v1512_v23  ;;  %v1521_v31 = vpop.xlane.xlu0 %1520  ;;  %13780 = vpow2.f32 %v1641_v32 }
 0x402   :  { %13782 = vpow2.f32 %v1635_v24  ;;  %v1607_v54 = vsub.f32 %v15601_v61, %v1521_v31 }
 0x403   :  { %v1637_v62 = vmul.f32 1.442695, %v1604_v58 }
 0x404   :  { %v1530_v46 = vpop.xlane.xlu1 %1529 }
 0x405   :  { %v1610_v23 = vsub.f32 %v15605_v10, %v1530_v46  ;;  %13784 = vpow2.f32 %v1637_v62 }
 0x407   :  { %v1649_v46 = vmul.f32 1.442695, %v1610_v23  ;;  %v15734_v23 = vpop.eup %13778 }
 0x408   :  { %v1524_v29 = vpop.xlane.xlu1 %1523 }
 0x409   :  { %v1608_v10 = vsub.f32 %v15607_v18, %v1524_v29 }
 0x40b   :  { %v1645_v18 = vmul.f32 1.442695, %v1608_v10 }
 0x40e   :  { %v15698_v19 = vpop.f32.mrb[48].mxu1 }
 0x40f   :  { %v15700_v63 = vpop.f32.mrb[49].mxu1  ;;  %v1585_v8 = vsel %vm1506_vm1, %v15698_v19, -inf }
 0x410   :  { %1586 = vmax.xlane.f32.xlu0 %v1585_v8  ;;  %v15705_v59 = vpop.f32.mrb[50].mxu1  ;;  %v1579_v0 = vsel %vm1506_vm1, %v15700_v63, -inf  ;;  %v1647_v8 = vmul.f32 1.442695, %v1609_v51  ;;  %v1643_v51 = vmul.f32 1.442695, %v1607_v54 }
 0x411   :  { %v15707_v39 = vpop.f32.mrb[51].mxu1  ;;  %v1588_v36 = vsel %vm1506_vm1, %v15705_v59, -inf }
 0x412   :  { %1589 = vmax.xlane.f32.xlu1 %v1588_v36  ;;  %v1582_v22 = vsel %vm1506_vm1, %v15707_v39, -inf  ;;  %13786 = vpow2.f32 %v1647_v8  ;;  %v15739_v8 = vpop.eup %13780 }
 0x413   :  { %13788 = vpow2.f32 %v1649_v46  ;;  %v15744_v46 = vpop.eup %13782 }
 0x414   :  { %1580 = vmax.xlane.f32.xlu0 %v1579_v0  ;;  %13790 = vpow2.f32 %v1643_v51  ;;  %v15749_v51 = vpop.eup %13784 }
 0x415   :  { %13792 = vpow2.f32 %v1645_v18 }
 0x416   :  { %v1539_v13 = vpop.xlane.xlu0 %1538  ;;  %1583 = vmax.xlane.f32.xlu1 %v1582_v22  ;;  %v15718_v38 = vpop.f32.mrb[52].mxu1 }
 0x417   :  { %v15720_v53 = vpop.f32.mrb[53].mxu1  ;;  %v1597_v58 = vsel %vm1506_vm1, %v15718_v38, -inf  ;;  %v1613_v31 = vsub.f32 %v15615_v55, %v1539_v13 }
 0x418   :  { %v1542_v32 = vpop.xlane.xlu1 %1541  ;;  %1598 = vmax.xlane.f32.xlu0 %v1597_v58  ;;  %v15725_v36 = vpop.f32.mrb[54].mxu1  ;;  %v1591_v62 = vsel %vm1506_vm1, %v15720_v53, -inf }
 0x419   :  { %v15727_v24 = vpop.f32.mrb[55].mxu1  ;;  %v1600_v61 = vsel %vm1506_vm1, %v15725_v36, -inf  ;;  %v1614_v29 = vsub.f32 %v15621_v49, %v1542_v32  ;;  %v1655_v55 = vmul.f32 1.442695, %v1613_v31 }
 0x41a   :  { %v1533_v0 = vpop.xlane.xlu0 %1532  ;;  %1601 = vmax.xlane.f32.xlu1 %v1600_v61  ;;  %v1594_v58 = vsel %vm1506_vm1, %v15727_v24, -inf  ;;  %v1705_v61 = vsel %vm1506_vm1, %v15734_v23, 0.0 }
 0x41b   :  { %v1611_v54 = vsub.f32 %v15617_v48, %v1533_v0  ;;  %v1657_v49 = vmul.f32 1.442695, %v1614_v29  ;;  %13794 = vpow2.f32 %v1655_v55 }
 0x41c   :  { %v1536_v22 = vpop.xlane.xlu1 %1535  ;;  %1592 = vmax.xlane.f32.xlu0 %v1591_v62  ;;  %v1708_v62 = vsel %vm1506_vm1, %v15739_v8, 0.0  ;;  %v15754_v18 = vpop.eup %13786 }
 0x41d   :  { %v1612_v10 = vsub.f32 %v15623_v1, %v1536_v22  ;;  %v1651_v48 = vmul.f32 1.442695, %v1611_v54  ;;  %13796 = vpow2.f32 %v1657_v49  ;;  %v15759_v55 = vpop.eup %13788 }
 0x41e   :  { %v1551_v13 = vpop.xlane.xlu0 %1550  ;;  %1595 = vmax.xlane.f32.xlu1 %v1594_v58  ;;  %v1699_v58 = vsel %vm1506_vm1, %v15744_v46, 0.0 }
 0x41f   :  { %v1617_v31 = vsub.f32 %v15631_v12, %v1551_v13  ;;  %v1653_v1 = vmul.f32 1.442695, %v1612_v10  ;;  %13798 = vpow2.f32 %v1651_v48  ;;  %v1717_v13 = vsel %vm1506_vm1, %v15754_v18, 0.0 }
 0x420   :  { %v1554_v32 = vpop.xlane.xlu1 %1553  ;;  %1706 = vadd.xlane.f32.xlu0 %v1705_v61  ;;  %v1702_v61 = vsel %vm1506_vm1, %v15749_v51, 0.0  ;;  %v1720_v10 = vsel %vm1506_vm1, %v15759_v55, 0.0 }
 0x421   :  { %v1618_v29 = vsub.f32 %v15637_v47, %v1554_v32  ;;  %v1663_v12 = vmul.f32 1.442695, %v1617_v31  ;;  %13800 = vpow2.f32 %v1653_v1 }
 0x422   :  { %1709 = vadd.xlane.f32.xlu1 %v1708_v62  ;;  %v1545_v0 = vpop.xlane.xlu0 %1544  ;;  %v15764_v62 = vpop.eup %13790 }
 0x423   :  { %v1615_v54 = vsub.f32 %v15633_v27, %v1545_v0  ;;  %v1665_v49 = vmul.f32 1.442695, %v1618_v29  ;;  %v15769_v32 = vpop.eup %13792  ;;  %13802 = vpow2.f32 %v1663_v12  ;;  %v1711_v27 = vsel %vm1506_vm1, %v15764_v62, 0.0 }
 0x424   :  { %1700 = vadd.xlane.f32.xlu0 %v1699_v58  ;;  %v1548_v22 = vpop.xlane.xlu1 %1547 }
 0x425   :  { %v1616_v47 = vsub.f32 %v15639_v17, %v1548_v22  ;;  %v1659_v48 = vmul.f32 1.442695, %v1615_v54  ;;  %v15773_v31 = vpop.eup %13794  ;;  %13804 = vpow2.f32 %v1665_v49  ;;  %v1714_v17 = vsel %vm1506_vm1, %v15769_v32, 0.0 }
 0x426   :  { %1703 = vadd.xlane.f32.xlu1 %v1702_v61  ;;  %v1729_v1 = vsel %vm1506_vm1, %v15773_v31, 0.0 }
 0x427   :  { %v1661_v0 = vmul.f32 1.442695, %v1616_v47  ;;  %v15777_v58 = vpop.eup %13796  ;;  %13806 = vpow2.f32 %v1659_v48 }
 0x428   :  { %1718 = vadd.xlane.f32.xlu0 %v1717_v13  ;;  %v1732_v22 = vsel %vm1506_vm1, %v15777_v58, 0.0 }
 0x429   :  { %v15781_v29 = vpop.eup %13798  ;;  %13808 = vpow2.f32 %v1661_v0 }
 0x42a   :  { %1721 = vadd.xlane.f32.xlu1 %v1720_v10  ;;  %v1723_v12 = vsel %vm1506_vm1, %v15781_v29, 0.0 }
 0x42b   :  { %v15785_v61 = vpop.eup %13800 }
 0x42c   :  { %1712 = vadd.xlane.f32.xlu0 %v1711_v27  ;;  %v1726_v13 = vsel %vm1506_vm1, %v15785_v61, 0.0 }
 0x42d   :  { %v15789_v54 = vpop.eup %13802 }
 0x42e   :  { %1715 = vadd.xlane.f32.xlu1 %v1714_v17  ;;  %v1741_v47 = vsel %vm1506_vm1, %v15789_v54, 0.0 }
 0x42f   :  { %v15793_v49 = vpop.eup %13804 }
 0x430   :  { %1730 = vadd.xlane.f32.xlu0 %v1729_v1  ;;  %v1744_v48 = vsel %vm1506_vm1, %v15793_v49, 0.0 }
 0x431   :  { %v15797_v10 = vpop.eup %13806 }
 0x432   :  { %1733 = vadd.xlane.f32.xlu1 %v1732_v22  ;;  %v1735_v0 = vsel %vm1506_vm1, %v15797_v10, 0.0 }
 0x433   :  { %v15801_v27 = vpop.eup %13808 }
 0x434   :  { %1724 = vadd.xlane.f32.xlu0 %v1723_v12  ;;  %v1738_v17 = vsel %vm1506_vm1, %v15801_v27, 0.0 }
 0x436   :  { %1727 = vadd.xlane.f32.xlu1 %v1726_v13 }
 0x438   :  { %1742 = vadd.xlane.f32.xlu0 %v1741_v47 }
 0x43a   :  { %1745 = vadd.xlane.f32.xlu1 %v1744_v48 }
 0x43c   :  { %1736 = vadd.xlane.f32.xlu0 %v1735_v0 }
 0x43e   :  { %1739 = vadd.xlane.f32.xlu1 %v1738_v17 }
 0x47d   :  { %v1563_v1 = vpop.xlane.xlu0 %1562 }
 0x47e   :  { %v1621_v22 = vsub.f32 %v15649_v7, %v1563_v1 }
 0x47f   :  { %v1566_v12 = vpop.xlane.xlu1 %1565 }
 0x480   :  { %v1671_v13 = vmul.f32 1.442695, %v1621_v22  ;;  %v1622_v47 = vsub.f32 %v15655_v35, %v1566_v12 }
 0x481   :  { %v1557_v2 = vpop.xlane.xlu0 %1556 }
 0x482   :  { %13810 = vpow2.f32 %v1671_v13  ;;  %v1673_v20 = vmul.f32 1.442695, %v1622_v47  ;;  %v1619_v48 = vsub.f32 %v15651_v34, %v1557_v2 }
 0x483   :  { %v1560_v5 = vpop.xlane.xlu1 %1559 }
 0x484   :  { %13812 = vpow2.f32 %v1673_v20  ;;  %v1667_v28 = vmul.f32 1.442695, %v1619_v48  ;;  %v1620_v0 = vsub.f32 %v15657_v15, %v1560_v5 }
 0x485   :  { %v1575_v42 = vpop.xlane.xlu0 %1574 }
 0x486   :  { %13814 = vpow2.f32 %v1667_v28  ;;  %v1669_v17 = vmul.f32 1.442695, %v1620_v0  ;;  %v1625_v60 = vsub.f32 %v15671_v3, %v1575_v42 }
 0x487   :  { %v1578_v7 = vpop.xlane.xlu1 %1577 }
 0x488   :  { %13816 = vpow2.f32 %v1669_v17  ;;  %v1679_v1 = vmul.f32 1.442695, %v1625_v60  ;;  %v1626_v35 = vsub.f32 %v15679_v4, %v1578_v7 }
 0x489   :  { %v1569_v22 = vpop.xlane.xlu0 %1568 }
 0x48a   :  { %13818 = vpow2.f32 %v1679_v1  ;;  %v1681_v12 = vmul.f32 1.442695, %v1626_v35  ;;  %v1623_v2 = vsub.f32 %v15673_v14, %v1569_v22 }
 0x48b   :  { %v1572_v34 = vpop.xlane.xlu1 %1571 }
 0x48c   :  { %v15814_v20 = vpop.eup %13810  ;;  %13820 = vpow2.f32 %v1681_v12  ;;  %v1675_v5 = vmul.f32 1.442695, %v1623_v2  ;;  %v1624_v28 = vsub.f32 %v15681_v44, %v1572_v34 }
 0x48d   :  { %v1753_v42 = vsel %vm1506_vm1, %v15814_v20, 0.0 }
 0x48e   :  { %v15819_v3 = vpop.eup %13812  ;;  %13822 = vpow2.f32 %v1675_v5  ;;  %v1677_v60 = vmul.f32 1.442695, %v1624_v28  ;;  %1754 = vadd.xlane.f32.xlu0 %v1753_v42 }
 0x48f   :  { %v1756_v15 = vsel %vm1506_vm1, %v15819_v3, 0.0 }
 0x490   :  { %v15823_v4 = vpop.eup %13814  ;;  %13824 = vpow2.f32 %v1677_v60  ;;  %1757 = vadd.xlane.f32.xlu1 %v1756_v15 }
 0x491   :  { %v1747_v14 = vsel %vm1506_vm1, %v15823_v4, 0.0 }
 0x492   :  { %v15827_v13 = vpop.eup %13816  ;;  %1748 = vadd.xlane.f32.xlu0 %v1747_v14 }
 0x493   :  { %v1750_v44 = vsel %vm1506_vm1, %v15827_v13, 0.0 }
 0x494   :  { %v15831_v47 = vpop.eup %13818  ;;  %1751 = vadd.xlane.f32.xlu1 %v1750_v44 }
 0x495   :  { %20183 = vst [vmem:[#allocation63_spill] sm:$0xff] %v15831_v47  ;;  %v1765_v48 = vsel %vm1506_vm1, %v15831_v47, 0.0 }
 0x496   :  { %v15835_v0 = vpop.eup %13820  ;;  %1766 = vadd.xlane.f32.xlu0 %v1765_v48 }
 0x497   :  { %v1768_v17 = vsel %vm1506_vm1, %v15835_v0, 0.0 }
 0x498   :  { %v15839_v7 = vpop.eup %13822  ;;  %1769 = vadd.xlane.f32.xlu1 %v1768_v17 }
 0x499   :  { %v1759_v1 = vsel %vm1506_vm1, %v15839_v7, 0.0 }
 0x49a   :  { %v15843_v35 = vpop.eup %13824  ;;  %1760 = vadd.xlane.f32.xlu0 %v1759_v1 }
 0x49b   :  { %20184 = vst [vmem:[#allocation64_spill] sm:$0xff] %v15843_v35  ;;  %v1762_v22 = vsel %vm1506_vm1, %v15843_v35, 0.0 }
 0x49c   :  { %1763 = vadd.xlane.f32.xlu1 %v1762_v22 }
 0x49d   :  { %v1587_v12 = vpop.xlane.xlu0 %1586 }
 0x49e   :  { %v1629_v2 = vsub.f32 %v15698_v19, %v1587_v12 }
 0x49f   :  { %v1590_v34 = vpop.xlane.xlu1 %1589 }
 0x4a0   :  { %v1687_v5 = vmul.f32 1.442695, %v1629_v2  ;;  %v1630_v28 = vsub.f32 %v15705_v59, %v1590_v34 }
 0x4a1   :  { %v1581_v42 = vpop.xlane.xlu0 %1580 }
 0x4a2   :  { %13826 = vpow2.f32 %v1687_v5  ;;  %v1689_v60 = vmul.f32 1.442695, %v1630_v28  ;;  %v1627_v15 = vsub.f32 %v15700_v63, %v1581_v42 }
 0x4a3   :  { %v1584_v14 = vpop.xlane.xlu1 %1583 }
 0x4a4   :  { %13828 = vpow2.f32 %v1689_v60  ;;  %v1683_v44 = vmul.f32 1.442695, %v1627_v15  ;;  %v1628_v48 = vsub.f32 %v15707_v39, %v1584_v14 }
 0x4a5   :  { %v15851_v17 = vpop.xlane.xlu0 %1598 }
 0x4a6   :  { %13830 = vpow2.f32 %v1683_v44  ;;  %v1685_v1 = vmul.f32 1.442695, %v1628_v48 }
 0x4a7   :  { %v15853_v22 = vpop.xlane.xlu1 %1601 }
 0x4a8   :  { %13832 = vpow2.f32 %v1685_v1 }
 0x4a9   :  { %v15855_v19 = vpop.xlane.xlu0 %1592 }
 0x4ab   :  { %v15857_v59 = vpop.xlane.xlu1 %1595 }
 0x4ac   :  { %v15859_v12 = vpop.eup %13826 }
 0x4ad   :  { %20185 = vst [vmem:[#allocation65_spill] sm:$0xff] %v15859_v12  ;;  %v1707_v2 = vpop.xlane.xlu0 %1706  ;;  %v1777_v63 = vsel %vm1506_vm1, %v15859_v12, 0.0 }
 0x4ae   :  { %v15863_v34 = vpop.eup %13828  ;;  %1778 = vadd.xlane.f32.xlu0 %v1777_v63 }
 0x4af   :  { %20186 = vst [vmem:[#allocation66_spill] sm:$0xff] %v15863_v34  ;;  %v1710_v39 = vpop.xlane.xlu1 %1709  ;;  %v1780_v5 = vsel %vm1506_vm1, %v15863_v34, 0.0 }
 0x4b0   :  { %v15867_v28 = vpop.eup %13830  ;;  %1781 = vadd.xlane.f32.xlu1 %v1780_v5  ;;  %13834 = vrcp.f32 %v1710_v39 }
 0x4b1   :  { %20187 = vst [vmem:[#allocation67_spill] sm:$0xff] %v15867_v28  ;;  %v1701_v42 = vpop.xlane.xlu0 %1700  ;;  %v1771_v60 = vsel %vm1506_vm1, %v15867_v28, 0.0 }
 0x4b2   :  { %v15871_v15 = vpop.eup %13832  ;;  %13836 = vrcp.f32 %v1701_v42  ;;  %1772 = vadd.xlane.f32.xlu0 %v1771_v60 }
 0x4b3   :  { %20188 = vst [vmem:[#allocation68_spill] sm:$0xff] %v15871_v15  ;;  %13838 = vrcp.f32 %v1707_v2  ;;  %v1704_v14 = vpop.xlane.xlu1 %1703  ;;  %v1774_v44 = vsel %vm1506_vm1, %v15871_v15, 0.0 }
 0x4b4   :  { %13840 = vrcp.f32 %v1704_v14  ;;  %1775 = vadd.xlane.f32.xlu1 %v1774_v44 }
 0x4b5   :  { %v1719_v48 = vpop.xlane.xlu0 %1718 }
 0x4b7   :  { %v1722_v1 = vpop.xlane.xlu1 %1721 }
 0x4b8   :  { %13842 = vrcp.f32 %v1722_v1 }
 0x4b9   :  { %v1713_v63 = vpop.xlane.xlu0 %1712 }
 0x4ba   :  { %13844 = vrcp.f32 %v1713_v63  ;;  %v13835_v39 = vpop.eup %13834 }
 0x4bb   :  { %13846 = vrcp.f32 %v1719_v48  ;;  %v1716_v5 = vpop.xlane.xlu1 %1715  ;;  %v1830_v2 = vmul.f32 %v13835_v39, %v15739_v8 }
 0x4bc   :  { %v13837_v12 = vpop.eup %13836  ;;  %13848 = vrcp.f32 %v1716_v5 }
 0x4bd   :  { %v13839_v28 = vpop.eup %13838  ;;  %v1731_v42 = vpop.xlane.xlu0 %1730  ;;  %v1827_v15 = vmul.f32 %v13837_v12, %v15744_v46 }
 0x4be   :  { %v13841_v60 = vpop.eup %13840  ;;  %v1829_v44 = vmul.f32 %v13839_v28, %v15734_v23 }
 0x4bf   :  { %v1734_v34 = vpop.xlane.xlu1 %1733  ;;  %v1828_v14 = vmul.f32 %v13841_v60, %v15749_v51 }
 0x4c0   :  { %13850 = vrcp.f32 %v1734_v34  ;;  %v1860_v47 = vpack.c.bf16 %v1830_v2, %v1829_v44 }
 0x4c1   :  { %v1725_v1 = vpop.xlane.xlu0 %1724  ;;  %v1859_v63 = vpack.c.bf16 %v1828_v14, %v1827_v15 }
 0x4c2   :  { %13852 = vrcp.f32 %v1725_v1  ;;  %v13843_v48 = vpop.eup %13842  ;;  %v1633_v1 = vsub.f32 %v15718_v38, %v15851_v17  ;;  %v1632_v38 = vsub.f32 %v15727_v24, %v15857_v59 }
 0x4c3   :  { %13854 = vrcp.f32 %v1731_v42  ;;  %v1728_v5 = vpop.xlane.xlu1 %1727  ;;  %12652 = vmatprep.mubr.msk.bf16.mxu0 %vm1506_vm1, %v1859_v63  ;;  %v1834_v51 = vmul.f32 %v13843_v48, %v15759_v55 }
 0x4c4   :  { %v13845_v35 = vpop.eup %13844  ;;  %13856 = vrcp.f32 %v1728_v5  ;;  %12653 = vmatmul.mubr.msk.bf16.vlgmr.msra.gmra.mrb[72].mxu0 %vm1506_vm1, %v1860_v47 }
 0x4c5   :  { %v13847_v8 = vpop.eup %13846  ;;  %12677 = vmatpush3.bf16.msra.mxu0 %v15465_v57  ;;  %2205 = vrot.lane.b32.xlu1 %v15371_v26, %s14913_s2  ;;  %v1743_v23 = vpop.xlane.xlu0 %1742  ;;  %v1831_v34 = vmul.f32 %v13845_v35, %v15764_v62 }
 0x4c6   :  { %v13849_v46 = vpop.eup %13848  ;;  %12678 = vmatprep.subr.bf16.mxu0 %v15463_v56  ;;  %v1833_v47 = vmul.f32 %v13847_v8, %v15754_v18 }
 0x4c7   :  { %v1746_v12 = vpop.xlane.xlu1 %1745  ;;  %v1832_v28 = vmul.f32 %v13849_v46, %v15769_v32 }
 0x4c8   :  { %2441 = vrot.lane.b32.xlu0 %v15469_v9, %s14913_s2  ;;  %13858 = vrcp.f32 %v1746_v12  ;;  %v1862_v42 = vpack.c.bf16 %v1834_v51, %v1833_v47  ;;  %v1693_v12 = vmul.f32 1.442695, %v1632_v38  ;;  %v20203_v38 = vld [vmem:[#allocation53_spill] sm:$0xff] }
 0x4c9   :  { %12679 = vmatpush3.bf16.msra.mxu0 %v15463_v56  ;;  %v1737_v15 = vpop.xlane.xlu0 %1736  ;;  %v1861_v39 = vpack.c.bf16 %v1832_v28, %v1831_v34 }
 0x4ca   :  { %12680 = vmatprep.subr.bf16.mxu0 %v15505_v41  ;;  %13860 = vrcp.f32 %v1737_v15  ;;  %v13851_v55 = vpop.eup %13850  ;;  %v20189_v15 = vld [vmem:[#allocation23_spill] sm:$0xff] }
 0x4cb   :  { %13862 = vrcp.f32 %v1743_v23  ;;  %v1740_v60 = vpop.xlane.xlu1 %1739  ;;  %12656 = vmatprep.mubr.msk.bf16.mxu0 %vm1506_vm1, %v1861_v39  ;;  %v1838_v35 = vmul.f32 %v13851_v55, %v15777_v58  ;;  %v1631_v58 = vsub.f32 %v15720_v53, %v15855_v19  ;;  %v1634_v53 = vsub.f32 %v15725_v36, %v15853_v22  ;;  %v20190_v39 = vld [vmem:[#allocation21_spill] sm:$0xff]  ;;  %v20192_v55 = vld [vmem:[#allocation43_spill] sm:$0xff] }
 0x4cc   :  { %v13853_v62 = vpop.eup %13852  ;;  %13864 = vrcp.f32 %v1740_v60  ;;  %12657 = vmatmul.mubr.msk.bf16.gmra.mrb[76].mxu0 %vm1506_vm1, %v1862_v42  ;;  %v20191_v42 = vld [vmem:[#allocation49_spill] sm:$0xff]  ;;  %v20193_v60 = vld [vmem:[#allocation39_spill] sm:$0xff] }
 0x4cd   :  { %v13855_v32 = vpop.eup %13854  ;;  %12681 = vmatpush3.bf16.msra.mxu0 %v15505_v41  ;;  %v1835_v2 = vmul.f32 %v13853_v62, %v15781_v29  ;;  %v1691_v19 = vmul.f32 1.442695, %v1631_v58  ;;  %v1697_v34 = vmul.f32 1.442695, %v1634_v53  ;;  %v20194_v62 = vld [vmem:[#allocation38_spill] sm:$0xff]  ;;  %v20201_v58 = vld [vmem:[#allocation41_spill] sm:$0xff] }
 0x4ce   :  { %v13857_v18 = vpop.eup %13856  ;;  %12682 = vmatprep.subr.bf16.mxu0 %v15501_v43  ;;  %v1837_v44 = vmul.f32 %v13855_v32, %v15773_v31  ;;  %v20195_v32 = vld [vmem:[#allocation31_spill] sm:$0xff] }
 0x4cf   :  { %v1836_v14 = vmul.f32 %v13857_v18, %v15785_v61  ;;  %v1695_v61 = vmul.f32 1.442695, %v1633_v1  ;;  %v20196_v18 = vld [vmem:[#allocation52_spill] sm:$0xff]  ;;  %v20199_v1 = vld [vmem:[#allocation47_spill] sm:$0xff] }
 0x4d0   :  { %v1864_v48 = vpack.c.bf16 %v1838_v35, %v1837_v44  ;;  %v20197_v35 = vld [vmem:[#allocation55_spill] sm:$0xff] }
 0x4d1   :  { %12683 = vmatpush3.bf16.msra.mxu0 %v15501_v43  ;;  %v1863_v63 = vpack.c.bf16 %v1836_v14, %v1835_v2  ;;  %13866 = vpow2.f32 %v1695_v61  ;;  %v20198_v44 = vld [vmem:[#allocation35_spill] sm:$0xff]  ;;  %v20202_v61 = vld [vmem:[#allocation40_spill] sm:$0xff] }
 0x4d2   :  { %13280 = vmatprep.subr.msk.bf16.mxu0 %vm1149_vm0, %v15677_v40  ;;  %v13859_v5 = vpop.eup %13858  ;;  %13868 = vpow2.f32 %v1691_v19  ;;  %v20204_v19 = vld [vmem:[#allocation51_spill] sm:$0xff] }
 0x4d3   :  { %12668 = vmatprep.mubr.msk.bf16.mxu1 %vm1506_vm1, %v1863_v63  ;;  %v1842_v8 = vmul.f32 %v13859_v5, %v15793_v49  ;;  %13870 = vpow2.f32 %v1693_v12  ;;  %v20200_v5 = vld [vmem:[#allocation45_spill] sm:$0xff] }
 0x4d4   :  { %v13861_v29 = vpop.eup %13860  ;;  %12669 = vmatmul.mubr.msk.bf16.vlgmr.msra.gmra.mrb[56].mxu1 %vm1506_vm1, %v1864_v48  ;;  %13872 = vpow2.f32 %v1697_v34 }
 0x4d5   :  { %v13863_v31 = vpop.eup %13862  ;;  %12693 = vmatpush3.bf16.msra.mxu1 %v15534_v30  ;;  %v1839_v23 = vmul.f32 %v13861_v29, %v15797_v10 }
 0x4d6   :  { %v13865_v17 = vpop.eup %13864  ;;  %12694 = vmatprep.subr.bf16.mxu1 %v15530_v21  ;;  %v1841_v51 = vmul.f32 %v13863_v31, %v15789_v54 }
 0x4d7   :  { %v1840_v46 = vmul.f32 %v13865_v17, %v15801_v27 }
 0x4d8   :  { %v1866_v59 = vpack.c.bf16 %v1842_v8, %v1841_v51 }
 0x4d9   :  { %12695 = vmatpush3.bf16.msra.mxu1 %v15530_v21  ;;  %v1865_v24 = vpack.c.bf16 %v1840_v46, %v1839_v23  ;;  %v20205_v46 = vld [vmem:[#allocation26_spill] sm:$0xff] }
 0x4da   :  { %12696 = vmatprep.subr.bf16.mxu1 %v15562_v50 }
 0x4db   :  { %12672 = vmatprep.mubr.msk.bf16.mxu1 %vm1506_vm1, %v1865_v24  ;;  %v15929_v36 = vpop.eup %13866 }
 0x4dc   :  { %12673 = vmatmul.mubr.msk.bf16.gmra.mrb[60].mxu1 %vm1506_vm1, %v1866_v59  ;;  %v15931_v54 = vpop.eup %13868  ;;  %v1789_v49 = vsel %vm1506_vm1, %v15929_v36, 0.0  ;;  %v20206_v59 = vld [vmem:[#allocation20_spill] sm:$0xff] }
 0x4dd   :  { %12697 = vmatpush3.bf16.msra.mxu1 %v15562_v50  ;;  %v15935_v10 = vpop.eup %13870  ;;  %v1783_v27 = vsel %vm1506_vm1, %v15931_v54, 0.0 }
 0x4de   :  { %12698 = vmatprep.subr.bf16.mxu1 %v15558_v11  ;;  %v15939_v22 = vpop.eup %13872  ;;  %v1786_v28 = vsel %vm1506_vm1, %v15935_v10, 0.0 }
 0x4df   :  { %v1792_v47 = vsel %vm1506_vm1, %v15939_v22, 0.0 }
 0x4e1   :  { %12699 = vmatpush3.bf16.msra.mxu1 %v15558_v11 }
 0x4e2   :  { %13284 = vmatprep.subr.msk.bf16.mxu1 %vm1149_vm0, %v15669_v16 }
 0x4e7   :  { %1790 = vadd.xlane.f32.xlu0 %v1789_v49 }
 0x4e9   :  { %1784 = vadd.xlane.f32.xlu1 %v1783_v27 }
 0x4eb   :  { %1787 = vadd.xlane.f32.xlu0 %v1786_v28  ;;  %v20207_v28 = vld [vmem:[#allocation30_spill] sm:$0xff] }
 0x4ed   :  { %1793 = vadd.xlane.f32.xlu1 %v1792_v47 }
 0x4fe   :  { %2443 = vrot.lane.b32.xlu1 %v15483_v25, %s14913_s2 }
 0x501   :  { %2334 = vrot.lane.b32.xlu0 %v15457_v37, %s14913_s2 }
 0x502   :  { %2445 = vrot.lane.b32.xlu1 %v15493_v6, %s14913_s2 }
 0x505   :  { %2316 = vrot.lane.b32.xlu0 %v15409_v45, %s14913_s2 }
 0x506   :  { %2318 = vrot.lane.b32.xlu1 %v15423_v33, %s14913_s2 }
 0x509   :  { %2554 = vrot.lane.b32.xlu0 %v15514_v52, %s14913_s2 }
 0x50a   :  { %2209 = vrot.lane.b32.xlu1 %v20189_v15, %s14913_s2 }
 0x50d   :  { %2207 = vrot.lane.b32.xlu0 %v20190_v39, %s14913_s2 }
 0x50e   :  { %2556 = vrot.lane.b32.xlu1 %v20191_v42, %s14913_s2 }
 0x511   :  { %2447 = vrot.lane.b32.xlu0 %v20192_v55, %s14913_s2 }
 0x512   :  { %2431 = vrot.lane.b32.xlu1 %v20193_v60, %s14913_s2 }
 0x515   :  { %2429 = vrot.lane.b32.xlu0 %v20194_v62, %s14913_s2 }
 0x516   :  { %2320 = vrot.lane.b32.xlu1 %v20195_v32, %s14913_s2 }
 0x519   :  { %2558 = vrot.lane.b32.xlu0 %v20196_v18, %s14913_s2 }
 0x51a   :  { %2560 = vrot.lane.b32.xlu1 %v20197_v35, %s14913_s2 }
 0x51b   :  { %v1755_v2 = vpop.xlane.xlu0 %1754 }
 0x51d   :  { %v1758_v14 = vpop.xlane.xlu1 %1757  ;;  %2322 = vrot.lane.b32.xlu0 %v20198_v44, %s14913_s2 }
 0x51e   :  { %2544 = vrot.lane.b32.xlu1 %v20199_v1, %s14913_s2  ;;  %13874 = vrcp.f32 %v1758_v14 }
 0x51f   :  { %v1749_v63 = vpop.xlane.xlu0 %1748 }
 0x520   :  { %13876 = vrcp.f32 %v1749_v63  ;;  %v20208_v63 = vld [vmem:[#allocation18_spill] sm:$0xff] }
 0x521   :  { %13878 = vrcp.f32 %v1755_v2  ;;  %v1752_v48 = vpop.xlane.xlu1 %1751  ;;  %2542 = vrot.lane.b32.xlu0 %v20200_v5, %s14913_s2 }
 0x522   :  { %13880 = vrcp.f32 %v1752_v48  ;;  %2435 = vrot.lane.b32.xlu1 %v20201_v58, %s14913_s2  ;;  %v20209_v48 = vld [vmem:[#allocation57_spill] sm:$0xff] }
 0x523   :  { %v1767_v29 = vpop.xlane.xlu0 %1766 }
 0x525   :  { %v1770_v31 = vpop.xlane.xlu1 %1769  ;;  %2433 = vrot.lane.b32.xlu0 %v20202_v61, %s14913_s2 }
 0x526   :  { %2548 = vrot.lane.b32.xlu1 %v20203_v38, %s14913_s2  ;;  %13882 = vrcp.f32 %v1770_v31  ;;  %v20210_v31 = vld [vmem:[#allocation24_spill] sm:$0xff] }
 0x527   :  { %v1761_v17 = vpop.xlane.xlu0 %1760 }
 0x528   :  { %13884 = vrcp.f32 %v1761_v17  ;;  %v13875_v8 = vpop.eup %13874 }
 0x529   :  { %13886 = vrcp.f32 %v1767_v29  ;;  %v1764_v53 = vpop.xlane.xlu1 %1763  ;;  %2546 = vrot.lane.b32.xlu0 %v20204_v19, %s14913_s2  ;;  %v1846_v24 = vmul.f32 %v13875_v8, %v15819_v3  ;;  %v20211_v8 = vld [vmem:[#allocation64_spill] sm:$0xff] }
 0x52a   :  { %v13877_v23 = vpop.eup %13876  ;;  %13888 = vrcp.f32 %v1764_v53  ;;  %3027 = vrot.lane.b32.xlu1 %v20205_v46, %s14913_s2 }
 0x52b   :  { %v13879_v51 = vpop.eup %13878  ;;  %v1843_v34 = vmul.f32 %v13877_v23, %v15823_v4  ;;  %v20212_v23 = vld [vmem:[#allocation34_spill] sm:$0xff] }
 0x52c   :  { %v13881_v12 = vpop.eup %13880  ;;  %v1845_v27 = vmul.f32 %v13879_v51, %v15814_v20  ;;  %v2236_v20 = vsel %vm1149_vm0, %v15677_v40, 0  ;;  %v20213_v51 = vld [vmem:[#allocation63_spill] sm:$0xff] }
 0x52d   :  { %3023 = vrot.lane.b32.xlu0 %v20206_v59, %s14913_s2  ;;  %v1844_v49 = vmul.f32 %v13881_v12, %v15827_v13 }
 0x52e   :  { %3116 = vrot.lane.b32.xlu1 %v20207_v28, %s14913_s2  ;;  %v1868_v2 = vpack.c.bf16 %v1846_v24, %v1845_v27  ;;  %v20216_v27 = vld [vmem:[#allocation61_spill] sm:$0xff] }
 0x52f   :  { %v1867_v47 = vpack.c.bf16 %v1844_v49, %v1843_v34  ;;  %v20214_v34 = vld [vmem:[#allocation28_spill] sm:$0xff] }
 0x530   :  { %v13883_v14 = vpop.eup %13882 }
 0x531   :  { %3025 = vrot.lane.b32.xlu0 %v20208_v63, %s14913_s2  ;;  %12684 = vmatprep.mubr.msk.bf16.mxu0 %vm1506_vm1, %v1867_v47  ;;  %v1850_v29 = vmul.f32 %v13883_v14, %v15835_v0  ;;  %v2239_v0 = vsel %vm1149_vm0, %v20209_v48, 0 }
 0x532   :  { %v13885_v3 = vpop.eup %13884  ;;  %3209 = vrot.lane.b32.xlu1 %v15465_v57, %s14913_s2  ;;  %12685 = vmatmul.mubr.msk.bf16.vlgmr.msra.gmra.mrb[80].mxu0 %vm1506_vm1, %v1868_v2 }
 0x533   :  { %v13887_v4 = vpop.eup %13886  ;;  %12709 = vmatpush3.bf16.xpose.msra.mxu0 %v2236_v20  ;;  %v1847_v17 = vmul.f32 %v13885_v3, %v15839_v7  ;;  %v20215_v7 = vld [vmem:[#allocation58_spill] sm:$0xff]  ;;  %v20217_v3 = vld [vmem:[#allocation33_spill] sm:$0xff] }
 0x534   :  { %v13889_v13 = vpop.eup %13888  ;;  %13281 = vmatprep.subr.msk.bf16.mxu0 %vm1149_vm0, %v20209_v48  ;;  %v1849_v40 = vmul.f32 %v13887_v4, %v20213_v51  ;;  %v20218_v20 = vld [vmem:[#allocation17_spill] sm:$0xff]  ;;  %v2242_v4 = vsel %vm1149_vm0, %v20216_v27, 0  ;;  %v20220_v48 = vld [vmem:[#allocation27_spill] sm:$0xff] }
 0x535   :  { %3029 = vrot.lane.b32.xlu0 %v20210_v31, %s14913_s2  ;;  %v1848_v53 = vmul.f32 %v13889_v13, %v20211_v8  ;;  %v20219_v13 = vld [vmem:[#allocation59_spill] sm:$0xff]  ;;  %v20221_v8 = vld [vmem:[#allocation25_spill] sm:$0xff] }
 0x536   :  { %3120 = vrot.lane.b32.xlu1 %v20212_v23, %s14913_s2  ;;  %v1870_v24 = vpack.c.bf16 %v1850_v29, %v1849_v40 }
 0x537   :  { %v1869_v12 = vpack.c.bf16 %v1848_v53, %v1847_v17  ;;  %v2245_v53 = vsel %vm1149_vm0, %v20219_v13, 0 }
 0x539   :  { %3118 = vrot.lane.b32.xlu0 %v20214_v34, %s14913_s2  ;;  %12688 = vmatprep.mubr.msk.bf16.mxu0 %vm1506_vm1, %v1869_v12 }
 0x53a   :  { %3213 = vrot.lane.b32.xlu1 %v15505_v41, %s14913_s2  ;;  %12689 = vmatmul.mubr.msk.bf16.gmra.mrb[84].mxu0 %vm1506_vm1, %v1870_v24  ;;  %v20222_v24 = vld [vmem:[#allocation66_spill] sm:$0xff] }
 0x53b   :  { %12711 = vmatpush3.bf16.xpose.msra.mxu0 %v2239_v0  ;;  %12716 = vmatprep.mubr.msk.bf16.mxu0 %vm1149_vm0, %v20215_v7  ;;  %v1779_v49 = vpop.xlane.xlu0 %1778  ;;  %v20223_v7 = vld [vmem:[#allocation67_spill] sm:$0xff] }
 0x53c   :  { %13282 = vmatprep.subr.msk.bf16.mxu0 %vm1149_vm0, %v20216_v27  ;;  %v20224_v27 = vld [vmem:[#allocation68_spill] sm:$0xff] }
 0x53d   :  { %v1782_v47 = vpop.xlane.xlu1 %1781  ;;  %3211 = vrot.lane.b32.xlu0 %v15463_v56, %s14913_s2 }
 0x53e   :  { %3302 = vrot.lane.b32.xlu1 %v15534_v30, %s14913_s2  ;;  %13890 = vrcp.f32 %v1782_v47 }
 0x53f   :  { %v1773_v2 = vpop.xlane.xlu0 %1772 }
 0x540   :  { %13892 = vrcp.f32 %v1773_v2  ;;  %v20225_v2 = vld [vmem:[#allocation29_spill] sm:$0xff] }
 0x541   :  { %13894 = vrcp.f32 %v1779_v49  ;;  %v1776_v14 = vpop.xlane.xlu1 %1775  ;;  %3122 = vrot.lane.b32.xlu0 %v20217_v3, %s14913_s2 }
 0x542   :  { %13896 = vrcp.f32 %v1776_v14  ;;  %3415 = vrot.lane.b32.xlu1 %v20218_v20, %s14909_s0  ;;  %v20226_v14 = vld [vmem:[#allocation65_spill] sm:$0xff] }
 0x543   :  { %12713 = vmatpush3.bf16.xpose.msra.mxu0 %v2242_v4  ;;  %v2442_v40 = vpop.permute.xlu0 %2441 }
 0x544   :  { %13283 = vmatprep.subr.msk.bf16.mxu0 %vm1149_vm0, %v20219_v13 }
 0x545   :  { %3215 = vrot.lane.b32.xlu0 %v15501_v43, %s14913_s2 }
 0x546   :  { %3520 = vrot.lane.b32.xlu1 %v20220_v48, %s14909_s0 }
 0x548   :  { %v13891_v29 = vpop.eup %13890 }
 0x549   :  { %3304 = vrot.lane.b32.xlu0 %v15530_v21, %s14913_s2  ;;  %v1854_v0 = vmul.f32 %v13891_v29, %v20222_v24  ;;  %v20227_v29 = vld [vmem:[#allocation32_spill] sm:$0xff]  ;;  %v20229_v24 = vld [vmem:[#allocation19_spill] sm:$0xff] }
 0x54a   :  { %v13893_v17 = vpop.eup %13892  ;;  %3421 = vrot.lane.b32.xlu1 %v20221_v8, %s14909_s0 }
 0x54b   :  { %v13895_v51 = vpop.eup %13894  ;;  %12715 = vmatpush3.bf16.xpose.msra.mxu0 %v2245_v53  ;;  %v1851_v49 = vmul.f32 %v13893_v17, %v20223_v7  ;;  %v2206_v53 = vpop.permute.xlu1 %2205  ;;  %v2462_v17 = vsel %vm1149_vm0, %v2442_v40, 0 }
 0x54c   :  { %v13897_v12 = vpop.eup %13896  ;;  %13288 = vmatprep.subr.msk.bf16.mxu0 %vm1149_vm0, %v2442_v40  ;;  %v1853_v4 = vmul.f32 %v13895_v51, %v20226_v14  ;;  %v2349_v51 = vsel %vm1149_vm0, %v15669_v16, 0  ;;  %v20231_v40 = vld [vmem:[#allocation62_spill] sm:$0xff]  ;;  %v20232_v16 = vld [vmem:[#allocation16_spill] sm:$0xff] }
 0x54d   :  { %3306 = vrot.lane.b32.xlu0 %v15562_v50, %s14913_s2  ;;  %v1852_v47 = vmul.f32 %v13897_v12, %v20224_v27  ;;  %v20228_v12 = vld [vmem:[#allocation60_spill] sm:$0xff] }
 0x54e   :  { %3522 = vrot.lane.b32.xlu1 %v20225_v2, %s14909_s0  ;;  %v1872_v8 = vpack.c.bf16 %v1854_v0, %v1853_v4  ;;  %v20230_v0 = vld [vmem:[#allocation22_spill] sm:$0xff]  ;;  %v2352_v7 = vsel %vm1149_vm0, %v20228_v12, 0 }
 0x54f   :  { %v1871_v13 = vpack.c.bf16 %v1852_v47, %v1851_v49 }
 0x551   :  { %3308 = vrot.lane.b32.xlu0 %v15558_v11, %s14913_s2  ;;  %12700 = vmatprep.mubr.msk.bf16.mxu1 %vm1506_vm1, %v1871_v13 }
 0x552   :  { %12717 = vmatmul.mubr.msk.bf16.vlgmr.msra.gmra.mrb[88].mxu0 %vm1149_vm0, %v2206_v53  ;;  %3524 = vrot.lane.b32.xlu1 %v20227_v29, %s14909_s0 }
 0x553   :  { %12701 = vmatmul.mubr.msk.bf16.vlgmr.msra.gmra.mrb[64].mxu1 %vm1506_vm1, %v1872_v8  ;;  %12741 = vmatpush3.bf16.xpose.msra.mxu0 %v2462_v17  ;;  %v2355_v8 = vsel %vm1149_vm0, %v20231_v40, 0 }
 0x554   :  { %12725 = vmatpush3.bf16.xpose.msra.mxu1 %v2349_v51 }
 0x555   :  { %13285 = vmatprep.subr.msk.bf16.mxu1 %vm1149_vm0, %v20228_v12  ;;  %3417 = vrot.lane.b32.xlu0 %v20229_v24, %s14909_s0 }
 0x559   :  { %3419 = vrot.lane.b32.xlu0 %v20230_v0, %s14909_s0 }
 0x55c   :  { %12727 = vmatpush3.bf16.xpose.msra.mxu1 %v2352_v7 }
 0x55d   :  { %13286 = vmatprep.subr.msk.bf16.mxu1 %vm1149_vm0, %v20231_v40  ;;  %3407 = vrot.lane.b32.xlu0 %v20232_v16, %s14909_s0 }
 0x564   :  { %12729 = vmatpush3.bf16.xpose.msra.mxu1 %v2355_v8 }
 0x574   :  { %v1791_v49 = vpop.xlane.xlu0 %1790 }
 0x576   :  { %v1785_v27 = vpop.xlane.xlu1 %1784 }
 0x577   :  { %13898 = vrcp.f32 %v1785_v27 }
 0x578   :  { %13900 = vrcp.f32 %v1791_v49  ;;  %v1788_v47 = vpop.xlane.xlu0 %1787 }
 0x579   :  { %13902 = vrcp.f32 %v1788_v47 }
 0x57a   :  { %v1794_v14 = vpop.xlane.xlu1 %1793 }
 0x57b   :  { %13904 = vrcp.f32 %v1794_v14 }
 0x57c   :  { %v2335_v4 = vpop.permute.xlu0 %2334 }
 0x57d   :  { %13287 = vmatprep.subr.msk.bf16.mxu1 %vm1149_vm0, %v2335_v4  ;;  %v2358_v13 = vsel %vm1149_vm0, %v2335_v4, 0 }
 0x57e   :  { %v2444_v53 = vpop.permute.xlu1 %2443  ;;  %12731 = vmatpush3.bf16.xpose.msra.mxu1 %v2358_v13 }
 0x57f   :  { %13289 = vmatprep.subr.msk.bf16.mxu0 %vm1149_vm0, %v2444_v53  ;;  %v2465_v17 = vsel %vm1149_vm0, %v2444_v53, 0 }
 0x580   :  { %12743 = vmatpush3.bf16.xpose.msra.mxu0 %v2465_v17  ;;  %v2317_v51 = vpop.permute.xlu0 %2316 }
 0x581   :  { %v13899_v12 = vpop.eup %13898 }
 0x582   :  { %v13901_v7 = vpop.eup %13900  ;;  %v2446_v40 = vpop.permute.xlu1 %2445  ;;  %v1855_v27 = vmul.f32 %v13899_v12, %v15931_v54 }
 0x583   :  { %v13903_v8 = vpop.eup %13902  ;;  %13290 = vmatprep.subr.msk.bf16.mxu0 %vm1149_vm0, %v2446_v40  ;;  %v1857_v53 = vmul.f32 %v13901_v7, %v15929_v36  ;;  %v2468_v29 = vsel %vm1149_vm0, %v2446_v40, 0 }
 0x584   :  { %v2555_v49 = vpop.permute.xlu0 %2554  ;;  %v1856_v47 = vmul.f32 %v13903_v8, %v15935_v10 }
 0x585   :  { %v13905_v14 = vpop.eup %13904  ;;  %13292 = vmatprep.subr.msk.bf16.mxu1 %vm1149_vm0, %v2555_v49 }
 0x586   :  { %v2319_v4 = vpop.permute.xlu1 %2318  ;;  %v1873_v13 = vpack.c.bf16 %v1856_v47, %v1855_v27  ;;  %v1858_v17 = vmul.f32 %v13905_v14, %v15939_v22 }
 0x588   :  { %12704 = vmatprep.mubr.msk.bf16.mxu1 %vm1506_vm1, %v1873_v13  ;;  %12745 = vmatpush3.bf16.xpose.msra.mxu0 %v2468_v29  ;;  %v2208_v16 = vpop.permute.xlu0 %2207  ;;  %v1874_v48 = vpack.c.bf16 %v1858_v17, %v1857_v53 }
 0x589   :  { %12720 = vmatprep.mubr.msk.bf16.mxu0 %vm1149_vm0, %v2208_v16  ;;  %v2575_v16 = vsel %vm1149_vm0, %v2555_v49, 0 }
 0x58a   :  { %v2210_v54 = vpop.permute.xlu1 %2209  ;;  %12705 = vmatmul.mubr.msk.bf16.gmra.mrb[68].mxu1 %vm1506_vm1, %v1874_v48 }
 0x58b   :  { %12721 = vmatmul.mubr.msk.bf16.gmra.mrb[92].mxu0 %vm1149_vm0, %v2210_v54  ;;  %12732 = vmatprep.mubr.msk.bf16.mxu1 %vm1149_vm0, %v2317_v51 }
 0x58c   :  { %v2448_v10 = vpop.permute.xlu0 %2447 }
 0x58d   :  { %13291 = vmatprep.subr.msk.bf16.mxu0 %vm1149_vm0, %v2448_v10  ;;  %v2471_v22 = vsel %vm1149_vm0, %v2448_v10, 0 }
 0x58e   :  { %v2557_v36 = vpop.permute.xlu1 %2556 }
 0x590   :  { %12747 = vmatpush3.bf16.xpose.msra.mxu0 %v2471_v22  ;;  %v2430_v12 = vpop.permute.xlu0 %2429 }
 0x591   :  { %12748 = vmatprep.mubr.msk.bf16.mxu0 %vm1149_vm0, %v2430_v12 }
 0x592   :  { %v2432_v29 = vpop.permute.xlu1 %2431  ;;  %12733 = vmatmul.mubr.msk.bf16.vlgmr.msra.gmra.mrb[72].mxu1 %vm1149_vm0, %v2319_v4  ;;  %v2578_v4 = vsel %vm1149_vm0, %v2557_v36, 0 }
 0x593   :  { %12757 = vmatpush3.bf16.xpose.msra.mxu1 %v2575_v16 }
 0x594   :  { %13293 = vmatprep.subr.msk.bf16.mxu1 %vm1149_vm0, %v2557_v36  ;;  %v2559_v48 = vpop.permute.xlu0 %2558 }
 0x596   :  { %v2321_v51 = vpop.permute.xlu1 %2320 }
 0x597   :  { %v16106_v7 = vpop.f32.mrb[72].mxu0  ;;  %12736 = vmatprep.mubr.msk.bf16.mxu1 %vm1149_vm0, %v2321_v51  ;;  %12749 = vmatmul.mubr.msk.bf16.vlgmr.msra.gmra.mrb[96].mxu0 %vm1149_vm0, %v2432_v29  ;;  %v2581_v51 = vsel %vm1149_vm0, %v2559_v48, 0 }
 0x598   :  { %20233 = vst [vmem:[#allocation23_spill] sm:$0xff] %v16106_v7  ;;  %v16110_v40 = vpop.f32.mrb[73].mxu0  ;;  %v2323_v8 = vpop.permute.xlu0 %2322 }
 0x599   :  { %20234 = vst [vmem:[#allocation21_spill] sm:$0xff] %v16110_v40  ;;  %v16112_v27 = vpop.f32.mrb[74].mxu0 }
 0x59a   :  { %20235 = vst [vmem:[#allocation43_spill] sm:$0xff] %v16112_v27  ;;  %v2561_v49 = vpop.permute.xlu1 %2560  ;;  %v16116_v14 = vpop.f32.mrb[75].mxu0  ;;  %12737 = vmatmul.mubr.msk.bf16.gmra.mrb[76].mxu1 %vm1149_vm0, %v2323_v8 }
 0x59b   :  { %20236 = vst [vmem:[#allocation57_spill] sm:$0xff] %v16116_v14  ;;  %12759 = vmatpush3.bf16.xpose.msra.mxu1 %v2578_v4 }
 0x59c   :  { %13294 = vmatprep.subr.msk.bf16.mxu1 %vm1149_vm0, %v2559_v48  ;;  %v2543_v53 = vpop.permute.xlu0 %2542 }
 0x59d   :  { %12764 = vmatprep.mubr.msk.bf16.mxu1 %vm1149_vm0, %v2543_v53 }
 0x59e   :  { %v2545_v17 = vpop.permute.xlu1 %2544 }
 0x59f   :  { %v16124_v54 = vpop.f32.mrb[76].mxu0 }
 0x5a0   :  { %20237 = vst [vmem:[#allocation64_spill] sm:$0xff] %v16124_v54  ;;  %v16126_v10 = vpop.f32.mrb[77].mxu0  ;;  %v2434_v22 = vpop.permute.xlu0 %2433 }
 0x5a1   :  { %20238 = vst [vmem:[#allocation63_spill] sm:$0xff] %v16126_v10  ;;  %v16128_v12 = vpop.f32.mrb[78].mxu0  ;;  %12752 = vmatprep.mubr.msk.bf16.mxu0 %vm1149_vm0, %v2434_v22 }
 0x5a2   :  { %20239 = vst [vmem:[#allocation58_spill] sm:$0xff] %v16128_v12  ;;  %v2436_v29 = vpop.permute.xlu1 %2435  ;;  %v16133_v16 = vpop.f32.mrb[79].mxu0 }
 0x5a3   :  { %20240 = vst [vmem:[#allocation61_spill] sm:$0xff] %v16133_v16  ;;  %12761 = vmatpush3.bf16.xpose.msra.mxu1 %v2581_v51  ;;  %12753 = vmatmul.mubr.msk.bf16.gmra.mrb[100].mxu0 %vm1149_vm0, %v2436_v29  ;;  %v2584_v29 = vsel %vm1149_vm0, %v2561_v49, 0 }
 0x5a4   :  { %13295 = vmatprep.subr.msk.bf16.mxu1 %vm1149_vm0, %v2561_v49  ;;  %v2547_v4 = vpop.permute.xlu0 %2546 }
 0x5a6   :  { %v2549_v53 = vpop.permute.xlu1 %2548 }
 0x5a7   :  { %v16140_v47 = vpop.f32.mrb[56].mxu1 }
 0x5a8   :  { %20241 = vst [vmem:[#allocation59_spill] sm:$0xff] %v16140_v47  ;;  %v16142_v22 = vpop.f32.mrb[57].mxu1  ;;  %v3024_v36 = vpop.permute.xlu0 %3023 }
 0x5a9   :  { %20242 = vst [vmem:[#allocation66_spill] sm:$0xff] %v16142_v22  ;;  %v16144_v13 = vpop.f32.mrb[58].mxu1  ;;  %12772 = vmatprep.subr.bf16.mxu0 %v3024_v36 }
 0x5aa   :  { %20243 = vst [vmem:[#allocation67_spill] sm:$0xff] %v16144_v13  ;;  %v3028_v54 = vpop.permute.xlu1 %3027  ;;  %v16148_v8 = vpop.f32.mrb[59].mxu1  ;;  %12773 = vmatpush3.bf16.msra.mxu0 %v3024_v36 }
 0x5ab   :  { %20244 = vst [vmem:[#allocation68_spill] sm:$0xff] %v16148_v8  ;;  %12763 = vmatpush3.bf16.xpose.msra.mxu1 %v2584_v29 }
 0x5ac   :  { %v3026_v12 = vpop.permute.xlu0 %3025 }
 0x5ad   :  { %12774 = vmatprep.subr.bf16.mxu0 %v3026_v12 }
 0x5ae   :  { %v3117_v10 = vpop.permute.xlu1 %3116  ;;  %12775 = vmatpush3.bf16.msra.mxu0 %v3026_v12 }
 0x5af   :  { %v16153_v16 = vpop.f32.mrb[60].mxu1  ;;  %12776 = vmatprep.subr.bf16.mxu0 %v3028_v54  ;;  %12788 = vmatprep.subr.bf16.mxu1 %v3117_v10 }
 0x5b0   :  { %20245 = vst [vmem:[#allocation65_spill] sm:$0xff] %v16153_v16  ;;  %v16155_v7 = vpop.f32.mrb[61].mxu1  ;;  %v3030_v48 = vpop.permute.xlu0 %3029 }
 0x5b1   :  { %20246 = vst [vmem:[#allocation60_spill] sm:$0xff] %v16155_v7  ;;  %v16157_v47 = vpop.f32.mrb[62].mxu1 }
 0x5b2   :  { %20247 = vst [vmem:[#allocation62_spill] sm:$0xff] %v16157_v47  ;;  %12765 = vmatmul.mubr.msk.bf16.vlgmr.msra.gmra.mrb[80].mxu1 %vm1149_vm0, %v2545_v17  ;;  %v16162_v36 = vpop.permute.xlu1 %3209  ;;  %v16164_v29 = vpop.f32.mrb[63].mxu1  ;;  %12777 = vmatpush3.bf16.msra.mxu0 %v3028_v54 }
 0x5b3   :  { %20248 = vst [vmem:[#allocation69_spill] sm:$0xff] %v16164_v29  ;;  %12768 = vmatprep.mubr.msk.bf16.mxu1 %vm1149_vm0, %v2547_v4  ;;  %12789 = vmatpush3.bf16.msra.mxu1 %v3117_v10 }
 0x5b4   :  { %12778 = vmatprep.subr.bf16.mxu0 %v3030_v48  ;;  %v3119_v51 = vpop.permute.xlu0 %3118 }
 0x5b5   :  { %12790 = vmatprep.subr.bf16.mxu1 %v3119_v51 }
 0x5b6   :  { %v3121_v13 = vpop.permute.xlu1 %3120  ;;  %12779 = vmatpush3.bf16.msra.mxu0 %v3030_v48 }
 0x5b7   :  { %12791 = vmatpush3.bf16.msra.mxu1 %v3119_v51  ;;  %12804 = vmatprep.subr.bf16.mxu0 %v16162_v36 }
 0x5b8   :  { %12792 = vmatprep.subr.bf16.mxu1 %v3121_v13  ;;  %v16170_v17 = vpop.permute.xlu0 %3211 }
 0x5ba   :  { %12769 = vmatmul.mubr.msk.bf16.gmra.mrb[84].mxu1 %vm1149_vm0, %v2549_v53  ;;  %v16173_v54 = vpop.permute.xlu1 %3213 }
 0x5bb   :  { %12793 = vmatpush3.bf16.msra.mxu1 %v3121_v13 }
 0x5bc   :  { %v3123_v49 = vpop.permute.xlu0 %3122 }
 0x5bd   :  { %12794 = vmatprep.subr.bf16.mxu1 %v3123_v49 }
 0x5be   :  { %v16175_v4 = vpop.permute.xlu1 %3302 }
 0x5bf   :  { %20249 = vst [vmem:[#allocation70_spill] sm:$0xff] %v16175_v4  ;;  %12795 = vmatpush3.bf16.msra.mxu1 %v3123_v49 }
 0x5c0   :  { %12820 = vmatprep.subr.bf16.mxu1 %v16175_v4  ;;  %v16336_v57 = vpop.permute.xlu0 %3215 }
 0x5c2   :  { %v16360_v61 = vpop.permute.xlu1 %3415 }
 0x605   :  { %v16178_v10 = vpop.f32.mrb[80].mxu0 }
 0x606   :  { %20250 = vst [vmem:[#allocation71_spill] sm:$0xff] %v16178_v10  ;;  %v16180_v48 = vpop.f32.mrb[81].mxu0 }
 0x607   :  { %20251 = vst [vmem:[#allocation72_spill] sm:$0xff] %v16180_v48  ;;  %v16182_v51 = vpop.f32.mrb[82].mxu0 }
 0x608   :  { %20252 = vst [vmem:[#allocation73_spill] sm:$0xff] %v16182_v51  ;;  %v16186_v53 = vpop.f32.mrb[83].mxu0 }
 0x609   :  { %20253 = vst [vmem:[#allocation74_spill] sm:$0xff] %v16186_v53 }
 0x60d   :  { %v16190_v16 = vpop.f32.mrb[84].mxu0 }
 0x60e   :  { %20254 = vst [vmem:[#allocation75_spill] sm:$0xff] %v16190_v16  ;;  %v16192_v47 = vpop.f32.mrb[85].mxu0 }
 0x60f   :  { %20255 = vst [vmem:[#allocation76_spill] sm:$0xff] %v16192_v47  ;;  %v16194_v49 = vpop.f32.mrb[86].mxu0 }
 0x610   :  { %20256 = vst [vmem:[#allocation77_spill] sm:$0xff] %v16194_v49  ;;  %v16198_v29 = vpop.f32.mrb[87].mxu0 }
 0x611   :  { %20257 = vst [vmem:[#allocation78_spill] sm:$0xff] %v16198_v29 }
 0x625   :  { %v16202_v12 = vpop.f32.mrb[88].mxu0 }
 0x626   :  { %v16204_v10 = vpop.f32.mrb[64].mxu1  ;;  %v16206_v51 = vpop.f32.mrb[89].mxu0  ;;  %v2657_v13 = vsel %vm1506_vm1, %v16202_v12, -inf }
 0x627   :  { %20258 = vst [vmem:[#allocation79_spill] sm:$0xff] %v16204_v10  ;;  %2658 = vmax.xlane.f32.xlu0 %v2657_v13  ;;  %v16210_v48 = vpop.f32.mrb[65].mxu1  ;;  %v16212_v53 = vpop.f32.mrb[90].mxu0  ;;  %v2651_v13 = vsel %vm1506_vm1, %v16206_v51, -inf }
 0x628   :  { %20259 = vst [vmem:[#allocation80_spill] sm:$0xff] %v16210_v48  ;;  %v16214_v7 = vpop.f32.mrb[66].mxu1  ;;  %v16216_v16 = vpop.f32.mrb[91].mxu0  ;;  %v2660_v8 = vsel %vm1506_vm1, %v16212_v53, -inf }
 0x629   :  { %20260 = vst [vmem:[#allocation81_spill] sm:$0xff] %v16214_v7  ;;  %v16220_v49 = vpop.f32.mrb[67].mxu1  ;;  %v2654_v47 = vsel %vm1506_vm1, %v16216_v16, -inf }
 0x62a   :  { %20261 = vst [vmem:[#allocation82_spill] sm:$0xff] %v16220_v49  ;;  %2655 = vmax.xlane.f32.xlu1 %v2654_v47 }
 0x62b   :  { %2652 = vmax.xlane.f32.xlu0 %v2651_v13 }
 0x62f   :  { %2661 = vmax.xlane.f32.xlu0 %v2660_v8 }
 0x65d   :  { %v16230_v27 = vpop.f32.mrb[68].mxu1 }
 0x65e   :  { %20262 = vst [vmem:[#allocation83_spill] sm:$0xff] %v16230_v27  ;;  %v16232_v22 = vpop.f32.mrb[69].mxu1  ;;  %v16234_v10 = vpop.f32.mrb[92].mxu0 }
 0x65f   :  { %20263 = vst [vmem:[#allocation84_spill] sm:$0xff] %v16232_v22  ;;  %v16236_v7 = vpop.f32.mrb[70].mxu1  ;;  %v16238_v40 = vpop.f32.mrb[93].mxu0  ;;  %v2669_v47 = vsel %vm1506_vm1, %v16234_v10, -inf }
 0x660   :  { %20264 = vst [vmem:[#allocation85_spill] sm:$0xff] %v16236_v7  ;;  %v16244_v29 = vpop.f32.mrb[71].mxu1  ;;  %2670 = vmax.xlane.f32.xlu0 %v2669_v47  ;;  %v16246_v8 = vpop.f32.mrb[94].mxu0  ;;  %v2663_v2 = vsel %vm1506_vm1, %v16238_v40, -inf }
 0x661   :  { %20265 = vst [vmem:[#allocation86_spill] sm:$0xff] %v16244_v29  ;;  %v16250_v49 = vpop.f32.mrb[95].mxu0  ;;  %v2672_v14 = vsel %vm1506_vm1, %v16246_v8, -inf }
 0x662   :  { %2673 = vmax.xlane.f32.xlu1 %v2672_v14  ;;  %v2666_v47 = vsel %vm1506_vm1, %v16250_v49, -inf }
 0x664   :  { %2664 = vmax.xlane.f32.xlu0 %v2663_v2 }
 0x665   :  { %v16256_v24 = vpop.f32.mrb[72].mxu1 }
 0x666   :  { %v16260_v13 = vpop.f32.mrb[73].mxu1  ;;  %2667 = vmax.xlane.f32.xlu1 %v2666_v47  ;;  %v2681_v48 = vsel %vm1506_vm1, %v16256_v24, -inf }
 0x667   :  { %v16264_v27 = vpop.f32.mrb[74].mxu1  ;;  %v2675_v50 = vsel %vm1506_vm1, %v16260_v13, -inf }
 0x668   :  { %v16266_v7 = vpop.f32.mrb[75].mxu1  ;;  %2682 = vmax.xlane.f32.xlu0 %v2681_v48  ;;  %v2684_v14 = vsel %vm1506_vm1, %v16264_v27, -inf }
 0x66a   :  { %2685 = vmax.xlane.f32.xlu1 %v2684_v14  ;;  %v16270_v2 = vpop.f32.mrb[96].mxu0 }
 0x66b   :  { %v16272_v22 = vpop.f32.mrb[97].mxu0  ;;  %v2705_v29 = vsel %vm1506_vm1, %v16270_v2, -inf }
 0x66c   :  { %2706 = vmax.xlane.f32.xlu0 %v2705_v29  ;;  %v16276_v47 = vpop.f32.mrb[98].mxu0  ;;  %v2678_v29 = vsel %vm1506_vm1, %v16266_v7, -inf  ;;  %v2699_v21 = vsel %vm1506_vm1, %v16272_v22, -inf }
 0x66d   :  { %v16278_v0 = vpop.f32.mrb[76].mxu1  ;;  %v16280_v11 = vpop.f32.mrb[99].mxu0  ;;  %v2708_v48 = vsel %vm1506_vm1, %v16276_v47, -inf }
 0x66e   :  { %2709 = vmax.xlane.f32.xlu1 %v2708_v48  ;;  %v16284_v20 = vpop.f32.mrb[77].mxu1  ;;  %v2702_v48 = vsel %vm1506_vm1, %v16280_v11, -inf }
 0x66f   :  { %v16286_v14 = vpop.f32.mrb[78].mxu1  ;;  %v2687_v41 = vsel %vm1506_vm1, %v16284_v20, -inf }
 0x670   :  { %2676 = vmax.xlane.f32.xlu0 %v2675_v50  ;;  %v16290_v43 = vpop.f32.mrb[79].mxu1  ;;  %v2693_v50 = vsel %vm1506_vm1, %v16278_v0, -inf }
 0x672   :  { %2679 = vmax.xlane.f32.xlu1 %v2678_v29  ;;  %v2696_v29 = vsel %vm1506_vm1, %v16286_v14, -inf }
 0x674   :  { %2700 = vmax.xlane.f32.xlu0 %v2699_v21 }
 0x676   :  { %2703 = vmax.xlane.f32.xlu1 %v2702_v48  ;;  %v16298_v3 = vpop.f32.mrb[100].mxu0 }
 0x677   :  { %v16300_v4 = vpop.f32.mrb[101].mxu0  ;;  %v2717_v21 = vsel %vm1506_vm1, %v16298_v3, -inf }
 0x678   :  { %2694 = vmax.xlane.f32.xlu0 %v2693_v50  ;;  %v16304_v30 = vpop.f32.mrb[102].mxu0  ;;  %v2690_v50 = vsel %vm1506_vm1, %v16290_v43, -inf  ;;  %v2711_v34 = vsel %vm1506_vm1, %v16300_v4, -inf }
 0x679   :  { %v16306_v56 = vpop.f32.mrb[103].mxu0  ;;  %v2720_v48 = vsel %vm1506_vm1, %v16304_v30, -inf }
 0x67a   :  { %2697 = vmax.xlane.f32.xlu1 %v2696_v29 }
 0x67c   :  { %2718 = vmax.xlane.f32.xlu0 %v2717_v21  ;;  %v2714_v21 = vsel %vm1506_vm1, %v16306_v56, -inf }
 0x67e   :  { %2721 = vmax.xlane.f32.xlu1 %v2720_v48 }
 0x680   :  { %2688 = vmax.xlane.f32.xlu0 %v2687_v41 }
 0x682   :  { %2691 = vmax.xlane.f32.xlu1 %v2690_v50 }
 0x684   :  { %2712 = vmax.xlane.f32.xlu0 %v2711_v34 }
 0x685   :  { %v16320_v29 = vpop.f32.mrb[80].mxu1 }
 0x686   :  { %v16324_v23 = vpop.f32.mrb[81].mxu1  ;;  %2715 = vmax.xlane.f32.xlu1 %v2714_v21  ;;  %v2729_v41 = vsel %vm1506_vm1, %v16320_v29, -inf }
 0x687   :  { %v16326_v48 = vpop.f32.mrb[82].mxu1  ;;  %v2723_v34 = vsel %vm1506_vm1, %v16324_v23, -inf }
 0x688   :  { %v16330_v31 = vpop.f32.mrb[83].mxu1  ;;  %2730 = vmax.xlane.f32.xlu0 %v2729_v41  ;;  %v2732_v50 = vsel %vm1506_vm1, %v16326_v48, -inf }
 0x689   :  { %v2726_v21 = vsel %vm1506_vm1, %v16330_v31, -inf }
 0x68a   :  { %2733 = vmax.xlane.f32.xlu1 %v2732_v50 }
 0x68c   :  { %2724 = vmax.xlane.f32.xlu0 %v2723_v34  ;;  %v16352_v34 = vpop.permute.xlu0 %3304 }
 0x68d   :  { %v16338_v63 = vpop.f32.mrb[84].mxu1  ;;  %20266 = vst [vmem:[#allocation87_spill] sm:$0xff] %v16352_v34 }
 0x68e   :  { %v16342_v28 = vpop.f32.mrb[85].mxu1  ;;  %2727 = vmax.xlane.f32.xlu1 %v2726_v21  ;;  %v2741_v41 = vsel %vm1506_vm1, %v16338_v63, -inf }
 0x68f   :  { %v16344_v59 = vpop.f32.mrb[86].mxu1  ;;  %v2735_v19 = vsel %vm1506_vm1, %v16342_v28, -inf }
 0x690   :  { %v16348_v50 = vpop.f32.mrb[87].mxu1  ;;  %2742 = vmax.xlane.f32.xlu0 %v2741_v41  ;;  %v2744_v46 = vsel %vm1506_vm1, %v16344_v59, -inf  ;;  %v16358_v38 = vpop.permute.xlu0 %3306 }
 0x691   :  { %v2738_v21 = vsel %vm1506_vm1, %v16348_v50, -inf  ;;  %20267 = vst [vmem:[#allocation88_spill] sm:$0xff] %v16358_v38  ;;  %v16364_v41 = vpop.permute.xlu1 %3520 }
 0x692   :  { %2745 = vmax.xlane.f32.xlu1 %v2744_v46  ;;  %20269 = vst [vmem:[#allocation90_spill] sm:$0xff] %v16364_v41 }
 0x694   :  { %2736 = vmax.xlane.f32.xlu0 %v2735_v19  ;;  %v16362_v58 = vpop.permute.xlu0 %3308 }
 0x695   :  { %20268 = vst [vmem:[#allocation89_spill] sm:$0xff] %v16362_v58  ;;  %v16368_v34 = vpop.permute.xlu1 %3421 }
 0x696   :  { %2739 = vmax.xlane.f32.xlu1 %v2738_v21  ;;  %20271 = vst [vmem:[#allocation92_spill] sm:$0xff] %v16368_v34 }
 0x698   :  { %v16366_v5 = vpop.permute.xlu0 %3417 }
 0x699   :  { %20270 = vst [vmem:[#allocation91_spill] sm:$0xff] %v16366_v5  ;;  %v16372_v1 = vpop.permute.xlu1 %3522 }
 0x69a   :  { %20273 = vst [vmem:[#allocation94_spill] sm:$0xff] %v16372_v1 }
 0x69c   :  { %v16370_v46 = vpop.permute.xlu0 %3419 }
 0x69d   :  { %20272 = vst [vmem:[#allocation93_spill] sm:$0xff] %v16370_v46  ;;  %v16376_v44 = vpop.permute.xlu1 %3524 }
 0x69e   :  { %20275 = vst [vmem:[#allocation96_spill] sm:$0xff] %v16376_v44 }
 0x6a0   :  { %v16374_v19 = vpop.permute.xlu0 %3407 }
 0x6a1   :  { %20274 = vst [vmem:[#allocation95_spill] sm:$0xff] %v16374_v19 }
 0x6b4   :  { %v2659_v21 = vpop.xlane.xlu0 %2658 }
 0x6b5   :  { %v2749_v38 = vsub.f32 %v16202_v12, %v2659_v21 }
 0x6b7   :  { %v2783_v35 = vmul.f32 1.442695, %v2749_v38  ;;  %v2656_v18 = vpop.xlane.xlu1 %2655 }
 0x6b8   :  { %v2653_v58 = vpop.xlane.xlu0 %2652  ;;  %v2748_v5 = vsub.f32 %v16216_v16, %v2656_v18 }
 0x6b9   :  { %13906 = vpow2.f32 %v2783_v35  ;;  %v2747_v41 = vsub.f32 %v16206_v51, %v2653_v58 }
 0x6ba   :  { %v2781_v46 = vmul.f32 1.442695, %v2748_v5 }
 0x6bb   :  { %v2779_v34 = vmul.f32 1.442695, %v2747_v41 }
 0x6bc   :  { %v2662_v32 = vpop.xlane.xlu0 %2661 }
 0x6bd   :  { %13908 = vpow2.f32 %v2779_v34  ;;  %v2750_v1 = vsub.f32 %v16212_v53, %v2662_v32 }
 0x6bf   :  { %v2785_v19 = vmul.f32 1.442695, %v2750_v1 }
 0x6c1   :  { %13910 = vpow2.f32 %v2785_v19 }
 0x6c2   :  { %13912 = vpow2.f32 %v2781_v46 }
 0x6c3   :  { %v16382_v44 = vpop.eup %13906 }
 0x6c4   :  { %v2849_v38 = vsel %vm1506_vm1, %v16382_v44, 0.0 }
 0x6c5   :  { %2850 = vadd.xlane.f32.xlu0 %v2849_v38 }
 0x6c7   :  { %v16386_v35 = vpop.eup %13908 }
 0x6c8   :  { %v2843_v18 = vsel %vm1506_vm1, %v16386_v35, 0.0 }
 0x6c9   :  { %2844 = vadd.xlane.f32.xlu0 %v2843_v18 }
 0x6cb   :  { %v16390_v58 = vpop.eup %13910 }
 0x6cc   :  { %v2852_v32 = vsel %vm1506_vm1, %v16390_v58, 0.0  ;;  %v16394_v1 = vpop.eup %13912 }
 0x6cd   :  { %2853 = vadd.xlane.f32.xlu1 %v2852_v32  ;;  %v2846_v5 = vsel %vm1506_vm1, %v16394_v1, 0.0 }
 0x6d1   :  { %2847 = vadd.xlane.f32.xlu1 %v2846_v5 }
 0x6ed   :  { %v2671_v16 = vpop.xlane.xlu0 %2670 }
 0x6ee   :  { %v2753_v12 = vsub.f32 %v16234_v10, %v2671_v16 }
 0x6ef   :  { %v2674_v51 = vpop.xlane.xlu1 %2673 }
 0x6f0   :  { %v2791_v53 = vmul.f32 1.442695, %v2753_v12  ;;  %v2754_v34 = vsub.f32 %v16246_v8, %v2674_v51 }
 0x6f1   :  { %v2665_v41 = vpop.xlane.xlu0 %2664 }
 0x6f2   :  { %13914 = vpow2.f32 %v2791_v53  ;;  %v2793_v46 = vmul.f32 1.442695, %v2754_v34  ;;  %v2751_v19 = vsub.f32 %v16238_v40, %v2665_v41 }
 0x6f3   :  { %v2668_v21 = vpop.xlane.xlu1 %2667 }
 0x6f4   :  { %13916 = vpow2.f32 %v2793_v46  ;;  %v2787_v38 = vmul.f32 1.442695, %v2751_v19  ;;  %v2752_v18 = vsub.f32 %v16250_v49, %v2668_v21 }
 0x6f5   :  { %v2683_v32 = vpop.xlane.xlu0 %2682 }
 0x6f6   :  { %13918 = vpow2.f32 %v2787_v38  ;;  %v2789_v5 = vmul.f32 1.442695, %v2752_v18  ;;  %v2757_v62 = vsub.f32 %v16256_v24, %v2683_v32 }
 0x6f7   :  { %v2686_v10 = vpop.xlane.xlu1 %2685 }
 0x6f8   :  { %13920 = vpow2.f32 %v2789_v5  ;;  %v2799_v16 = vmul.f32 1.442695, %v2757_v62 }
 0x6f9   :  { %v2707_v12 = vpop.xlane.xlu0 %2706 }
 0x6fa   :  { %v2765_v8 = vsub.f32 %v16270_v2, %v2707_v12  ;;  %13922 = vpow2.f32 %v2799_v16 }
 0x6fb   :  { %v2710_v51 = vpop.xlane.xlu1 %2709 }
 0x6fc   :  { %v16404_v53 = vpop.eup %13914  ;;  %v2815_v40 = vmul.f32 1.442695, %v2765_v8  ;;  %v2766_v34 = vsub.f32 %v16276_v47, %v2710_v51 }
 0x6fd   :  { %v2677_v41 = vpop.xlane.xlu0 %2676  ;;  %v2861_v49 = vsel %vm1506_vm1, %v16404_v53, 0.0 }
 0x6fe   :  { %v16409_v46 = vpop.eup %13916  ;;  %v2817_v24 = vmul.f32 1.442695, %v2766_v34  ;;  %v2755_v19 = vsub.f32 %v16260_v13, %v2677_v41  ;;  %2862 = vadd.xlane.f32.xlu1 %v2861_v49  ;;  %13924 = vpow2.f32 %v2815_v40  ;;  %v2758_v13 = vsub.f32 %v16264_v27, %v2686_v10 }
 0x6ff   :  { %v2680_v62 = vpop.xlane.xlu1 %2679  ;;  %v2864_v47 = vsel %vm1506_vm1, %v16409_v46, 0.0 }
 0x700   :  { %v16412_v2 = vpop.eup %13918  ;;  %13926 = vpow2.f32 %v2817_v24  ;;  %v2795_v21 = vmul.f32 1.442695, %v2755_v19  ;;  %v2801_v49 = vmul.f32 1.442695, %v2758_v13 }
 0x701   :  { %v2701_v38 = vpop.xlane.xlu0 %2700  ;;  %v2855_v18 = vsel %vm1506_vm1, %v16412_v2, 0.0 }
 0x702   :  { %v16418_v32 = vpop.eup %13920  ;;  %v2763_v5 = vsub.f32 %v16272_v22, %v2701_v38  ;;  %2865 = vadd.xlane.f32.xlu1 %v2864_v47  ;;  %2856 = vadd.xlane.f32.xlu0 %v2855_v18  ;;  %13928 = vpow2.f32 %v2795_v21  ;;  %v2756_v22 = vsub.f32 %v16266_v7, %v2680_v62 }
 0x703   :  { %v2704_v16 = vpop.xlane.xlu1 %2703  ;;  %v2858_v40 = vsel %vm1506_vm1, %v16418_v32, 0.0 }
 0x704   :  { %v2811_v12 = vmul.f32 1.442695, %v2763_v5  ;;  %v2764_v8 = vsub.f32 %v16280_v11, %v2704_v16  ;;  %v16425_v34 = vpop.eup %13922  ;;  %v2797_v47 = vmul.f32 1.442695, %v2756_v22 }
 0x705   :  { %v2695_v51 = vpop.xlane.xlu0 %2694  ;;  %v2873_v11 = vsel %vm1506_vm1, %v16425_v34, 0.0 }
 0x706   :  { %v2813_v41 = vmul.f32 1.442695, %v2764_v8  ;;  %2859 = vadd.xlane.f32.xlu1 %v2858_v40  ;;  %13930 = vpow2.f32 %v2811_v12  ;;  %v2761_v18 = vsub.f32 %v16278_v0, %v2695_v51 }
 0x707   :  { %v2698_v24 = vpop.xlane.xlu1 %2697 }
 0x708   :  { %13932 = vpow2.f32 %v2813_v41  ;;  %v2762_v27 = vsub.f32 %v16286_v14, %v2698_v24  ;;  %v16429_v10 = vpop.eup %13924  ;;  %v2807_v8 = vmul.f32 1.442695, %v2761_v18 }
 0x709   :  { %v2719_v19 = vpop.xlane.xlu0 %2718  ;;  %13934 = vpow2.f32 %v2801_v49  ;;  %v2897_v13 = vsel %vm1506_vm1, %v16429_v10, 0.0 }
 0x70a   :  { %v16433_v21 = vpop.eup %13926  ;;  %v2809_v38 = vmul.f32 1.442695, %v2762_v27  ;;  %2874 = vadd.xlane.f32.xlu1 %v2873_v11  ;;  %v2769_v0 = vsub.f32 %v16298_v3, %v2719_v19 }
 0x70b   :  { %v2722_v7 = vpop.xlane.xlu1 %2721  ;;  %v2900_v62 = vsel %vm1506_vm1, %v16433_v21, 0.0 }
 0x70c   :  { %13936 = vpow2.f32 %v2809_v38  ;;  %v2770_v14 = vsub.f32 %v16304_v30, %v2722_v7  ;;  %2901 = vadd.xlane.f32.xlu0 %v2900_v62  ;;  %v16441_v16 = vpop.eup %13928  ;;  %v2823_v27 = vmul.f32 1.442695, %v2769_v0 }
 0x70d   :  { %v2689_v5 = vpop.xlane.xlu0 %2688  ;;  %13938 = vpow2.f32 %v2797_v47  ;;  %v2867_v49 = vsel %vm1506_vm1, %v16441_v16, 0.0 }
 0x70e   :  { %v2825_v12 = vmul.f32 1.442695, %v2770_v14  ;;  %2898 = vadd.xlane.f32.xlu1 %v2897_v13  ;;  %v2759_v11 = vsub.f32 %v16284_v20, %v2689_v5 }
 0x70f   :  { %v2692_v51 = vpop.xlane.xlu1 %2691 }
 0x710   :  { %13940 = vpow2.f32 %v2825_v12  ;;  %v2760_v40 = vsub.f32 %v16290_v43, %v2692_v51  ;;  %v16445_v41 = vpop.eup %13930  ;;  %v2803_v62 = vmul.f32 1.442695, %v2759_v11 }
 0x711   :  { %v2713_v30 = vpop.xlane.xlu0 %2712  ;;  %13942 = vpow2.f32 %v2807_v8  ;;  %v2891_v47 = vsel %vm1506_vm1, %v16445_v41, 0.0 }
 0x712   :  { %v16449_v22 = vpop.eup %13932  ;;  %v2805_v24 = vmul.f32 1.442695, %v2760_v40  ;;  %2868 = vadd.xlane.f32.xlu1 %v2867_v49  ;;  %v2767_v20 = vsub.f32 %v16300_v4, %v2713_v30 }
 0x713   :  { %v2716_v38 = vpop.xlane.xlu1 %2715  ;;  %v2894_v3 = vsel %vm1506_vm1, %v16449_v22, 0.0  ;;  %v16455_v19 = vpop.eup %13934 }
 0x714   :  { %13944 = vpow2.f32 %v2805_v24  ;;  %v2768_v43 = vsub.f32 %v16306_v56, %v2716_v38  ;;  %2895 = vadd.xlane.f32.xlu0 %v2894_v3  ;;  %v2876_v8 = vsel %vm1506_vm1, %v16455_v19, 0.0  ;;  %v2819_v4 = vmul.f32 1.442695, %v2767_v20 }
 0x715   :  { %13946 = vpow2.f32 %v2823_v27  ;;  %v2731_v14 = vpop.xlane.xlu0 %2730 }
 0x716   :  { %v16459_v18 = vpop.eup %13936  ;;  %v2821_v7 = vmul.f32 1.442695, %v2768_v43  ;;  %2892 = vadd.xlane.f32.xlu1 %v2891_v47  ;;  %v2773_v49 = vsub.f32 %v16320_v29, %v2731_v14 }
 0x717   :  { %v2734_v5 = vpop.xlane.xlu1 %2733  ;;  %v2888_v13 = vsel %vm1506_vm1, %v16459_v18, 0.0  ;;  %v16465_v12 = vpop.eup %13938 }
 0x718   :  { %13948 = vpow2.f32 %v2821_v7  ;;  %v2774_v56 = vsub.f32 %v16326_v48, %v2734_v5  ;;  %2889 = vadd.xlane.f32.xlu0 %v2888_v13  ;;  %v2870_v11 = vsel %vm1506_vm1, %v16465_v12, 0.0  ;;  %v2831_v47 = vmul.f32 1.442695, %v2773_v49 }
 0x719   :  { %13950 = vpow2.f32 %v2803_v62  ;;  %v2725_v27 = vpop.xlane.xlu0 %2724 }
 0x71a   :  { %v16469_v0 = vpop.eup %13940  ;;  %v2833_v51 = vmul.f32 1.442695, %v2774_v56  ;;  %2877 = vadd.xlane.f32.xlu1 %v2876_v8  ;;  %v2771_v29 = vsub.f32 %v16324_v23, %v2725_v27 }
 0x71b   :  { %v2728_v40 = vpop.xlane.xlu1 %2727  ;;  %v2912_v30 = vsel %vm1506_vm1, %v16469_v0, 0.0  ;;  %v16475_v24 = vpop.eup %13942 }
 0x71c   :  { %13952 = vpow2.f32 %v2833_v51  ;;  %v2772_v48 = vsub.f32 %v16330_v31, %v2728_v40  ;;  %2913 = vadd.xlane.f32.xlu0 %v2912_v30  ;;  %v2885_v7 = vsel %vm1506_vm1, %v16475_v24, 0.0  ;;  %v2827_v14 = vmul.f32 1.442695, %v2771_v29 }
 0x71d   :  { %13954 = vpow2.f32 %v2819_v4 }
 0x71e   :  { %v16479_v38 = vpop.eup %13944  ;;  %v2829_v3 = vmul.f32 1.442695, %v2772_v48  ;;  %2871 = vadd.xlane.f32.xlu1 %v2870_v11 }
 0x71f   :  { %v2882_v43 = vsel %vm1506_vm1, %v16479_v38, 0.0  ;;  %v16484_v31 = vpop.eup %13946 }
 0x720   :  { %13956 = vpow2.f32 %v2829_v3  ;;  %2883 = vadd.xlane.f32.xlu0 %v2882_v43  ;;  %v2909_v23 = vsel %vm1506_vm1, %v16484_v31, 0.0  ;;  %v2743_v3 = vpop.xlane.xlu0 %2742 }
 0x721   :  { %13958 = vpow2.f32 %v2831_v47  ;;  %v2777_v43 = vsub.f32 %v16338_v63, %v2743_v3 }
 0x722   :  { %v16488_v62 = vpop.eup %13948  ;;  %2886 = vadd.xlane.f32.xlu1 %v2885_v7  ;;  %13960 = vpow2.f32 %v2827_v14 }
 0x723   :  { %v2906_v20 = vsel %vm1506_vm1, %v16488_v62, 0.0  ;;  %v16492_v5 = vpop.eup %13950  ;;  %v2839_v29 = vmul.f32 1.442695, %v2777_v43 }
 0x724   :  { %2907 = vadd.xlane.f32.xlu0 %v2906_v20  ;;  %v2879_v51 = vsel %vm1506_vm1, %v16492_v5, 0.0  ;;  %v2737_v47 = vpop.xlane.xlu0 %2736  ;;  %v2746_v20 = vpop.xlane.xlu1 %2745 }
 0x725   :  { %v2775_v7 = vsub.f32 %v16342_v28, %v2737_v47  ;;  %13962 = vpow2.f32 %v2839_v29  ;;  %v2778_v14 = vsub.f32 %v16344_v59, %v2746_v20 }
 0x726   :  { %v16496_v13 = vpop.eup %13952  ;;  %2910 = vadd.xlane.f32.xlu1 %v2909_v23 }
 0x727   :  { %v2924_v56 = vsel %vm1506_vm1, %v16496_v13, 0.0  ;;  %v16500_v8 = vpop.eup %13954  ;;  %v2835_v23 = vmul.f32 1.442695, %v2775_v7 }
 0x728   :  { %2925 = vadd.xlane.f32.xlu0 %v2924_v56  ;;  %v2903_v30 = vsel %vm1506_vm1, %v16500_v8, 0.0 }
 0x729   :  { %13964 = vpow2.f32 %v2835_v23 }
 0x72a   :  { %v16504_v4 = vpop.eup %13956  ;;  %2880 = vadd.xlane.f32.xlu1 %v2879_v51  ;;  %v2740_v51 = vpop.xlane.xlu1 %2739 }
 0x72b   :  { %v2918_v40 = vsel %vm1506_vm1, %v16504_v4, 0.0  ;;  %v16510_v49 = vpop.eup %13958 }
 0x72c   :  { %2919 = vadd.xlane.f32.xlu0 %v2918_v40  ;;  %v2921_v48 = vsel %vm1506_vm1, %v16510_v49, 0.0  ;;  %v16514_v27 = vpop.eup %13960  ;;  %v2841_v40 = vmul.f32 1.442695, %v2778_v14 }
 0x72d   :  { %v2915_v11 = vsel %vm1506_vm1, %v16514_v27, 0.0 }
 0x72e   :  { %2904 = vadd.xlane.f32.xlu1 %v2903_v30  ;;  %v2776_v30 = vsub.f32 %v16348_v50, %v2740_v51  ;;  %13966 = vpow2.f32 %v2841_v40 }
 0x730   :  { %v2837_v3 = vmul.f32 1.442695, %v2776_v30 }
 0x732   :  { %2922 = vadd.xlane.f32.xlu1 %v2921_v48 }
 0x736   :  { %2916 = vadd.xlane.f32.xlu1 %v2915_v11  ;;  %v16528_v11 = vpop.eup %13962 }
 0x737   :  { %v2933_v59 = vsel %vm1506_vm1, %v16528_v11, 0.0  ;;  %v16532_v43 = vpop.eup %13964 }
 0x738   :  { %v2927_v50 = vsel %vm1506_vm1, %v16532_v43, 0.0  ;;  %v16536_v47 = vpop.eup %13966 }
 0x739   :  { %v2936_v14 = vsel %vm1506_vm1, %v16536_v47, 0.0 }
 0x742   :  { %3625 = vrot.lane.b32.xlu0 %v15469_v9, %s14909_s0 }
 0x747   :  { %3409 = vrot.lane.b32.xlu1 %v15371_v26, %s14909_s0 }
 0x74b   :  { %3627 = vrot.lane.b32.xlu1 %v15483_v25, %s14909_s0 }
 0x752   :  { %v2851_v56 = vpop.xlane.xlu0 %2850 }
 0x756   :  { %v2845_v48 = vpop.xlane.xlu0 %2844 }
 0x75a   :  { %v2854_v63 = vpop.xlane.xlu1 %2853 }
 0x75b   :  { %13968 = vrcp.f32 %v2854_v63 }
 0x75c   :  { %13970 = vrcp.f32 %v2845_v48 }
 0x75d   :  { %13972 = vrcp.f32 %v2851_v56 }
 0x75e   :  { %v2848_v28 = vpop.xlane.xlu1 %2847 }
 0x75f   :  { %13974 = vrcp.f32 %v2848_v28 }
 0x760   :  { %13976 = vpow2.f32 %v2837_v3 }
 0x761   :  { %2934 = vadd.xlane.f32.xlu0 %v2933_v59  ;;  %v20279_v59 = vld [vmem:[#allocation55_spill] sm:$0xff] }
 0x765   :  { %2928 = vadd.xlane.f32.xlu0 %v2927_v50  ;;  %v13969_v29 = vpop.eup %13968 }
 0x766   :  { %v13971_v7 = vpop.eup %13970  ;;  %v2974_v56 = vmul.f32 %v13969_v29, %v16390_v58 }
 0x767   :  { %v13973_v20 = vpop.eup %13972  ;;  %v2971_v51 = vmul.f32 %v13971_v7, %v16386_v35  ;;  %v20277_v35 = vld [vmem:[#allocation31_spill] sm:$0xff] }
 0x768   :  { %v2973_v48 = vmul.f32 %v13973_v20, %v16382_v44  ;;  %v20280_v7 = vld [vmem:[#allocation35_spill] sm:$0xff] }
 0x769   :  { %v13975_v23 = vpop.eup %13974  ;;  %2937 = vadd.xlane.f32.xlu0 %v2936_v14  ;;  %v20281_v14 = vld [vmem:[#allocation47_spill] sm:$0xff] }
 0x76a   :  { %v2972_v40 = vmul.f32 %v13975_v23, %v16394_v1  ;;  %v16543_v30 = vpop.eup %13976  ;;  %v3004_v3 = vpack.c.bf16 %v2974_v56, %v2973_v48  ;;  %v20278_v1 = vld [vmem:[#allocation52_spill] sm:$0xff] }
 0x76b   :  { %v2930_v28 = vsel %vm1506_vm1, %v16543_v30, 0.0 }
 0x76c   :  { %v3003_v63 = vpack.c.bf16 %v2972_v40, %v2971_v51 }
 0x76e   :  { %12780 = vmatprep.mubr.msk.bf16.mxu0 %vm1506_vm1, %v3003_v63  ;;  %v20282_v63 = vld [vmem:[#allocation45_spill] sm:$0xff] }
 0x76f   :  { %12781 = vmatmul.mubr.msk.bf16.vlgmr.msra.gmra.mrb[104].mxu0 %vm1506_vm1, %v3004_v3  ;;  %2931 = vadd.xlane.f32.xlu1 %v2930_v28 }
 0x770   :  { %12805 = vmatpush3.bf16.msra.mxu0 %v16162_v36 }
 0x771   :  { %12806 = vmatprep.subr.bf16.mxu0 %v16170_v17 }
 0x774   :  { %12807 = vmatpush3.bf16.msra.mxu0 %v16170_v17 }
 0x775   :  { %12808 = vmatprep.subr.bf16.mxu0 %v16173_v54 }
 0x778   :  { %12809 = vmatpush3.bf16.msra.mxu0 %v16173_v54  ;;  %v20276_v54 = vld [vmem:[#allocation38_spill] sm:$0xff] }
 0x779   :  { %12810 = vmatprep.subr.bf16.mxu0 %v16336_v57 }
 0x77c   :  { %12811 = vmatpush3.bf16.msra.mxu0 %v16336_v57 }
 0x77d   :  { %13296 = vmatprep.subr.msk.bf16.mxu0 %vm1149_vm0, %v16360_v61 }
 0x77f   :  { %3526 = vrot.lane.b32.xlu0 %v15457_v37, %s14909_s0 }
 0x780   :  { %3629 = vrot.lane.b32.xlu1 %v15493_v6, %s14909_s0 }
 0x783   :  { %3512 = vrot.lane.b32.xlu0 %v15409_v45, %s14909_s0 }
 0x784   :  { %3514 = vrot.lane.b32.xlu1 %v15423_v33, %s14909_s0 }
 0x787   :  { %3730 = vrot.lane.b32.xlu0 %v15514_v52, %s14909_s0 }
 0x788   :  { %3413 = vrot.lane.b32.xlu1 %v20189_v15, %s14909_s0 }
 0x78b   :  { %v2863_v57 = vpop.xlane.xlu1 %2862  ;;  %3411 = vrot.lane.b32.xlu0 %v20190_v39, %s14909_s0 }
 0x78c   :  { %3732 = vrot.lane.b32.xlu1 %v20191_v42, %s14909_s0 }
 0x78f   :  { %v2866_v44 = vpop.xlane.xlu1 %2865  ;;  %3631 = vrot.lane.b32.xlu0 %v20192_v55, %s14909_s0  ;;  %v2857_v36 = vpop.xlane.xlu0 %2856 }
 0x790   :  { %3619 = vrot.lane.b32.xlu1 %v20193_v60, %s14909_s0  ;;  %13978 = vrcp.f32 %v2866_v44 }
 0x791   :  { %13980 = vrcp.f32 %v2857_v36 }
 0x792   :  { %13982 = vrcp.f32 %v2863_v57  ;;  %v20283_v57 = vld [vmem:[#allocation41_spill] sm:$0xff] }
 0x793   :  { %v2860_v17 = vpop.xlane.xlu1 %2859  ;;  %3617 = vrot.lane.b32.xlu0 %v20276_v54, %s14909_s0 }
 0x794   :  { %13984 = vrcp.f32 %v2860_v17  ;;  %3516 = vrot.lane.b32.xlu1 %v20277_v35, %s14909_s0 }
 0x797   :  { %v2875_v58 = vpop.xlane.xlu1 %2874  ;;  %3734 = vrot.lane.b32.xlu0 %v20278_v1, %s14909_s0 }
 0x798   :  { %3736 = vrot.lane.b32.xlu1 %v20279_v59, %s14909_s0 }
 0x799   :  { %v2902_v56 = vpop.xlane.xlu0 %2901 }
 0x79a   :  { %v13979_v50 = vpop.eup %13978 }
 0x79b   :  { %v2899_v29 = vpop.xlane.xlu1 %2898  ;;  %3518 = vrot.lane.b32.xlu0 %v20280_v7, %s14909_s0  ;;  %v13981_v20 = vpop.eup %13980  ;;  %v2978_v40 = vmul.f32 %v13979_v50, %v16409_v46  ;;  %v20284_v50 = vld [vmem:[#allocation40_spill] sm:$0xff] }
 0x79c   :  { %3724 = vrot.lane.b32.xlu1 %v20281_v14, %s14909_s0  ;;  %v13983_v23 = vpop.eup %13982  ;;  %v2975_v3 = vmul.f32 %v13981_v20, %v16412_v2  ;;  %13986 = vrcp.f32 %v2899_v29  ;;  %v20285_v2 = vld [vmem:[#allocation53_spill] sm:$0xff]  ;;  %v20286_v29 = vld [vmem:[#allocation51_spill] sm:$0xff]  ;;  %v20287_v20 = vld [vmem:[#allocation26_spill] sm:$0xff] }
 0x79d   :  { %v2977_v44 = vmul.f32 %v13983_v23, %v16404_v53 }
 0x79e   :  { %v13985_v51 = vpop.eup %13984 }
 0x79f   :  { %v2869_v48 = vpop.xlane.xlu1 %2868  ;;  %3722 = vrot.lane.b32.xlu0 %v20282_v63, %s14909_s0  ;;  %v2976_v28 = vmul.f32 %v13985_v51, %v16418_v32  ;;  %v3006_v14 = vpack.c.bf16 %v2978_v40, %v2977_v44  ;;  %v20288_v40 = vld [vmem:[#allocation20_spill] sm:$0xff] }
 0x7a0   :  { %3623 = vrot.lane.b32.xlu1 %v20283_v57, %s14909_s0 }
 0x7a1   :  { %v2896_v36 = vpop.xlane.xlu0 %2895  ;;  %v3005_v17 = vpack.c.bf16 %v2976_v28, %v2975_v3 }
 0x7a2   :  { %13988 = vrcp.f32 %v2896_v36 }
 0x7a3   :  { %13990 = vrcp.f32 %v2902_v56  ;;  %v2893_v46 = vpop.xlane.xlu1 %2892  ;;  %3621 = vrot.lane.b32.xlu0 %v20284_v50, %s14909_s0  ;;  %12784 = vmatprep.mubr.msk.bf16.mxu0 %vm1506_vm1, %v3005_v17 }
 0x7a4   :  { %13992 = vrcp.f32 %v2893_v46  ;;  %3728 = vrot.lane.b32.xlu1 %v20285_v2, %s14909_s0  ;;  %12785 = vmatmul.mubr.msk.bf16.gmra.mrb[108].mxu0 %vm1506_vm1, %v3006_v14  ;;  %v20289_v14 = vld [vmem:[#allocation30_spill] sm:$0xff] }
 0x7a5   :  { %v2890_v32 = vpop.xlane.xlu0 %2889 }
 0x7a6   :  { %v13987_v56 = vpop.eup %13986 }
 0x7a7   :  { %v2878_v53 = vpop.xlane.xlu1 %2877  ;;  %3726 = vrot.lane.b32.xlu0 %v20286_v29, %s14909_s0  ;;  %v2989_v17 = vmul.f32 %v13987_v56, %v16429_v10  ;;  %v20292_v10 = vld [vmem:[#allocation24_spill] sm:$0xff] }
 0x7a8   :  { %4199 = vrot.lane.b32.xlu1 %v20287_v20, %s14909_s0  ;;  %13994 = vrcp.f32 %v2878_v53  ;;  %v20290_v53 = vld [vmem:[#allocation18_spill] sm:$0xff] }
 0x7a9   :  { %v2914_v23 = vpop.xlane.xlu0 %2913  ;;  %13996 = vrcp.f32 %v2869_v48 }
 0x7aa   :  { %13998 = vrcp.f32 %v2875_v58 }
 0x7ab   :  { %v2872_v51 = vpop.xlane.xlu1 %2871  ;;  %4195 = vrot.lane.b32.xlu0 %v20288_v40, %s14909_s0 }
 0x7ac   :  { %v13989_v3 = vpop.eup %13988  ;;  %14000 = vrcp.f32 %v2872_v51  ;;  %4284 = vrot.lane.b32.xlu1 %v20289_v14, %s14909_s0  ;;  %v20291_v51 = vld [vmem:[#allocation37_spill] sm:$0xff] }
 0x7ad   :  { %v13991_v28 = vpop.eup %13990  ;;  %v2884_v44 = vpop.xlane.xlu0 %2883  ;;  %v2988_v48 = vmul.f32 %v13989_v3, %v16449_v22 }
 0x7ae   :  { %v13993_v36 = vpop.eup %13992  ;;  %v2990_v20 = vmul.f32 %v13991_v28, %v16433_v21  ;;  %v3436_v21 = vsel %vm1149_vm0, %v16360_v61, 0  ;;  %v20294_v28 = vld [vmem:[#allocation91_spill] sm:$0xff] }
 0x7af   :  { %v2887_v46 = vpop.xlane.xlu1 %2886  ;;  %4197 = vrot.lane.b32.xlu0 %v20290_v53, %s14909_s0  ;;  %v2987_v58 = vmul.f32 %v13993_v36, %v16445_v41  ;;  %v20293_v41 = vld [vmem:[#allocation34_spill] sm:$0xff]  ;;  %v20295_v36 = vld [vmem:[#allocation28_spill] sm:$0xff] }
 0x7b0   :  { %4373 = vrot.lane.b32.xlu1 %v20291_v51, %s14909_s0  ;;  %v3012_v2 = vpack.c.bf16 %v2990_v20, %v2989_v17  ;;  %14002 = vrcp.f32 %v2887_v46  ;;  %v20296_v46 = vld [vmem:[#allocation44_spill] sm:$0xff] }
 0x7b1   :  { %v3011_v40 = vpack.c.bf16 %v2988_v48, %v2987_v58  ;;  %v2908_v50 = vpop.xlane.xlu0 %2907  ;;  %14004 = vrcp.f32 %v2884_v44  ;;  %v20297_v58 = vld [vmem:[#allocation36_spill] sm:$0xff] }
 0x7b2   :  { %v13995_v59 = vpop.eup %13994  ;;  %14006 = vrcp.f32 %v2890_v32 }
 0x7b3   :  { %v2911_v60 = vpop.xlane.xlu1 %2910  ;;  %4201 = vrot.lane.b32.xlu0 %v20292_v10, %s14909_s0  ;;  %12812 = vmatprep.mubr.msk.bf16.mxu0 %vm1506_vm1, %v3011_v40  ;;  %v13997_v56 = vpop.eup %13996  ;;  %v2982_v3 = vmul.f32 %v13995_v59, %v16455_v19 }
 0x7b4   :  { %4288 = vrot.lane.b32.xlu1 %v20293_v41, %s14909_s0  ;;  %12813 = vmatmul.mubr.msk.bf16.vlgmr.msra.gmra.mrb[112].mxu0 %vm1506_vm1, %v3012_v2  ;;  %v13999_v22 = vpop.eup %13998  ;;  %v2979_v2 = vmul.f32 %v13997_v56, %v16441_v16  ;;  %v20299_v16 = vld [vmem:[#allocation70_spill] sm:$0xff] }
 0x7b5   :  { %12837 = vmatpush3.bf16.xpose.msra.mxu0 %v3436_v21  ;;  %v2981_v61 = vmul.f32 %v13999_v22, %v16425_v34  ;;  %v2926_v19 = vpop.xlane.xlu0 %2925  ;;  %v20298_v34 = vld [vmem:[#allocation50_spill] sm:$0xff]  ;;  %v20302_v21 = vld [vmem:[#allocation33_spill] sm:$0xff] }
 0x7b6   :  { %v14001_v20 = vpop.eup %14000  ;;  %13297 = vmatprep.subr.msk.bf16.mxu0 %vm1149_vm0, %v20294_v28 }
 0x7b7   :  { %v2881_v40 = vpop.xlane.xlu1 %2880  ;;  %4286 = vrot.lane.b32.xlu0 %v20295_v36, %s14909_s0  ;;  %v2980_v17 = vmul.f32 %v14001_v20, %v16465_v12  ;;  %v3008_v44 = vpack.c.bf16 %v2982_v3, %v2981_v61  ;;  %v20300_v12 = vld [vmem:[#allocation87_spill] sm:$0xff]  ;;  %v20303_v20 = vld [vmem:[#allocation48_spill] sm:$0xff] }
 0x7b8   :  { %14008 = vrcp.f32 %v2881_v40  ;;  %4377 = vrot.lane.b32.xlu1 %v20296_v46, %s14909_s0  ;;  %v20304_v40 = vld [vmem:[#allocation88_spill] sm:$0xff] }
 0x7b9   :  { %14010 = vrcp.f32 %v2911_v60  ;;  %v3007_v59 = vpack.c.bf16 %v2980_v17, %v2979_v2  ;;  %v3439_v60 = vsel %vm1149_vm0, %v20294_v28, 0  ;;  %v2920_v48 = vpop.xlane.xlu0 %2919 }
 0x7ba   :  { %14012 = vrcp.f32 %v2908_v50  ;;  %v20301_v50 = vld [vmem:[#allocation93_spill] sm:$0xff] }
 0x7bb   :  { %14014 = vrcp.f32 %v2914_v23  ;;  %12796 = vmatprep.mubr.msk.bf16.mxu1 %vm1506_vm1, %v3007_v59  ;;  %v2905_v32 = vpop.xlane.xlu1 %2904  ;;  %4375 = vrot.lane.b32.xlu0 %v20297_v58, %s14909_s0  ;;  %v14003_v23 = vpop.eup %14002  ;;  %v20305_v59 = vld [vmem:[#allocation42_spill] sm:$0xff] }
 0x7bc   :  { %14016 = vrcp.f32 %v2905_v32  ;;  %12797 = vmatmul.mubr.msk.bf16.vlgmr.msra.gmra.mrb[88].mxu1 %vm1506_vm1, %v3008_v44  ;;  %4462 = vrot.lane.b32.xlu1 %v20298_v34, %s14909_s0  ;;  %v14005_v22 = vpop.eup %14004  ;;  %v2985_v2 = vmul.f32 %v14003_v23, %v16475_v24 }
 0x7bd   :  { %12821 = vmatpush3.bf16.msra.mxu1 %v20299_v16  ;;  %12839 = vmatpush3.bf16.xpose.msra.mxu0 %v3439_v60  ;;  %v14007_v3 = vpop.eup %14006  ;;  %v2984_v32 = vmul.f32 %v14005_v22, %v16479_v38  ;;  %v20306_v16 = vld [vmem:[#allocation56_spill] sm:$0xff] }
 0x7be   :  { %12822 = vmatprep.subr.bf16.mxu1 %v20300_v12  ;;  %13298 = vmatprep.subr.msk.bf16.mxu0 %vm1149_vm0, %v20301_v50  ;;  %v2986_v24 = vmul.f32 %v14007_v3, %v16459_v18  ;;  %v20310_v3 = vld [vmem:[#allocation54_spill] sm:$0xff] }
 0x7bf   :  { %v2923_v56 = vpop.xlane.xlu1 %2922  ;;  %4290 = vrot.lane.b32.xlu0 %v20302_v21, %s14909_s0 }
 0x7c0   :  { %4464 = vrot.lane.b32.xlu1 %v20303_v20, %s14909_s0  ;;  %14018 = vrcp.f32 %v2923_v56  ;;  %v20307_v56 = vld [vmem:[#allocation89_spill] sm:$0xff]  ;;  %v3010_v38 = vpack.c.bf16 %v2986_v24, %v2985_v2  ;;  %v20311_v2 = vld [vmem:[#allocation90_spill] sm:$0xff] }
 0x7c1   :  { %12823 = vmatpush3.bf16.msra.mxu1 %v20300_v12  ;;  %14020 = vrcp.f32 %v2920_v48  ;;  %v3442_v12 = vsel %vm1149_vm0, %v20301_v50, 0 }
 0x7c2   :  { %v14009_v28 = vpop.eup %14008  ;;  %12824 = vmatprep.subr.bf16.mxu1 %v20304_v40  ;;  %14022 = vrcp.f32 %v2926_v19 }
 0x7c3   :  { %v14011_v17 = vpop.eup %14010  ;;  %v2917_v61 = vpop.xlane.xlu1 %2916  ;;  %4379 = vrot.lane.b32.xlu0 %v20305_v59, %s14909_s0  ;;  %v2983_v44 = vmul.f32 %v14009_v28, %v16492_v5  ;;  %v20308_v5 = vld [vmem:[#allocation92_spill] sm:$0xff]  ;;  %v20309_v28 = vld [vmem:[#allocation17_spill] sm:$0xff] }
 0x7c4   :  { %v14013_v60 = vpop.eup %14012  ;;  %14024 = vrcp.f32 %v2917_v61  ;;  %4466 = vrot.lane.b32.xlu1 %v20306_v16, %s14909_s0  ;;  %v2993_v22 = vmul.f32 %v14011_v17, %v16484_v31 }
 0x7c5   :  { %v14015_v23 = vpop.eup %14014  ;;  %12825 = vmatpush3.bf16.msra.mxu1 %v20304_v40  ;;  %12841 = vmatpush3.bf16.xpose.msra.mxu0 %v3442_v12  ;;  %v3009_v19 = vpack.c.bf16 %v2984_v32, %v2983_v44  ;;  %v2992_v50 = vmul.f32 %v14013_v60, %v16488_v62  ;;  %v20312_v44 = vld [vmem:[#allocation22_spill] sm:$0xff]  ;;  %v3626_v60 = vpop.permute.xlu0 %3625  ;;  %v20314_v12 = vld [vmem:[#allocation95_spill] sm:$0xff] }
 0x7c6   :  { %v14017_v48 = vpop.eup %14016  ;;  %12826 = vmatprep.subr.bf16.mxu1 %v20307_v56  ;;  %13299 = vmatprep.subr.msk.bf16.mxu0 %vm1149_vm0, %v20308_v5  ;;  %v2994_v40 = vmul.f32 %v14015_v23, %v16469_v0  ;;  %v3445_v0 = vsel %vm1149_vm0, %v20308_v5, 0 }
 0x7c7   :  { %4575 = vrot.lane.b32.xlu0 %v20309_v28, %s14914_s25  ;;  %12800 = vmatprep.mubr.msk.bf16.mxu1 %vm1506_vm1, %v3009_v19  ;;  %v2991_v18 = vmul.f32 %v14017_v48, %v16500_v8  ;;  %v20313_v8 = vld [vmem:[#allocation19_spill] sm:$0xff]  ;;  %v20315_v19 = vld [vmem:[#allocation29_spill] sm:$0xff] }
 0x7c8   :  { %4468 = vrot.lane.b32.xlu1 %v20310_v3, %s14909_s0  ;;  %12801 = vmatmul.mubr.msk.bf16.gmra.mrb[92].mxu1 %vm1506_vm1, %v3010_v38  ;;  %v3014_v17 = vpack.c.bf16 %v2994_v40, %v2993_v22  ;;  %v3410_v38 = vpop.permute.xlu1 %3409  ;;  %v20316_v22 = vld [vmem:[#allocation27_spill] sm:$0xff]  ;;  %v20320_v40 = vld [vmem:[#allocation32_spill] sm:$0xff] }
 0x7c9   :  { %12827 = vmatpush3.bf16.msra.mxu1 %v20307_v56  ;;  %v3013_v31 = vpack.c.bf16 %v2992_v50, %v2991_v18  ;;  %v20318_v50 = vld [vmem:[#allocation94_spill] sm:$0xff] }
 0x7ca   :  { %13300 = vmatprep.subr.msk.bf16.mxu1 %vm1149_vm0, %v20311_v2  ;;  %v14019_v61 = vpop.eup %14018 }
 0x7cb   :  { %4579 = vrot.lane.b32.xlu0 %v20312_v44, %s14914_s25  ;;  %12816 = vmatprep.mubr.msk.bf16.mxu0 %vm1506_vm1, %v3013_v31  ;;  %v14021_v62 = vpop.eup %14020  ;;  %v2997_v23 = vmul.f32 %v14019_v61, %v16510_v49  ;;  %v20317_v49 = vld [vmem:[#allocation25_spill] sm:$0xff]  ;;  %v3544_v31 = vsel %vm1149_vm0, %v20318_v50, 0 }
 0x7cc   :  { %4577 = vrot.lane.b32.xlu1 %v20313_v8, %s14914_s25  ;;  %12817 = vmatmul.mubr.msk.bf16.gmra.mrb[116].mxu0 %vm1506_vm1, %v3014_v17  ;;  %v14023_v32 = vpop.eup %14022  ;;  %v2996_v56 = vmul.f32 %v14021_v62, %v16504_v4  ;;  %v3541_v4 = vsel %vm1149_vm0, %v20311_v2, 0  ;;  %v20321_v17 = vld [vmem:[#allocation96_spill] sm:$0xff] }
 0x7cd   :  { %12843 = vmatpush3.bf16.xpose.msra.mxu0 %v3445_v0  ;;  %12844 = vmatprep.mubr.msk.bf16.mxu0 %vm1149_vm0, %v20314_v12  ;;  %v2998_v5 = vmul.f32 %v14023_v32, %v16496_v13  ;;  %v3646_v13 = vsel %vm1149_vm0, %v3626_v60, 0  ;;  %v3547_v61 = vsel %vm1149_vm0, %v20321_v17, 0 }
 0x7ce   :  { %v14025_v24 = vpop.eup %14024  ;;  %13304 = vmatprep.subr.msk.bf16.mxu0 %vm1149_vm0, %v3626_v60 }
 0x7cf   :  { %4682 = vrot.lane.b32.xlu0 %v20315_v19, %s14914_s25  ;;  %v2995_v48 = vmul.f32 %v14025_v24, %v16514_v27  ;;  %v3016_v18 = vpack.c.bf16 %v2998_v5, %v2997_v23  ;;  %v3628_v27 = vpop.permute.xlu1 %3627 }
 0x7d0   :  { %4680 = vrot.lane.b32.xlu1 %v20316_v22, %s14914_s25  ;;  %v3649_v2 = vsel %vm1149_vm0, %v3628_v27, 0 }
 0x7d1   :  { %v3015_v28 = vpack.c.bf16 %v2996_v56, %v2995_v48 }
 0x7d3   :  { %4569 = vrot.lane.b32.xlu0 %v15371_v26, %s14914_s25  ;;  %12828 = vmatprep.mubr.msk.bf16.mxu1 %vm1506_vm1, %v3015_v28  ;;  %v20319_v26 = vld [vmem:[#allocation16_spill] sm:$0xff] }
 0x7d4   :  { %4581 = vrot.lane.b32.xlu1 %v20317_v49, %s14914_s25  ;;  %12829 = vmatmul.mubr.msk.bf16.vlgmr.msra.gmra.mrb[96].mxu1 %vm1506_vm1, %v3016_v18 }
 0x7d5   :  { %12845 = vmatmul.mubr.msk.bf16.vlgmr.msra.gmra.mrb[120].mxu0 %vm1149_vm0, %v3410_v38  ;;  %12853 = vmatpush3.bf16.xpose.msra.mxu1 %v3541_v4 }
 0x7d6   :  { %12869 = vmatpush3.bf16.xpose.msra.mxu0 %v3646_v13  ;;  %13301 = vmatprep.subr.msk.bf16.mxu1 %vm1149_vm0, %v20318_v50 }
 0x7d7   :  { %13305 = vmatprep.subr.msk.bf16.mxu0 %vm1149_vm0, %v3628_v27 }
 0x7d8   :  { %4567 = vrot.lane.b32.xlu1 %v20319_v26, %s14914_s25 }
 0x7dc   :  { %4684 = vrot.lane.b32.xlu1 %v20320_v40, %s14914_s25 }
 0x7dd   :  { %12855 = vmatpush3.bf16.xpose.msra.mxu1 %v3544_v31 }
 0x7de   :  { %12871 = vmatpush3.bf16.xpose.msra.mxu0 %v3649_v2  ;;  %13302 = vmatprep.subr.msk.bf16.mxu1 %vm1149_vm0, %v20321_v17 }
 0x7e5   :  { %12857 = vmatpush3.bf16.xpose.msra.mxu1 %v3547_v61 }
 0x7ee   :  { %v2935_v44 = vpop.xlane.xlu0 %2934 }
 0x7f2   :  { %v2929_v62 = vpop.xlane.xlu0 %2928 }
 0x7f6   :  { %v2938_v8 = vpop.xlane.xlu0 %2937 }
 0x7f7   :  { %14026 = vrcp.f32 %v2938_v8 }
 0x7f8   :  { %14028 = vrcp.f32 %v2929_v62 }
 0x7f9   :  { %14030 = vrcp.f32 %v2935_v44 }
 0x7fa   :  { %v3527_v0 = vpop.permute.xlu0 %3526 }
 0x7fb   :  { %13303 = vmatprep.subr.msk.bf16.mxu1 %vm1149_vm0, %v3527_v0  ;;  %v3550_v32 = vsel %vm1149_vm0, %v3527_v0, 0 }
 0x7fc   :  { %v2932_v60 = vpop.xlane.xlu1 %2931  ;;  %12859 = vmatpush3.bf16.xpose.msra.mxu1 %v3550_v32 }
 0x7fd   :  { %14032 = vrcp.f32 %v2932_v60 }
 0x7fe   :  { %v3513_v12 = vpop.permute.xlu0 %3512 }
 0x800   :  { %v3630_v24 = vpop.permute.xlu1 %3629 }
 0x801   :  { %13306 = vmatprep.subr.msk.bf16.mxu0 %vm1149_vm0, %v3630_v24  ;;  %v3652_v23 = vsel %vm1149_vm0, %v3630_v24, 0  ;;  %v14027_v48 = vpop.eup %14026 }
 0x802   :  { %12873 = vmatpush3.bf16.xpose.msra.mxu0 %v3652_v23  ;;  %v3731_v19 = vpop.permute.xlu0 %3730  ;;  %v14029_v5 = vpop.eup %14028  ;;  %v3002_v18 = vmul.f32 %v14027_v48, %v16536_v47 }
 0x803   :  { %13308 = vmatprep.subr.msk.bf16.mxu1 %vm1149_vm0, %v3731_v19  ;;  %v14031_v38 = vpop.eup %14030  ;;  %v2999_v4 = vmul.f32 %v14029_v5, %v16532_v43  ;;  %v3751_v17 = vsel %vm1149_vm0, %v3731_v19, 0 }
 0x804   :  { %v3515_v56 = vpop.permute.xlu1 %3514  ;;  %v3001_v27 = vmul.f32 %v14031_v38, %v16528_v11 }
 0x806   :  { %v3412_v22 = vpop.permute.xlu0 %3411  ;;  %v3018_v31 = vpack.c.bf16 %v3002_v18, %v3001_v27 }
 0x807   :  { %v14033_v28 = vpop.eup %14032  ;;  %12848 = vmatprep.mubr.msk.bf16.mxu0 %vm1149_vm0, %v3412_v22 }
 0x808   :  { %v3414_v49 = vpop.permute.xlu1 %3413  ;;  %v3000_v13 = vmul.f32 %v14033_v28, %v16543_v30 }
 0x809   :  { %12849 = vmatmul.mubr.msk.bf16.gmra.mrb[124].mxu0 %vm1149_vm0, %v3414_v49 }
 0x80a   :  { %v3632_v50 = vpop.permute.xlu0 %3631  ;;  %v3017_v26 = vpack.c.bf16 %v3000_v13, %v2999_v4 }
 0x80b   :  { %13307 = vmatprep.subr.msk.bf16.mxu0 %vm1149_vm0, %v3632_v50  ;;  %v3655_v40 = vsel %vm1149_vm0, %v3632_v50, 0 }
 0x80c   :  { %v3733_v2 = vpop.permute.xlu1 %3732  ;;  %12832 = vmatprep.mubr.msk.bf16.mxu1 %vm1506_vm1, %v3017_v26  ;;  %12875 = vmatpush3.bf16.xpose.msra.mxu0 %v3655_v40 }
 0x80d   :  { %12833 = vmatmul.mubr.msk.bf16.gmra.mrb[100].mxu1 %vm1506_vm1, %v3018_v31  ;;  %v3754_v0 = vsel %vm1149_vm0, %v3733_v2, 0 }
 0x80e   :  { %12860 = vmatprep.mubr.msk.bf16.mxu1 %vm1149_vm0, %v3513_v12  ;;  %v3618_v43 = vpop.permute.xlu0 %3617 }
 0x80f   :  { %12876 = vmatprep.mubr.msk.bf16.mxu0 %vm1149_vm0, %v3618_v43 }
 0x810   :  { %v3620_v47 = vpop.permute.xlu1 %3619 }
 0x812   :  { %v3735_v11 = vpop.permute.xlu0 %3734 }
 0x813   :  { %12877 = vmatmul.mubr.msk.bf16.vlgmr.msra.gmra.mrb[128].mxu0 %vm1149_vm0, %v3620_v47  ;;  %v3757_v23 = vsel %vm1149_vm0, %v3735_v11, 0 }
 0x814   :  { %v3517_v30 = vpop.permute.xlu1 %3516 }
 0x815   :  { %12861 = vmatmul.mubr.msk.bf16.vlgmr.msra.gmra.mrb[104].mxu1 %vm1149_vm0, %v3515_v56 }
 0x816   :  { %12885 = vmatpush3.bf16.xpose.msra.mxu1 %v3751_v17  ;;  %12864 = vmatprep.mubr.msk.bf16.mxu1 %vm1149_vm0, %v3517_v30  ;;  %v3519_v61 = vpop.permute.xlu0 %3518 }
 0x817   :  { %13309 = vmatprep.subr.msk.bf16.mxu1 %vm1149_vm0, %v3733_v2 }
 0x818   :  { %v3737_v44 = vpop.permute.xlu1 %3736 }
 0x819   :  { %v3760_v38 = vsel %vm1149_vm0, %v3737_v44, 0 }
 0x81a   :  { %v3723_v62 = vpop.permute.xlu0 %3722 }
 0x81c   :  { %v3725_v8 = vpop.permute.xlu1 %3724 }
 0x81d   :  { %12865 = vmatmul.mubr.msk.bf16.gmra.mrb[108].mxu1 %vm1149_vm0, %v3519_v61 }
 0x81e   :  { %12887 = vmatpush3.bf16.xpose.msra.mxu1 %v3754_v0  ;;  %12892 = vmatprep.mubr.msk.bf16.mxu1 %vm1149_vm0, %v3723_v62  ;;  %v3622_v32 = vpop.permute.xlu0 %3621 }
 0x81f   :  { %13310 = vmatprep.subr.msk.bf16.mxu1 %vm1149_vm0, %v3735_v11  ;;  %12880 = vmatprep.mubr.msk.bf16.mxu0 %vm1149_vm0, %v3622_v32 }
 0x820   :  { %v3624_v60 = vpop.permute.xlu1 %3623 }
 0x821   :  { %12881 = vmatmul.mubr.msk.bf16.gmra.mrb[132].mxu0 %vm1149_vm0, %v3624_v60 }
 0x822   :  { %v3727_v12 = vpop.permute.xlu0 %3726 }
 0x824   :  { %v3729_v24 = vpop.permute.xlu1 %3728 }
 0x826   :  { %12889 = vmatpush3.bf16.xpose.msra.mxu1 %v3757_v23  ;;  %v4196_v19 = vpop.permute.xlu0 %4195 }
 0x827   :  { %13311 = vmatprep.subr.msk.bf16.mxu1 %vm1149_vm0, %v3737_v44  ;;  %12900 = vmatprep.subr.bf16.mxu0 %v4196_v19 }
 0x828   :  { %v4200_v48 = vpop.permute.xlu1 %4199  ;;  %12901 = vmatpush3.bf16.msra.mxu0 %v4196_v19 }
 0x82a   :  { %v4198_v56 = vpop.permute.xlu0 %4197 }
 0x82b   :  { %12902 = vmatprep.subr.bf16.mxu0 %v4198_v56 }
 0x82c   :  { %v4285_v5 = vpop.permute.xlu1 %4284  ;;  %12903 = vmatpush3.bf16.msra.mxu0 %v4198_v56 }
 0x82d   :  { %12904 = vmatprep.subr.bf16.mxu0 %v4200_v48 }
 0x82e   :  { %12891 = vmatpush3.bf16.xpose.msra.mxu1 %v3760_v38  ;;  %v4202_v22 = vpop.permute.xlu0 %4201 }
 0x82f   :  { %12916 = vmatprep.subr.bf16.mxu1 %v4285_v5 }
 0x830   :  { %v16758_v28 = vpop.permute.xlu1 %4373  ;;  %12905 = vmatpush3.bf16.msra.mxu0 %v4200_v48 }
 0x831   :  { %12906 = vmatprep.subr.bf16.mxu0 %v4202_v22 }
 0x832   :  { %v4287_v18 = vpop.permute.xlu0 %4286 }
 0x834   :  { %12907 = vmatpush3.bf16.msra.mxu0 %v4202_v22  ;;  %v4289_v49 = vpop.permute.xlu1 %4288 }
 0x835   :  { %12893 = vmatmul.mubr.msk.bf16.vlgmr.msra.gmra.mrb[112].mxu1 %vm1149_vm0, %v3725_v8  ;;  %12932 = vmatprep.subr.bf16.mxu0 %v16758_v28 }
 0x836   :  { %12896 = vmatprep.mubr.msk.bf16.mxu1 %vm1149_vm0, %v3727_v12  ;;  %12917 = vmatpush3.bf16.msra.mxu1 %v4285_v5  ;;  %v16763_v4 = vpop.permute.xlu0 %4375 }
 0x837   :  { %12918 = vmatprep.subr.bf16.mxu1 %v4287_v18 }
 0x838   :  { %v16765_v13 = vpop.permute.xlu1 %4377 }
 0x83a   :  { %12919 = vmatpush3.bf16.msra.mxu1 %v4287_v18  ;;  %v4291_v27 = vpop.permute.xlu0 %4290 }
 0x83b   :  { %12920 = vmatprep.subr.bf16.mxu1 %v4289_v49 }
 0x83c   :  { %v16768_v50 = vpop.permute.xlu1 %4462 }
 0x83d   :  { %12897 = vmatmul.mubr.msk.bf16.gmra.mrb[116].mxu1 %vm1149_vm0, %v3729_v24  ;;  %20322 = vst [vmem:[#allocation38_spill] sm:$0xff] %v16768_v50 }
 0x83e   :  { %12921 = vmatpush3.bf16.msra.mxu1 %v4289_v49 }
 0x83f   :  { %12922 = vmatprep.subr.bf16.mxu1 %v4291_v27 }
 0x842   :  { %v16770_v26 = vpop.f32.mrb[104].mxu0  ;;  %12923 = vmatpush3.bf16.msra.mxu1 %v4291_v27 }
 0x843   :  { %20323 = vst [vmem:[#allocation31_spill] sm:$0xff] %v16770_v26  ;;  %v16772_v40 = vpop.f32.mrb[105].mxu0  ;;  %12948 = vmatprep.subr.bf16.mxu1 %v16768_v50 }
 0x844   :  { %20324 = vst [vmem:[#allocation52_spill] sm:$0xff] %v16772_v40  ;;  %v16775_v31 = vpop.f32.mrb[106].mxu0 }
 0x845   :  { %20325 = vst [vmem:[#allocation45_spill] sm:$0xff] %v16775_v31  ;;  %v16779_v43 = vpop.f32.mrb[107].mxu0 }
 0x846   :  { %20326 = vst [vmem:[#allocation41_spill] sm:$0xff] %v16779_v43 }
 0x877   :  { %v16783_v11 = vpop.f32.mrb[108].mxu0 }
 0x878   :  { %20327 = vst [vmem:[#allocation51_spill] sm:$0xff] %v16783_v11  ;;  %v16785_v30 = vpop.f32.mrb[109].mxu0 }
 0x879   :  { %20328 = vst [vmem:[#allocation18_spill] sm:$0xff] %v16785_v30  ;;  %v16787_v17 = vpop.f32.mrb[110].mxu0 }
 0x87a   :  { %20329 = vst [vmem:[#allocation91_spill] sm:$0xff] %v16787_v17  ;;  %v16791_v44 = vpop.f32.mrb[111].mxu0 }
 0x87b   :  { %20330 = vst [vmem:[#allocation70_spill] sm:$0xff] %v16791_v44 }
 0x887   :  { %v16795_v8 = vpop.f32.mrb[112].mxu0 }
 0x888   :  { %20331 = vst [vmem:[#allocation87_spill] sm:$0xff] %v16795_v8  ;;  %v16797_v0 = vpop.f32.mrb[113].mxu0 }
 0x889   :  { %20332 = vst [vmem:[#allocation93_spill] sm:$0xff] %v16797_v0  ;;  %v16799_v32 = vpop.f32.mrb[114].mxu0 }
 0x88a   :  { %20333 = vst [vmem:[#allocation88_spill] sm:$0xff] %v16799_v32  ;;  %v16803_v12 = vpop.f32.mrb[115].mxu0 }
 0x88b   :  { %20334 = vst [vmem:[#allocation89_spill] sm:$0xff] %v16803_v12 }
 0x88f   :  { %v16807_v23 = vpop.f32.mrb[88].mxu1 }
 0x890   :  { %20335 = vst [vmem:[#allocation92_spill] sm:$0xff] %v16807_v23  ;;  %v16809_v19 = vpop.f32.mrb[89].mxu1 }
 0x891   :  { %20336 = vst [vmem:[#allocation17_spill] sm:$0xff] %v16809_v19  ;;  %v16811_v48 = vpop.f32.mrb[90].mxu1 }
 0x892   :  { %20337 = vst [vmem:[#allocation90_spill] sm:$0xff] %v16811_v48  ;;  %v16815_v5 = vpop.f32.mrb[91].mxu1 }
 0x893   :  { %20338 = vst [vmem:[#allocation22_spill] sm:$0xff] %v16815_v5 }
 0x89b   :  { %v16819_v22 = vpop.f32.mrb[92].mxu1 }
 0x89c   :  { %20339 = vst [vmem:[#allocation19_spill] sm:$0xff] %v16819_v22  ;;  %v16821_v18 = vpop.f32.mrb[93].mxu1 }
 0x89d   :  { %20340 = vst [vmem:[#allocation95_spill] sm:$0xff] %v16821_v18  ;;  %v16823_v49 = vpop.f32.mrb[94].mxu1 }
 0x89e   :  { %20341 = vst [vmem:[#allocation29_spill] sm:$0xff] %v16823_v49  ;;  %v16827_v60 = vpop.f32.mrb[95].mxu1 }
 0x89f   :  { %20342 = vst [vmem:[#allocation27_spill] sm:$0xff] %v16827_v60  ;;  %v16831_v56 = vpop.f32.mrb[116].mxu0 }
 0x8a0   :  { %20343 = vst [vmem:[#allocation25_spill] sm:$0xff] %v16831_v56  ;;  %v16833_v61 = vpop.f32.mrb[117].mxu0 }
 0x8a1   :  { %20344 = vst [vmem:[#allocation94_spill] sm:$0xff] %v16833_v61  ;;  %v16835_v2 = vpop.f32.mrb[118].mxu0 }
 0x8a2   :  { %20345 = vst [vmem:[#allocation16_spill] sm:$0xff] %v16835_v2  ;;  %v16839_v62 = vpop.f32.mrb[119].mxu0 }
 0x8a3   :  { %20346 = vst [vmem:[#allocation32_spill] sm:$0xff] %v16839_v62 }
 0x8a7   :  { %v16843_v27 = vpop.f32.mrb[96].mxu1 }
 0x8a8   :  { %20347 = vst [vmem:[#allocation96_spill] sm:$0xff] %v16843_v27  ;;  %v16845_v8 = vpop.f32.mrb[120].mxu0  ;;  %v16847_v32 = vpop.f32.mrb[97].mxu1 }
 0x8a9   :  { %20348 = vst [vmem:[#allocation97_spill] sm:$0xff] %v16847_v32  ;;  %v16849_v24 = vpop.f32.mrb[121].mxu0  ;;  %v3833_v22 = vsel %vm1506_vm1, %v16845_v8, -inf  ;;  %v16853_v49 = vpop.f32.mrb[98].mxu1 }
 0x8aa   :  { %20349 = vst [vmem:[#allocation98_spill] sm:$0xff] %v16853_v49  ;;  %3834 = vmax.xlane.f32.xlu0 %v3833_v22  ;;  %v16857_v56 = vpop.f32.mrb[122].mxu0  ;;  %v16859_v47 = vpop.f32.mrb[99].mxu1  ;;  %v3827_v0 = vsel %vm1506_vm1, %v16849_v24, -inf }
 0x8ab   :  { %20350 = vst [vmem:[#allocation99_spill] sm:$0xff] %v16859_v47  ;;  %v16863_v62 = vpop.f32.mrb[123].mxu0  ;;  %v3836_v22 = vsel %vm1506_vm1, %v16857_v56, -inf }
 0x8ac   :  { %v3830_v2 = vsel %vm1506_vm1, %v16863_v62, -inf }
 0x8ad   :  { %3831 = vmax.xlane.f32.xlu1 %v3830_v2 }
 0x8ae   :  { %3828 = vmax.xlane.f32.xlu0 %v3827_v0 }
 0x8b2   :  { %3837 = vmax.xlane.f32.xlu0 %v3836_v22 }
 0x8dc   :  { %v16871_v38 = vpop.f32.mrb[124].mxu0 }
 0x8dd   :  { %v16873_v27 = vpop.f32.mrb[125].mxu0  ;;  %v3845_v61 = vsel %vm1506_vm1, %v16871_v38, -inf }
 0x8de   :  { %3846 = vmax.xlane.f32.xlu0 %v3845_v61  ;;  %v16877_v49 = vpop.f32.mrb[126].mxu0  ;;  %v3839_v22 = vsel %vm1506_vm1, %v16873_v27, -inf }
 0x8df   :  { %v16879_v32 = vpop.f32.mrb[127].mxu0  ;;  %v3848_v2 = vsel %vm1506_vm1, %v16877_v49, -inf }
 0x8e0   :  { %v16883_v0 = vpop.f32.mrb[100].mxu1  ;;  %3849 = vmax.xlane.f32.xlu1 %v3848_v2  ;;  %v3842_v48 = vsel %vm1506_vm1, %v16879_v32, -inf }
 0x8e1   :  { %20351 = vst [vmem:[#allocation100_spill] sm:$0xff] %v16883_v0  ;;  %v16885_v47 = vpop.f32.mrb[101].mxu1 }
 0x8e2   :  { %20352 = vst [vmem:[#allocation101_spill] sm:$0xff] %v16885_v47  ;;  %v16889_v12 = vpop.f32.mrb[102].mxu1  ;;  %3840 = vmax.xlane.f32.xlu0 %v3839_v22 }
 0x8e3   :  { %20353 = vst [vmem:[#allocation102_spill] sm:$0xff] %v16889_v12  ;;  %v16893_v23 = vpop.f32.mrb[103].mxu1 }
 0x8e4   :  { %20354 = vst [vmem:[#allocation103_spill] sm:$0xff] %v16893_v23  ;;  %3843 = vmax.xlane.f32.xlu1 %v3842_v48 }
 0x8e6   :  { %v16899_v2 = vpop.f32.mrb[128].mxu0 }
 0x8e7   :  { %v16901_v60 = vpop.f32.mrb[129].mxu0  ;;  %v3881_v47 = vsel %vm1506_vm1, %v16899_v2, -inf }
 0x8e8   :  { %v16903_v11 = vpop.f32.mrb[104].mxu1  ;;  %v16905_v17 = vpop.f32.mrb[130].mxu0 }
 0x8e9   :  { %v16907_v22 = vpop.f32.mrb[105].mxu1  ;;  %v16909_v61 = vpop.f32.mrb[131].mxu0  ;;  %v3857_v0 = vsel %vm1506_vm1, %v16903_v11, -inf  ;;  %v3884_v23 = vsel %vm1506_vm1, %v16905_v17, -inf }
 0x8ea   :  { %v16913_v12 = vpop.f32.mrb[106].mxu1  ;;  %3858 = vmax.xlane.f32.xlu0 %v3857_v0  ;;  %v3851_v0 = vsel %vm1506_vm1, %v16907_v22, -inf }
 0x8eb   :  { %v16915_v18 = vpop.f32.mrb[107].mxu1  ;;  %v3860_v48 = vsel %vm1506_vm1, %v16913_v12, -inf }
 0x8ec   :  { %3861 = vmax.xlane.f32.xlu1 %v3860_v48  ;;  %v3854_v48 = vsel %vm1506_vm1, %v16915_v18, -inf }
 0x8ee   :  { %3882 = vmax.xlane.f32.xlu0 %v3881_v47 }
 0x8f0   :  { %3885 = vmax.xlane.f32.xlu1 %v3884_v23  ;;  %v16923_v19 = vpop.f32.mrb[108].mxu1  ;;  %v3875_v23 = vsel %vm1506_vm1, %v16901_v60, -inf }
 0x8f1   :  { %v16925_v5 = vpop.f32.mrb[109].mxu1  ;;  %v3869_v40 = vsel %vm1506_vm1, %v16923_v19, -inf }
 0x8f2   :  { %3852 = vmax.xlane.f32.xlu0 %v3851_v0  ;;  %v16929_v26 = vpop.f32.mrb[110].mxu1  ;;  %v3878_v0 = vsel %vm1506_vm1, %v16909_v61, -inf  ;;  %v3863_v16 = vsel %vm1506_vm1, %v16925_v5, -inf }
 0x8f3   :  { %v16931_v31 = vpop.f32.mrb[111].mxu1 }
 0x8f4   :  { %3855 = vmax.xlane.f32.xlu1 %v3854_v48  ;;  %v16935_v47 = vpop.f32.mrb[132].mxu0  ;;  %v3872_v48 = vsel %vm1506_vm1, %v16929_v26, -inf }
 0x8f5   :  { %v16937_v30 = vpop.f32.mrb[133].mxu0  ;;  %v3893_v43 = vsel %vm1506_vm1, %v16935_v47, -inf }
 0x8f6   :  { %3876 = vmax.xlane.f32.xlu0 %v3875_v23  ;;  %v16941_v44 = vpop.f32.mrb[134].mxu0 }
 0x8f7   :  { %v16943_v3 = vpop.f32.mrb[135].mxu0  ;;  %v3896_v23 = vsel %vm1506_vm1, %v16941_v44, -inf }
 0x8f8   :  { %3879 = vmax.xlane.f32.xlu1 %v3878_v0  ;;  %v3866_v0 = vsel %vm1506_vm1, %v16931_v31, -inf }
 0x8fa   :  { %3870 = vmax.xlane.f32.xlu0 %v3869_v40  ;;  %v3887_v40 = vsel %vm1506_vm1, %v16937_v30, -inf }
 0x8fc   :  { %3873 = vmax.xlane.f32.xlu1 %v3872_v48  ;;  %v3890_v48 = vsel %vm1506_vm1, %v16943_v3, -inf }
 0x8fe   :  { %3894 = vmax.xlane.f32.xlu0 %v3893_v43 }
 0x900   :  { %3897 = vmax.xlane.f32.xlu1 %v3896_v23 }
 0x902   :  { %3864 = vmax.xlane.f32.xlu0 %v3863_v16 }
 0x904   :  { %3867 = vmax.xlane.f32.xlu1 %v3866_v0  ;;  %v16973_v0 = vpop.permute.xlu1 %4464 }
 0x905   :  { %20355 = vst [vmem:[#allocation104_spill] sm:$0xff] %v16973_v0 }
 0x906   :  { %3888 = vmax.xlane.f32.xlu0 %v3887_v40 }
 0x908   :  { %v16963_v43 = vpop.f32.mrb[112].mxu1  ;;  %3891 = vmax.xlane.f32.xlu1 %v3890_v48  ;;  %v16983_v41 = vpop.permute.xlu1 %4466 }
 0x909   :  { %v16965_v34 = vpop.f32.mrb[113].mxu1  ;;  %v3905_v23 = vsel %vm1506_vm1, %v16963_v43, -inf  ;;  %20356 = vst [vmem:[#allocation105_spill] sm:$0xff] %v16983_v41 }
 0x90a   :  { %v16969_v16 = vpop.f32.mrb[114].mxu1  ;;  %3906 = vmax.xlane.f32.xlu0 %v3905_v23  ;;  %v3899_v40 = vsel %vm1506_vm1, %v16965_v34, -inf  ;;  %v16991_v23 = vpop.permute.xlu0 %4379 }
 0x90b   :  { %v16971_v20 = vpop.f32.mrb[115].mxu1 }
 0x90c   :  { %v16987_v59 = vpop.permute.xlu1 %4468 }
 0x90d   :  { %20357 = vst [vmem:[#allocation106_spill] sm:$0xff] %v16987_v59 }
 0x90e   :  { %3900 = vmax.xlane.f32.xlu0 %v3899_v40  ;;  %v16995_v40 = vpop.permute.xlu0 %4575 }
 0x910   :  { %v16977_v46 = vpop.f32.mrb[116].mxu1  ;;  %v16993_v0 = vpop.permute.xlu1 %4577 }
 0x911   :  { %v16979_v51 = vpop.f32.mrb[117].mxu1  ;;  %20358 = vst [vmem:[#allocation107_spill] sm:$0xff] %v16993_v0 }
 0x912   :  { %v16981_v48 = vpop.f32.mrb[118].mxu1  ;;  %v17001_v50 = vpop.permute.xlu0 %4579 }
 0x913   :  { %v16985_v10 = vpop.f32.mrb[119].mxu1  ;;  %20360 = vst [vmem:[#allocation109_spill] sm:$0xff] %v17001_v50  ;;  %v3908_v50 = vsel %vm1506_vm1, %v16969_v16, -inf }
 0x914   :  { %v16999_v58 = vpop.permute.xlu1 %4680 }
 0x915   :  { %20359 = vst [vmem:[#allocation108_spill] sm:$0xff] %v16999_v58 }
 0x916   :  { %v17005_v42 = vpop.permute.xlu0 %4682 }
 0x917   :  { %20362 = vst [vmem:[#allocation111_spill] sm:$0xff] %v17005_v42 }
 0x918   :  { %v17003_v41 = vpop.permute.xlu1 %4581 }
 0x919   :  { %4571 = vrot.lane.b32.xlu1 %v20190_v39, %s14914_s25  ;;  %20361 = vst [vmem:[#allocation110_spill] sm:$0xff] %v17003_v41 }
 0x91a   :  { %v17009_v39 = vpop.permute.xlu0 %4569 }
 0x91b   :  { %20364 = vst [vmem:[#allocation113_spill] sm:$0xff] %v17009_v39 }
 0x91c   :  { %v17007_v59 = vpop.permute.xlu1 %4567 }
 0x91d   :  { %20363 = vst [vmem:[#allocation112_spill] sm:$0xff] %v17007_v59 }
 0x920   :  { %v17011_v21 = vpop.permute.xlu1 %4684 }
 0x921   :  { %20365 = vst [vmem:[#allocation114_spill] sm:$0xff] %v17011_v21  ;;  %v3902_v21 = vsel %vm1506_vm1, %v16971_v20, -inf }
 0x924   :  { %4785 = vrot.lane.b32.xlu0 %v15469_v9, %s14914_s25 }
 0x937   :  { %v3835_v7 = vpop.xlane.xlu0 %3834 }
 0x938   :  { %v3925_v0 = vsub.f32 %v16845_v8, %v3835_v7 }
 0x93a   :  { %v3959_v36 = vmul.f32 1.442695, %v3925_v0  ;;  %v3832_v52 = vpop.xlane.xlu1 %3831 }
 0x93b   :  { %v3829_v9 = vpop.xlane.xlu0 %3828  ;;  %v3924_v42 = vsub.f32 %v16863_v62, %v3832_v52  ;;  %v3911_v52 = vsel %vm1506_vm1, %v16979_v51, -inf }
 0x93c   :  { %v3923_v58 = vsub.f32 %v16849_v24, %v3829_v9  ;;  %14034 = vpow2.f32 %v3959_v36  ;;  %v3917_v24 = vsel %vm1506_vm1, %v16977_v46, -inf  ;;  %v3920_v36 = vsel %vm1506_vm1, %v16981_v48, -inf }
 0x93d   :  { %3909 = vmax.xlane.f32.xlu1 %v3908_v50  ;;  %v3957_v7 = vmul.f32 1.442695, %v3924_v42  ;;  %v3914_v42 = vsel %vm1506_vm1, %v16985_v10, -inf }
 0x93e   :  { %v3955_v59 = vmul.f32 1.442695, %v3923_v58 }
 0x93f   :  { %v3838_v41 = vpop.xlane.xlu0 %3837 }
 0x940   :  { %v3926_v39 = vsub.f32 %v16857_v56, %v3838_v41  ;;  %14036 = vpow2.f32 %v3955_v59 }
 0x941   :  { %3903 = vmax.xlane.f32.xlu1 %v3902_v21 }
 0x942   :  { %v3961_v8 = vmul.f32 1.442695, %v3926_v39 }
 0x943   :  { %3918 = vmax.xlane.f32.xlu0 %v3917_v24 }
 0x944   :  { %14038 = vpow2.f32 %v3961_v8 }
 0x945   :  { %3921 = vmax.xlane.f32.xlu1 %v3920_v36  ;;  %14040 = vpow2.f32 %v3957_v7 }
 0x946   :  { %v17027_v41 = vpop.eup %14034 }
 0x947   :  { %3912 = vmax.xlane.f32.xlu0 %v3911_v52  ;;  %v4025_v58 = vsel %vm1506_vm1, %v17027_v41, 0.0 }
 0x949   :  { %3915 = vmax.xlane.f32.xlu1 %v3914_v42 }
 0x94a   :  { %v17033_v21 = vpop.eup %14036 }
 0x94b   :  { %4026 = vadd.xlane.f32.xlu0 %v4025_v58  ;;  %v4019_v50 = vsel %vm1506_vm1, %v17033_v21, 0.0 }
 0x94e   :  { %v17035_v59 = vpop.eup %14038 }
 0x94f   :  { %4020 = vadd.xlane.f32.xlu0 %v4019_v50  ;;  %v4028_v62 = vsel %vm1506_vm1, %v17035_v59, 0.0  ;;  %v17041_v56 = vpop.eup %14040 }
 0x950   :  { %4029 = vadd.xlane.f32.xlu1 %v4028_v62  ;;  %v4022_v0 = vsel %vm1506_vm1, %v17041_v56, 0.0 }
 0x954   :  { %4023 = vadd.xlane.f32.xlu1 %v4022_v0 }
 0x96b   :  { %v3847_v39 = vpop.xlane.xlu0 %3846 }
 0x96c   :  { %v3929_v9 = vsub.f32 %v16871_v38, %v3847_v39 }
 0x96d   :  { %v3850_v7 = vpop.xlane.xlu1 %3849 }
 0x96e   :  { %v3967_v8 = vmul.f32 1.442695, %v3929_v9  ;;  %v3930_v24 = vsub.f32 %v16877_v49, %v3850_v7 }
 0x96f   :  { %v3841_v36 = vpop.xlane.xlu0 %3840 }
 0x970   :  { %14042 = vpow2.f32 %v3967_v8  ;;  %v3969_v52 = vmul.f32 1.442695, %v3930_v24  ;;  %v3927_v42 = vsub.f32 %v16873_v27, %v3841_v36 }
 0x971   :  { %v3844_v58 = vpop.xlane.xlu1 %3843 }
 0x972   :  { %14044 = vpow2.f32 %v3969_v52  ;;  %v3963_v50 = vmul.f32 1.442695, %v3927_v42  ;;  %v3928_v62 = vsub.f32 %v16879_v32, %v3844_v58 }
 0x974   :  { %14046 = vpow2.f32 %v3963_v50  ;;  %v3965_v14 = vmul.f32 1.442695, %v3928_v62 }
 0x976   :  { %14048 = vpow2.f32 %v3965_v14 }
 0x977   :  { %v3859_v0 = vpop.xlane.xlu0 %3858 }
 0x978   :  { %v3933_v38 = vsub.f32 %v16903_v11, %v3859_v0 }
 0x979   :  { %v3862_v39 = vpop.xlane.xlu1 %3861 }
 0x97a   :  { %v17050_v9 = vpop.eup %14042  ;;  %v3975_v49 = vmul.f32 1.442695, %v3933_v38  ;;  %v3934_v0 = vsub.f32 %v16913_v12, %v3862_v39 }
 0x97b   :  { %v3883_v7 = vpop.xlane.xlu0 %3882  ;;  %v4037_v8 = vsel %vm1506_vm1, %v17050_v9, 0.0 }
 0x97c   :  { %v17054_v27 = vpop.eup %14044  ;;  %14050 = vpow2.f32 %v3975_v49  ;;  %v3941_v24 = vsub.f32 %v16899_v2, %v3883_v7  ;;  %4038 = vadd.xlane.f32.xlu1 %v4037_v8 }
 0x97d   :  { %v3886_v32 = vpop.xlane.xlu1 %3885  ;;  %v4040_v42 = vsel %vm1506_vm1, %v17054_v27, 0.0 }
 0x97e   :  { %v17057_v36 = vpop.eup %14046  ;;  %v3991_v14 = vmul.f32 1.442695, %v3941_v24  ;;  %v3942_v11 = vsub.f32 %v16905_v17, %v3886_v32  ;;  %v3977_v24 = vmul.f32 1.442695, %v3934_v0 }
 0x97f   :  { %v3853_v52 = vpop.xlane.xlu0 %3852  ;;  %v4031_v58 = vsel %vm1506_vm1, %v17057_v36, 0.0 }
 0x980   :  { %v17064_v50 = vpop.eup %14048  ;;  %14052 = vpow2.f32 %v3991_v14  ;;  %v3993_v62 = vmul.f32 1.442695, %v3942_v11  ;;  %v3931_v2 = vsub.f32 %v16907_v22, %v3853_v52  ;;  %4041 = vadd.xlane.f32.xlu1 %v4040_v42  ;;  %4032 = vadd.xlane.f32.xlu0 %v4031_v58 }
 0x981   :  { %v3856_v38 = vpop.xlane.xlu1 %3855  ;;  %v4034_v7 = vsel %vm1506_vm1, %v17064_v50, 0.0 }
 0x982   :  { %14054 = vpow2.f32 %v3993_v62  ;;  %v3971_v17 = vmul.f32 1.442695, %v3931_v2  ;;  %v3932_v32 = vsub.f32 %v16915_v18, %v3856_v38 }
 0x983   :  { %v3877_v49 = vpop.xlane.xlu0 %3876 }
 0x984   :  { %14056 = vpow2.f32 %v3971_v17  ;;  %v3939_v8 = vsub.f32 %v16901_v60, %v3877_v49  ;;  %4035 = vadd.xlane.f32.xlu1 %v4034_v7  ;;  %v3973_v58 = vmul.f32 1.442695, %v3932_v32 }
 0x985   :  { %v3880_v14 = vpop.xlane.xlu1 %3879 }
 0x986   :  { %v17072_v22 = vpop.eup %14050  ;;  %v3987_v11 = vmul.f32 1.442695, %v3939_v8  ;;  %v3940_v12 = vsub.f32 %v16909_v61, %v3880_v14 }
 0x987   :  { %v3871_v39 = vpop.xlane.xlu0 %3870  ;;  %v4049_v52 = vsel %vm1506_vm1, %v17072_v22, 0.0 }
 0x988   :  { %14058 = vpow2.f32 %v3987_v11  ;;  %v3989_v42 = vmul.f32 1.442695, %v3940_v12  ;;  %4050 = vadd.xlane.f32.xlu1 %v4049_v52  ;;  %v3937_v18 = vsub.f32 %v16923_v19, %v3871_v39 }
 0x989   :  { %14060 = vpow2.f32 %v3977_v24  ;;  %v3874_v60 = vpop.xlane.xlu1 %3873 }
 0x98a   :  { %v17077_v62 = vpop.eup %14052  ;;  %14062 = vpow2.f32 %v3989_v42  ;;  %v3938_v2 = vsub.f32 %v16929_v26, %v3874_v60  ;;  %v3983_v19 = vmul.f32 1.442695, %v3937_v18 }
 0x98b   :  { %v3895_v0 = vpop.xlane.xlu0 %3894  ;;  %v4073_v61 = vsel %vm1506_vm1, %v17077_v62, 0.0  ;;  %14064 = vpow2.f32 %v3973_v58 }
 0x98c   :  { %v17083_v38 = vpop.eup %14054  ;;  %v3985_v17 = vmul.f32 1.442695, %v3938_v2  ;;  %4074 = vadd.xlane.f32.xlu1 %v4073_v61  ;;  %v3945_v49 = vsub.f32 %v16935_v47, %v3895_v0 }
 0x98d   :  { %v3898_v7 = vpop.xlane.xlu1 %3897  ;;  %v4076_v8 = vsel %vm1506_vm1, %v17083_v38, 0.0 }
 0x98e   :  { %v17088_v24 = vpop.eup %14056  ;;  %14066 = vpow2.f32 %v3985_v17  ;;  %4077 = vadd.xlane.f32.xlu0 %v4076_v8  ;;  %v3999_v14 = vmul.f32 1.442695, %v3945_v49 }
 0x98f   :  { %v3865_v26 = vpop.xlane.xlu0 %3864  ;;  %v4043_v32 = vsel %vm1506_vm1, %v17088_v24, 0.0  ;;  %14068 = vpow2.f32 %v3983_v19 }
 0x990   :  { %4044 = vadd.xlane.f32.xlu1 %v4043_v32  ;;  %v3935_v11 = vsub.f32 %v16925_v5, %v3865_v26  ;;  %14070 = vpow2.f32 %v3999_v14  ;;  %v3946_v14 = vsub.f32 %v16941_v44, %v3898_v7 }
 0x991   :  { %v3868_v12 = vpop.xlane.xlu1 %3867 }
 0x992   :  { %v17093_v39 = vpop.eup %14058  ;;  %v3936_v47 = vsub.f32 %v16931_v31, %v3868_v12  ;;  %v3979_v2 = vmul.f32 1.442695, %v3935_v11  ;;  %v4001_v12 = vmul.f32 1.442695, %v3946_v14 }
 0x993   :  { %v17096_v52 = vpop.eup %14060  ;;  %v3889_v42 = vpop.xlane.xlu0 %3888  ;;  %v4067_v58 = vsel %vm1506_vm1, %v17093_v39, 0.0 }
 0x994   :  { %v17100_v60 = vpop.eup %14062  ;;  %v3981_v18 = vmul.f32 1.442695, %v3936_v47  ;;  %4068 = vadd.xlane.f32.xlu1 %v4067_v58  ;;  %v3943_v61 = vsub.f32 %v16937_v30, %v3889_v42  ;;  %v4052_v49 = vsel %vm1506_vm1, %v17096_v52, 0.0 }
 0x995   :  { %v3892_v0 = vpop.xlane.xlu1 %3891  ;;  %v4070_v5 = vsel %vm1506_vm1, %v17100_v60, 0.0  ;;  %v17106_v17 = vpop.eup %14064 }
 0x996   :  { %14072 = vpow2.f32 %v3981_v18  ;;  %v3944_v31 = vsub.f32 %v16943_v3, %v3892_v0  ;;  %4071 = vadd.xlane.f32.xlu0 %v4070_v5  ;;  %v3995_v30 = vmul.f32 1.442695, %v3943_v61  ;;  %v4046_v3 = vsel %vm1506_vm1, %v17106_v17, 0.0 }
 0x997   :  { %14074 = vpow2.f32 %v3979_v2  ;;  %v3907_v26 = vpop.xlane.xlu0 %3906 }
 0x998   :  { %v17110_v8 = vpop.eup %14066  ;;  %v3997_v19 = vmul.f32 1.442695, %v3944_v31  ;;  %4053 = vadd.xlane.f32.xlu1 %v4052_v49  ;;  %v3949_v47 = vsub.f32 %v16963_v43, %v3907_v26 }
 0x999   :  { %v4064_v32 = vsel %vm1506_vm1, %v17110_v8, 0.0  ;;  %v17117_v11 = vpop.eup %14068 }
 0x99a   :  { %14076 = vpow2.f32 %v3997_v19  ;;  %4065 = vadd.xlane.f32.xlu0 %v4064_v32  ;;  %v17120_v42 = vpop.eup %14070  ;;  %v4061_v18 = vsel %vm1506_vm1, %v17117_v11, 0.0  ;;  %v4007_v2 = vmul.f32 1.442695, %v3949_v47 }
 0x99b   :  { %14078 = vpow2.f32 %v3995_v30  ;;  %v3901_v58 = vpop.xlane.xlu0 %3900  ;;  %v4085_v43 = vsel %vm1506_vm1, %v17120_v42, 0.0 }
 0x99c   :  { %4047 = vadd.xlane.f32.xlu1 %v4046_v3  ;;  %14080 = vpow2.f32 %v4001_v12  ;;  %v3947_v0 = vsub.f32 %v16965_v34, %v3901_v58  ;;  %v17155_v58 = vpop.permute.xlu1 %4571 }
 0x99d   :  { %14082 = vpow2.f32 %v4007_v2 }
 0x99e   :  { %v4003_v49 = vmul.f32 1.442695, %v3947_v0 }
 0x99f   :  { %v17160_v2 = vpop.permute.xlu0 %4785 }
 0x9a0   :  { %v17124_v44 = vpop.eup %14072  ;;  %4062 = vadd.xlane.f32.xlu1 %v4061_v18  ;;  %14084 = vpow2.f32 %v4003_v49 }
 0x9a1   :  { %v4058_v7 = vsel %vm1506_vm1, %v17124_v44, 0.0  ;;  %v17129_v5 = vpop.eup %14074 }
 0x9a2   :  { %4059 = vadd.xlane.f32.xlu0 %v4058_v7  ;;  %v4055_v19 = vsel %vm1506_vm1, %v17129_v5, 0.0 }
 0x9a4   :  { %v17133_v61 = vpop.eup %14076  ;;  %4086 = vadd.xlane.f32.xlu1 %v4085_v43 }
 0x9a5   :  { %v4082_v31 = vsel %vm1506_vm1, %v17133_v61, 0.0  ;;  %v17139_v26 = vpop.eup %14078 }
 0x9a6   :  { %4083 = vadd.xlane.f32.xlu0 %v4082_v31  ;;  %v4079_v34 = vsel %vm1506_vm1, %v17139_v26, 0.0  ;;  %v17143_v32 = vpop.eup %14080 }
 0x9a7   :  { %v4088_v14 = vsel %vm1506_vm1, %v17143_v32, 0.0  ;;  %v17147_v30 = vpop.eup %14082 }
 0x9a8   :  { %4056 = vadd.xlane.f32.xlu1 %v4055_v19  ;;  %20366 = vst [vmem:[#allocation115_spill] sm:$0xff] %v17147_v30  ;;  %v4097_v3 = vsel %vm1506_vm1, %v17147_v30, 0.0 }
 0x9aa   :  { %v17151_v12 = vpop.eup %14084 }
 0x9ab   :  { %20367 = vst [vmem:[#allocation116_spill] sm:$0xff] %v17151_v12  ;;  %v4091_v47 = vsel %vm1506_vm1, %v17151_v12, 0.0 }
 0x9ac   :  { %4080 = vadd.xlane.f32.xlu1 %v4079_v34 }
 0x9b0   :  { %4089 = vadd.xlane.f32.xlu1 %v4088_v14 }
 0x9b4   :  { %4098 = vadd.xlane.f32.xlu1 %v4097_v3 }
 0x9b8   :  { %4092 = vadd.xlane.f32.xlu1 %v4091_v47 }
 0x9c9   :  { %4686 = vrot.lane.b32.xlu1 %v15457_v37, %s14914_s25 }
 0x9ca   :  { %v3910_v18 = vpop.xlane.xlu1 %3909 }
 0x9cb   :  { %v3950_v7 = vsub.f32 %v16969_v16, %v3910_v18 }
 0x9cd   :  { %v4009_v0 = vmul.f32 1.442695, %v3950_v7 }
 0x9ce   :  { %v3904_v43 = vpop.xlane.xlu1 %3903 }
 0x9cf   :  { %14086 = vpow2.f32 %v4009_v0  ;;  %v3948_v31 = vsub.f32 %v16971_v20, %v3904_v43 }
 0x9d0   :  { %v3919_v49 = vpop.xlane.xlu0 %3918 }
 0x9d1   :  { %v4005_v19 = vmul.f32 1.442695, %v3948_v31  ;;  %v3953_v3 = vsub.f32 %v16977_v46, %v3919_v49 }
 0x9d2   :  { %v3922_v34 = vpop.xlane.xlu1 %3921 }
 0x9d3   :  { %14088 = vpow2.f32 %v4005_v19  ;;  %v4015_v12 = vmul.f32 1.442695, %v3953_v3  ;;  %v3954_v46 = vsub.f32 %v16981_v48, %v3922_v34 }
 0x9d4   :  { %v3913_v14 = vpop.xlane.xlu0 %3912 }
 0x9d5   :  { %v3951_v18 = vsub.f32 %v16979_v51, %v3913_v14  ;;  %14090 = vpow2.f32 %v4015_v12  ;;  %v4017_v19 = vmul.f32 1.442695, %v3954_v46 }
 0x9d6   :  { %v3916_v37 = vpop.xlane.xlu1 %3915 }
 0x9d7   :  { %v4011_v31 = vmul.f32 1.442695, %v3951_v18 }
 0x9d8   :  { %v4027_v47 = vpop.xlane.xlu0 %4026 }
 0x9d9   :  { %v17164_v30 = vpop.eup %14086 }
 0x9da   :  { %v4100_v16 = vsel %vm1506_vm1, %v17164_v30, 0.0 }
 0x9db   :  { %4101 = vadd.xlane.f32.xlu0 %v4100_v16 }
 0x9dc   :  { %v4021_v0 = vpop.xlane.xlu0 %4020 }
 0x9dd   :  { %v17169_v7 = vpop.eup %14088  ;;  %v4030_v20 = vpop.xlane.xlu1 %4029 }
 0x9de   :  { %20368 = vst [vmem:[#allocation117_spill] sm:$0xff] %v17169_v7  ;;  %v4094_v43 = vsel %vm1506_vm1, %v17169_v7, 0.0  ;;  %14092 = vrcp.f32 %v4030_v20 }
 0x9df   :  { %4095 = vadd.xlane.f32.xlu0 %v4094_v43  ;;  %14094 = vrcp.f32 %v4021_v0  ;;  %v17174_v51 = vpop.eup %14090 }
 0x9e0   :  { %14096 = vrcp.f32 %v4027_v47  ;;  %v4109_v48 = vsel %vm1506_vm1, %v17174_v51, 0.0 }
 0x9e1   :  { %v4024_v49 = vpop.xlane.xlu1 %4023 }
 0x9e2   :  { %14098 = vrcp.f32 %v4024_v49 }
 0x9e3   :  { %14100 = vpow2.f32 %v4011_v31 }
 0x9e4   :  { %14102 = vpow2.f32 %v4017_v19 }
 0x9e8   :  { %v14093_v14 = vpop.eup %14092 }
 0x9e9   :  { %v14095_v3 = vpop.eup %14094  ;;  %v4150_v7 = vmul.f32 %v14093_v14, %v17035_v59 }
 0x9ea   :  { %v14097_v12 = vpop.eup %14096  ;;  %v4147_v47 = vmul.f32 %v14095_v3, %v17033_v21 }
 0x9eb   :  { %v4149_v20 = vmul.f32 %v14097_v12, %v17027_v41  ;;  %v3952_v41 = vsub.f32 %v16985_v10, %v3916_v37 }
 0x9ec   :  { %v14099_v16 = vpop.eup %14098 }
 0x9ed   :  { %v17179_v34 = vpop.eup %14100  ;;  %4110 = vadd.xlane.f32.xlu1 %v4109_v48  ;;  %v4148_v18 = vmul.f32 %v14099_v16, %v17041_v56  ;;  %v4180_v43 = vpack.c.bf16 %v4150_v7, %v4149_v20 }
 0x9ee   :  { %v4103_v46 = vsel %vm1506_vm1, %v17179_v34, 0.0  ;;  %v17186_v31 = vpop.eup %14102 }
 0x9ef   :  { %v4179_v0 = vpack.c.bf16 %v4148_v18, %v4147_v47  ;;  %v4112_v21 = vsel %vm1506_vm1, %v17186_v31, 0.0 }
 0x9f1   :  { %12908 = vmatprep.mubr.msk.bf16.mxu0 %vm1506_vm1, %v4179_v0  ;;  %4104 = vadd.xlane.f32.xlu1 %v4103_v46 }
 0x9f2   :  { %12909 = vmatmul.mubr.msk.bf16.vlgmr.msra.gmra.mrb[136].mxu0 %vm1506_vm1, %v4180_v43 }
 0x9f3   :  { %12933 = vmatpush3.bf16.msra.mxu0 %v16758_v28  ;;  %v4013_v28 = vmul.f32 1.442695, %v3952_v41 }
 0x9f4   :  { %12934 = vmatprep.subr.bf16.mxu0 %v16763_v4 }
 0x9f5   :  { %4573 = vrot.lane.b32.xlu0 %v20189_v15, %s14914_s25  ;;  %4113 = vadd.xlane.f32.xlu1 %v4112_v21  ;;  %14104 = vpow2.f32 %v4013_v28 }
 0x9f7   :  { %12935 = vmatpush3.bf16.msra.mxu0 %v16763_v4 }
 0x9f8   :  { %12936 = vmatprep.subr.bf16.mxu0 %v16765_v13 }
 0x9fb   :  { %12937 = vmatpush3.bf16.msra.mxu0 %v16765_v13 }
 0x9fc   :  { %12938 = vmatprep.subr.bf16.mxu0 %v16991_v23 }
 0x9ff   :  { %12939 = vmatpush3.bf16.msra.mxu0 %v16991_v23  ;;  %v17210_v10 = vpop.eup %14104 }
 0xa00   :  { %13312 = vmatprep.subr.msk.bf16.mxu0 %vm1149_vm0, %v16995_v40 }
 0xa06   :  { %4672 = vrot.lane.b32.xlu1 %v15409_v45, %s14914_s25  ;;  %v4106_v45 = vsel %vm1506_vm1, %v17210_v10, 0.0 }
 0xa09   :  { %v4039_v15 = vpop.xlane.xlu1 %4038 }
 0xa0a   :  { %4789 = vrot.lane.b32.xlu1 %v15493_v6, %s14914_s25 }
 0xa0d   :  { %v4042_v4 = vpop.xlane.xlu1 %4041  ;;  %v4033_v13 = vpop.xlane.xlu0 %4032 }
 0xa0e   :  { %4676 = vrot.lane.b32.xlu1 %v20277_v35, %s14914_s25  ;;  %14106 = vrcp.f32 %v4042_v4 }
 0xa0f   :  { %14108 = vrcp.f32 %v4033_v13 }
 0xa10   :  { %14110 = vrcp.f32 %v4039_v15 }
 0xa11   :  { %v4036_v23 = vpop.xlane.xlu1 %4035 }
 0xa12   :  { %14112 = vrcp.f32 %v4036_v23  ;;  %4791 = vrot.lane.b32.xlu1 %v20192_v55, %s14914_s25 }
 0xa14   :  { %4107 = vadd.xlane.f32.xlu0 %v4106_v45 }
 0xa15   :  { %v4051_v6 = vpop.xlane.xlu1 %4050 }
 0xa16   :  { %4777 = vrot.lane.b32.xlu1 %v20276_v54, %s14914_s25 }
 0xa18   :  { %v14107_v59 = vpop.eup %14106 }
 0xa19   :  { %v4075_v35 = vpop.xlane.xlu1 %4074  ;;  %v14109_v56 = vpop.eup %14108  ;;  %v4154_v49 = vmul.f32 %v14107_v59, %v17054_v27 }
 0xa1a   :  { %4894 = vrot.lane.b32.xlu1 %v20278_v1, %s14914_s25  ;;  %v14111_v37 = vpop.eup %14110  ;;  %v4151_v55 = vmul.f32 %v14109_v56, %v17057_v36  ;;  %v20374_v56 = vld [vmem:[#allocation33_spill] sm:$0xff] }
 0xa1b   :  { %v4078_v3 = vpop.xlane.xlu0 %4077  ;;  %v4153_v54 = vmul.f32 %v14111_v37, %v17050_v9 }
 0xa1c   :  { %v14113_v7 = vpop.eup %14112  ;;  %14114 = vrcp.f32 %v4078_v3 }
 0xa1d   :  { %v4045_v19 = vpop.xlane.xlu1 %4044  ;;  %v4152_v14 = vmul.f32 %v14113_v7, %v17064_v50  ;;  %v4182_v16 = vpack.c.bf16 %v4154_v49, %v4153_v54  ;;  %v20377_v7 = vld [vmem:[#allocation36_spill] sm:$0xff]  ;;  %v20379_v54 = vld [vmem:[#allocation109_spill] sm:$0xff] }
 0xa1e   :  { %4783 = vrot.lane.b32.xlu1 %v20283_v57, %s14914_s25  ;;  %v20378_v49 = vld [vmem:[#allocation104_spill] sm:$0xff] }
 0xa1f   :  { %v4181_v12 = vpack.c.bf16 %v4152_v14, %v4151_v55 }
 0xa21   :  { %v4069_v48 = vpop.xlane.xlu1 %4068  ;;  %12912 = vmatprep.mubr.msk.bf16.mxu0 %vm1506_vm1, %v4181_v12  ;;  %v20380_v12 = vld [vmem:[#allocation39_spill] sm:$0xff] }
 0xa22   :  { %14116 = vrcp.f32 %v4069_v48  ;;  %4882 = vrot.lane.b32.xlu1 %v20282_v63, %s14914_s25  ;;  %12913 = vmatmul.mubr.msk.bf16.gmra.mrb[140].mxu0 %vm1506_vm1, %v4182_v16  ;;  %v20381_v48 = vld [vmem:[#allocation42_spill] sm:$0xff] }
 0xa23   :  { %14118 = vrcp.f32 %v4075_v35  ;;  %v4072_v1 = vpop.xlane.xlu0 %4071  ;;  %v20372_v35 = vld [vmem:[#allocation107_spill] sm:$0xff] }
 0xa24   :  { %14120 = vrcp.f32 %v4072_v1 }
 0xa25   :  { %v4054_v27 = vpop.xlane.xlu1 %4053 }
 0xa26   :  { %4886 = vrot.lane.b32.xlu1 %v20286_v29, %s14914_s25  ;;  %14122 = vrcp.f32 %v4054_v27  ;;  %v14115_v63 = vpop.eup %14114  ;;  %v20369_v29 = vld [vmem:[#allocation30_spill] sm:$0xff]  ;;  %v20382_v27 = vld [vmem:[#allocation105_spill] sm:$0xff] }
 0xa27   :  { %14124 = vrcp.f32 %v4045_v19  ;;  %v4066_v9 = vpop.xlane.xlu0 %4065  ;;  %v4166_v20 = vmul.f32 %v14115_v63, %v17083_v38  ;;  %v20370_v38 = vld [vmem:[#allocation46_spill] sm:$0xff]  ;;  %v4599_v19 = vsel %vm1149_vm0, %v20372_v35, 0 }
 0xa28   :  { %14126 = vrcp.f32 %v4051_v6 }
 0xa29   :  { %v4048_v57 = vpop.xlane.xlu1 %4047 }
 0xa2a   :  { %14128 = vrcp.f32 %v4048_v57  ;;  %4787 = vrot.lane.b32.xlu0 %v15483_v25, %s14914_s25  ;;  %5357 = vrot.lane.b32.xlu1 %v20290_v53, %s14914_s25 }
 0xa2c   :  { %v14117_v36 = vpop.eup %14116 }
 0xa2d   :  { %v14119_v50 = vpop.eup %14118  ;;  %v4063_v47 = vpop.xlane.xlu1 %4062  ;;  %v4163_v25 = vmul.f32 %v14117_v36, %v17093_v39 }
 0xa2e   :  { %v14121_v18 = vpop.eup %14120  ;;  %4674 = vrot.lane.b32.xlu0 %v15423_v33, %s14914_s25  ;;  %5444 = vrot.lane.b32.xlu1 %v20369_v29, %s14914_s25  ;;  %v4165_v53 = vmul.f32 %v14119_v50, %v17077_v62  ;;  %v20371_v33 = vld [vmem:[#allocation28_spill] sm:$0xff]  ;;  %14130 = vrcp.f32 %v4063_v47  ;;  %v4596_v62 = vsel %vm1149_vm0, %v16995_v40, 0  ;;  %v20384_v29 = vld [vmem:[#allocation106_spill] sm:$0xff] }
 0xa2f   :  { %v4060_v0 = vpop.xlane.xlu0 %4059  ;;  %v4164_v43 = vmul.f32 %v14121_v18, %v17100_v60  ;;  %v20383_v50 = vld [vmem:[#allocation40_spill] sm:$0xff] }
 0xa30   :  { %v14123_v46 = vpop.eup %14122  ;;  %v4188_v15 = vpack.c.bf16 %v4166_v20, %v4165_v53  ;;  %14132 = vrcp.f32 %v4060_v0  ;;  %v4602_v0 = vsel %vm1149_vm0, %v20379_v54, 0 }
 0xa31   :  { %v4087_v21 = vpop.xlane.xlu1 %4086  ;;  %v4187_v41 = vpack.c.bf16 %v4164_v43, %v4163_v25  ;;  %v14125_v28 = vpop.eup %14124  ;;  %v4158_v60 = vmul.f32 %v14123_v46, %v17096_v52  ;;  %14134 = vrcp.f32 %v4066_v9  ;;  %v20373_v52 = vld [vmem:[#allocation35_spill] sm:$0xff]  ;;  %v20385_v43 = vld [vmem:[#allocation110_spill] sm:$0xff] }
 0xa32   :  { %4890 = vrot.lane.b32.xlu0 %v20370_v38, %s14914_s25  ;;  %5446 = vrot.lane.b32.xlu1 %v20371_v33, %s14914_s25  ;;  %v14127_v4 = vpop.eup %14126  ;;  %v4155_v45 = vmul.f32 %v14125_v28, %v17088_v24  ;;  %v20389_v38 = vld [vmem:[#allocation53_spill] sm:$0xff]  ;;  %v20390_v33 = vld [vmem:[#allocation112_spill] sm:$0xff] }
 0xa33   :  { %12940 = vmatprep.mubr.msk.bf16.mxu0 %vm1506_vm1, %v4187_v41  ;;  %v4084_v13 = vpop.xlane.xlu0 %4083  ;;  %v4157_v59 = vmul.f32 %v14127_v4, %v17072_v22  ;;  %v20376_v22 = vld [vmem:[#allocation38_spill] sm:$0xff]  ;;  %v20388_v41 = vld [vmem:[#allocation47_spill] sm:$0xff]  ;;  %v4806_v4 = vsel %vm1149_vm0, %v17160_v2, 0 }
 0xa34   :  { %v14129_v39 = vpop.eup %14128  ;;  %12941 = vmatmul.mubr.msk.bf16.vlgmr.msra.gmra.mrb[144].mxu0 %vm1506_vm1, %v4188_v15  ;;  %v4605_v15 = vsel %vm1149_vm0, %v20385_v43, 0 }
 0xa35   :  { %12965 = vmatpush3.bf16.xpose.msra.mxu0 %v4596_v62  ;;  %v4057_v23 = vpop.xlane.xlu1 %4056  ;;  %v4156_v6 = vmul.f32 %v14129_v39, %v17106_v17  ;;  %v4184_v37 = vpack.c.bf16 %v4158_v60, %v4157_v59  ;;  %v20375_v17 = vld [vmem:[#allocation49_spill] sm:$0xff]  ;;  %v20393_v39 = vld [vmem:[#allocation26_spill] sm:$0xff]  ;;  %v20394_v60 = vld [vmem:[#allocation24_spill] sm:$0xff] }
 0xa36   :  { %14136 = vrcp.f32 %v4057_v23  ;;  %13313 = vmatprep.subr.msk.bf16.mxu0 %vm1149_vm0, %v20372_v35  ;;  %4678 = vrot.lane.b32.xlu0 %v20373_v52, %s14914_s25  ;;  %v20395_v62 = vld [vmem:[#allocation34_spill] sm:$0xff]  ;;  %v20396_v23 = vld [vmem:[#allocation37_spill] sm:$0xff] }
 0xa37   :  { %5450 = vrot.lane.b32.xlu1 %v20374_v56, %s14914_s25  ;;  %v4183_v40 = vpack.c.bf16 %v4156_v6, %v4155_v45  ;;  %14138 = vrcp.f32 %v4084_v13  ;;  %v20397_v45 = vld [vmem:[#allocation44_spill] sm:$0xff] }
 0xa38   :  { %v14131_v55 = vpop.eup %14130 }
 0xa39   :  { %12924 = vmatprep.mubr.msk.bf16.mxu1 %vm1506_vm1, %v4183_v40  ;;  %v4081_v24 = vpop.xlane.xlu1 %4080  ;;  %v4161_v9 = vmul.f32 %v14131_v55, %v17117_v11 }
 0xa3a   :  { %14140 = vrcp.f32 %v4081_v24  ;;  %4892 = vrot.lane.b32.xlu0 %v20375_v17, %s14914_s25  ;;  %12925 = vmatmul.mubr.msk.bf16.vlgmr.msra.gmra.mrb[120].mxu1 %vm1506_vm1, %v4184_v37  ;;  %v14133_v3 = vpop.eup %14132  ;;  %v20398_v17 = vld [vmem:[#allocation116_spill] sm:$0xff] }
 0xa3b   :  { %12949 = vmatpush3.bf16.msra.mxu1 %v20376_v22  ;;  %5535 = vrot.lane.b32.xlu1 %v20377_v7, %s14914_s25  ;;  %14142 = vrcp.f32 %v4087_v21  ;;  %v14135_v16 = vpop.eup %14134  ;;  %v4160_v63 = vmul.f32 %v14133_v3, %v17124_v44  ;;  %v20387_v21 = vld [vmem:[#allocation108_spill] sm:$0xff]  ;;  %v20399_v7 = vld [vmem:[#allocation117_spill] sm:$0xff] }
 0xa3c   :  { %12950 = vmatprep.subr.bf16.mxu1 %v20378_v49  ;;  %v4162_v18 = vmul.f32 %v14135_v16, %v17110_v8  ;;  %v20386_v8 = vld [vmem:[#allocation55_spill] sm:$0xff] }
 0xa3d   :  { %12967 = vmatpush3.bf16.xpose.msra.mxu0 %v4599_v19  ;;  %v4090_v14 = vpop.xlane.xlu1 %4089  ;;  %v20400_v19 = vld [vmem:[#allocation115_spill] sm:$0xff] }
 0xa3e   :  { %14144 = vrcp.f32 %v4090_v14  ;;  %13314 = vmatprep.subr.msk.bf16.mxu0 %vm1149_vm0, %v20379_v54  ;;  %4779 = vrot.lane.b32.xlu0 %v20380_v12, %s14914_s25  ;;  %v4186_v44 = vpack.c.bf16 %v4162_v18, %v4161_v9  ;;  %v4701_v12 = vsel %vm1149_vm0, %v20387_v21, 0 }
 0xa3f   :  { %12951 = vmatpush3.bf16.msra.mxu1 %v20378_v49  ;;  %5539 = vrot.lane.b32.xlu1 %v20381_v48, %s14914_s25  ;;  %v20401_v48 = vld [vmem:[#allocation111_spill] sm:$0xff] }
 0xa40   :  { %v14137_v1 = vpop.eup %14136  ;;  %12952 = vmatprep.subr.bf16.mxu1 %v20382_v27 }
 0xa41   :  { %v4159_v57 = vmul.f32 %v14137_v1, %v17129_v5  ;;  %v14139_v36 = vpop.eup %14138  ;;  %v4099_v13 = vpop.xlane.xlu1 %4098  ;;  %v4704_v1 = vsel %vm1149_vm0, %v20401_v48, 0 }
 0xa42   :  { %4781 = vrot.lane.b32.xlu0 %v20383_v50, %s14914_s25  ;;  %v4168_v5 = vmul.f32 %v14139_v36, %v17133_v61 }
 0xa43   :  { %12953 = vmatpush3.bf16.msra.mxu1 %v20382_v27  ;;  %v4185_v47 = vpack.c.bf16 %v4160_v63, %v4159_v57  ;;  %v20402_v57 = vld [vmem:[#allocation114_spill] sm:$0xff] }
 0xa44   :  { %v14141_v20 = vpop.eup %14140  ;;  %12954 = vmatprep.subr.bf16.mxu1 %v20384_v29  ;;  %v4707_v9 = vsel %vm1149_vm0, %v20402_v57, 0 }
 0xa45   :  { %12969 = vmatpush3.bf16.xpose.msra.mxu0 %v4602_v0  ;;  %12928 = vmatprep.mubr.msk.bf16.mxu1 %vm1506_vm1, %v4185_v47  ;;  %v4167_v11 = vmul.f32 %v14141_v20, %v17139_v26  ;;  %v14143_v25 = vpop.eup %14142 }
 0xa46   :  { %13315 = vmatprep.subr.msk.bf16.mxu0 %vm1149_vm0, %v20385_v43  ;;  %4896 = vrot.lane.b32.xlu0 %v20386_v8, %s14914_s25  ;;  %v4169_v61 = vmul.f32 %v14143_v25, %v17120_v42  ;;  %v20391_v42 = vld [vmem:[#allocation20_spill] sm:$0xff] }
 0xa47   :  { %12929 = vmatmul.mubr.msk.bf16.gmra.mrb[124].mxu1 %vm1506_vm1, %v4186_v44  ;;  %v4189_v53 = vpack.c.bf16 %v4168_v5, %v4167_v11 }
 0xa48   :  { %v14145_v46 = vpop.eup %14144  ;;  %12955 = vmatpush3.bf16.msra.mxu1 %v20384_v29 }
 0xa49   :  { %13316 = vmatprep.subr.msk.bf16.mxu1 %vm1149_vm0, %v20387_v21  ;;  %12944 = vmatprep.mubr.msk.bf16.mxu0 %vm1506_vm1, %v4189_v53  ;;  %v4170_v26 = vmul.f32 %v14145_v46, %v17143_v32  ;;  %v20392_v32 = vld [vmem:[#allocation113_spill] sm:$0xff] }
 0xa4a   :  { %4884 = vrot.lane.b32.xlu0 %v20388_v41, %s14914_s25 }
 0xa4b   :  { %v4190_v28 = vpack.c.bf16 %v4170_v26, %v4169_v61 }
 0xa4d   :  { %12971 = vmatpush3.bf16.xpose.msra.mxu0 %v4605_v15 }
 0xa4e   :  { %12945 = vmatmul.mubr.msk.bf16.gmra.mrb[148].mxu0 %vm1506_vm1, %v4190_v28  ;;  %13320 = vmatprep.subr.msk.bf16.mxu0 %vm1149_vm0, %v17160_v2  ;;  %v4093_v2 = vpop.xlane.xlu1 %4092 }
 0xa4f   :  { %4888 = vrot.lane.b32.xlu0 %v20389_v38, %s14914_s25  ;;  %12972 = vmatprep.mubr.msk.bf16.mxu0 %vm1149_vm0, %v20390_v33 }
 0xa52   :  { %v4687_v40 = vpop.permute.xlu1 %4686 }
 0xa53   :  { %5355 = vrot.lane.b32.xlu0 %v20391_v42, %s14914_s25  ;;  %v4710_v47 = vsel %vm1149_vm0, %v4687_v40, 0 }
 0xa56   :  { %12973 = vmatmul.mubr.msk.bf16.vlgmr.msra.gmra.mrb[152].mxu0 %vm1149_vm0, %v20392_v32 }
 0xa57   :  { %12997 = vmatpush3.bf16.xpose.msra.mxu0 %v4806_v4  ;;  %5359 = vrot.lane.b32.xlu0 %v20393_v39, %s14914_s25 }
 0xa58   :  { %12976 = vmatprep.mubr.msk.bf16.mxu0 %vm1149_vm0, %v17155_v58 }
 0xa5b   :  { %5361 = vrot.lane.b32.xlu0 %v20394_v60, %s14914_s25 }
 0xa5f   :  { %5448 = vrot.lane.b32.xlu0 %v20395_v62, %s14914_s25 }
 0xa63   :  { %5533 = vrot.lane.b32.xlu0 %v20396_v23, %s14914_s25 }
 0xa67   :  { %5537 = vrot.lane.b32.xlu0 %v20397_v45, %s14914_s25 }
 0xa68   :  { %v4102_v6 = vpop.xlane.xlu0 %4101 }
 0xa69   :  { %14146 = vrcp.f32 %v4102_v6 }
 0xa6a   :  { %14148 = vrcp.f32 %v4093_v2 }
 0xa6b   :  { %14150 = vrcp.f32 %v4099_v13 }
 0xa6c   :  { %v4096_v59 = vpop.xlane.xlu0 %4095 }
 0xa6d   :  { %14152 = vrcp.f32 %v4096_v59 }
 0xa70   :  { %v4574_v58 = vpop.permute.xlu0 %4573 }
 0xa71   :  { %12977 = vmatmul.mubr.msk.bf16.gmra.mrb[156].mxu0 %vm1149_vm0, %v4574_v58 }
 0xa73   :  { %v14147_v35 = vpop.eup %14146 }
 0xa74   :  { %v14149_v52 = vpop.eup %14148  ;;  %v4174_v24 = vmul.f32 %v14147_v35, %v17164_v30 }
 0xa75   :  { %v14151_v56 = vpop.eup %14150  ;;  %v4171_v22 = vmul.f32 %v14149_v52, %v20398_v17 }
 0xa76   :  { %v4173_v55 = vmul.f32 %v14151_v56, %v20400_v19 }
 0xa77   :  { %v14153_v37 = vpop.eup %14152 }
 0xa78   :  { %v4172_v49 = vmul.f32 %v14153_v37, %v20399_v7  ;;  %v4192_v54 = vpack.c.bf16 %v4174_v24, %v4173_v55 }
 0xa7a   :  { %v4111_v14 = vpop.xlane.xlu1 %4110  ;;  %v4191_v3 = vpack.c.bf16 %v4172_v49, %v4171_v22 }
 0xa7c   :  { %12956 = vmatprep.mubr.msk.bf16.mxu1 %vm1506_vm1, %v4191_v3 }
 0xa7d   :  { %12957 = vmatmul.mubr.msk.bf16.vlgmr.msra.gmra.mrb[128].mxu1 %vm1506_vm1, %v4192_v54 }
 0xa7e   :  { %12981 = vmatpush3.bf16.xpose.msra.mxu1 %v4701_v12  ;;  %v4105_v16 = vpop.xlane.xlu1 %4104 }
 0xa7f   :  { %13317 = vmatprep.subr.msk.bf16.mxu1 %vm1149_vm0, %v20401_v48 }
 0xa82   :  { %v4114_v30 = vpop.xlane.xlu1 %4113 }
 0xa83   :  { %14154 = vrcp.f32 %v4114_v30 }
 0xa84   :  { %14156 = vrcp.f32 %v4105_v16 }
 0xa85   :  { %14158 = vrcp.f32 %v4111_v14 }
 0xa86   :  { %12983 = vmatpush3.bf16.xpose.msra.mxu1 %v4704_v1  ;;  %v4673_v27 = vpop.permute.xlu1 %4672 }
 0xa87   :  { %13318 = vmatprep.subr.msk.bf16.mxu1 %vm1149_vm0, %v20402_v57 }
 0xa8a   :  { %v4790_v63 = vpop.permute.xlu1 %4789 }
 0xa8b   :  { %v4812_v61 = vsel %vm1149_vm0, %v4790_v63, 0 }
 0xa8d   :  { %v14155_v44 = vpop.eup %14154 }
 0xa8e   :  { %12985 = vmatpush3.bf16.xpose.msra.mxu1 %v4707_v9  ;;  %v4677_v36 = vpop.permute.xlu1 %4676  ;;  %v14157_v5 = vpop.eup %14156  ;;  %v4178_v8 = vmul.f32 %v14155_v44, %v17186_v31 }
 0xa8f   :  { %13319 = vmatprep.subr.msk.bf16.mxu1 %vm1149_vm0, %v4687_v40  ;;  %v14159_v25 = vpop.eup %14158  ;;  %v4175_v46 = vmul.f32 %v14157_v5, %v17179_v34 }
 0xa90   :  { %v4177_v26 = vmul.f32 %v14159_v25, %v17174_v51 }
 0xa92   :  { %v4792_v50 = vpop.permute.xlu1 %4791  ;;  %v4194_v28 = vpack.c.bf16 %v4178_v8, %v4177_v26 }
 0xa96   :  { %12987 = vmatpush3.bf16.xpose.msra.mxu1 %v4710_v47  ;;  %v4778_v18 = vpop.permute.xlu1 %4777 }
 0xa97   :  { %13004 = vmatprep.mubr.msk.bf16.mxu0 %vm1149_vm0, %v4778_v18 }
 0xa9a   :  { %v4895_v34 = vpop.permute.xlu1 %4894 }
 0xa9b   :  { %v4917_v35 = vsel %vm1149_vm0, %v4895_v34, 0 }
 0xa9e   :  { %v4784_v33 = vpop.permute.xlu1 %4783 }
 0xaa1   :  { %v4108_v20 = vpop.xlane.xlu0 %4107 }
 0xaa2   :  { %14160 = vrcp.f32 %v4108_v20  ;;  %v4883_v32 = vpop.permute.xlu1 %4882 }
 0xaa5   :  { %v4788_v29 = vpop.permute.xlu0 %4787 }
 0xaa6   :  { %13321 = vmatprep.subr.msk.bf16.mxu0 %vm1149_vm0, %v4788_v29  ;;  %v4809_v0 = vsel %vm1149_vm0, %v4788_v29, 0  ;;  %v4887_v23 = vpop.permute.xlu1 %4886 }
 0xaa7   :  { %12999 = vmatpush3.bf16.xpose.msra.mxu0 %v4809_v0 }
 0xaa8   :  { %13322 = vmatprep.subr.msk.bf16.mxu0 %vm1149_vm0, %v4790_v63 }
 0xaa9   :  { %v4675_v11 = vpop.permute.xlu0 %4674 }
 0xaaa   :  { %v5358_v52 = vpop.permute.xlu1 %5357 }
 0xaac   :  { %v14161_v43 = vpop.eup %14160 }
 0xaad   :  { %v4891_v53 = vpop.permute.xlu0 %4890  ;;  %v4176_v21 = vmul.f32 %v14161_v43, %v17210_v10  ;;  %v4815_v10 = vsel %vm1149_vm0, %v4792_v50, 0 }
 0xaae   :  { %13324 = vmatprep.subr.msk.bf16.mxu1 %vm1149_vm0, %v4891_v53  ;;  %v4911_v51 = vsel %vm1149_vm0, %v4891_v53, 0  ;;  %v5445_v24 = vpop.permute.xlu1 %5444 }
 0xaaf   :  { %13001 = vmatpush3.bf16.xpose.msra.mxu0 %v4812_v61  ;;  %v4193_v41 = vpack.c.bf16 %v4176_v21, %v4175_v46 }
 0xab0   :  { %13323 = vmatprep.subr.msk.bf16.mxu0 %vm1149_vm0, %v4792_v50 }
 0xab1   :  { %12960 = vmatprep.mubr.msk.bf16.mxu1 %vm1506_vm1, %v4193_v41  ;;  %v4679_v15 = vpop.permute.xlu0 %4678 }
 0xab2   :  { %12961 = vmatmul.mubr.msk.bf16.gmra.mrb[132].mxu1 %vm1506_vm1, %v4194_v28  ;;  %v5447_v7 = vpop.permute.xlu1 %5446 }
 0xab3   :  { %12988 = vmatprep.mubr.msk.bf16.mxu1 %vm1149_vm0, %v4673_v27 }
 0xab5   :  { %v4893_v31 = vpop.permute.xlu0 %4892 }
 0xab6   :  { %v4914_v39 = vsel %vm1149_vm0, %v4893_v31, 0  ;;  %v5451_v19 = vpop.permute.xlu1 %5450 }
 0xab7   :  { %13003 = vmatpush3.bf16.xpose.msra.mxu0 %v4815_v10 }
 0xab9   :  { %v4780_v38 = vpop.permute.xlu0 %4779 }
 0xaba   :  { %12989 = vmatmul.mubr.msk.bf16.vlgmr.msra.gmra.mrb[136].mxu1 %vm1149_vm0, %v4675_v11 }
 0xabb   :  { %13013 = vmatpush3.bf16.xpose.msra.mxu1 %v4911_v51  ;;  %12992 = vmatprep.mubr.msk.bf16.mxu1 %vm1149_vm0, %v4677_v36 }
 0xabc   :  { %13325 = vmatprep.subr.msk.bf16.mxu1 %vm1149_vm0, %v4893_v31 }
 0xabd   :  { %v4782_v42 = vpop.permute.xlu0 %4781 }
 0xabe   :  { %13005 = vmatmul.mubr.msk.bf16.vlgmr.msra.gmra.mrb[160].mxu0 %vm1149_vm0, %v4780_v38 }
 0xabf   :  { %13008 = vmatprep.mubr.msk.bf16.mxu0 %vm1149_vm0, %v4782_v42 }
 0xac1   :  { %v4897_v4 = vpop.permute.xlu0 %4896 }
 0xac2   :  { %12993 = vmatmul.mubr.msk.bf16.gmra.mrb[140].mxu1 %vm1149_vm0, %v4679_v15  ;;  %v4920_v37 = vsel %vm1149_vm0, %v4897_v4, 0 }
 0xac3   :  { %13015 = vmatpush3.bf16.xpose.msra.mxu1 %v4914_v39  ;;  %13020 = vmatprep.mubr.msk.bf16.mxu1 %vm1149_vm0, %v4883_v32 }
 0xac4   :  { %13326 = vmatprep.subr.msk.bf16.mxu1 %vm1149_vm0, %v4895_v34 }
 0xac5   :  { %v17377_v60 = vpop.f32.mrb[136].mxu0  ;;  %v4885_v62 = vpop.permute.xlu0 %4884 }
 0xac6   :  { %v17379_v13 = vpop.f32.mrb[137].mxu0  ;;  %13009 = vmatmul.mubr.msk.bf16.gmra.mrb[164].mxu0 %vm1149_vm0, %v4784_v33 }
 0xac7   :  { %v17382_v45 = vpop.f32.mrb[138].mxu0 }
 0xac8   :  { %v17386_v6 = vpop.f32.mrb[139].mxu0 }
 0xac9   :  { %v4889_v58 = vpop.permute.xlu0 %4888 }
 0xacb   :  { %13017 = vmatpush3.bf16.xpose.msra.mxu1 %v4917_v35 }
 0xacc   :  { %13327 = vmatprep.subr.msk.bf16.mxu1 %vm1149_vm0, %v4897_v4 }
 0xacd   :  { %v5356_v56 = vpop.permute.xlu0 %5355 }
 0xace   :  { %13028 = vmatprep.subr.bf16.mxu0 %v5356_v56 }
 0xacf   :  { %13029 = vmatpush3.bf16.msra.mxu0 %v5356_v56 }
 0xad0   :  { %13030 = vmatprep.subr.bf16.mxu0 %v5358_v52 }
 0xad1   :  { %v5360_v40 = vpop.permute.xlu0 %5359 }
 0xad3   :  { %13019 = vmatpush3.bf16.xpose.msra.mxu1 %v4920_v37  ;;  %13031 = vmatpush3.bf16.msra.mxu0 %v5358_v52 }
 0xad4   :  { %13044 = vmatprep.subr.bf16.mxu1 %v5445_v24  ;;  %13032 = vmatprep.subr.bf16.mxu0 %v5360_v40 }
 0xad5   :  { %v5362_v17 = vpop.permute.xlu0 %5361 }
 0xad7   :  { %13033 = vmatpush3.bf16.msra.mxu0 %v5360_v40 }
 0xad8   :  { %13034 = vmatprep.subr.bf16.mxu0 %v5362_v17 }
 0xad9   :  { %v5449_v22 = vpop.permute.xlu0 %5448 }
 0xada   :  { %13021 = vmatmul.mubr.msk.bf16.vlgmr.msra.gmra.mrb[144].mxu1 %vm1149_vm0, %v4885_v62 }
 0xadb   :  { %13024 = vmatprep.mubr.msk.bf16.mxu1 %vm1149_vm0, %v4887_v23  ;;  %13045 = vmatpush3.bf16.msra.mxu1 %v5445_v24 }
 0xadc   :  { %13035 = vmatpush3.bf16.msra.mxu0 %v5362_v17  ;;  %13046 = vmatprep.subr.bf16.mxu1 %v5447_v7 }
 0xadd   :  { %v17395_v49 = vpop.permute.xlu0 %5533 }
 0xade   :  { %13060 = vmatprep.subr.bf16.mxu0 %v17395_v49 }
 0xadf   :  { %13047 = vmatpush3.bf16.msra.mxu1 %v5447_v7 }
 0xae0   :  { %13048 = vmatprep.subr.bf16.mxu1 %v5449_v22 }
 0xae2   :  { %13025 = vmatmul.mubr.msk.bf16.gmra.mrb[148].mxu1 %vm1149_vm0, %v4889_v58 }
 0xae3   :  { %13049 = vmatpush3.bf16.msra.mxu1 %v5449_v22 }
 0xae4   :  { %13050 = vmatprep.subr.bf16.mxu1 %v5451_v19 }
 0xae7   :  { %13051 = vmatpush3.bf16.msra.mxu1 %v5451_v19 }
 0xaf5   :  { %v17399_v55 = vpop.f32.mrb[140].mxu0 }
 0xaf6   :  { %v17401_v14 = vpop.f32.mrb[141].mxu0 }
 0xaf7   :  { %v17403_v3 = vpop.f32.mrb[142].mxu0 }
 0xaf8   :  { %v17407_v12 = vpop.f32.mrb[143].mxu0 }
 0xb07   :  { %v17411_v48 = vpop.f32.mrb[144].mxu0 }
 0xb08   :  { %20403 = vst [vmem:[#allocation30_spill] sm:$0xff] %v17411_v48  ;;  %v17413_v30 = vpop.f32.mrb[145].mxu0 }
 0xb09   :  { %20404 = vst [vmem:[#allocation46_spill] sm:$0xff] %v17413_v30  ;;  %v17415_v1 = vpop.f32.mrb[146].mxu0 }
 0xb0a   :  { %20405 = vst [vmem:[#allocation28_spill] sm:$0xff] %v17415_v1  ;;  %v17419_v57 = vpop.f32.mrb[147].mxu0 }
 0xb0b   :  { %20406 = vst [vmem:[#allocation107_spill] sm:$0xff] %v17419_v57 }
 0xb0d   :  { %v17423_v9 = vpop.f32.mrb[120].mxu1 }
 0xb0e   :  { %v17425_v36 = vpop.f32.mrb[121].mxu1 }
 0xb0f   :  { %v17427_v50 = vpop.f32.mrb[122].mxu1 }
 0xb10   :  { %v17431_v18 = vpop.f32.mrb[123].mxu1 }
 0xb1a   :  { %v17435_v29 = vpop.f32.mrb[124].mxu1 }
 0xb1b   :  { %20407 = vst [vmem:[#allocation35_spill] sm:$0xff] %v17435_v29  ;;  %v17437_v0 = vpop.f32.mrb[125].mxu1 }
 0xb1c   :  { %v17439_v44 = vpop.f32.mrb[126].mxu1 }
 0xb1d   :  { %20408 = vst [vmem:[#allocation33_spill] sm:$0xff] %v17439_v44  ;;  %v17443_v5 = vpop.f32.mrb[127].mxu1 }
 0xb21   :  { %v17447_v43 = vpop.f32.mrb[148].mxu0 }
 0xb22   :  { %20409 = vst [vmem:[#allocation49_spill] sm:$0xff] %v17447_v43  ;;  %v17449_v8 = vpop.f32.mrb[149].mxu0 }
 0xb23   :  { %20410 = vst [vmem:[#allocation38_spill] sm:$0xff] %v17449_v8  ;;  %v17451_v53 = vpop.f32.mrb[150].mxu0  ;;  %v20425_v8 = vld [vmem:[#allocation50_spill] sm:$0xff] }
 0xb24   :  { %20411 = vst [vmem:[#allocation36_spill] sm:$0xff] %v17451_v53  ;;  %v17455_v21 = vpop.f32.mrb[151].mxu0 }
 0xb25   :  { %20412 = vst [vmem:[#allocation104_spill] sm:$0xff] %v17455_v21 }
 0xb29   :  { %v17459_v26 = vpop.f32.mrb[152].mxu0 }
 0xb2a   :  { %v17461_v41 = vpop.f32.mrb[153].mxu0  ;;  %v4993_v28 = vsel %vm1506_vm1, %v17459_v26, -inf }
 0xb2b   :  { %4994 = vmax.xlane.f32.xlu0 %v4993_v28  ;;  %v17465_v15 = vpop.f32.mrb[154].mxu0  ;;  %v4987_v34 = vsel %vm1506_vm1, %v17461_v41, -inf }
 0xb2c   :  { %4988 = vmax.xlane.f32.xlu1 %v4987_v34  ;;  %v17469_v31 = vpop.f32.mrb[155].mxu0  ;;  %v4996_v38 = vsel %vm1506_vm1, %v17465_v15, -inf }
 0xb2d   :  { %v4990_v10 = vsel %vm1506_vm1, %v17469_v31, -inf }
 0xb2f   :  { %4991 = vmax.xlane.f32.xlu0 %v4990_v10 }
 0xb30   :  { %4997 = vmax.xlane.f32.xlu1 %v4996_v38 }
 0xb44   :  { %v17475_v51 = vpop.f32.mrb[156].mxu0 }
 0xb45   :  { %v17477_v33 = vpop.f32.mrb[157].mxu0  ;;  %v5005_v42 = vsel %vm1506_vm1, %v17475_v51, -inf }
 0xb46   :  { %5006 = vmax.xlane.f32.xlu0 %v5005_v42  ;;  %v17481_v32 = vpop.f32.mrb[158].mxu0  ;;  %v4999_v62 = vsel %vm1506_vm1, %v17477_v33, -inf }
 0xb47   :  { %v17483_v4 = vpop.f32.mrb[159].mxu0  ;;  %v5008_v39 = vsel %vm1506_vm1, %v17481_v32, -inf }
 0xb48   :  { %5009 = vmax.xlane.f32.xlu1 %v5008_v39  ;;  %v5002_v23 = vsel %vm1506_vm1, %v17483_v4, -inf }
 0xb4a   :  { %5000 = vmax.xlane.f32.xlu0 %v4999_v62 }
 0xb4c   :  { %5003 = vmax.xlane.f32.xlu1 %v5002_v23 }
 0xb50   :  { %v17491_v58 = vpop.f32.mrb[128].mxu1 }
 0xb51   :  { %20413 = vst [vmem:[#allocation109_spill] sm:$0xff] %v17491_v58  ;;  %v17493_v35 = vpop.f32.mrb[129].mxu1 }
 0xb52   :  { %20414 = vst [vmem:[#allocation39_spill] sm:$0xff] %v17493_v35  ;;  %v17495_v52 = vpop.f32.mrb[130].mxu1  ;;  %v20422_v35 = vld [vmem:[#allocation48_spill] sm:$0xff] }
 0xb53   :  { %20415 = vst [vmem:[#allocation42_spill] sm:$0xff] %v17495_v52  ;;  %v17499_v40 = vpop.f32.mrb[131].mxu1  ;;  %v17611_v52 = vpop.permute.xlu1 %5535 }
 0xb54   :  { %20416 = vst [vmem:[#allocation105_spill] sm:$0xff] %v17499_v40  ;;  %20421 = vst [vmem:[#allocation108_spill] sm:$0xff] %v17611_v52  ;;  %v17617_v40 = vpop.permute.xlu0 %5537 }
 0xb55   :  { %20424 = vst [vmem:[#allocation53_spill] sm:$0xff] %v17617_v40 }
 0xb85   :  { %v17503_v24 = vpop.f32.mrb[132].mxu1 }
 0xb86   :  { %20417 = vst [vmem:[#allocation40_spill] sm:$0xff] %v17503_v24  ;;  %v17505_v17 = vpop.f32.mrb[133].mxu1 }
 0xb87   :  { %20418 = vst [vmem:[#allocation106_spill] sm:$0xff] %v17505_v17  ;;  %v17507_v22 = vpop.f32.mrb[134].mxu1 }
 0xb88   :  { %20419 = vst [vmem:[#allocation110_spill] sm:$0xff] %v17507_v22  ;;  %v17511_v19 = vpop.f32.mrb[135].mxu1 }
 0xb89   :  { %20420 = vst [vmem:[#allocation55_spill] sm:$0xff] %v17511_v19 }
 0xb8d   :  { %v17515_v34 = vpop.f32.mrb[136].mxu1 }
 0xb8e   :  { %v17517_v10 = vpop.f32.mrb[137].mxu1  ;;  %v5017_v38 = vsel %vm1506_vm1, %v17515_v34, -inf }
 0xb8f   :  { %5018 = vmax.xlane.f32.xlu0 %v5017_v38  ;;  %v17521_v42 = vpop.f32.mrb[138].mxu1 }
 0xb90   :  { %v17523_v39 = vpop.f32.mrb[139].mxu1  ;;  %v5020_v62 = vsel %vm1506_vm1, %v17521_v42, -inf }
 0xb91   :  { %5021 = vmax.xlane.f32.xlu1 %v5020_v62  ;;  %v17527_v23 = vpop.f32.mrb[160].mxu0  ;;  %v5011_v62 = vsel %vm1506_vm1, %v17517_v10, -inf }
 0xb92   :  { %v17529_v7 = vpop.f32.mrb[161].mxu0  ;;  %v5041_v28 = vsel %vm1506_vm1, %v17527_v23, -inf }
 0xb93   :  { %5042 = vmax.xlane.f32.xlu0 %v5041_v28  ;;  %v17533_v56 = vpop.f32.mrb[162].mxu0  ;;  %v5014_v28 = vsel %vm1506_vm1, %v17523_v39, -inf }
 0xb94   :  { %v17535_v37 = vpop.f32.mrb[163].mxu0  ;;  %v5044_v38 = vsel %vm1506_vm1, %v17533_v56, -inf }
 0xb95   :  { %v17539_v61 = vpop.f32.mrb[140].mxu1  ;;  %5045 = vmax.xlane.f32.xlu1 %v5044_v38  ;;  %v5035_v38 = vsel %vm1506_vm1, %v17529_v7, -inf }
 0xb96   :  { %v17541_v46 = vpop.f32.mrb[141].mxu1  ;;  %v5029_v20 = vsel %vm1506_vm1, %v17539_v61, -inf }
 0xb97   :  { %v17545_v63 = vpop.f32.mrb[142].mxu1  ;;  %5012 = vmax.xlane.f32.xlu0 %v5011_v62  ;;  %v5038_v62 = vsel %vm1506_vm1, %v17535_v37, -inf  ;;  %v5023_v16 = vsel %vm1506_vm1, %v17541_v46, -inf }
 0xb98   :  { %v17547_v27 = vpop.f32.mrb[143].mxu1 }
 0xb99   :  { %5015 = vmax.xlane.f32.xlu1 %v5014_v28  ;;  %v17551_v11 = vpop.f32.mrb[164].mxu0  ;;  %v5032_v28 = vsel %vm1506_vm1, %v17545_v63, -inf }
 0xb9a   :  { %v17553_v47 = vpop.f32.mrb[165].mxu0  ;;  %v5053_v2 = vsel %vm1506_vm1, %v17551_v11, -inf }
 0xb9b   :  { %5036 = vmax.xlane.f32.xlu0 %v5035_v38  ;;  %v17557_v25 = vpop.f32.mrb[166].mxu0 }
 0xb9c   :  { %v17559_v54 = vpop.f32.mrb[167].mxu0  ;;  %v5056_v38 = vsel %vm1506_vm1, %v17557_v25, -inf }
 0xb9d   :  { %5039 = vmax.xlane.f32.xlu1 %v5038_v62  ;;  %v5026_v62 = vsel %vm1506_vm1, %v17547_v27, -inf }
 0xb9f   :  { %5030 = vmax.xlane.f32.xlu0 %v5029_v20  ;;  %v5047_v20 = vsel %vm1506_vm1, %v17553_v47, -inf }
 0xba1   :  { %5033 = vmax.xlane.f32.xlu1 %v5032_v28  ;;  %v5050_v28 = vsel %vm1506_vm1, %v17559_v54, -inf }
 0xba3   :  { %5054 = vmax.xlane.f32.xlu0 %v5053_v2 }
 0xba5   :  { %5057 = vmax.xlane.f32.xlu1 %v5056_v38 }
 0xba7   :  { %5024 = vmax.xlane.f32.xlu0 %v5023_v16 }
 0xba9   :  { %5027 = vmax.xlane.f32.xlu1 %v5026_v62 }
 0xbab   :  { %5048 = vmax.xlane.f32.xlu0 %v5047_v20 }
 0xbad   :  { %v17579_v2 = vpop.f32.mrb[144].mxu1  ;;  %5051 = vmax.xlane.f32.xlu1 %v5050_v28 }
 0xbae   :  { %v17581_v59 = vpop.f32.mrb[145].mxu1  ;;  %v5065_v38 = vsel %vm1506_vm1, %v17579_v2, -inf }
 0xbaf   :  { %v17585_v16 = vpop.f32.mrb[146].mxu1  ;;  %5066 = vmax.xlane.f32.xlu0 %v5065_v38  ;;  %v5059_v20 = vsel %vm1506_vm1, %v17581_v59, -inf }
 0xbb0   :  { %v17587_v17 = vpop.f32.mrb[147].mxu1  ;;  %v5068_v62 = vsel %vm1506_vm1, %v17585_v16, -inf }
 0xbb1   :  { %5069 = vmax.xlane.f32.xlu1 %v5068_v62  ;;  %v5062_v28 = vsel %vm1506_vm1, %v17587_v17, -inf }
 0xbb3   :  { %5060 = vmax.xlane.f32.xlu0 %v5059_v20 }
 0xbb5   :  { %v17595_v19 = vpop.f32.mrb[148].mxu1  ;;  %5063 = vmax.xlane.f32.xlu1 %v5062_v28 }
 0xbb6   :  { %v17597_v24 = vpop.f32.mrb[149].mxu1  ;;  %v5077_v38 = vsel %vm1506_vm1, %v17595_v19, -inf }
 0xbb7   :  { %v17601_v22 = vpop.f32.mrb[150].mxu1  ;;  %5078 = vmax.xlane.f32.xlu0 %v5077_v38  ;;  %v5071_v20 = vsel %vm1506_vm1, %v17597_v24, -inf  ;;  %v17615_v38 = vpop.permute.xlu1 %5539 }
 0xbb8   :  { %v17603_v58 = vpop.f32.mrb[151].mxu1  ;;  %v5080_v62 = vsel %vm1506_vm1, %v17601_v22, -inf  ;;  %20423 = vst [vmem:[#allocation47_spill] sm:$0xff] %v17615_v38 }
 0xbb9   :  { %5081 = vmax.xlane.f32.xlu1 %v5080_v62  ;;  %v5074_v28 = vsel %vm1506_vm1, %v17603_v58, -inf  ;;  %v4995_v62 = vpop.xlane.xlu0 %4994 }
 0xbba   :  { %v5085_v53 = vsub.f32 %v17459_v26, %v4995_v62 }
 0xbbb   :  { %5072 = vmax.xlane.f32.xlu0 %v5071_v20  ;;  %v4989_v21 = vpop.xlane.xlu1 %4988 }
 0xbbc   :  { %v5119_v57 = vmul.f32 1.442695, %v5085_v53  ;;  %v5083_v48 = vsub.f32 %v17461_v41, %v4989_v21 }
 0xbbd   :  { %5075 = vmax.xlane.f32.xlu1 %v5074_v28  ;;  %v4992_v43 = vpop.xlane.xlu0 %4991 }
 0xbbe   :  { %v5084_v1 = vsub.f32 %v17469_v31, %v4992_v43  ;;  %14162 = vpow2.f32 %v5119_v57  ;;  %v5115_v40 = vmul.f32 1.442695, %v5083_v48 }
 0xbbf   :  { %v4998_v20 = vpop.xlane.xlu1 %4997 }
 0xbc0   :  { %v5086_v28 = vsub.f32 %v17465_v15, %v4998_v20  ;;  %v5117_v44 = vmul.f32 1.442695, %v5084_v1 }
 0xbc2   :  { %v5121_v38 = vmul.f32 1.442695, %v5086_v28 }
 0xbc4   :  { %14164 = vpow2.f32 %v5121_v38 }
 0xbc5   :  { %14166 = vpow2.f32 %v5115_v40 }
 0xbc6   :  { %14168 = vpow2.f32 %v5117_v44 }
 0xbc8   :  { %v17629_v57 = vpop.eup %14162 }
 0xbc9   :  { %v5185_v1 = vsel %vm1506_vm1, %v17629_v57, 0.0 }
 0xbce   :  { %5624 = vrot.lane.b32.xlu1 %v20422_v35, %s14914_s25 }
 0xbd1   :  { %5622 = vrot.lane.b32.xlu0 %v20425_v8, %s14914_s25 }
 0xbd3   :  { %v5007_v30 = vpop.xlane.xlu0 %5006 }
 0xbd4   :  { %v5089_v8 = vsub.f32 %v17475_v51, %v5007_v30  ;;  %v17631_v30 = vpop.eup %14164 }
 0xbd5   :  { %v5010_v35 = vpop.xlane.xlu1 %5009  ;;  %v17635_v31 = vpop.eup %14166 }
 0xbd6   :  { %v5090_v52 = vsub.f32 %v17481_v32, %v5010_v35  ;;  %v5127_v15 = vmul.f32 1.442695, %v5089_v8  ;;  %v17639_v44 = vpop.eup %14168  ;;  %v5179_v51 = vsel %vm1506_vm1, %v17635_v31, 0.0 }
 0xbd7   :  { %v5001_v29 = vpop.xlane.xlu0 %5000  ;;  %v5182_v32 = vsel %vm1506_vm1, %v17639_v44, 0.0 }
 0xbd8   :  { %v5087_v53 = vsub.f32 %v17477_v33, %v5001_v29  ;;  %v5129_v21 = vmul.f32 1.442695, %v5090_v52  ;;  %14170 = vpow2.f32 %v5127_v15  ;;  %v5188_v29 = vsel %vm1506_vm1, %v17631_v30, 0.0 }
 0xbd9   :  { %v5004_v26 = vpop.xlane.xlu1 %5003 }
 0xbda   :  { %v5088_v41 = vsub.f32 %v17483_v4, %v5004_v26  ;;  %v5123_v43 = vmul.f32 1.442695, %v5087_v53  ;;  %14172 = vpow2.f32 %v5129_v21 }
 0xbdc   :  { %v5125_v48 = vmul.f32 1.442695, %v5088_v41  ;;  %14174 = vpow2.f32 %v5123_v43 }
 0xbde   :  { %14176 = vpow2.f32 %v5125_v48 }
 0xbe2   :  { %v17643_v33 = vpop.eup %14170 }
 0xbe3   :  { %v5197_v52 = vsel %vm1506_vm1, %v17643_v33, 0.0 }
 0xbe4   :  { %v17647_v4 = vpop.eup %14172 }
 0xbe5   :  { %v5200_v38 = vsel %vm1506_vm1, %v17647_v4, 0.0 }
 0xbe6   :  { %v17651_v40 = vpop.eup %14174 }
 0xbe7   :  { %v5191_v20 = vsel %vm1506_vm1, %v17651_v40, 0.0 }
 0xbe8   :  { %v17655_v62 = vpop.eup %14176 }
 0xbe9   :  { %v5194_v28 = vsel %vm1506_vm1, %v17655_v62, 0.0 }
 0xbf0   :  { %5186 = vadd.xlane.f32.xlu0 %v5185_v1 }
 0xbf2   :  { %5189 = vadd.xlane.f32.xlu1 %v5188_v29 }
 0xbf4   :  { %5180 = vadd.xlane.f32.xlu0 %v5179_v51 }
 0xbf6   :  { %5183 = vadd.xlane.f32.xlu1 %v5182_v32 }
 0xbf8   :  { %5198 = vadd.xlane.f32.xlu0 %v5197_v52 }
 0xbfa   :  { %5201 = vadd.xlane.f32.xlu1 %v5200_v38 }
 0xbfc   :  { %5192 = vadd.xlane.f32.xlu0 %v5191_v20 }
 0xbfe   :  { %5195 = vadd.xlane.f32.xlu1 %v5194_v28 }
 0xc1c   :  { %v5019_v35 = vpop.xlane.xlu0 %5018 }
 0xc1d   :  { %v5093_v8 = vsub.f32 %v17515_v34, %v5019_v35 }
 0xc1e   :  { %v5022_v26 = vpop.xlane.xlu1 %5021 }
 0xc1f   :  { %v5135_v15 = vmul.f32 1.442695, %v5093_v8  ;;  %v5094_v43 = vsub.f32 %v17521_v42, %v5022_v26 }
 0xc20   :  { %v5043_v53 = vpop.xlane.xlu0 %5042 }
 0xc21   :  { %14178 = vpow2.f32 %v5135_v15  ;;  %v5101_v21 = vsub.f32 %v17527_v23, %v5043_v53  ;;  %v5137_v52 = vmul.f32 1.442695, %v5094_v43 }
 0xc22   :  { %v5046_v41 = vpop.xlane.xlu1 %5045 }
 0xc23   :  { %v5151_v48 = vmul.f32 1.442695, %v5101_v21  ;;  %v5102_v51 = vsub.f32 %v17533_v56, %v5046_v41 }
 0xc24   :  { %v5013_v1 = vpop.xlane.xlu0 %5012 }
 0xc25   :  { %14180 = vpow2.f32 %v5151_v48  ;;  %v5091_v29 = vsub.f32 %v17517_v10, %v5013_v1  ;;  %v5153_v23 = vmul.f32 1.442695, %v5102_v51 }
 0xc26   :  { %v5016_v32 = vpop.xlane.xlu1 %5015 }
 0xc27   :  { %v5131_v38 = vmul.f32 1.442695, %v5091_v29  ;;  %v5092_v34 = vsub.f32 %v17523_v39, %v5016_v32 }
 0xc28   :  { %v5037_v20 = vpop.xlane.xlu0 %5036 }
 0xc29   :  { %14182 = vpow2.f32 %v5131_v38  ;;  %v5099_v28 = vsub.f32 %v17529_v7, %v5037_v20  ;;  %v5133_v42 = vmul.f32 1.442695, %v5092_v34 }
 0xc2a   :  { %v5040_v35 = vpop.xlane.xlu1 %5039  ;;  %14184 = vpow2.f32 %v5137_v52 }
 0xc2b   :  { %v17668_v8 = vpop.eup %14178  ;;  %v5147_v26 = vmul.f32 1.442695, %v5099_v28  ;;  %v5100_v10 = vsub.f32 %v17535_v37, %v5040_v35 }
 0xc2c   :  { %v5031_v15 = vpop.xlane.xlu0 %5030  ;;  %v5209_v56 = vsel %vm1506_vm1, %v17668_v8, 0.0 }
 0xc2d   :  { %14186 = vpow2.f32 %v5147_v26  ;;  %v5097_v39 = vsub.f32 %v17539_v61, %v5031_v15  ;;  %5210 = vadd.xlane.f32.xlu1 %v5209_v56  ;;  %v5149_v53 = vmul.f32 1.442695, %v5100_v10 }
 0xc2e   :  { %14188 = vpow2.f32 %v5153_v23  ;;  %v5034_v7 = vpop.xlane.xlu1 %5033 }
 0xc2f   :  { %v17674_v21 = vpop.eup %14180  ;;  %14190 = vpow2.f32 %v5133_v42  ;;  %v5143_v41 = vmul.f32 1.442695, %v5097_v39  ;;  %v5098_v61 = vsub.f32 %v17545_v63, %v5034_v7 }
 0xc30   :  { %v5055_v43 = vpop.xlane.xlu0 %5054  ;;  %v5233_v48 = vsel %vm1506_vm1, %v17674_v21, 0.0  ;;  %14192 = vpow2.f32 %v5149_v53 }
 0xc31   :  { %v5105_v37 = vsub.f32 %v17551_v11, %v5055_v43  ;;  %5234 = vadd.xlane.f32.xlu0 %v5233_v48  ;;  %14194 = vpow2.f32 %v5143_v41  ;;  %v5145_v23 = vmul.f32 1.442695, %v5098_v61 }
 0xc32   :  { %v5058_v1 = vpop.xlane.xlu1 %5057 }
 0xc33   :  { %v17679_v29 = vpop.eup %14182  ;;  %v5159_v51 = vmul.f32 1.442695, %v5105_v37  ;;  %v5106_v11 = vsub.f32 %v17557_v25, %v5058_v1 }
 0xc34   :  { %v5025_v32 = vpop.xlane.xlu0 %5024  ;;  %v5203_v52 = vsel %vm1506_vm1, %v17679_v29, 0.0  ;;  %v17684_v38 = vpop.eup %14184 }
 0xc35   :  { %v5095_v34 = vsub.f32 %v17541_v46, %v5025_v32  ;;  %5204 = vadd.xlane.f32.xlu1 %v5203_v52  ;;  %14196 = vpow2.f32 %v5159_v51  ;;  %v5212_v10 = vsel %vm1506_vm1, %v17684_v38, 0.0  ;;  %v5161_v56 = vmul.f32 1.442695, %v5106_v11 }
 0xc36   :  { %v5028_v20 = vpop.xlane.xlu1 %5027 }
 0xc37   :  { %v17688_v28 = vpop.eup %14186  ;;  %v5139_v35 = vmul.f32 1.442695, %v5095_v34  ;;  %v5096_v63 = vsub.f32 %v17547_v27, %v5028_v20 }
 0xc38   :  { %v17691_v42 = vpop.eup %14188  ;;  %v5049_v26 = vpop.xlane.xlu0 %5048  ;;  %v5227_v46 = vsel %vm1506_vm1, %v17688_v28, 0.0 }
 0xc39   :  { %v17697_v15 = vpop.eup %14190  ;;  %14198 = vpow2.f32 %v5139_v35  ;;  %v5103_v25 = vsub.f32 %v17553_v47, %v5049_v26  ;;  %5213 = vadd.xlane.f32.xlu1 %v5212_v10  ;;  %5228 = vadd.xlane.f32.xlu0 %v5227_v46  ;;  %v5141_v27 = vmul.f32 1.442695, %v5096_v63  ;;  %v5236_v37 = vsel %vm1506_vm1, %v17691_v42, 0.0 }
 0xc3a   :  { %v5052_v39 = vpop.xlane.xlu1 %5051  ;;  %14200 = vpow2.f32 %v5145_v23  ;;  %v17701_v41 = vpop.eup %14192  ;;  %v5206_v48 = vsel %vm1506_vm1, %v17697_v15, 0.0 }
 0xc3b   :  { %v5155_v53 = vmul.f32 1.442695, %v5103_v25  ;;  %v5104_v7 = vsub.f32 %v17559_v54, %v5052_v39  ;;  %v17707_v1 = vpop.eup %14194  ;;  %v5230_v34 = vsel %vm1506_vm1, %v17701_v41, 0.0 }
 0xc3c   :  { %v5067_v43 = vpop.xlane.xlu0 %5066  ;;  %v5221_v11 = vsel %vm1506_vm1, %v17707_v1, 0.0 }
 0xc3d   :  { %14202 = vpow2.f32 %v5155_v53  ;;  %v5109_v47 = vsub.f32 %v17579_v2, %v5067_v43  ;;  %5207 = vadd.xlane.f32.xlu1 %v5206_v48  ;;  %5237 = vadd.xlane.f32.xlu0 %v5236_v37  ;;  %v5157_v61 = vmul.f32 1.442695, %v5104_v7 }
 0xc3e   :  { %14204 = vpow2.f32 %v5161_v56  ;;  %v5070_v51 = vpop.xlane.xlu1 %5069 }
 0xc3f   :  { %14206 = vpow2.f32 %v5141_v27  ;;  %v5167_v54 = vmul.f32 1.442695, %v5109_v47  ;;  %v5110_v32 = vsub.f32 %v17585_v16, %v5070_v51  ;;  %v17715_v20 = vpop.eup %14196 }
 0xc40   :  { %v5061_v52 = vpop.xlane.xlu0 %5060  ;;  %14208 = vpow2.f32 %v5157_v61  ;;  %v5245_v46 = vsel %vm1506_vm1, %v17715_v20, 0.0 }
 0xc41   :  { %v5107_v2 = vsub.f32 %v17581_v59, %v5061_v52  ;;  %5231 = vadd.xlane.f32.xlu1 %v5230_v34  ;;  %5222 = vadd.xlane.f32.xlu0 %v5221_v11  ;;  %v5169_v23 = vmul.f32 1.442695, %v5110_v32  ;;  %14210 = vpow2.f32 %v5167_v54 }
 0xc42   :  { %v5064_v35 = vpop.xlane.xlu1 %5063 }
 0xc43   :  { %v17718_v63 = vpop.eup %14198  ;;  %v5163_v16 = vmul.f32 1.442695, %v5107_v2  ;;  %v5108_v26 = vsub.f32 %v17587_v17, %v5064_v35  ;;  %14212 = vpow2.f32 %v5169_v23 }
 0xc44   :  { %v5079_v10 = vpop.xlane.xlu0 %5078  ;;  %v5215_v25 = vsel %vm1506_vm1, %v17718_v63, 0.0  ;;  %v17725_v56 = vpop.eup %14200 }
 0xc45   :  { %v5113_v59 = vsub.f32 %v17595_v19, %v5079_v10  ;;  %5246 = vadd.xlane.f32.xlu1 %v5245_v46  ;;  %5216 = vadd.xlane.f32.xlu0 %v5215_v25  ;;  %v5165_v39 = vmul.f32 1.442695, %v5108_v26  ;;  %14214 = vpow2.f32 %v5163_v16  ;;  %v5224_v37 = vsel %vm1506_vm1, %v17725_v56, 0.0 }
 0xc46   :  { %v5082_v27 = vpop.xlane.xlu1 %5081 }
 0xc47   :  { %v17728_v53 = vpop.eup %14202  ;;  %v5175_v17 = vmul.f32 1.442695, %v5113_v59  ;;  %v5114_v7 = vsub.f32 %v17601_v22, %v5082_v27  ;;  %14216 = vpow2.f32 %v5165_v39 }
 0xc48   :  { %v17731_v43 = vpop.eup %14204  ;;  %v5073_v48 = vpop.xlane.xlu0 %5072  ;;  %v5239_v19 = vsel %vm1506_vm1, %v17728_v53, 0.0 }
 0xc49   :  { %v17737_v47 = vpop.eup %14206  ;;  %v5111_v61 = vsub.f32 %v17597_v24, %v5073_v48  ;;  %5225 = vadd.xlane.f32.xlu0 %v5224_v37  ;;  %5240 = vadd.xlane.f32.xlu1 %v5239_v19  ;;  %v5177_v51 = vmul.f32 1.442695, %v5114_v7  ;;  %14218 = vpow2.f32 %v5175_v17  ;;  %v5248_v11 = vsel %vm1506_vm1, %v17731_v43, 0.0 }
 0xc4a   :  { %v5076_v54 = vpop.xlane.xlu1 %5075  ;;  %v17741_v52 = vpop.eup %14208  ;;  %v5218_v2 = vsel %vm1506_vm1, %v17737_v47, 0.0 }
 0xc4b   :  { %v5171_v22 = vmul.f32 1.442695, %v5111_v61  ;;  %v5112_v32 = vsub.f32 %v17603_v58, %v5076_v54  ;;  %v17749_v24 = vpop.eup %14210  ;;  %14220 = vpow2.f32 %v5177_v51  ;;  %v5242_v35 = vsel %vm1506_vm1, %v17741_v52, 0.0  ;;  %v20426_v51 = vld [vmem:[#allocation56_spill] sm:$0xff]  ;;  %v20427_v54 = vld [vmem:[#allocation41_spill] sm:$0xff] }
 0xc4c   :  { %v17743_v34 = vpop.permute.xlu0 %5622  ;;  %v5257_v16 = vsel %vm1506_vm1, %v17749_v24, 0.0 }
 0xc4d   :  { %5249 = vadd.xlane.f32.xlu0 %v5248_v11  ;;  %5219 = vadd.xlane.f32.xlu1 %v5218_v2  ;;  %14222 = vpow2.f32 %v5171_v22  ;;  %v5173_v23 = vmul.f32 1.442695, %v5112_v32  ;;  %v17752_v58 = vpop.eup %14212  ;;  %v20428_v22 = vld [vmem:[#allocation52_spill] sm:$0xff]  ;;  %v20430_v11 = vpack.c.bf16 %v17386_v6, %v17379_v13  ;;  %v20431_v2 = vld [vmem:[#allocation54_spill] sm:$0xff]  ;;  %v20438_v13 = vpack.c.bf16 %v17407_v12, %v17401_v14  ;;  %v20444_v14 = vld [vmem:[#allocation51_spill] sm:$0xff] }
 0xc4e   :  { %13076 = vmatprep.subr.bf16.mxu1 %v17743_v34  ;;  %v5260_v46 = vsel %vm1506_vm1, %v17752_v58, 0.0  ;;  %v20429_v32 = vpack.c.bf16 %v20427_v54, %v20428_v22  ;;  %v20441_v54 = vld [vmem:[#allocation17_spill] sm:$0xff] }
 0xc4f   :  { %v17758_v26 = vpop.eup %14214  ;;  %14224 = vpow2.f32 %v5173_v23  ;;  %v20432_v23 = vld [vmem:[#allocation70_spill] sm:$0xff] }
 0xc50   :  { %v5251_v25 = vsel %vm1506_vm1, %v17758_v26, 0.0 }
 0xc51   :  { %5243 = vadd.xlane.f32.xlu0 %v5242_v35  ;;  %5258 = vadd.xlane.f32.xlu1 %v5257_v16  ;;  %v17760_v10 = vpop.eup %14216  ;;  %v20433_v35 = vld [vmem:[#allocation18_spill] sm:$0xff] }
 0xc52   :  { %v5254_v27 = vsel %vm1506_vm1, %v17760_v10, 0.0  ;;  %v20434_v16 = vpack.c.bf16 %v20432_v23, %v20433_v35  ;;  %v20447_v23 = vpack.c.bf16 %v17403_v3, %v17399_v55 }
 0xc53   :  { %v17766_v59 = vpop.eup %14218 }
 0xc54   :  { %v5269_v17 = vsel %vm1506_vm1, %v17766_v59, 0.0 }
 0xc55   :  { %5261 = vadd.xlane.f32.xlu0 %v5260_v46  ;;  %5252 = vadd.xlane.f32.xlu1 %v5251_v25  ;;  %v17768_v39 = vpop.eup %14220  ;;  %v17800_v46 = vpop.permute.xlu1 %5624  ;;  %v20435_v25 = vld [vmem:[#allocation45_spill] sm:$0xff] }
 0xc56   :  { %v5272_v48 = vsel %vm1506_vm1, %v17768_v39, 0.0 }
 0xc57   :  { %v17774_v7 = vpop.eup %14222 }
 0xc58   :  { %v5263_v37 = vsel %vm1506_vm1, %v17774_v7, 0.0 }
 0xc59   :  { %5255 = vadd.xlane.f32.xlu0 %v5254_v27  ;;  %5270 = vadd.xlane.f32.xlu1 %v5269_v17  ;;  %v17780_v19 = vpop.eup %14224  ;;  %v20436_v27 = vld [vmem:[#allocation31_spill] sm:$0xff] }
 0xc5a   :  { %v5266_v61 = vsel %vm1506_vm1, %v17780_v19, 0.0  ;;  %v20437_v17 = vpack.c.bf16 %v20435_v25, %v20436_v27  ;;  %v20449_v25 = vld [vmem:[#allocation95_spill] sm:$0xff] }
 0xc5d   :  { %5273 = vadd.xlane.f32.xlu0 %v5272_v48  ;;  %5264 = vadd.xlane.f32.xlu1 %v5263_v37  ;;  %v20439_v37 = vpack.c.bf16 %v17382_v45, %v17377_v60  ;;  %v20446_v60 = vpack.c.bf16 %v17431_v18, %v17425_v36  ;;  %v20451_v36 = vld [vmem:[#allocation90_spill] sm:$0xff]  ;;  %v20452_v18 = vld [vmem:[#allocation92_spill] sm:$0xff] }
 0xc61   :  { %5267 = vadd.xlane.f32.xlu0 %v5266_v61 }
 0xc6e   :  { %5626 = vrot.lane.b32.xlu1 %v20426_v51, %s14914_s25  ;;  %v20440_v51 = vld [vmem:[#allocation22_spill] sm:$0xff] }
 0xc6f   :  { %v20442_v22 = vpack.c.bf16 %v20440_v51, %v20441_v54  ;;  %v20455_v51 = vpack.c.bf16 %v17427_v50, %v17423_v9 }
 0xc72   :  { %5743 = vrot.lane.b32.xlu1 %v20429_v32, %s14914_s25 }
 0xc76   :  { %5791 = vrot.lane.b32.xlu1 %v20430_v11, %s14909_s0  ;;  %v20443_v11 = vld [vmem:[#allocation91_spill] sm:$0xff] }
 0xc77   :  { %5628 = vrot.lane.b32.xlu0 %v20431_v2, %s14914_s25  ;;  %v20445_v12 = vpack.c.bf16 %v20443_v11, %v20444_v14 }
 0xc7a   :  { %5747 = vrot.lane.b32.xlu1 %v20434_v16, %s14914_s25  ;;  %v20448_v16 = vld [vmem:[#allocation27_spill] sm:$0xff] }
 0xc7b   :  { %5745 = vrot.lane.b32.xlu0 %v20437_v17, %s14914_s25  ;;  %v20450_v27 = vpack.c.bf16 %v20448_v16, %v20449_v25 }
 0xc7d   :  { %v5187_v48 = vpop.xlane.xlu0 %5186 }
 0xc7e   :  { %5795 = vrot.lane.b32.xlu1 %v20438_v13, %s14909_s0  ;;  %v20453_v13 = vpack.c.bf16 %v20451_v36, %v20452_v18  ;;  %v20467_v18 = vld [vmem:[#allocation88_spill] sm:$0xff] }
 0xc7f   :  { %v5190_v6 = vpop.xlane.xlu1 %5189  ;;  %5793 = vrot.lane.b32.xlu0 %v20439_v37, %s14909_s0 }
 0xc80   :  { %14226 = vrcp.f32 %v5190_v6 }
 0xc81   :  { %v5181_v61 = vpop.xlane.xlu0 %5180 }
 0xc82   :  { %14228 = vrcp.f32 %v5181_v61  ;;  %5751 = vrot.lane.b32.xlu1 %v20442_v22, %s14914_s25  ;;  %v20454_v61 = vpack.c.bf16 %v17443_v5, %v17437_v0  ;;  %v20459_v5 = vld [vmem:[#allocation29_spill] sm:$0xff] }
 0xc83   :  { %14230 = vrcp.f32 %v5187_v48  ;;  %v5184_v32 = vpop.xlane.xlu1 %5183  ;;  %5749 = vrot.lane.b32.xlu0 %v20445_v12, %s14914_s25  ;;  %v20457_v12 = vld [vmem:[#allocation93_spill] sm:$0xff] }
 0xc84   :  { %14232 = vrcp.f32 %v5184_v32 }
 0xc85   :  { %v5199_v2 = vpop.xlane.xlu0 %5198 }
 0xc86   :  { %5799 = vrot.lane.b32.xlu1 %v20446_v60, %s14909_s0  ;;  %v20460_v60 = vld [vmem:[#allocation19_spill] sm:$0xff] }
 0xc87   :  { %v5202_v45 = vpop.xlane.xlu1 %5201  ;;  %5797 = vrot.lane.b32.xlu0 %v20447_v23, %s14909_s0  ;;  %v20463_v23 = vld [vmem:[#allocation33_spill] sm:$0xff] }
 0xc88   :  { %14234 = vrcp.f32 %v5202_v45  ;;  %v20461_v45 = vpack.c.bf16 %v20459_v5, %v20460_v60 }
 0xc89   :  { %v5193_v35 = vpop.xlane.xlu0 %5192 }
 0xc8a   :  { %14236 = vrcp.f32 %v5193_v35  ;;  %5755 = vrot.lane.b32.xlu1 %v20450_v27, %s14914_s25  ;;  %v14227_v17 = vpop.eup %14226  ;;  %v20464_v35 = vld [vmem:[#allocation35_spill] sm:$0xff] }
 0xc8b   :  { %14238 = vrcp.f32 %v5199_v2  ;;  %v5196_v48 = vpop.xlane.xlu1 %5195  ;;  %5753 = vrot.lane.b32.xlu0 %v20453_v13, %s14914_s25  ;;  %v5310_v37 = vmul.f32 %v14227_v17, %v17631_v30  ;;  %v20456_v30 = vld [vmem:[#allocation89_spill] sm:$0xff]  ;;  %v20465_v16 = vpack.c.bf16 %v20463_v23, %v20464_v35 }
 0xc8c   :  { %v14229_v6 = vpop.eup %14228  ;;  %14240 = vrcp.f32 %v5196_v48  ;;  %v20458_v2 = vpack.c.bf16 %v20456_v30, %v20457_v12 }
 0xc8d   :  { %v14231_v55 = vpop.eup %14230  ;;  %v5307_v54 = vmul.f32 %v14229_v6, %v17635_v31  ;;  %v20462_v31 = vld [vmem:[#allocation108_spill] sm:$0xff] }
 0xc8e   :  { %v14233_v3 = vpop.eup %14232  ;;  %5803 = vrot.lane.b32.xlu1 %v20454_v61, %s14909_s0  ;;  %v5309_v32 = vmul.f32 %v14231_v55, %v17629_v57 }
 0xc8f   :  { %5801 = vrot.lane.b32.xlu0 %v20455_v51, %s14909_s0  ;;  %v5308_v22 = vmul.f32 %v14233_v3, %v17639_v44 }
 0xc90   :  { %v5340_v14 = vpack.c.bf16 %v5310_v37, %v5309_v32 }
 0xc91   :  { %v5339_v11 = vpack.c.bf16 %v5308_v22, %v5307_v54 }
 0xc92   :  { %5759 = vrot.lane.b32.xlu1 %v20458_v2, %s14914_s25  ;;  %v14235_v0 = vpop.eup %14234 }
 0xc93   :  { %5757 = vrot.lane.b32.xlu0 %v20461_v45, %s14914_s25  ;;  %13036 = vmatprep.mubr.msk.bf16.mxu0 %vm1506_vm1, %v5339_v11  ;;  %v5314_v44 = vmul.f32 %v14235_v0, %v17647_v4  ;;  %v20468_v4 = vld [vmem:[#allocation87_spill] sm:$0xff] }
 0xc94   :  { %v14237_v9 = vpop.eup %14236  ;;  %13037 = vmatmul.mubr.msk.bf16.vlgmr.msra.gmra.mrb[168].mxu0 %vm1506_vm1, %v5340_v14  ;;  %v20469_v13 = vpack.c.bf16 %v20467_v18, %v20468_v4 }
 0xc95   :  { %v14239_v50 = vpop.eup %14238  ;;  %13061 = vmatpush3.bf16.msra.mxu0 %v17395_v49  ;;  %v5311_v25 = vmul.f32 %v14237_v9, %v17651_v40  ;;  %v20466_v49 = vld [vmem:[#allocation53_spill] sm:$0xff]  ;;  %v20470_v40 = vld [vmem:[#allocation47_spill] sm:$0xff] }
 0xc96   :  { %v14241_v57 = vpop.eup %14240  ;;  %13062 = vmatprep.subr.bf16.mxu0 %v20462_v31  ;;  %v5313_v17 = vmul.f32 %v14239_v50, %v17643_v33 }
 0xc97   :  { %5805 = vrot.lane.b32.xlu0 %v20465_v16, %s14909_s0  ;;  %v5312_v27 = vmul.f32 %v14241_v57, %v17655_v62 }
 0xc98   :  { %v5342_v36 = vpack.c.bf16 %v5314_v44, %v5313_v17 }
 0xc99   :  { %13063 = vmatpush3.bf16.msra.mxu0 %v20462_v31  ;;  %v5341_v48 = vpack.c.bf16 %v5312_v27, %v5311_v25 }
 0xc9a   :  { %13064 = vmatprep.subr.bf16.mxu0 %v20466_v49 }
 0xc9b   :  { %5761 = vrot.lane.b32.xlu0 %v20469_v13, %s14914_s25  ;;  %13040 = vmatprep.mubr.msk.bf16.mxu0 %vm1506_vm1, %v5341_v48 }
 0xc9c   :  { %13041 = vmatmul.mubr.msk.bf16.gmra.mrb[172].mxu0 %vm1506_vm1, %v5342_v36 }
 0xc9d   :  { %13065 = vmatpush3.bf16.msra.mxu0 %v20466_v49 }
 0xc9e   :  { %13066 = vmatprep.subr.bf16.mxu0 %v20470_v40 }
 0xca1   :  { %13067 = vmatpush3.bf16.msra.mxu0 %v20470_v40 }
 0xcba   :  { %v5211_v33 = vpop.xlane.xlu1 %5210 }
 0xcbe   :  { %v5235_v62 = vpop.xlane.xlu0 %5234 }
 0xcc2   :  { %v5205_v6 = vpop.xlane.xlu1 %5204 }
 0xcc6   :  { %v5214_v55 = vpop.xlane.xlu1 %5213  ;;  %v5229_v3 = vpop.xlane.xlu0 %5228 }
 0xcc7   :  { %14242 = vrcp.f32 %v5214_v55 }
 0xcc8   :  { %14244 = vrcp.f32 %v5205_v6 }
 0xcc9   :  { %14246 = vrcp.f32 %v5211_v33 }
 0xcca   :  { %v5208_v37 = vpop.xlane.xlu1 %5207  ;;  %v5238_v61 = vpop.xlane.xlu0 %5237 }
 0xccb   :  { %14248 = vrcp.f32 %v5208_v37 }
 0xccc   :  { %14250 = vrcp.f32 %v5238_v61 }
 0xccd   :  { %14252 = vrcp.f32 %v5229_v3 }
 0xcce   :  { %14254 = vrcp.f32 %v5235_v62  ;;  %v5232_v51 = vpop.xlane.xlu1 %5231  ;;  %v5223_v54 = vpop.xlane.xlu0 %5222 }
 0xccf   :  { %14256 = vrcp.f32 %v5232_v51 }
 0xcd1   :  { %v14243_v22 = vpop.eup %14242 }
 0xcd2   :  { %v5247_v32 = vpop.xlane.xlu1 %5246  ;;  %v5217_v11 = vpop.xlane.xlu0 %5216  ;;  %v5318_v2 = vmul.f32 %v14243_v22, %v17684_v38 }
 0xcd3   :  { %v14245_v14 = vpop.eup %14244 }
 0xcd4   :  { %v14247_v30 = vpop.eup %14246  ;;  %v5315_v45 = vmul.f32 %v14245_v14, %v17679_v29 }
 0xcd5   :  { %v14249_v12 = vpop.eup %14248  ;;  %v5317_v57 = vmul.f32 %v14247_v30, %v17668_v8 }
 0xcd6   :  { %v14251_v0 = vpop.eup %14250  ;;  %v5241_v5 = vpop.xlane.xlu1 %5240  ;;  %v5316_v9 = vmul.f32 %v14249_v12, %v17697_v15 }
 0xcd7   :  { %v5226_v60 = vpop.xlane.xlu0 %5225  ;;  %v14253_v50 = vpop.eup %14252  ;;  %v5344_v35 = vpack.c.bf16 %v5318_v2, %v5317_v57  ;;  %v5326_v16 = vmul.f32 %v14251_v0, %v17691_v42 }
 0xcd8   :  { %v14255_v31 = vpop.eup %14254  ;;  %14258 = vrcp.f32 %v5226_v60  ;;  %v5343_v44 = vpack.c.bf16 %v5316_v9, %v5315_v45  ;;  %v5323_v29 = vmul.f32 %v14253_v50, %v17688_v28 }
 0xcd9   :  { %v14257_v23 = vpop.eup %14256  ;;  %14260 = vrcp.f32 %v5217_v11  ;;  %v5325_v27 = vmul.f32 %v14255_v31, %v17674_v21 }
 0xcda   :  { %14262 = vrcp.f32 %v5223_v54  ;;  %13052 = vmatprep.mubr.msk.bf16.mxu1 %vm1506_vm1, %v5343_v44  ;;  %v5220_v38 = vpop.xlane.xlu1 %5219  ;;  %v5324_v15 = vmul.f32 %v14257_v23, %v17701_v41 }
 0xcdb   :  { %v5250_v25 = vpop.xlane.xlu0 %5249  ;;  %14264 = vrcp.f32 %v5220_v38  ;;  %13053 = vmatmul.mubr.msk.bf16.vlgmr.msra.gmra.mrb[152].mxu1 %vm1506_vm1, %v5344_v35  ;;  %v5348_v17 = vpack.c.bf16 %v5326_v16, %v5325_v27  ;;  %v13386_v35 = vld [vmem:[#allocation7] sm:$0xff]   ;;  %v13387_v16 = vld [vmem:[#allocation7 + $0x8] sm:$0xff]   ;;  %v13388_v38 = vld [vmem:[#allocation7 + $0x10] sm:$0xff]  }
 0xcdc   :  { %13077 = vmatpush3.bf16.msra.mxu1 %v17743_v34  ;;  %v5347_v8 = vpack.c.bf16 %v5324_v15, %v5323_v29  ;;  %14266 = vrcp.f32 %v5250_v25  ;;  %13092 = vmatprep.subr.bf16.mxu0 %v13386_v35  ;;  %v13393_v25 = vld [vmem:[#allocation7 + $0x38] sm:$0xff]  }
 0xcdd   :  { %13078 = vmatprep.subr.bf16.mxu1 %v17800_v46  ;;  %14268 = vrcp.f32 %v5241_v5 }
 0xcde   :  { %v5259_v42 = vpop.xlane.xlu1 %5258  ;;  %13068 = vmatprep.mubr.msk.bf16.mxu0 %vm1506_vm1, %v5347_v8  ;;  %14270 = vrcp.f32 %v5247_v32 }
 0xcdf   :  { %v5244_v48 = vpop.xlane.xlu0 %5243  ;;  %13069 = vmatmul.mubr.msk.bf16.vlgmr.msra.gmra.mrb[176].mxu0 %vm1506_vm1, %v5348_v17 }
 0xce0   :  { %14272 = vrcp.f32 %v5244_v48  ;;  %13079 = vmatpush3.bf16.msra.mxu1 %v17800_v46  ;;  %13093 = vmatpush3.bf16.msra.mxu0 %v13386_v35 }
 0xce1   :  { %13094 = vmatprep.subr.bf16.mxu0 %v13387_v16 }
 0xce2   :  { %v14259_v21 = vpop.eup %14258  ;;  %v5253_v28 = vpop.xlane.xlu1 %5252 }
 0xce3   :  { %v5262_v41 = vpop.xlane.xlu0 %5261  ;;  %v14261_v34 = vpop.eup %14260  ;;  %v5322_v18 = vmul.f32 %v14259_v21, %v17725_v56  ;;  %v20471_v21 = vld [vmem:[#allocation28_spill] sm:$0xff] }
 0xce4   :  { %v14263_v49 = vpop.eup %14262  ;;  %14274 = vrcp.f32 %v5262_v41  ;;  %v5319_v40 = vmul.f32 %v14261_v34, %v17718_v63  ;;  %13095 = vmatpush3.bf16.msra.mxu0 %v13387_v16 }
 0xce5   :  { %v14265_v36 = vpop.eup %14264  ;;  %14276 = vrcp.f32 %v5253_v28  ;;  %v5321_v46 = vmul.f32 %v14263_v49, %v17707_v1  ;;  %13096 = vmatprep.subr.bf16.mxu0 %v13388_v38  ;;  %v20472_v28 = vld [vmem:[#allocation30_spill] sm:$0xff]  ;;  %v20474_v49 = vld [vmem:[#allocation107_spill] sm:$0xff] }
 0xce6   :  { %v5271_v4 = vpop.xlane.xlu1 %5270  ;;  %v5320_v33 = vmul.f32 %v14265_v36, %v17737_v47  ;;  %v14267_v62 = vpop.eup %14266  ;;  %14278 = vrcp.f32 %v5259_v42  ;;  %v20473_v41 = vpack.c.bf16 %v20471_v21, %v20472_v28  ;;  %v20475_v36 = vld [vmem:[#allocation46_spill] sm:$0xff] }
 0xce7   :  { %v5256_v13 = vpop.xlane.xlu0 %5255  ;;  %v14269_v6 = vpop.eup %14268  ;;  %v5346_v37 = vpack.c.bf16 %v5322_v18, %v5321_v46  ;;  %v5330_v54 = vmul.f32 %v14267_v62, %v17731_v43  ;;  %v20476_v18 = vpack.c.bf16 %v20474_v49, %v20475_v36  ;;  %v20477_v62 = vld [vmem:[#allocation16_spill] sm:$0xff]  ;;  %v20478_v46 = vld [vmem:[#allocation25_spill] sm:$0xff] }
 0xce8   :  { %14280 = vrcp.f32 %v5256_v13  ;;  %v5345_v55 = vpack.c.bf16 %v5320_v33, %v5319_v40  ;;  %v14271_v3 = vpop.eup %14270  ;;  %v5327_v63 = vmul.f32 %v14269_v6, %v17728_v53  ;;  %13097 = vmatpush3.bf16.msra.mxu0 %v13388_v38  ;;  %v20479_v6 = vpack.c.bf16 %v20477_v62, %v20478_v46  ;;  %v20483_v38 = vld [vmem:[#allocation36_spill] sm:$0xff] }
 0xce9   :  { %v5329_v1 = vmul.f32 %v14271_v3, %v17715_v20  ;;  %v20481_v3 = vld [vmem:[#allocation94_spill] sm:$0xff] }
 0xcea   :  { %v14273_v61 = vpop.eup %14272  ;;  %v5265_v51 = vpop.xlane.xlu1 %5264  ;;  %13056 = vmatprep.mubr.msk.bf16.mxu1 %vm1506_vm1, %v5345_v55  ;;  %v20480_v55 = vld [vmem:[#allocation32_spill] sm:$0xff] }
 0xceb   :  { %v5274_v56 = vpop.xlane.xlu0 %5273  ;;  %13057 = vmatmul.mubr.msk.bf16.gmra.mrb[156].mxu1 %vm1506_vm1, %v5346_v37  ;;  %v5328_v47 = vmul.f32 %v14273_v61, %v17741_v52  ;;  %14282 = vrcp.f32 %v5265_v51  ;;  %v5350_v14 = vpack.c.bf16 %v5330_v54, %v5329_v1  ;;  %v20482_v37 = vpack.c.bf16 %v20480_v55, %v20481_v3  ;;  %v20499_v55 = vld [vmem:[#allocation109_spill] sm:$0xff] }
 0xcec   :  { %14284 = vrcp.f32 %v5274_v56 }
 0xced   :  { %v5349_v22 = vpack.c.bf16 %v5328_v47, %v5327_v63  ;;  %14286 = vrcp.f32 %v5271_v4 }
 0xcee   :  { %v5627_v32 = vpop.permute.xlu1 %5626  ;;  %v14275_v30 = vpop.eup %14274 }
 0xcef   :  { %v5268_v11 = vpop.xlane.xlu0 %5267  ;;  %13072 = vmatprep.mubr.msk.bf16.mxu0 %vm1506_vm1, %v5349_v22  ;;  %13080 = vmatprep.subr.bf16.mxu1 %v5627_v32  ;;  %v14277_v43 = vpop.eup %14276  ;;  %v5334_v12 = vmul.f32 %v14275_v30, %v17752_v58 }
 0xcf0   :  { %14288 = vrcp.f32 %v5268_v11  ;;  %13073 = vmatmul.mubr.msk.bf16.gmra.mrb[180].mxu0 %vm1506_vm1, %v5350_v14  ;;  %13081 = vmatpush3.bf16.msra.mxu1 %v5627_v32  ;;  %v14279_v53 = vpop.eup %14278  ;;  %v5331_v2 = vmul.f32 %v14277_v43, %v17758_v26 }
 0xcf1   :  { %v5333_v5 = vmul.f32 %v14279_v53, %v17749_v24 }
 0xcf2   :  { %v14281_v52 = vpop.eup %14280  ;;  %v17942_v51 = vpop.permute.xlu1 %5743 }
 0xcf3   :  { %v5629_v20 = vpop.permute.xlu0 %5628  ;;  %v5332_v0 = vmul.f32 %v14281_v52, %v17760_v10  ;;  %v5352_v9 = vpack.c.bf16 %v5334_v12, %v5333_v5 }
 0xcf4   :  { %13082 = vmatprep.subr.bf16.mxu1 %v5629_v20 }
 0xcf5   :  { %13083 = vmatpush3.bf16.msra.mxu1 %v5629_v20  ;;  %v5351_v60 = vpack.c.bf16 %v5332_v0, %v5331_v2  ;;  %v14283_v45 = vpop.eup %14282 }
 0xcf6   :  { %v14285_v50 = vpop.eup %14284  ;;  %v5335_v58 = vmul.f32 %v14283_v45, %v17774_v7  ;;  %v13389_v7 = vld [vmem:[#allocation7 + $0x18] sm:$0xff]   ;;  %v17946_v1 = vpop.permute.xlu1 %5791 }
 0xcf7   :  { %13084 = vmatprep.mubr.msk.bf16.mxu1 %vm1506_vm1, %v5351_v60  ;;  %v14287_v57 = vpop.eup %14286  ;;  %v5338_v26 = vmul.f32 %v14285_v50, %v17768_v39  ;;  %13098 = vmatprep.subr.bf16.mxu0 %v13389_v7  ;;  %v13390_v39 = vld [vmem:[#allocation7 + $0x20] sm:$0xff]   ;;  %v17940_v61 = vpop.permute.xlu0 %5745 }
 0xcf8   :  { %13085 = vmatmul.mubr.msk.bf16.vlgmr.msra.gmra.mrb[160].mxu1 %vm1506_vm1, %v5352_v9  ;;  %v5337_v24 = vmul.f32 %v14287_v57, %v17766_v59  ;;  %13099 = vmatpush3.bf16.msra.mxu0 %v13389_v7  ;;  %v13391_v59 = vld [vmem:[#allocation7 + $0x28] sm:$0xff]  }
 0xcf9   :  { %13100 = vmatprep.subr.bf16.mxu0 %v13390_v39  ;;  %v20484_v7 = vld [vmem:[#allocation49_spill] sm:$0xff] }
 0xcfa   :  { %v14289_v31 = vpop.eup %14288  ;;  %v5354_v23 = vpack.c.bf16 %v5338_v26, %v5337_v24  ;;  %v17952_v2 = vpop.permute.xlu1 %5747 }
 0xcfb   :  { %v5336_v44 = vmul.f32 %v14289_v31, %v17780_v19  ;;  %v13392_v19 = vld [vmem:[#allocation7 + $0x30] sm:$0xff]   ;;  %v17944_v63 = vpop.permute.xlu0 %5793 }
 0xcfc   :  { %13101 = vmatpush3.bf16.msra.mxu0 %v13390_v39  ;;  %v20485_v39 = vpack.c.bf16 %v20483_v38, %v20484_v7  ;;  %v20513_v7 = vld [vmem:[#allocation110_spill] sm:$0xff] }
 0xcfd   :  { %v5353_v10 = vpack.c.bf16 %v5336_v44, %v5335_v58  ;;  %13102 = vmatprep.subr.bf16.mxu0 %v13391_v59 }
 0xcfe   :  { %v17958_v5 = vpop.permute.xlu1 %5795 }
 0xcff   :  { %13088 = vmatprep.mubr.msk.bf16.mxu1 %vm1506_vm1, %v5353_v10  ;;  %v17950_v12 = vpop.permute.xlu0 %5749 }
 0xd00   :  { %13089 = vmatmul.mubr.msk.bf16.gmra.mrb[164].mxu1 %vm1506_vm1, %v5354_v23  ;;  %13103 = vmatpush3.bf16.msra.mxu0 %v13391_v59 }
 0xd01   :  { %13104 = vmatprep.subr.bf16.mxu0 %v13392_v19 }
 0xd02   :  { %v17962_v44 = vpop.permute.xlu1 %5751 }
 0xd03   :  { %v17956_v0 = vpop.permute.xlu0 %5797 }
 0xd04   :  { %13105 = vmatpush3.bf16.msra.mxu0 %v13392_v19  ;;  %v20486_v19 = vld [vmem:[#allocation104_spill] sm:$0xff] }
 0xd05   :  { %13106 = vmatprep.subr.bf16.mxu0 %v13393_v25 }
 0xd07   :  { %v17960_v31 = vpop.permute.xlu0 %5753 }
 0xd08   :  { %13107 = vmatpush3.bf16.msra.mxu0 %v13393_v25  ;;  %v20487_v25 = vld [vmem:[#allocation38_spill] sm:$0xff] }
 0xd0b   :  { %v17970_v59 = vpop.permute.xlu0 %5801 }
 0xd0f   :  { %v17981_v28 = vpop.permute.xlu0 %5757 }
 0xd67   :  { %v13038_v29 = vpop.f32.mrb[168].mxu0 }
 0xd68   :  { %v5413_v15 = vpop.f32.mrb[169].mxu0 }
 0xd69   :  { %v13039_v27 = vpop.f32.mrb[170].mxu0 }
 0xd6a   :  { %v5712_v8 = vpack.c.bf16 %v13039_v27, %v13038_v29  ;;  %v5416_v17 = vpop.f32.mrb[171].mxu0  ;;  %v20488_v29 = vpack.c.bf16 %v20486_v19, %v20487_v25 }
 0xd6b   :  { %v5711_v42 = vpack.c.bf16 %v5416_v17, %v5413_v15  ;;  %v5800_v15 = vpop.permute.xlu1 %5799  ;;  %v20489_v17 = vld [vmem:[#allocation99_spill] sm:$0xff] }
 0xd6c   :  { %5841 = vrot.lane.b32.xlu0 %v5712_v8, %s14913_s2 }
 0xd6d   :  { %5839 = vrot.lane.b32.xlu1 %v5711_v42, %s14913_s2  ;;  %v20490_v42 = vld [vmem:[#allocation97_spill] sm:$0xff] }
 0xd6f   :  { %v13042_v48 = vpop.f32.mrb[172].mxu0  ;;  %v5756_v49 = vpop.permute.xlu1 %5755 }
 0xd70   :  { %5809 = vrot.lane.b32.xlu0 %v20473_v41, %s14909_s0  ;;  %v5429_v34 = vpop.f32.mrb[173].mxu0 }
 0xd71   :  { %5807 = vrot.lane.b32.xlu1 %v20476_v18, %s14909_s0  ;;  %v13043_v4 = vpop.f32.mrb[174].mxu0  ;;  %v20492_v18 = vld [vmem:[#allocation98_spill] sm:$0xff] }
 0xd72   :  { %v5714_v13 = vpack.c.bf16 %v13043_v4, %v13042_v48  ;;  %v5432_v40 = vpop.f32.mrb[175].mxu0  ;;  %v20491_v48 = vpack.c.bf16 %v20489_v17, %v20490_v42  ;;  %v20493_v4 = vld [vmem:[#allocation96_spill] sm:$0xff]  ;;  %v20519_v42 = vld [vmem:[#allocation61_spill] sm:$0xff] }
 0xd73   :  { %v5713_v33 = vpack.c.bf16 %v5432_v40, %v5429_v34  ;;  %v20495_v40 = vld [vmem:[#allocation105_spill] sm:$0xff] }
 0xd74   :  { %5845 = vrot.lane.b32.xlu0 %v5714_v13, %s14913_s2  ;;  %v20494_v13 = vpack.c.bf16 %v20492_v18, %v20493_v4  ;;  %v20523_v18 = vld [vmem:[#allocation64_spill] sm:$0xff] }
 0xd75   :  { %5843 = vrot.lane.b32.xlu1 %v5713_v33, %s14913_s2  ;;  %v20496_v33 = vld [vmem:[#allocation39_spill] sm:$0xff] }
 0xd76   :  { %v20497_v62 = vpack.c.bf16 %v20495_v40, %v20496_v33 }
 0xd78   :  { %5765 = vrot.lane.b32.xlu0 %v20479_v6, %s14914_s25  ;;  %v20498_v6 = vld [vmem:[#allocation42_spill] sm:$0xff] }
 0xd79   :  { %5763 = vrot.lane.b32.xlu1 %v20482_v37, %s14914_s25  ;;  %v20500_v3 = vpack.c.bf16 %v20498_v6, %v20499_v55  ;;  %v5806_v37 = vpop.permute.xlu0 %5805  ;;  %v20526_v55 = vld [vmem:[#allocation66_spill] sm:$0xff] }
 0xdae   :  { %v13054_v56 = vpop.f32.mrb[152].mxu1 }
 0xdaf   :  { %v5502_v54 = vpop.f32.mrb[153].mxu1 }
 0xdb0   :  { %v13055_v47 = vpop.f32.mrb[154].mxu1 }
 0xdb1   :  { %v5716_v22 = vpack.c.bf16 %v13055_v47, %v13054_v56  ;;  %v5505_v32 = vpop.f32.mrb[155].mxu1 }
 0xdb2   :  { %v5715_v11 = vpack.c.bf16 %v5505_v32, %v5502_v54  ;;  %v13070_v14 = vpop.f32.mrb[176].mxu0  ;;  %v5804_v54 = vpop.permute.xlu1 %5803 }
 0xdb3   :  { %5849 = vrot.lane.b32.xlu0 %v5716_v22, %s14913_s2  ;;  %v5591_v30 = vpop.f32.mrb[177].mxu0 }
 0xdb4   :  { %5847 = vrot.lane.b32.xlu1 %v5715_v11, %s14913_s2  ;;  %v13071_v43 = vpop.f32.mrb[178].mxu0 }
 0xdb5   :  { %v5720_v53 = vpack.c.bf16 %v13071_v43, %v13070_v14  ;;  %v5594_v52 = vpop.f32.mrb[179].mxu0  ;;  %v20501_v14 = vld [vmem:[#allocation102_spill] sm:$0xff] }
 0xdb6   :  { %v5719_v20 = vpack.c.bf16 %v5594_v52, %v5591_v30  ;;  %v20502_v30 = vld [vmem:[#allocation100_spill] sm:$0xff]  ;;  %v20505_v52 = vld [vmem:[#allocation101_spill] sm:$0xff] }
 0xdb7   :  { %5857 = vrot.lane.b32.xlu0 %v5720_v53, %s14913_s2  ;;  %v20503_v43 = vpack.c.bf16 %v20501_v14, %v20502_v30  ;;  %v20504_v53 = vld [vmem:[#allocation103_spill] sm:$0xff] }
 0xdb8   :  { %5855 = vrot.lane.b32.xlu1 %v5719_v20, %s14913_s2  ;;  %v20506_v20 = vpack.c.bf16 %v20504_v53, %v20505_v52 }
 0xdbe   :  { %v13058_v60 = vpop.f32.mrb[156].mxu1 }
 0xdbf   :  { %v5518_v45 = vpop.f32.mrb[157].mxu1 }
 0xdc0   :  { %v13059_v9 = vpop.f32.mrb[158].mxu1 }
 0xdc1   :  { %v5718_v50 = vpack.c.bf16 %v13059_v9, %v13058_v60  ;;  %v5521_v57 = vpop.f32.mrb[159].mxu1  ;;  %v18004_v60 = vpop.permute.xlu0 %5761  ;;  %v20507_v9 = vld [vmem:[#allocation57_spill] sm:$0xff] }
 0xdc2   :  { %v5717_v58 = vpack.c.bf16 %v5521_v57, %v5518_v45  ;;  %v5760_v45 = vpop.permute.xlu1 %5759 }
 0xdc3   :  { %v13074_v26 = vpop.f32.mrb[180].mxu0  ;;  %5853 = vrot.lane.b32.xlu0 %v5718_v50, %s14913_s2  ;;  %v20508_v50 = vld [vmem:[#allocation21_spill] sm:$0xff] }
 0xdc4   :  { %v5607_v10 = vpop.f32.mrb[181].mxu0  ;;  %5851 = vrot.lane.b32.xlu1 %v5717_v58, %s14913_s2  ;;  %v20509_v57 = vpack.c.bf16 %v20507_v9, %v20508_v50 }
 0xdc5   :  { %v13075_v24 = vpop.f32.mrb[182].mxu0 }
 0xdc6   :  { %v5722_v23 = vpack.c.bf16 %v13075_v24, %v13074_v26  ;;  %v5610_v35 = vpop.f32.mrb[183].mxu0  ;;  %v5873_v58 = vsel %vm1149_vm0, %v20509_v57, %v17942_v51  ;;  %v20510_v24 = vld [vmem:[#allocation43_spill] sm:$0xff] }
 0xdc7   :  { %v5721_v16 = vpack.c.bf16 %v5610_v35, %v5607_v10  ;;  %5813 = vrot.lane.b32.xlu0 %v20485_v39, %s14909_s0  ;;  %v5920_v10 = vsel %vm1506_vm1, %v5873_v58, %v17946_v1  ;;  %v20514_v39 = vld [vmem:[#allocation40_spill] sm:$0xff]  ;;  %v20516_v51 = vld [vmem:[#allocation55_spill] sm:$0xff]  ;;  %v20534_v58 = vld [vmem:[#allocation62_spill] sm:$0xff] }
 0xdc8   :  { %5811 = vrot.lane.b32.xlu1 %v20488_v29, %s14909_s0  ;;  %v20515_v19 = vpack.c.bf16 %v20513_v7, %v20514_v39  ;;  %v20517_v29 = vld [vmem:[#allocation106_spill] sm:$0xff] }
 0xdcb   :  { %v13086_v27 = vpop.f32.mrb[160].mxu1  ;;  %5861 = vrot.lane.b32.xlu0 %v5722_v23, %s14913_s2  ;;  %v20511_v23 = vld [vmem:[#allocation23_spill] sm:$0xff] }
 0xdcc   :  { %v5680_v8 = vpop.f32.mrb[161].mxu1  ;;  %5767 = vrot.lane.b32.xlu1 %v20491_v48, %s14914_s25  ;;  %v20512_v35 = vpack.c.bf16 %v20510_v24, %v20511_v23  ;;  %v20537_v23 = vld [vmem:[#allocation74_spill] sm:$0xff] }
 0xdcd   :  { %v13087_v21 = vpop.f32.mrb[162].mxu1 }
 0xdce   :  { %v5724_v41 = vpack.c.bf16 %v13087_v21, %v13086_v27  ;;  %v5683_v34 = vpop.f32.mrb[163].mxu1  ;;  %v20518_v27 = vpack.c.bf16 %v20516_v51, %v20517_v29  ;;  %v20540_v29 = vld [vmem:[#allocation73_spill] sm:$0xff] }
 0xdcf   :  { %v5723_v36 = vpack.c.bf16 %v5683_v34, %v5680_v8  ;;  %5769 = vrot.lane.b32.xlu0 %v20494_v13, %s14914_s25 }
 0xdd0   :  { %5815 = vrot.lane.b32.xlu1 %v20497_v62, %s14909_s0 }
 0xdd3   :  { %v13090_v46 = vpop.f32.mrb[164].mxu1  ;;  %5817 = vrot.lane.b32.xlu0 %v20500_v3, %s14909_s0 }
 0xdd4   :  { %v5696_v56 = vpop.f32.mrb[165].mxu1  ;;  %5859 = vrot.lane.b32.xlu1 %v5721_v16, %s14913_s2  ;;  %v5876_v16 = vsel %vm1149_vm0, %v20512_v35, %v17940_v61  ;;  %v20538_v35 = vld [vmem:[#allocation72_spill] sm:$0xff] }
 0xdd5   :  { %v13091_v47 = vpop.f32.mrb[166].mxu1  ;;  %v5922_v25 = vsel %vm1506_vm1, %v5876_v16, %v17944_v63  ;;  %v20520_v63 = vld [vmem:[#allocation63_spill] sm:$0xff]  ;;  %v20539_v16 = vpack.c.bf16 %v20537_v23, %v20538_v35 }
 0xdd6   :  { %v5726_v22 = vpack.c.bf16 %v13091_v47, %v13090_v46  ;;  %v5699_v32 = vpop.f32.mrb[167].mxu1  ;;  %v20521_v48 = vpack.c.bf16 %v20519_v42, %v20520_v63 }
 0xdd7   :  { %v5725_v11 = vpack.c.bf16 %v5699_v32, %v5696_v56  ;;  %5773 = vrot.lane.b32.xlu0 %v20503_v43, %s14914_s25 }
 0xdd8   :  { %5771 = vrot.lane.b32.xlu1 %v20506_v20, %s14914_s25  ;;  %v5879_v21 = vsel %vm1149_vm0, %v20521_v48, %v17952_v2  ;;  %v20531_v20 = vld [vmem:[#allocation69_spill] sm:$0xff]  ;;  %v20543_v48 = vld [vmem:[#allocation78_spill] sm:$0xff] }
 0xdd9   :  { %v5924_v34 = vsel %vm1506_vm1, %v5879_v21, %v17958_v5  ;;  %v20525_v5 = vld [vmem:[#allocation68_spill] sm:$0xff] }
 0xdda   :  { %v20527_v3 = vpack.c.bf16 %v20525_v5, %v20526_v55  ;;  %v20544_v21 = vld [vmem:[#allocation76_spill] sm:$0xff] }
 0xddb   :  { %5865 = vrot.lane.b32.xlu0 %v5724_v41, %s14913_s2 }
 0xddc   :  { %5863 = vrot.lane.b32.xlu1 %v5723_v36, %s14913_s2  ;;  %v20522_v36 = vld [vmem:[#allocation58_spill] sm:$0xff]  ;;  %v5885_v56 = vsel %vm1149_vm0, %v20527_v3, %v17962_v44  ;;  %v20550_v3 = vld [vmem:[#allocation80_spill] sm:$0xff] }
 0xddd   :  { %v20524_v4 = vpack.c.bf16 %v20522_v36, %v20523_v18  ;;  %v20546_v18 = vld [vmem:[#allocation77_spill] sm:$0xff] }
 0xdde   :  { %v5842_v26 = vpop.permute.xlu0 %5841 }
 0xddf   :  { %v5840_v38 = vpop.permute.xlu1 %5839  ;;  %5821 = vrot.lane.b32.xlu0 %v20515_v19, %s14909_s0  ;;  %v5956_v8 = vsel %vm5951_vm2, %v5922_v25, %v5842_v26  ;;  %v5882_v13 = vsel %vm1149_vm0, %v20524_v4, %v17950_v12  ;;  %v5928_v12 = vsel %vm1506_vm1, %v5885_v56, %v5800_v15  ;;  %v20532_v15 = vld [vmem:[#allocation60_spill] sm:$0xff]  ;;  %v20535_v26 = vld [vmem:[#allocation65_spill] sm:$0xff]  ;;  %v20547_v4 = vld [vmem:[#allocation75_spill] sm:$0xff] }
 0xde0   :  { %5819 = vrot.lane.b32.xlu1 %v20518_v27, %s14909_s0  ;;  %v5953_v1 = vsel %vm5951_vm2, %v5920_v10, %v5840_v38  ;;  %v5926_v33 = vsel %vm1506_vm1, %v5882_v13, %v17956_v0  ;;  %v20529_v0 = vld [vmem:[#allocation59_spill] sm:$0xff]  ;;  %v20533_v9 = vpack.c.bf16 %v20531_v20, %v20532_v15  ;;  %v5897_v38 = vsel %vm1149_vm0, %v20539_v16, %v5760_v45  ;;  %v20555_v20 = vld [vmem:[#allocation86_spill] sm:$0xff]  ;;  %v20556_v15 = vld [vmem:[#allocation84_spill] sm:$0xff] }
 0xde1   :  { %13108 = vmatprep.mubr.bf16.mxu0 %v5953_v1  ;;  %v20541_v27 = vld [vmem:[#allocation71_spill] sm:$0xff]  ;;  %v20548_v13 = vpack.c.bf16 %v20546_v18, %v20547_v4  ;;  %v14731_v4 = vld [vmem:[#allocation2 + $0x20] sm:$0xff] }
 0xde2   :  { %13109 = vmatmul.mubr.bf16.vlgmr.msra.gmra.mrb[184].mxu0 %v5956_v8  ;;  %v5810_v61 = vpop.permute.xlu0 %5809  ;;  %v5891_v50 = vsel %vm1149_vm0, %v20533_v9, %v5756_v49  ;;  %v20542_v45 = vpack.c.bf16 %v20540_v29, %v20541_v27  ;;  %v20557_v9 = vpack.c.bf16 %v20555_v20, %v20556_v15 }
 0xde3   :  { %v5808_v17 = vpop.permute.xlu1 %5807  ;;  %5869 = vrot.lane.b32.xlu0 %v5726_v22, %s14913_s2  ;;  %v20528_v22 = vld [vmem:[#allocation67_spill] sm:$0xff] }
 0xde4   :  { %5867 = vrot.lane.b32.xlu1 %v5725_v11, %s14913_s2  ;;  %v20530_v32 = vpack.c.bf16 %v20528_v22, %v20529_v0  ;;  %v5936_v49 = vsel %vm1506_vm1, %v5897_v38, %v5808_v17  ;;  %v20553_v22 = vld [vmem:[#allocation79_spill] sm:$0xff]  ;;  %v18130_v38 = vld [vmem:[%s19838_s5] ss:$0 sm:$0xff] }
 0xde6   :  { %v5846_v41 = vpop.permute.xlu0 %5845  ;;  %v5888_v11 = vsel %vm1149_vm0, %v20530_v32, %v17960_v31  ;;  %v5932_v31 = vsel %vm1506_vm1, %v5891_v50, %v5804_v54 }
 0xde7   :  { %v5844_v40 = vpop.permute.xlu1 %5843  ;;  %v5962_v46 = vsel %vm5951_vm2, %v5926_v33, %v5846_v41  ;;  %v5930_v30 = vsel %vm1506_vm1, %v5888_v11, %v17970_v59  ;;  %v20536_v59 = vpack.c.bf16 %v20534_v58, %v20535_v26  ;;  %v20545_v41 = vpack.c.bf16 %v20543_v48, %v20544_v21  ;;  %v20559_v58 = vld [vmem:[#allocation83_spill] sm:$0xff] }
 0xde8   :  { %v5959_v62 = vsel %vm5951_vm2, %v5924_v34, %v5844_v40 }
 0xde9   :  { %13112 = vmatprep.mubr.bf16.mxu0 %v5959_v62  ;;  %v5894_v10 = vsel %vm1149_vm0, %v20536_v59, %v17981_v28 }
 0xdea   :  { %13113 = vmatmul.mubr.bf16.gmra.mrb[188].mxu0 %v5962_v46  ;;  %v5766_v2 = vpop.permute.xlu0 %5765  ;;  %v5934_v7 = vsel %vm1506_vm1, %v5894_v10, %v5806_v37  ;;  %v5900_v37 = vsel %vm1149_vm0, %v20542_v45, %v18004_v60  ;;  %v14728_v45 = vld [vmem:[#allocation2 + $0x8] sm:$0xff] }
 0xdeb   :  { %v5764_v6 = vpop.permute.xlu1 %5763  ;;  %v5938_v8 = vsel %vm1506_vm1, %v5900_v37, %v5810_v61  ;;  %v5906_v40 = vsel %vm1149_vm0, %v20548_v13, %v5766_v2  ;;  %v20552_v2 = vld [vmem:[#allocation81_spill] sm:$0xff] }
 0xdec   :  { %v5903_v34 = vsel %vm1149_vm0, %v20545_v41, %v5764_v6  ;;  %v20549_v6 = vld [vmem:[#allocation82_spill] sm:$0xff]  ;;  %v20554_v0 = vpack.c.bf16 %v20552_v2, %v20553_v22  ;;  %v14735_v2 = vld [vmem:[#allocation2 + $0x40] sm:$0xff] }
 0xded   :  { %v20551_v56 = vpack.c.bf16 %v20549_v6, %v20550_v3 }
 0xe25   :  { %v5850_v47 = vpop.permute.xlu0 %5849 }
 0xe26   :  { %v5848_v14 = vpop.permute.xlu1 %5847  ;;  %v5968_v53 = vsel %vm5951_vm2, %v5930_v30, %v5850_v47 }
 0xe27   :  { %v5965_v43 = vsel %vm5951_vm2, %v5928_v12, %v5848_v14 }
 0xe28   :  { %13116 = vmatprep.mubr.bf16.mxu0 %v5965_v43 }
 0xe29   :  { %13117 = vmatmul.mubr.bf16.gmra.mrb[192].mxu0 %v5968_v53  ;;  %v5858_v44 = vpop.permute.xlu0 %5857 }
 0xe2a   :  { %v5856_v52 = vpop.permute.xlu1 %5855  ;;  %v5980_v17 = vsel %vm5951_vm2, %v5938_v8, %v5858_v44 }
 0xe2b   :  { %v5977_v25 = vsel %vm5951_vm2, %v5936_v49, %v5856_v52 }
 0xe35   :  { %v5854_v57 = vpop.permute.xlu0 %5853 }
 0xe36   :  { %v5852_v24 = vpop.permute.xlu1 %5851  ;;  %v5974_v54 = vsel %vm5951_vm2, %v5934_v7, %v5854_v57 }
 0xe37   :  { %v5971_v39 = vsel %vm5951_vm2, %v5932_v31, %v5852_v24  ;;  %v20558_v31 = vld [vmem:[#allocation85_spill] sm:$0xff] }
 0xe38   :  { %13120 = vmatprep.mubr.bf16.mxu0 %v5971_v39  ;;  %v20560_v26 = vpack.c.bf16 %v20558_v31, %v20559_v58  ;;  %v14739_v31 = vld [vmem:[#allocation2 + $0x60] sm:$0xff] }
 0xe39   :  { %13121 = vmatmul.mubr.bf16.gmra.mrb[196].mxu0 %v5974_v54  ;;  %v5814_v19 = vpop.permute.xlu0 %5813 }
 0xe3a   :  { %v5812_v28 = vpop.permute.xlu1 %5811  ;;  %13124 = vmatprep.mubr.bf16.mxu0 %v5977_v25  ;;  %v5942_v61 = vsel %vm1506_vm1, %v5906_v40, %v5814_v19  ;;  %v14727_v25 = vld [vmem:[#allocation2] sm:$0xff] }
 0xe3b   :  { %v5940_v60 = vsel %vm1506_vm1, %v5903_v34, %v5812_v28 }
 0xe3d   :  { %v5862_v51 = vpop.permute.xlu0 %5861 }
 0xe3e   :  { %v5768_v1 = vpop.permute.xlu1 %5767  ;;  %v5986_v46 = vsel %vm5951_vm2, %v5942_v61, %v5862_v51  ;;  %v14733_v61 = vld [vmem:[#allocation2 + $0x30] sm:$0xff] }
 0xe3f   :  { %v5909_v47 = vsel %vm1149_vm0, %v20551_v56, %v5768_v1  ;;  %v14729_v1 = vld [vmem:[#allocation2 + $0x18] sm:$0xff] }
 0xe41   :  { %13125 = vmatmul.mubr.bf16.gmra.mrb[200].mxu0 %v5980_v17  ;;  %v5770_v42 = vpop.permute.xlu0 %5769 }
 0xe42   :  { %v5816_v63 = vpop.permute.xlu1 %5815  ;;  %v5912_v32 = vsel %vm1149_vm0, %v20554_v0, %v5770_v42 }
 0xe43   :  { %v5944_v11 = vsel %vm1506_vm1, %v5909_v47, %v5816_v63  ;;  %v14730_v63 = vld [vmem:[#allocation2 + $0x10] sm:$0xff] }
 0xe45   :  { %v5818_v36 = vpop.permute.xlu0 %5817 }
 0xe46   :  { %v5860_v33 = vpop.permute.xlu1 %5859  ;;  %v5946_v30 = vsel %vm1506_vm1, %v5912_v32, %v5818_v36 }
 0xe47   :  { %v5983_v62 = vsel %vm5951_vm2, %v5940_v60, %v5860_v33  ;;  %v14732_v60 = vld [vmem:[#allocation2 + $0x28] sm:$0xff] }
 0xe48   :  { %13128 = vmatprep.mubr.bf16.mxu0 %v5983_v62 }
 0xe49   :  { %13129 = vmatmul.mubr.bf16.gmra.mrb[204].mxu0 %v5986_v46  ;;  %v5774_v5 = vpop.permute.xlu0 %5773  ;;  %v14734_v46 = vld [vmem:[#allocation2 + $0x38] sm:$0xff] }
 0xe4a   :  { %v5772_v55 = vpop.permute.xlu1 %5771  ;;  %v5918_v59 = vsel %vm1149_vm0, %v20560_v26, %v5774_v5 }
 0xe4b   :  { %v5915_v50 = vsel %vm1149_vm0, %v20557_v9, %v5772_v55 }
 0xe4d   :  { %v5866_v12 = vpop.permute.xlu0 %5865 }
 0xe4e   :  { %v5864_v14 = vpop.permute.xlu1 %5863  ;;  %v5992_v53 = vsel %vm5951_vm2, %v5946_v30, %v5866_v12  ;;  %v14737_v30 = vld [vmem:[#allocation2 + $0x50] sm:$0xff] }
 0xe4f   :  { %v5989_v43 = vsel %vm5951_vm2, %v5944_v11, %v5864_v14  ;;  %v14736_v11 = vld [vmem:[#allocation2 + $0x48] sm:$0xff] }
 0xe50   :  { %13132 = vmatprep.mubr.bf16.mxu0 %v5989_v43 }
 0xe51   :  { %13133 = vmatmul.mubr.bf16.gmra.mrb[208].mxu0 %v5992_v53  ;;  %v5822_v44 = vpop.permute.xlu0 %5821  ;;  %v14738_v53 = vld [vmem:[#allocation2 + $0x58] sm:$0xff] }
 0xe52   :  { %v5820_v52 = vpop.permute.xlu1 %5819  ;;  %v5950_v23 = vsel %vm1506_vm1, %v5918_v59, %v5822_v44 }
 0xe53   :  { %v5948_v10 = vsel %vm1506_vm1, %v5915_v50, %v5820_v52 }
 0xe55   :  { %v5870_v57 = vpop.permute.xlu0 %5869 }
 0xe56   :  { %v5868_v24 = vpop.permute.xlu1 %5867  ;;  %v5998_v16 = vsel %vm5951_vm2, %v5950_v23, %v5870_v57  ;;  %v14741_v23 = vld [vmem:[#allocation2 + $0x70] sm:$0xff] }
 0xe57   :  { %v5995_v35 = vsel %vm5951_vm2, %v5948_v10, %v5868_v24  ;;  %v14740_v10 = vld [vmem:[#allocation2 + $0x68] sm:$0xff] }
 0xe58   :  { %13136 = vmatprep.mubr.bf16.mxu0 %v5995_v35 }
 0xe59   :  { %13137 = vmatmul.mubr.bf16.gmra.mrb[212].mxu0 %v5998_v16 }
 0xeb5   :  { %v13110_v7 = vpop.f32.mrb[184].mxu0 }
 0xeb6   :  { %v6105_v39 = vpop.f32.mrb[185].mxu0  ;;  %v6114_v27 = vadd.f32 %v13110_v7, %v18130_v38 }
 0xeb7   :  { %v6106_v49 = vadd.f32 %v18130_v38, %v6105_v39  ;;  %v13111_v54 = vpop.f32.mrb[186].mxu0  ;;  %v14742_v39 = vld [vmem:[#allocation2 + $0x78] sm:$0xff] }
 0xeb8   :  { %v6108_v19 = vpop.f32.mrb[187].mxu0  ;;  %v6117_v51 = vadd.f32 %v13111_v54, %v18130_v38  ;;  %v18144_v48 = vadd.f32 %v14730_v63, %v6114_v27  ;;  %v14745_v63 = vld [vmem:[#allocation2 + $0x90] sm:$0xff] }
 0xeb9   :  { %v18133_v28 = vadd.f32 %v14727_v25, %v6106_v49  ;;  %v6109_v29 = vadd.f32 %v18130_v38, %v6108_v19 }
 0xeba   :  { %v18141_v8 = vadd.f32 %v14729_v1, %v6117_v51  ;;  %20564 = vst [vmem:[#allocation26_spill] sm:$0xff] %v18144_v48 }
 0xebb   :  { %20561 = vst [vmem:[#allocation112_spill] sm:$0xff] %v18133_v28  ;;  %v18138_v37 = vadd.f32 %v14728_v45, %v6109_v29  ;;  %6266 = vadd.xlane.f32.xlu1 %v18133_v28  ;;  %v14743_v29 = vld [vmem:[#allocation2 + $0x80] sm:$0xff] }
 0xebc   :  { %20563 = vst [vmem:[#allocation113_spill] sm:$0xff] %v18141_v8 }
 0xebd   :  { %20562 = vst [vmem:[#allocation20_spill] sm:$0xff] %v18138_v37  ;;  %6268 = vadd.xlane.f32.xlu0 %v18138_v37  ;;  %v13114_v17 = vpop.f32.mrb[188].mxu0 }
 0xebe   :  { %v6121_v42 = vpop.f32.mrb[189].mxu0  ;;  %v6130_v18 = vadd.f32 %v13114_v17, %v18130_v38  ;;  %v14744_v17 = vld [vmem:[#allocation2 + $0x88] sm:$0xff] }
 0xebf   :  { %v6122_v21 = vadd.f32 %v18130_v38, %v6121_v42  ;;  %6272 = vadd.xlane.f32.xlu1 %v18141_v8  ;;  %v13115_v41 = vpop.f32.mrb[190].mxu0 }
 0xec0   :  { %v6124_v34 = vpop.f32.mrb[191].mxu0  ;;  %v6133_v40 = vadd.f32 %v13115_v41, %v18130_v38  ;;  %v18158_v62 = vadd.f32 %v14733_v61, %v6130_v18 }
 0xec1   :  { %v6125_v36 = vadd.f32 %v18130_v38, %v6124_v34  ;;  %6270 = vadd.xlane.f32.xlu0 %v18144_v48  ;;  %v18151_v13 = vadd.f32 %v14731_v4, %v6122_v21 }
 0xec2   :  { %20567 = vst [vmem:[#allocation37_spill] sm:$0xff] %v18158_v62  ;;  %v18160_v5 = vadd.f32 %v14734_v46, %v6133_v40  ;;  %v14747_v46 = vld [vmem:[#allocation2 + $0xa0] sm:$0xff] }
 0xec3   :  { %20565 = vst [vmem:[#allocation24_spill] sm:$0xff] %v18151_v13  ;;  %v18154_v33 = vadd.f32 %v14732_v60, %v6125_v36  ;;  %v14746_v36 = vld [vmem:[#allocation2 + $0x98] sm:$0xff] }
 0xec4   :  { %20568 = vst [vmem:[#allocation44_spill] sm:$0xff] %v18160_v5 }
 0xec5   :  { %20566 = vst [vmem:[#allocation34_spill] sm:$0xff] %v18154_v33  ;;  %6276 = vadd.xlane.f32.xlu1 %v18154_v33  ;;  %6274 = vadd.xlane.f32.xlu0 %v18151_v13 }
 0xec9   :  { %6280 = vadd.xlane.f32.xlu1 %v18160_v5  ;;  %6278 = vadd.xlane.f32.xlu0 %v18158_v62 }
 0xefc   :  { %v13118_v55 = vpop.f32.mrb[192].mxu0 }
 0xefd   :  { %v6137_v6 = vpop.f32.mrb[193].mxu0  ;;  %v6146_v12 = vadd.f32 %v13118_v55, %v18130_v38 }
 0xefe   :  { %v6138_v3 = vadd.f32 %v18130_v38, %v6137_v6  ;;  %v13119_v56 = vpop.f32.mrb[194].mxu0 }
 0xeff   :  { %v6140_v47 = vpop.f32.mrb[195].mxu0  ;;  %v6149_v32 = vadd.f32 %v13119_v56, %v18130_v38  ;;  %v18173_v43 = vadd.f32 %v14737_v30, %v6146_v12  ;;  %v14748_v56 = vld [vmem:[#allocation2 + $0xa8] sm:$0xff]  ;;  %v14749_v12 = vld [vmem:[#allocation2 + $0xb0] sm:$0xff] }
 0xf00   :  { %v18166_v22 = vadd.f32 %v14735_v2, %v6138_v3  ;;  %v6141_v0 = vadd.f32 %v18130_v38, %v6140_v47 }
 0xf01   :  { %20571 = vst [vmem:[#allocation115_spill] sm:$0xff] %v18173_v43  ;;  %v18176_v44 = vadd.f32 %v14738_v53, %v6149_v32 }
 0xf02   :  { %20569 = vst [vmem:[#allocation116_spill] sm:$0xff] %v18166_v22  ;;  %v18170_v14 = vadd.f32 %v14736_v11, %v6141_v0  ;;  %6282 = vadd.xlane.f32.xlu0 %v18166_v22  ;;  %v14750_v11 = vld [vmem:[#allocation2 + $0xb8] sm:$0xff] }
 0xf03   :  { %20572 = vst [vmem:[#allocation111_spill] sm:$0xff] %v18176_v44 }
 0xf04   :  { %20570 = vst [vmem:[#allocation117_spill] sm:$0xff] %v18170_v14  ;;  %6284 = vadd.xlane.f32.xlu1 %v18170_v14 }
 0xf06   :  { %6286 = vadd.xlane.f32.xlu0 %v18173_v43 }
 0xf08   :  { %6288 = vadd.xlane.f32.xlu1 %v18176_v44 }
 0xf0c   :  { %v13122_v52 = vpop.f32.mrb[196].mxu0 }
 0xf0d   :  { %v6153_v20 = vpop.f32.mrb[197].mxu0  ;;  %v6162_v57 = vadd.f32 %v13122_v52, %v18130_v38 }
 0xf0e   :  { %v6154_v15 = vadd.f32 %v18130_v38, %v6153_v20  ;;  %v13123_v9 = vpop.f32.mrb[198].mxu0 }
 0xf0f   :  { %v6156_v50 = vpop.f32.mrb[199].mxu0  ;;  %v6165_v59 = vadd.f32 %v13123_v9, %v18130_v38  ;;  %v18189_v35 = vadd.f32 %v14741_v23, %v6162_v57  ;;  %v14751_v9 = vld [vmem:[#allocation2 + $0xc0] sm:$0xff] }
 0xf10   :  { %v18182_v58 = vadd.f32 %v14739_v31, %v6154_v15  ;;  %v6157_v26 = vadd.f32 %v18130_v38, %v6156_v50 }
 0xf11   :  { %20575 = vst [vmem:[#allocation50_spill] sm:$0xff] %v18189_v35  ;;  %v18192_v49 = vadd.f32 %v14742_v39, %v6165_v59  ;;  %v14754_v39 = vld [vmem:[#allocation2 + $0xd8] sm:$0xff] }
 0xf12   :  { %20573 = vst [vmem:[#allocation114_spill] sm:$0xff] %v18182_v58  ;;  %v18186_v24 = vadd.f32 %v14740_v10, %v6157_v26  ;;  %6290 = vadd.xlane.f32.xlu0 %v18182_v58  ;;  %v14752_v26 = vld [vmem:[#allocation2 + $0xc8] sm:$0xff]  ;;  %v14753_v10 = vld [vmem:[#allocation2 + $0xd0] sm:$0xff] }
 0xf13   :  { %20576 = vst [vmem:[#allocation56_spill] sm:$0xff] %v18192_v49 }
 0xf14   :  { %20574 = vst [vmem:[#allocation48_spill] sm:$0xff] %v18186_v24  ;;  %v13126_v16 = vpop.f32.mrb[200].mxu0  ;;  %6292 = vadd.xlane.f32.xlu1 %v18186_v24 }
 0xf15   :  { %v6169_v7 = vpop.f32.mrb[201].mxu0  ;;  %v6178_v51 = vadd.f32 %v13126_v16, %v18130_v38 }
 0xf16   :  { %v6170_v54 = vadd.f32 %v18130_v38, %v6169_v7  ;;  %v13127_v19 = vpop.f32.mrb[202].mxu0  ;;  %6294 = vadd.xlane.f32.xlu0 %v18189_v35 }
 0xf17   :  { %v6172_v25 = vpop.f32.mrb[203].mxu0  ;;  %v6181_v1 = vadd.f32 %v13127_v19, %v18130_v38  ;;  %v18205_v21 = vadd.f32 %v14745_v63, %v6178_v51 }
 0xf18   :  { %v18197_v27 = vadd.f32 %v14743_v29, %v6170_v54  ;;  %v6173_v45 = vadd.f32 %v18130_v38, %v6172_v25  ;;  %6296 = vadd.xlane.f32.xlu1 %v18192_v49 }
 0xf19   :  { %20579 = vst [vmem:[#allocation54_spill] sm:$0xff] %v18205_v21  ;;  %v18208_v18 = vadd.f32 %v14746_v36, %v6181_v1  ;;  %v14757_v36 = vld [vmem:[#allocation2 + $0xf0] sm:$0xff] }
 0xf1a   :  { %20577 = vst [vmem:[#allocation41_spill] sm:$0xff] %v18197_v27  ;;  %v18202_v42 = vadd.f32 %v14744_v17, %v6173_v45  ;;  %6298 = vadd.xlane.f32.xlu0 %v18197_v27  ;;  %v14755_v45 = vld [vmem:[#allocation2 + $0xe0] sm:$0xff] }
 0xf1b   :  { %20580 = vst [vmem:[#allocation70_spill] sm:$0xff] %v18208_v18 }
 0xf1c   :  { %20578 = vst [vmem:[#allocation52_spill] sm:$0xff] %v18202_v42  ;;  %6300 = vadd.xlane.f32.xlu1 %v18202_v42  ;;  %v13130_v41 = vpop.f32.mrb[204].mxu0 }
 0xf1d   :  { %v6185_v34 = vpop.f32.mrb[205].mxu0  ;;  %v6194_v61 = vadd.f32 %v13130_v41, %v18130_v38  ;;  %v14756_v41 = vld [vmem:[#allocation2 + $0xe8] sm:$0xff] }
 0xf1e   :  { %v6186_v4 = vadd.f32 %v18130_v38, %v6185_v34  ;;  %6302 = vadd.xlane.f32.xlu0 %v18205_v21  ;;  %v13131_v40 = vpop.f32.mrb[206].mxu0 }
 0xf1f   :  { %v6188_v60 = vpop.f32.mrb[207].mxu0  ;;  %v6197_v3 = vadd.f32 %v13131_v40, %v18130_v38  ;;  %v18221_v2 = vadd.f32 %v14749_v12, %v6194_v61  ;;  %v14758_v40 = vld [vmem:[#allocation2 + $0xf8] sm:$0xff] }
 0xf20   :  { %v18213_v55 = vadd.f32 %v14747_v46, %v6186_v4  ;;  %v6189_v6 = vadd.f32 %v18130_v38, %v6188_v60  ;;  %6304 = vadd.xlane.f32.xlu1 %v18208_v18 }
 0xf21   :  { %20583 = vst [vmem:[#allocation31_spill] sm:$0xff] %v18221_v2  ;;  %v18224_v30 = vadd.f32 %v14750_v11, %v6197_v3 }
 0xf22   :  { %20581 = vst [vmem:[#allocation18_spill] sm:$0xff] %v18213_v55  ;;  %v18218_v47 = vadd.f32 %v14748_v56, %v6189_v6  ;;  %6306 = vadd.xlane.f32.xlu0 %v18213_v55 }
 0xf23   :  { %20584 = vst [vmem:[#allocation22_spill] sm:$0xff] %v18224_v30 }
 0xf24   :  { %20582 = vst [vmem:[#allocation45_spill] sm:$0xff] %v18218_v47  ;;  %6308 = vadd.xlane.f32.xlu1 %v18218_v47  ;;  %v13134_v0 = vpop.f32.mrb[208].mxu0 }
 0xf25   :  { %v6201_v32 = vpop.f32.mrb[209].mxu0  ;;  %v6210_v15 = vadd.f32 %v13134_v0, %v18130_v38 }
 0xf26   :  { %v6202_v53 = vadd.f32 %v18130_v38, %v6201_v32  ;;  %6310 = vadd.xlane.f32.xlu0 %v18221_v2  ;;  %v13135_v52 = vpop.f32.mrb[210].mxu0 }
 0xf27   :  { %v6204_v20 = vpop.f32.mrb[211].mxu0  ;;  %v6213_v31 = vadd.f32 %v13135_v52, %v18130_v38  ;;  %v18237_v23 = vadd.f32 %v14753_v10, %v6210_v15 }
 0xf28   :  { %v18229_v50 = vadd.f32 %v14751_v9, %v6202_v53  ;;  %v6205_v57 = vadd.f32 %v18130_v38, %v6204_v20  ;;  %6312 = vadd.xlane.f32.xlu1 %v18224_v30 }
 0xf29   :  { %20587 = vst [vmem:[#allocation51_spill] sm:$0xff] %v18237_v23  ;;  %v18240_v54 = vadd.f32 %v14754_v39, %v6213_v31 }
 0xf2a   :  { %20585 = vst [vmem:[#allocation17_spill] sm:$0xff] %v18229_v50  ;;  %v18234_v59 = vadd.f32 %v14752_v26, %v6205_v57  ;;  %6314 = vadd.xlane.f32.xlu0 %v18229_v50 }
 0xf2b   :  { %20588 = vst [vmem:[#allocation27_spill] sm:$0xff] %v18240_v54 }
 0xf2c   :  { %20586 = vst [vmem:[#allocation91_spill] sm:$0xff] %v18234_v59  ;;  %6316 = vadd.xlane.f32.xlu1 %v18234_v59  ;;  %v13138_v16 = vpop.f32.mrb[212].mxu0 }
 0xf2d   :  { %v6217_v7 = vpop.f32.mrb[213].mxu0  ;;  %v6226_v29 = vadd.f32 %v13138_v16, %v18130_v38 }
 0xf2e   :  { %v6218_v19 = vadd.f32 %v18130_v38, %v6217_v7  ;;  %6318 = vadd.xlane.f32.xlu0 %v18237_v23  ;;  %v13139_v25 = vpop.f32.mrb[214].mxu0 }
 0xf2f   :  { %v6220_v51 = vpop.f32.mrb[215].mxu0  ;;  %v6229_v63 = vadd.f32 %v13139_v25, %v18130_v38  ;;  %v18253_v4 = vadd.f32 %v14757_v36, %v6226_v29 }
 0xf30   :  { %v18245_v1 = vadd.f32 %v14755_v45, %v6218_v19  ;;  %v6221_v17 = vadd.f32 %v18130_v38, %v6220_v51  ;;  %6320 = vadd.xlane.f32.xlu1 %v18240_v54 }
 0xf31   :  { %20591 = vst [vmem:[#allocation92_spill] sm:$0xff] %v18253_v4  ;;  %v18256_v60 = vadd.f32 %v14758_v40, %v6229_v63 }
 0xf32   :  { %20589 = vst [vmem:[#allocation95_spill] sm:$0xff] %v18245_v1  ;;  %v18250_v34 = vadd.f32 %v14756_v41, %v6221_v17  ;;  %6322 = vadd.xlane.f32.xlu0 %v18245_v1 }
 0xf33   :  { %20592 = vst [vmem:[#allocation89_spill] sm:$0xff] %v18256_v60 }
 0xf34   :  { %20590 = vst [vmem:[#allocation90_spill] sm:$0xff] %v18250_v34  ;;  %6324 = vadd.xlane.f32.xlu1 %v18250_v34 }
 0xf36   :  { %6326 = vadd.xlane.f32.xlu0 %v18253_v4 }
 0xf38   :  { %6328 = vadd.xlane.f32.xlu1 %v18256_v60 }
 0xf48   :  { %v6267_v61 = vpop.xlane.xlu1 %6266 }
 0xf49   :  { %v6330_v46 = vmul.f32 0.0078125, %v6267_v61 }
 0xf4a   :  { %v6269_v38 = vpop.xlane.xlu0 %6268 }
 0xf4b   :  { %v18261_v6 = vsub.f32 %v18133_v28, %v6330_v46  ;;  %v6331_v3 = vmul.f32 0.0078125, %v6269_v38 }
 0xf4c   :  { %v6273_v56 = vpop.xlane.xlu1 %6272 }
 0xf4d   :  { %v18264_v12 = vsub.f32 %v18138_v37, %v6331_v3  ;;  %v6333_v0 = vmul.f32 0.0078125, %v6273_v56  ;;  %v6394_v32 = vmul.f32 %v18261_v6, %v18261_v6 }
 0xf4e   :  { %v6271_v11 = vpop.xlane.xlu0 %6270 }
 0xf4f   :  { %v18269_v53 = vsub.f32 %v18141_v8, %v6333_v0  ;;  %v6332_v52 = vmul.f32 0.0078125, %v6271_v11  ;;  %6426 = vadd.xlane.f32.xlu0 %v6394_v32  ;;  %v6395_v20 = vmul.f32 %v18264_v12, %v18264_v12 }
 0xf51   :  { %v18274_v15 = vsub.f32 %v18144_v48, %v6332_v52  ;;  %6428 = vadd.xlane.f32.xlu1 %v6395_v20  ;;  %v6397_v10 = vmul.f32 %v18269_v53, %v18269_v53 }
 0xf52   :  { %v6277_v9 = vpop.xlane.xlu1 %6276  ;;  %v6275_v57 = vpop.xlane.xlu0 %6274 }
 0xf53   :  { %v6335_v31 = vmul.f32 0.0078125, %v6277_v9  ;;  %v6334_v26 = vmul.f32 0.0078125, %v6275_v57  ;;  %v6396_v16 = vmul.f32 %v18274_v15, %v18274_v15 }
 0xf55   :  { %v18281_v7 = vsub.f32 %v18154_v33, %v6335_v31  ;;  %v18284_v39 = vsub.f32 %v18151_v13, %v6334_v26  ;;  %6432 = vadd.xlane.f32.xlu1 %v6397_v10  ;;  %6430 = vadd.xlane.f32.xlu0 %v6396_v16 }
 0xf56   :  { %v6281_v19 = vpop.xlane.xlu1 %6280  ;;  %v6279_v25 = vpop.xlane.xlu0 %6278 }
 0xf57   :  { %v6337_v51 = vmul.f32 0.0078125, %v6281_v19  ;;  %v6336_v29 = vmul.f32 0.0078125, %v6279_v25  ;;  %v6399_v45 = vmul.f32 %v18281_v7, %v18281_v7  ;;  %v6398_v17 = vmul.f32 %v18284_v39, %v18284_v39 }
 0xf59   :  { %v18291_v63 = vsub.f32 %v18160_v5, %v6337_v51  ;;  %v18294_v41 = vsub.f32 %v18158_v62, %v6336_v29  ;;  %6436 = vadd.xlane.f32.xlu1 %v6399_v45  ;;  %6434 = vadd.xlane.f32.xlu0 %v6398_v17 }
 0xf5b   :  { %v6401_v36 = vmul.f32 %v18291_v63, %v18291_v63  ;;  %v6400_v40 = vmul.f32 %v18294_v41, %v18294_v41 }
 0xf5d   :  { %6440 = vadd.xlane.f32.xlu1 %v6401_v36  ;;  %6438 = vadd.xlane.f32.xlu0 %v6400_v40 }
 0xf8f   :  { %v6283_v61 = vpop.xlane.xlu0 %6282 }
 0xf90   :  { %v6338_v46 = vmul.f32 0.0078125, %v6283_v61 }
 0xf91   :  { %v6285_v38 = vpop.xlane.xlu1 %6284 }
 0xf92   :  { %v18301_v3 = vsub.f32 %v18166_v22, %v6338_v46  ;;  %v6339_v56 = vmul.f32 0.0078125, %v6285_v38 }
 0xf93   :  { %v6287_v0 = vpop.xlane.xlu0 %6286 }
 0xf94   :  { %v18304_v32 = vsub.f32 %v18170_v14, %v6339_v56  ;;  %v6340_v11 = vmul.f32 0.0078125, %v6287_v0  ;;  %v6402_v52 = vmul.f32 %v18301_v3, %v18301_v3 }
 0xf95   :  { %v6289_v20 = vpop.xlane.xlu1 %6288 }
 0xf96   :  { %v18309_v9 = vsub.f32 %v18173_v43, %v6340_v11  ;;  %v6341_v57 = vmul.f32 0.0078125, %v6289_v20  ;;  %6442 = vadd.xlane.f32.xlu0 %v6402_v52  ;;  %v6403_v31 = vmul.f32 %v18304_v32, %v18304_v32 }
 0xf98   :  { %v18314_v26 = vsub.f32 %v18176_v44, %v6341_v57  ;;  %6444 = vadd.xlane.f32.xlu1 %v6403_v31  ;;  %v6404_v10 = vmul.f32 %v18309_v9, %v18309_v9 }
 0xf9a   :  { %6446 = vadd.xlane.f32.xlu0 %v6404_v10  ;;  %v6405_v16 = vmul.f32 %v18314_v26, %v18314_v26 }
 0xf9c   :  { %6448 = vadd.xlane.f32.xlu1 %v6405_v16 }
 0xf9f   :  { %v6291_v19 = vpop.xlane.xlu0 %6290 }
 0xfa0   :  { %v6342_v25 = vmul.f32 0.0078125, %v6291_v19 }
 0xfa1   :  { %v6293_v51 = vpop.xlane.xlu1 %6292 }
 0xfa2   :  { %v18321_v29 = vsub.f32 %v18182_v58, %v6342_v25  ;;  %v6343_v45 = vmul.f32 0.0078125, %v6293_v51 }
 0xfa3   :  { %v6295_v17 = vpop.xlane.xlu0 %6294 }
 0xfa4   :  { %v18324_v36 = vsub.f32 %v18186_v24, %v6343_v45  ;;  %v6344_v40 = vmul.f32 0.0078125, %v6295_v17  ;;  %v6406_v61 = vmul.f32 %v18321_v29, %v18321_v29 }
 0xfa5   :  { %v6297_v46 = vpop.xlane.xlu1 %6296 }
 0xfa6   :  { %v18329_v38 = vsub.f32 %v18189_v35, %v6344_v40  ;;  %v6345_v56 = vmul.f32 0.0078125, %v6297_v46  ;;  %6450 = vadd.xlane.f32.xlu0 %v6406_v61  ;;  %v6407_v0 = vmul.f32 %v18324_v36, %v18324_v36 }
 0xfa7   :  { %v6299_v11 = vpop.xlane.xlu0 %6298 }
 0xfa8   :  { %v18334_v52 = vsub.f32 %v18192_v49, %v6345_v56  ;;  %v6346_v20 = vmul.f32 0.0078125, %v6299_v11  ;;  %6452 = vadd.xlane.f32.xlu1 %v6407_v0  ;;  %v6408_v57 = vmul.f32 %v18329_v38, %v18329_v38 }
 0xfa9   :  { %v6301_v31 = vpop.xlane.xlu1 %6300 }
 0xfaa   :  { %v18339_v10 = vsub.f32 %v18197_v27, %v6346_v20  ;;  %v6347_v16 = vmul.f32 0.0078125, %v6301_v31  ;;  %6454 = vadd.xlane.f32.xlu0 %v6408_v57  ;;  %v6409_v19 = vmul.f32 %v18334_v52, %v18334_v52 }
 0xfab   :  { %v6303_v25 = vpop.xlane.xlu0 %6302 }
 0xfac   :  { %v18344_v51 = vsub.f32 %v18202_v42, %v6347_v16  ;;  %v6348_v45 = vmul.f32 0.0078125, %v6303_v25  ;;  %6456 = vadd.xlane.f32.xlu1 %v6409_v19  ;;  %v6410_v17 = vmul.f32 %v18339_v10, %v18339_v10 }
 0xfad   :  { %v6305_v40 = vpop.xlane.xlu1 %6304 }
 0xfae   :  { %v18349_v61 = vsub.f32 %v18205_v21, %v6348_v45  ;;  %v6349_v46 = vmul.f32 0.0078125, %v6305_v40  ;;  %6458 = vadd.xlane.f32.xlu0 %v6410_v17  ;;  %v6411_v56 = vmul.f32 %v18344_v51, %v18344_v51 }
 0xfaf   :  { %v6307_v0 = vpop.xlane.xlu0 %6306 }
 0xfb0   :  { %v18354_v11 = vsub.f32 %v18208_v18, %v6349_v46  ;;  %v6350_v20 = vmul.f32 0.0078125, %v6307_v0  ;;  %6460 = vadd.xlane.f32.xlu1 %v6411_v56  ;;  %v6412_v57 = vmul.f32 %v18349_v61, %v18349_v61 }
 0xfb1   :  { %v6309_v31 = vpop.xlane.xlu1 %6308 }
 0xfb2   :  { %v18359_v16 = vsub.f32 %v18213_v55, %v6350_v20  ;;  %v6351_v19 = vmul.f32 0.0078125, %v6309_v31  ;;  %6462 = vadd.xlane.f32.xlu0 %v6412_v57  ;;  %v6413_v25 = vmul.f32 %v18354_v11, %v18354_v11 }
 0xfb3   :  { %v6311_v45 = vpop.xlane.xlu0 %6310 }
 0xfb4   :  { %v18364_v17 = vsub.f32 %v18218_v47, %v6351_v19  ;;  %v6352_v40 = vmul.f32 0.0078125, %v6311_v45  ;;  %6464 = vadd.xlane.f32.xlu1 %v6413_v25  ;;  %v6414_v46 = vmul.f32 %v18359_v16, %v18359_v16 }
 0xfb5   :  { %v6313_v56 = vpop.xlane.xlu1 %6312 }
 0xfb6   :  { %v18369_v0 = vsub.f32 %v18221_v2, %v6352_v40  ;;  %v6353_v20 = vmul.f32 0.0078125, %v6313_v56  ;;  %6466 = vadd.xlane.f32.xlu0 %v6414_v46  ;;  %v6415_v57 = vmul.f32 %v18364_v17, %v18364_v17 }
 0xfb7   :  { %v6315_v31 = vpop.xlane.xlu0 %6314 }
 0xfb8   :  { %v18374_v55 = vsub.f32 %v18224_v30, %v6353_v20  ;;  %v6354_v19 = vmul.f32 0.0078125, %v6315_v31  ;;  %6468 = vadd.xlane.f32.xlu1 %v6415_v57  ;;  %v6416_v25 = vmul.f32 %v18369_v0, %v18369_v0 }
 0xfb9   :  { %v6317_v45 = vpop.xlane.xlu1 %6316 }
 0xfba   :  { %v18379_v47 = vsub.f32 %v18229_v50, %v6354_v19  ;;  %v6355_v40 = vmul.f32 0.0078125, %v6317_v45  ;;  %6470 = vadd.xlane.f32.xlu0 %v6416_v25  ;;  %v6417_v46 = vmul.f32 %v18374_v55, %v18374_v55  ;;  %v20056_v45 = vmov 0.0  }
 0xfbb   :  { %v6319_v56 = vpop.xlane.xlu0 %6318  ;;  %13186 = vmatprep.subr.bf16.mxu0 %v20056_v45 }
 0xfbc   :  { %v18384_v2 = vsub.f32 %v18234_v59, %v6355_v40  ;;  %v6356_v20 = vmul.f32 0.0078125, %v6319_v56  ;;  %6472 = vadd.xlane.f32.xlu1 %v6417_v46  ;;  %v6418_v57 = vmul.f32 %v18379_v47, %v18379_v47 }
 0xfbd   :  { %v6321_v31 = vpop.xlane.xlu1 %6320 }
 0xfbe   :  { %v18389_v30 = vsub.f32 %v18237_v23, %v6356_v20  ;;  %v6357_v19 = vmul.f32 0.0078125, %v6321_v31  ;;  %6474 = vadd.xlane.f32.xlu0 %v6418_v57  ;;  %v6419_v25 = vmul.f32 %v18384_v2, %v18384_v2 }
 0xfbf   :  { %v6323_v42 = vpop.xlane.xlu0 %6322 }
 0xfc0   :  { %v18395_v40 = vsub.f32 %v18240_v54, %v6357_v19  ;;  %v6358_v46 = vmul.f32 0.0078125, %v6323_v42  ;;  %6476 = vadd.xlane.f32.xlu1 %v6419_v25  ;;  %v6420_v56 = vmul.f32 %v18389_v30, %v18389_v30 }
 0xfc1   :  { %v6325_v18 = vpop.xlane.xlu1 %6324 }
 0xfc2   :  { %v18400_v20 = vsub.f32 %v18245_v1, %v6358_v46  ;;  %v6359_v57 = vmul.f32 0.0078125, %v6325_v18  ;;  %6478 = vadd.xlane.f32.xlu0 %v6420_v56  ;;  %v6421_v31 = vmul.f32 %v18395_v40, %v18395_v40 }
 0xfc3   :  { %v6327_v27 = vpop.xlane.xlu0 %6326 }
 0xfc4   :  { %v18405_v45 = vsub.f32 %v18250_v34, %v6359_v57  ;;  %v6360_v19 = vmul.f32 0.0078125, %v6327_v27  ;;  %6480 = vadd.xlane.f32.xlu1 %v6421_v31  ;;  %v6422_v42 = vmul.f32 %v18400_v20, %v18400_v20 }
 0xfc5   :  { %v6329_v25 = vpop.xlane.xlu1 %6328 }
 0xfc6   :  { %v18410_v21 = vsub.f32 %v18253_v4, %v6360_v19  ;;  %v6361_v46 = vmul.f32 0.0078125, %v6329_v25  ;;  %6482 = vadd.xlane.f32.xlu0 %v6422_v42  ;;  %v6423_v18 = vmul.f32 %v18405_v45, %v18405_v45 }
 0xfc8   :  { %v18415_v56 = vsub.f32 %v18256_v60, %v6361_v46  ;;  %6484 = vadd.xlane.f32.xlu1 %v6423_v18  ;;  %v6424_v27 = vmul.f32 %v18410_v21, %v18410_v21 }
 0xfca   :  { %6486 = vadd.xlane.f32.xlu0 %v6424_v27  ;;  %v6425_v57 = vmul.f32 %v18415_v56, %v18415_v56 }
 0xfcc   :  { %6488 = vadd.xlane.f32.xlu1 %v6425_v57 }
 0xfdc   :  { %v6427_v31 = vpop.xlane.xlu0 %6426 }
 0xfdd   :  { %v6490_v19 = vmul.f32 0.0078125, %v6427_v31 }
 0xfde   :  { %v6429_v34 = vpop.xlane.xlu1 %6428 }
 0xfdf   :  { %v6522_v25 = vadd.f32 1e-05, %v6490_v19  ;;  %v6491_v42 = vmul.f32 0.0078125, %v6429_v34 }
 0xfe1   :  { %14290 = vrsqrt.f32 %v6522_v25  ;;  %v6523_v24 = vadd.f32 1e-05, %v6491_v42 }
 0xfe2   :  { %v6433_v49 = vpop.xlane.xlu1 %6432  ;;  %v6431_v1 = vpop.xlane.xlu0 %6430 }
 0xfe3   :  { %14292 = vrsqrt.f32 %v6523_v24  ;;  %v6493_v46 = vmul.f32 0.0078125, %v6433_v49  ;;  %v6492_v18 = vmul.f32 0.0078125, %v6431_v1  ;;  %v18424_v24 = vld [vmem:[%s19839_s6] ss:$0 sm:$0xff] }
 0xfe5   :  { %v6525_v60 = vadd.f32 1e-05, %v6493_v46  ;;  %v6524_v58 = vadd.f32 1e-05, %v6492_v18 }
 0xfe6   :  { %v6437_v4 = vpop.xlane.xlu1 %6436  ;;  %v6435_v27 = vpop.xlane.xlu0 %6434 }
 0xfe7   :  { %14294 = vrsqrt.f32 %v6525_v60  ;;  %v6495_v35 = vmul.f32 0.0078125, %v6437_v4  ;;  %v6494_v59 = vmul.f32 0.0078125, %v6435_v27 }
 0xfe8   :  { %14296 = vrsqrt.f32 %v6524_v58  ;;  %v18430_v58 = vld [vmem:[%s19840_s7] ss:$0 sm:$0xff] }
 0xfe9   :  { %v6527_v57 = vadd.f32 1e-05, %v6495_v35  ;;  %v6526_v31 = vadd.f32 1e-05, %v6494_v59 }
 0xfea   :  { %v6441_v33 = vpop.xlane.xlu1 %6440  ;;  %v6439_v19 = vpop.xlane.xlu0 %6438 }
 0xfeb   :  { %v14291_v34 = vpop.eup %14290  ;;  %14298 = vrsqrt.f32 %v6527_v57  ;;  %v6497_v25 = vmul.f32 0.0078125, %v6441_v33  ;;  %v6496_v42 = vmul.f32 0.0078125, %v6439_v19 }
 0xfec   :  { %14300 = vrsqrt.f32 %v6526_v31  ;;  %v6586_v49 = vmul.f32 %v14291_v34, %v18261_v6 }
 0xfed   :  { %v14293_v1 = vpop.eup %14292  ;;  %v6529_v4 = vadd.f32 1e-05, %v6497_v25  ;;  %v6528_v60 = vadd.f32 1e-05, %v6496_v42 }
 0xfee   :  { %v6624_v35 = vmul.f32 %v18424_v24, %v6586_v49  ;;  %v6587_v33 = vmul.f32 %v14293_v1, %v18264_v12 }
 0xfef   :  { %14302 = vrsqrt.f32 %v6529_v4 }
 0xff0   :  { %14304 = vrsqrt.f32 %v6528_v60  ;;  %v18435_v59 = vadd.f32 %v18430_v58, %v6624_v35  ;;  %v6625_v46 = vmul.f32 %v18424_v24, %v6587_v33 }
 0xff1   :  { %v14295_v6 = vpop.eup %14294 }
 0xff2   :  { %v14297_v18 = vpop.eup %14296  ;;  %v6694_v27 = vmul.f32 %v18435_v59, %v18435_v59  ;;  %v18441_v57 = vadd.f32 %v18430_v58, %v6625_v46  ;;  %v6589_v31 = vmul.f32 %v14295_v6, %v18269_v53 }
 0xff3   :  { %v6588_v19 = vmul.f32 %v14297_v18, %v18274_v15 }
 0xff4   :  { %6726 = vadd.xlane.f32.xlu0 %v6694_v27  ;;  %v6695_v12 = vmul.f32 %v18441_v57, %v18441_v57  ;;  %v6627_v34 = vmul.f32 %v18424_v24, %v6589_v31 }
 0xff5   :  { %v14299_v25 = vpop.eup %14298  ;;  %v6626_v42 = vmul.f32 %v18424_v24, %v6588_v19 }
 0xff6   :  { %v14301_v49 = vpop.eup %14300  ;;  %6728 = vadd.xlane.f32.xlu1 %v6695_v12  ;;  %v18450_v1 = vadd.f32 %v18430_v58, %v6627_v34  ;;  %v6591_v4 = vmul.f32 %v14299_v25, %v18281_v7 }
 0xff7   :  { %v18454_v53 = vadd.f32 %v18430_v58, %v6626_v42  ;;  %v6590_v15 = vmul.f32 %v14301_v49, %v18284_v39 }
 0xff8   :  { %v6697_v60 = vmul.f32 %v18450_v1, %v18450_v1  ;;  %v6629_v35 = vmul.f32 %v18424_v24, %v6591_v4  ;;  %v7126_v4 = vld [vmem:[%s19841_s8] sm:$0xf]  ;;  %s14919_s8 = smov [#allocation11]  }
 0xff9   :  { %v14303_v33 = vpop.eup %14302  ;;  %v6696_v46 = vmul.f32 %v18454_v53, %v18454_v53  ;;  %v6628_v6 = vmul.f32 %v18424_v24, %v6590_v15  ;;  %13140 = vmatprep.subr.bf16.mxu1 %v7126_v4  ;;  %s11530_s30 = sshll.u32 %s14919_s8, 4  ;;  %s11531_s30 = int_to_ptr.vmem [resolvable:$true] %s11530_s30 }
 0xffa   :  { %v14305_v18 = vpop.eup %14304  ;;  %6732 = vadd.xlane.f32.xlu1 %v6697_v60  ;;  %v18464_v7 = vadd.f32 %v18430_v58, %v6629_v35  ;;  %v6593_v27 = vmul.f32 %v14303_v33, %v18291_v63  ;;  %13141 = vmatpush3.bf16.xpose.msra.mxu1 %v7126_v4  ;;  %v20593_v60 = vmov 0.0   ;;  %s14869_s12 = scalar_lea.vmem %s11531_s30, 4096  ;;  %p14874_p13 = scmp.lt.s32.totalorder %s11531_s30, %s11531_s30 }
 0xffb   :  { %6730 = vadd.xlane.f32.xlu0 %v6696_v46  ;;  %v18468_v39 = vadd.f32 %v18430_v58, %v6628_v6  ;;  %v6592_v31 = vmul.f32 %v14305_v18, %v18294_v41  ;;  %13174 = vmatprep.subr.bf16.mxu1 %v20593_v60  ;;  %p14870_p12 = scmp.ne.s32.totalorder %s11531_s30, %s14869_s12  ;;  %p14875_p0 = scmp.lt.s32.totalorder %s14869_s12, %s14869_s12 }
 0xffc   :  { %v6699_v19 = vmul.f32 %v18464_v7, %v18464_v7  ;;  %v6631_v12 = vmul.f32 %v18424_v24, %v6593_v27 }
 0xffd   :  { %v6698_v34 = vmul.f32 %v18468_v39, %v18468_v39  ;;  %v6630_v25 = vmul.f32 %v18424_v24, %v6592_v31  ;;  %p14876_p1 = por %p14875_p0, %p14874_p13 }
 0xffe   :  { %6736 = vadd.xlane.f32.xlu1 %v6699_v19  ;;  %v18478_v42 = vadd.f32 %v18430_v58, %v6631_v12 }
 0xfff   :  { %6734 = vadd.xlane.f32.xlu0 %v6698_v34  ;;  %v18481_v63 = vadd.f32 %v18430_v58, %v6630_v25  ;;  %p14877_p2 = pnand %p14876_p1, %p14870_p12 }
0x1000   :  { %v6701_v41 = vmul.f32 %v18478_v42, %v18478_v42 }
0x1001   :  { %v6700_v49 = vmul.f32 %v18481_v63, %v18481_v63 }
0x1002   :  { %6740 = vadd.xlane.f32.xlu1 %v6701_v41 }
0x1003   :  { %6738 = vadd.xlane.f32.xlu0 %v6700_v49 }
0x1023   :  { %v6443_v15 = vpop.xlane.xlu0 %6442 }
0x1024   :  { %v6498_v35 = vmul.f32 0.0078125, %v6443_v15 }
0x1025   :  { %v6445_v33 = vpop.xlane.xlu1 %6444 }
0x1026   :  { %v6530_v46 = vadd.f32 1e-05, %v6498_v35  ;;  %v6499_v6 = vmul.f32 0.0078125, %v6445_v33 }
0x1027   :  { %v6447_v18 = vpop.xlane.xlu0 %6446 }
0x1028   :  { %14306 = vrsqrt.f32 %v6530_v46  ;;  %v6531_v27 = vadd.f32 1e-05, %v6499_v6  ;;  %v6500_v31 = vmul.f32 0.0078125, %v6447_v18 }
0x1029   :  { %v6449_v19 = vpop.xlane.xlu1 %6448 }
0x102a   :  { %14308 = vrsqrt.f32 %v6531_v27  ;;  %v6532_v12 = vadd.f32 1e-05, %v6500_v31  ;;  %v6501_v34 = vmul.f32 0.0078125, %v6449_v19 }
0x102c   :  { %14310 = vrsqrt.f32 %v6532_v12  ;;  %v6533_v25 = vadd.f32 1e-05, %v6501_v34 }
0x102e   :  { %14312 = vrsqrt.f32 %v6533_v25 }
0x1032   :  { %v14307_v41 = vpop.eup %14306 }
0x1033   :  { %v6451_v49 = vpop.xlane.xlu0 %6450  ;;  %v6594_v4 = vmul.f32 %v14307_v41, %v18301_v3 }
0x1034   :  { %v14309_v54 = vpop.eup %14308  ;;  %v6502_v15 = vmul.f32 0.0078125, %v6451_v49 }
0x1035   :  { %v6453_v5 = vpop.xlane.xlu1 %6452  ;;  %v6632_v35 = vmul.f32 %v18424_v24, %v6594_v4  ;;  %v6595_v33 = vmul.f32 %v14309_v54, %v18304_v32 }
0x1036   :  { %v14311_v46 = vpop.eup %14310  ;;  %v6534_v6 = vadd.f32 1e-05, %v6502_v15  ;;  %v6503_v18 = vmul.f32 0.0078125, %v6453_v5 }
0x1037   :  { %v6455_v27 = vpop.xlane.xlu0 %6454  ;;  %v18495_v31 = vadd.f32 %v18430_v58, %v6632_v35  ;;  %v6633_v19 = vmul.f32 %v18424_v24, %v6595_v33  ;;  %v6596_v12 = vmul.f32 %v14311_v46, %v18309_v9 }
0x1038   :  { %v14313_v34 = vpop.eup %14312  ;;  %14314 = vrsqrt.f32 %v6534_v6  ;;  %v6535_v3 = vadd.f32 1e-05, %v6503_v18  ;;  %v6504_v25 = vmul.f32 0.0078125, %v6455_v27 }
0x1039   :  { %v6457_v41 = vpop.xlane.xlu1 %6456  ;;  %v6702_v49 = vmul.f32 %v18495_v31, %v18495_v31  ;;  %v18502_v54 = vadd.f32 %v18430_v58, %v6633_v19  ;;  %v6634_v5 = vmul.f32 %v18424_v24, %v6596_v12  ;;  %v6597_v32 = vmul.f32 %v14313_v34, %v18314_v26 }
0x103a   :  { %14316 = vrsqrt.f32 %v6535_v3  ;;  %v6536_v4 = vadd.f32 1e-05, %v6504_v25  ;;  %v6505_v15 = vmul.f32 0.0078125, %v6457_v41 }
0x103b   :  { %6742 = vadd.xlane.f32.xlu0 %v6702_v49  ;;  %v6459_v9 = vpop.xlane.xlu0 %6458  ;;  %v6703_v35 = vmul.f32 %v18502_v54, %v18502_v54  ;;  %v7929_v33 = vpack.c.bf16 %v18502_v54, %v18495_v31  ;;  %v18511_v46 = vadd.f32 %v18430_v58, %v6634_v5  ;;  %v6635_v6 = vmul.f32 %v18424_v24, %v6597_v32 }
0x103c   :  { %14318 = vrsqrt.f32 %v6536_v4  ;;  %v6537_v18 = vadd.f32 1e-05, %v6505_v15  ;;  %v6506_v27 = vmul.f32 0.0078125, %v6459_v9 }
0x103d   :  { %6744 = vadd.xlane.f32.xlu1 %v6703_v35  ;;  %v6461_v26 = vpop.xlane.xlu1 %6460  ;;  %13187 = vmatpush3.bf16.msra.mxu0 %v7929_v33  ;;  %v6704_v19 = vmul.f32 %v18511_v46, %v18511_v46  ;;  %v18517_v12 = vadd.f32 %v18430_v58, %v6635_v6 }
0x103e   :  { %14320 = vrsqrt.f32 %v6537_v18  ;;  %v6538_v34 = vadd.f32 1e-05, %v6506_v27  ;;  %v6507_v3 = vmul.f32 0.0078125, %v6461_v26  ;;  %13188 = vmatprep.subr.bf16.mxu0 %v20593_v60 }
0x103f   :  { %6746 = vadd.xlane.f32.xlu0 %v6704_v19  ;;  %v6463_v25 = vpop.xlane.xlu0 %6462  ;;  %v6705_v41 = vmul.f32 %v18517_v12, %v18517_v12  ;;  %v7930_v49 = vpack.c.bf16 %v18517_v12, %v18511_v46 }
0x1040   :  { %14322 = vrsqrt.f32 %v6538_v34  ;;  %v6539_v5 = vadd.f32 1e-05, %v6507_v3  ;;  %v6508_v32 = vmul.f32 0.0078125, %v6463_v25 }
0x1041   :  { %6748 = vadd.xlane.f32.xlu1 %v6705_v41  ;;  %v6465_v4 = vpop.xlane.xlu1 %6464  ;;  %13189 = vmatpush3.bf16.msra.mxu0 %v7930_v49 }
0x1042   :  { %v14315_v15 = vpop.eup %14314  ;;  %14324 = vrsqrt.f32 %v6539_v5  ;;  %v6540_v9 = vadd.f32 1e-05, %v6508_v32  ;;  %v6509_v35 = vmul.f32 0.0078125, %v6465_v4  ;;  %13190 = vmatprep.subr.bf16.mxu0 %v20593_v60 }
0x1043   :  { %v6467_v33 = vpop.xlane.xlu0 %6466  ;;  %v6598_v6 = vmul.f32 %v14315_v15, %v18321_v29 }
0x1044   :  { %v14317_v18 = vpop.eup %14316  ;;  %14326 = vrsqrt.f32 %v6540_v9  ;;  %v6541_v27 = vadd.f32 1e-05, %v6509_v35  ;;  %v6510_v26 = vmul.f32 0.0078125, %v6467_v33 }
0x1045   :  { %v6469_v19 = vpop.xlane.xlu1 %6468  ;;  %v6636_v34 = vmul.f32 %v18424_v24, %v6598_v6  ;;  %v6599_v3 = vmul.f32 %v14317_v18, %v18324_v36 }
0x1046   :  { %v14319_v25 = vpop.eup %14318  ;;  %14328 = vrsqrt.f32 %v6541_v27  ;;  %v6542_v41 = vadd.f32 1e-05, %v6510_v26  ;;  %v6511_v49 = vmul.f32 0.0078125, %v6469_v19 }
0x1047   :  { %v6471_v5 = vpop.xlane.xlu0 %6470  ;;  %v18529_v32 = vadd.f32 %v18430_v58, %v6636_v34  ;;  %v6637_v4 = vmul.f32 %v18424_v24, %v6599_v3  ;;  %v6600_v29 = vmul.f32 %v14319_v25, %v18329_v38 }
0x1048   :  { %v14321_v15 = vpop.eup %14320  ;;  %14330 = vrsqrt.f32 %v6542_v41  ;;  %v6543_v9 = vadd.f32 1e-05, %v6511_v49  ;;  %v6512_v35 = vmul.f32 0.0078125, %v6471_v5 }
0x1049   :  { %v6473_v33 = vpop.xlane.xlu1 %6472  ;;  %v6706_v36 = vmul.f32 %v18529_v32, %v18529_v32  ;;  %v18536_v6 = vadd.f32 %v18430_v58, %v6637_v4  ;;  %v6638_v18 = vmul.f32 %v18424_v24, %v6600_v29  ;;  %v6601_v27 = vmul.f32 %v14321_v15, %v18334_v52 }
0x104a   :  { %v14323_v26 = vpop.eup %14322  ;;  %14332 = vrsqrt.f32 %v6543_v9  ;;  %v6544_v19 = vadd.f32 1e-05, %v6512_v35  ;;  %v6513_v34 = vmul.f32 0.0078125, %v6473_v33 }
0x104b   :  { %6750 = vadd.xlane.f32.xlu0 %v6706_v36  ;;  %v6475_v38 = vpop.xlane.xlu0 %6474  ;;  %v6707_v3 = vmul.f32 %v18536_v6, %v18536_v6  ;;  %v7931_v25 = vpack.c.bf16 %v18536_v6, %v18529_v32  ;;  %v18545_v41 = vadd.f32 %v18430_v58, %v6638_v18  ;;  %v6639_v49 = vmul.f32 %v18424_v24, %v6601_v27 }
0x104c   :  { %v14325_v5 = vpop.eup %14324  ;;  %14334 = vrsqrt.f32 %v6544_v19  ;;  %v6545_v52 = vadd.f32 1e-05, %v6513_v34  ;;  %v6514_v4 = vmul.f32 0.0078125, %v6475_v38  ;;  %v6602_v29 = vmul.f32 %v14323_v26, %v18339_v10 }
0x104d   :  { %6752 = vadd.xlane.f32.xlu1 %v6707_v3  ;;  %v6477_v15 = vpop.xlane.xlu1 %6476  ;;  %13191 = vmatpush3.bf16.msra.mxu0 %v7931_v25  ;;  %v6708_v9 = vmul.f32 %v18545_v41, %v18545_v41  ;;  %v18552_v35 = vadd.f32 %v18430_v58, %v6639_v49  ;;  %v6603_v33 = vmul.f32 %v14325_v5, %v18344_v51 }
0x104e   :  { %v14327_v36 = vpop.eup %14326  ;;  %14336 = vrsqrt.f32 %v6545_v52  ;;  %v6546_v18 = vadd.f32 1e-05, %v6514_v4  ;;  %v6515_v27 = vmul.f32 0.0078125, %v6477_v15  ;;  %13192 = vmatprep.subr.bf16.mxu0 %v20593_v60  ;;  %v6640_v19 = vmul.f32 %v18424_v24, %v6602_v29 }
0x104f   :  { %6754 = vadd.xlane.f32.xlu0 %v6708_v9  ;;  %v6479_v10 = vpop.xlane.xlu0 %6478  ;;  %v6709_v26 = vmul.f32 %v18552_v35, %v18552_v35  ;;  %v7932_v34 = vpack.c.bf16 %v18552_v35, %v18545_v41  ;;  %v6641_v38 = vmul.f32 %v18424_v24, %v6603_v33  ;;  %v6604_v51 = vmul.f32 %v14327_v36, %v18349_v61 }
0x1050   :  { %v14329_v3 = vpop.eup %14328  ;;  %14338 = vrsqrt.f32 %v6546_v18  ;;  %v6547_v25 = vadd.f32 1e-05, %v6515_v27  ;;  %v6516_v49 = vmul.f32 0.0078125, %v6479_v10  ;;  %v18564_v5 = vadd.f32 %v18430_v58, %v6640_v19 }
0x1051   :  { %6756 = vadd.xlane.f32.xlu1 %v6709_v26  ;;  %v6481_v52 = vpop.xlane.xlu1 %6480  ;;  %13193 = vmatpush3.bf16.msra.mxu0 %v7932_v34  ;;  %v18567_v4 = vadd.f32 %v18430_v58, %v6641_v38  ;;  %v6642_v29 = vmul.f32 %v18424_v24, %v6604_v51  ;;  %v6605_v15 = vmul.f32 %v14329_v3, %v18354_v11 }
0x1052   :  { %v14331_v9 = vpop.eup %14330  ;;  %14340 = vrsqrt.f32 %v6547_v25  ;;  %v6548_v61 = vadd.f32 1e-05, %v6516_v49  ;;  %v6517_v33 = vmul.f32 0.0078125, %v6481_v52  ;;  %v6710_v36 = vmul.f32 %v18564_v5, %v18564_v5  ;;  %13210 = vmatprep.subr.bf16.mxu0 %v20593_v60 }
0x1053   :  { %v6483_v18 = vpop.xlane.xlu0 %6482  ;;  %v6711_v27 = vmul.f32 %v18567_v4, %v18567_v4  ;;  %v18577_v19 = vadd.f32 %v18430_v58, %v6642_v29  ;;  %v6643_v10 = vmul.f32 %v18424_v24, %v6605_v15  ;;  %v6606_v11 = vmul.f32 %v14331_v9, %v18359_v16 }
0x1054   :  { %v14333_v26 = vpop.eup %14332  ;;  %14342 = vrsqrt.f32 %v6548_v61  ;;  %v6549_v34 = vadd.f32 1e-05, %v6517_v33  ;;  %6758 = vadd.xlane.f32.xlu0 %v6710_v36  ;;  %v6518_v38 = vmul.f32 0.0078125, %v6483_v18 }
0x1055   :  { %6760 = vadd.xlane.f32.xlu1 %v6711_v27  ;;  %v6485_v51 = vpop.xlane.xlu1 %6484  ;;  %v6712_v3 = vmul.f32 %v18577_v19, %v18577_v19  ;;  %v18584_v25 = vadd.f32 %v18430_v58, %v6643_v10  ;;  %v6644_v49 = vmul.f32 %v18424_v24, %v6606_v11  ;;  %v6607_v52 = vmul.f32 %v14333_v26, %v18364_v17 }
0x1056   :  { %v14335_v29 = vpop.eup %14334  ;;  %14344 = vrsqrt.f32 %v6549_v34  ;;  %v6550_v16 = vadd.f32 1e-05, %v6518_v38  ;;  %v6519_v15 = vmul.f32 0.0078125, %v6485_v51 }
0x1057   :  { %v6487_v9 = vpop.xlane.xlu0 %6486  ;;  %v6713_v61 = vmul.f32 %v18584_v25, %v18584_v25  ;;  %v18591_v33 = vadd.f32 %v18430_v58, %v6644_v49  ;;  %v6645_v36 = vmul.f32 %v18424_v24, %v6607_v52  ;;  %v6608_v18 = vmul.f32 %v14335_v29, %v18369_v0 }
0x1058   :  { %v14337_v27 = vpop.eup %14336  ;;  %14346 = vrsqrt.f32 %v6550_v16  ;;  %v6551_v10 = vadd.f32 1e-05, %v6519_v15  ;;  %6762 = vadd.xlane.f32.xlu0 %v6712_v3  ;;  %v6520_v17 = vmul.f32 0.0078125, %v6487_v9 }
0x1059   :  { %6764 = vadd.xlane.f32.xlu1 %v6713_v61  ;;  %v6489_v11 = vpop.xlane.xlu1 %6488  ;;  %v6714_v26 = vmul.f32 %v18591_v33, %v18591_v33  ;;  %v18598_v34 = vadd.f32 %v18430_v58, %v6645_v36  ;;  %v6646_v38 = vmul.f32 %v18424_v24, %v6608_v18  ;;  %v6609_v51 = vmul.f32 %v14337_v27, %v18374_v55 }
0x105a   :  { %v14339_v49 = vpop.eup %14338  ;;  %14348 = vrsqrt.f32 %v6551_v10  ;;  %v6552_v0 = vadd.f32 1e-05, %v6520_v17  ;;  %v6521_v52 = vmul.f32 0.0078125, %v6489_v11 }
0x105b   :  { %v6715_v3 = vmul.f32 %v18598_v34, %v18598_v34  ;;  %v18605_v29 = vadd.f32 %v18430_v58, %v6646_v38  ;;  %v6647_v16 = vmul.f32 %v18424_v24, %v6609_v51  ;;  %v6610_v15 = vmul.f32 %v14339_v49, %v18379_v47 }
0x105c   :  { %v14341_v9 = vpop.eup %14340  ;;  %14350 = vrsqrt.f32 %v6552_v0  ;;  %v6553_v61 = vadd.f32 1e-05, %v6521_v52  ;;  %6766 = vadd.xlane.f32.xlu0 %v6714_v26 }
0x105d   :  { %6768 = vadd.xlane.f32.xlu1 %v6715_v3  ;;  %v6716_v55 = vmul.f32 %v18605_v29, %v18605_v29  ;;  %v18612_v36 = vadd.f32 %v18430_v58, %v6647_v16  ;;  %v6648_v18 = vmul.f32 %v18424_v24, %v6610_v15  ;;  %v6611_v27 = vmul.f32 %v14341_v9, %v18384_v2 }
0x105e   :  { %v14343_v10 = vpop.eup %14342  ;;  %14352 = vrsqrt.f32 %v6553_v61 }
0x105f   :  { %v6717_v47 = vmul.f32 %v18612_v36, %v18612_v36  ;;  %v18619_v17 = vadd.f32 %v18430_v58, %v6648_v18  ;;  %v6649_v11 = vmul.f32 %v18424_v24, %v6611_v27  ;;  %v6612_v26 = vmul.f32 %v14343_v10, %v18389_v30 }
0x1060   :  { %v14345_v38 = vpop.eup %14344  ;;  %6770 = vadd.xlane.f32.xlu0 %v6716_v55 }
0x1061   :  { %20594 = vst [vmem:[#allocation93_spill] sm:$0xff] %v18619_v17  ;;  %6772 = vadd.xlane.f32.xlu1 %v6717_v47  ;;  %v6718_v51 = vmul.f32 %v18619_v17, %v18619_v17  ;;  %v18626_v2 = vadd.f32 %v18430_v58, %v6649_v11  ;;  %v6650_v49 = vmul.f32 %v18424_v24, %v6612_v26 }
0x1062   :  { %v6613_v0 = vmul.f32 %v14345_v38, %v18395_v40  ;;  %v14347_v52 = vpop.eup %14346 }
0x1063   :  { %20595 = vst [vmem:[#allocation29_spill] sm:$0xff] %v18626_v2  ;;  %v6719_v3 = vmul.f32 %v18626_v2, %v18626_v2  ;;  %v18633_v16 = vadd.f32 %v18430_v58, %v6650_v49  ;;  %v6614_v15 = vmul.f32 %v14347_v52, %v18400_v20 }
0x1064   :  { %v6651_v30 = vmul.f32 %v18424_v24, %v6613_v0  ;;  %v14349_v9 = vpop.eup %14348  ;;  %6774 = vadd.xlane.f32.xlu0 %v6718_v51 }
0x1065   :  { %20596 = vst [vmem:[#allocation19_spill] sm:$0xff] %v18633_v16  ;;  %6776 = vadd.xlane.f32.xlu1 %v6719_v3  ;;  %v6720_v61 = vmul.f32 %v18633_v16, %v18633_v16  ;;  %v6652_v40 = vmul.f32 %v18424_v24, %v6614_v15  ;;  %v6615_v18 = vmul.f32 %v14349_v9, %v18405_v45 }
0x1066   :  { %v18640_v55 = vadd.f32 %v18430_v58, %v6651_v30  ;;  %v14351_v27 = vpop.eup %14350 }
0x1067   :  { %v18647_v47 = vadd.f32 %v18430_v58, %v6652_v40  ;;  %v6653_v20 = vmul.f32 %v18424_v24, %v6615_v18  ;;  %v6616_v11 = vmul.f32 %v14351_v27, %v18410_v21 }
0x1068   :  { %20597 = vst [vmem:[#allocation108_spill] sm:$0xff] %v18640_v55  ;;  %v6721_v10 = vmul.f32 %v18640_v55, %v18640_v55  ;;  %v14353_v26 = vpop.eup %14352  ;;  %6778 = vadd.xlane.f32.xlu0 %v6720_v61 }
0x1069   :  { %20598 = vst [vmem:[#allocation33_spill] sm:$0xff] %v18647_v47  ;;  %v6722_v38 = vmul.f32 %v18647_v47, %v18647_v47  ;;  %v18654_v51 = vadd.f32 %v18430_v58, %v6653_v20  ;;  %v6654_v45 = vmul.f32 %v18424_v24, %v6616_v11  ;;  %v6617_v49 = vmul.f32 %v14353_v26, %v18415_v56 }
0x106a   :  { %6780 = vadd.xlane.f32.xlu1 %v6721_v10 }
0x106b   :  { %20599 = vst [vmem:[#allocation35_spill] sm:$0xff] %v18654_v51  ;;  %v6723_v0 = vmul.f32 %v18654_v51, %v18654_v51  ;;  %v18661_v52 = vadd.f32 %v18430_v58, %v6654_v45  ;;  %v6655_v21 = vmul.f32 %v18424_v24, %v6617_v49 }
0x106c   :  { %6782 = vadd.xlane.f32.xlu0 %v6722_v38 }
0x106d   :  { %20600 = vst [vmem:[#allocation53_spill] sm:$0xff] %v18661_v52  ;;  %v6724_v3 = vmul.f32 %v18661_v52, %v18661_v52  ;;  %v18667_v30 = vadd.f32 %v18430_v58, %v6655_v21 }
0x106e   :  { %6784 = vadd.xlane.f32.xlu1 %v6723_v0 }
0x106f   :  { %20601 = vst [vmem:[#allocation88_spill] sm:$0xff] %v18667_v30  ;;  %v6725_v15 = vmul.f32 %v18667_v30, %v18667_v30 }
0x1070   :  { %6786 = vadd.xlane.f32.xlu0 %v6724_v3 }
0x1072   :  { %6788 = vadd.xlane.f32.xlu1 %v6725_v15 }
0x1081   :  { %v6727_v56 = vpop.xlane.xlu0 %6726 }
0x1082   :  { %14354 = vrsqrt.f32 %v6727_v56  ;;  %vm6792_vm3 = vcmp.eq.f32.partialorder %v6727_v56, inf  ;;  %v6795_v38 = vand.u32 2147483648, %v6727_v56  ;;  %vm6794_vm5 = vcmp.eq.f32.partialorder %v6727_v56, 0.0 }
0x1083   :  { %v6729_v9 = vpop.xlane.xlu1 %6728 }
0x1084   :  { %14356 = vrsqrt.f32 %v6729_v9  ;;  %vm6799_vm4 = vcmp.eq.f32.partialorder %v6729_v9, inf  ;;  %v6802_v45 = vand.u32 2147483648, %v6729_v9  ;;  %vm6801_vm6 = vcmp.eq.f32.partialorder %v6729_v9, 0.0 }
0x1087   :  { %v6733_v61 = vpop.xlane.xlu1 %6732 }
0x1088   :  { %14358 = vrsqrt.f32 %v6733_v61  ;;  %v6731_v24 = vpop.xlane.xlu0 %6730  ;;  %vm6813_vm7 = vcmp.eq.f32.partialorder %v6733_v61, inf  ;;  %vm6815_vm8 = vcmp.eq.f32.partialorder %v6733_v61, 0.0  ;;  %v6816_v13 = vand.u32 2147483648, %v6733_v61 }
0x1089   :  { %14360 = vrsqrt.f32 %v6731_v24  ;;  %vm6806_vm9 = vcmp.eq.f32.partialorder %v6731_v24, inf  ;;  %v6809_v14 = vand.u32 2147483648, %v6731_v24  ;;  %vm6808_vm10 = vcmp.eq.f32.partialorder %v6731_v24, 0.0 }
0x108b   :  { %v6737_v40 = vpop.xlane.xlu1 %6736 }
0x108c   :  { %v14355_v18 = vpop.eup %14354  ;;  %14362 = vrsqrt.f32 %v6737_v40  ;;  %v6735_v27 = vpop.xlane.xlu0 %6734  ;;  %vm6827_vm11 = vcmp.eq.f32.partialorder %v6737_v40, inf  ;;  %vm6829_vm12 = vcmp.eq.f32.partialorder %v6737_v40, 0.0 }
0x108d   :  { %v6791_v10 = vmul.f32 %v14355_v18, %v6727_v56  ;;  %14364 = vrsqrt.f32 %v6735_v27  ;;  %vm6820_vm13 = vcmp.eq.f32.partialorder %v6735_v27, inf  ;;  %vm6822_vm14 = vcmp.eq.f32.partialorder %v6735_v27, 0.0 }
0x108e   :  { %v14357_v58 = vpop.eup %14356 }
0x108f   :  { %v6793_v20 = vsel %vm6792_vm3, %v6727_v56, %v6791_v10  ;;  %v6798_v11 = vmul.f32 %v14357_v58, %v6729_v9  ;;  %v18671_v26 = vpop.xlane.xlu1 %6740 }
0x1090   :  { %14366 = vrsqrt.f32 %v18671_v26  ;;  %v18674_v49 = vpop.xlane.xlu0 %6738  ;;  %v6796_v3 = vsel %vm6794_vm5, %v6795_v38, %v6793_v20  ;;  %vm6841_vm15 = vcmp.eq.f32.partialorder %v18671_v26, inf  ;;  %vm6843_vm0 = vcmp.eq.f32.partialorder %v18671_v26, 0.0 }
0x1091   :  { %v6800_v0 = vsel %vm6799_vm4, %v6729_v9, %v6798_v11  ;;  %14368 = vrsqrt.f32 %v18674_v49  ;;  %v7014_v58 = vmax.f32 %v6796_v3, 1e-12  ;;  %vm6834_vm2 = vcmp.eq.f32.partialorder %v18674_v49, inf }
0x1092   :  { %v14359_v21 = vpop.eup %14358  ;;  %v6803_v15 = vsel %vm6801_vm6, %v6802_v45, %v6800_v0  ;;  %vm6836_vm3 = vcmp.eq.f32.partialorder %v18674_v49, 0.0 }
0x1093   :  { %v14361_v18 = vpop.eup %14360  ;;  %v6812_v10 = vmul.f32 %v14359_v21, %v6733_v61  ;;  %v7015_v50 = vmax.f32 %v6803_v15, 1e-12  ;;  %14370 = vrcp.f32 %v7014_v58  ;;  %v6830_v21 = vand.u32 2147483648, %v6737_v40 }
0x1094   :  { %v6805_v23 = vmul.f32 %v14361_v18, %v6731_v24 }
0x1095   :  { %v6814_v62 = vsel %vm6813_vm7, %v6733_v61, %v6812_v10  ;;  %14372 = vrcp.f32 %v7015_v50  ;;  %v6823_v61 = vand.u32 2147483648, %v6735_v27 }
0x1096   :  { %v14363_v56 = vpop.eup %14362  ;;  %v6817_v11 = vsel %vm6815_vm8, %v6816_v13, %v6814_v62  ;;  %v6807_v9 = vsel %vm6806_vm9, %v6731_v24, %v6805_v23 }
0x1097   :  { %v14365_v37 = vpop.eup %14364  ;;  %v7017_v20 = vmax.f32 %v6817_v11, 1e-12  ;;  %v6810_v38 = vsel %vm6808_vm10, %v6809_v14, %v6807_v9  ;;  %v6826_v45 = vmul.f32 %v14363_v56, %v6737_v40 }
0x1098   :  { %v7016_v0 = vmax.f32 %v6810_v38, 1e-12  ;;  %v6819_v3 = vmul.f32 %v14365_v37, %v6735_v27  ;;  %v6844_v37 = vand.u32 2147483648, %v18671_v26 }
0x1099   :  { %14374 = vrcp.f32 %v7017_v20  ;;  %v6828_v15 = vsel %vm6827_vm11, %v6737_v40, %v6826_v45 }
0x109a   :  { %v14367_v18 = vpop.eup %14366  ;;  %14376 = vrcp.f32 %v7016_v0  ;;  %v6831_v10 = vsel %vm6829_vm12, %v6830_v21, %v6828_v15  ;;  %v6821_v13 = vsel %vm6820_vm13, %v6735_v27, %v6819_v3  ;;  %v6837_v27 = vand.u32 2147483648, %v18674_v49 }
0x109b   :  { %v14369_v62 = vpop.eup %14368  ;;  %v7019_v50 = vmax.f32 %v6831_v10, 1e-12  ;;  %v6824_v23 = vsel %vm6822_vm14, %v6823_v61, %v6821_v13  ;;  %v6840_v14 = vmul.f32 %v14367_v18, %v18671_v26 }
0x109c   :  { %v7018_v24 = vmax.f32 %v6824_v23, 1e-12  ;;  %v6833_v40 = vmul.f32 %v14369_v62, %v18674_v49 }
0x109d   :  { %14378 = vrcp.f32 %v7019_v50  ;;  %v6842_v58 = vsel %vm6841_vm15, %v18671_v26, %v6840_v14  ;;  %v14371_v9 = vpop.eup %14370  ;;  %v7925_v50 = vpack.c.bf16 %v18441_v57, %v18435_v59 }
0x109e   :  { %14380 = vrcp.f32 %v7018_v24  ;;  %v6845_v56 = vsel %vm6843_vm0, %v6844_v37, %v6842_v58  ;;  %v6835_v11 = vsel %vm6834_vm2, %v18674_v49, %v6833_v40  ;;  %v7078_v21 = vmul.f32 %v14371_v9, %v18435_v59 }
0x109f   :  { %v7021_v20 = vmax.f32 %v6845_v56, 1e-12  ;;  %v6838_v38 = vsel %vm6836_vm3, %v6837_v27, %v6835_v11  ;;  %v14373_v45 = vpop.eup %14372  ;;  %v7926_v58 = vpack.c.bf16 %v18450_v1, %v18454_v53  ;;  %v7928_v11 = vpack.c.bf16 %v18478_v42, %v18481_v63 }
0x10a0   :  { %v7020_v0 = vmax.f32 %v6838_v38, 1e-12  ;;  %v7079_v26 = vmul.f32 %v14373_v45, %v18441_v57  ;;  %v7927_v57 = vpack.c.bf16 %v18464_v7, %v18468_v39 }
0x10a1   :  { %14382 = vrcp.f32 %v7021_v20 }
0x10a2   :  { %14384 = vrcp.f32 %v7020_v0  ;;  %v7110_v15 = vpack.c.bf16 %v7079_v26, %v7078_v21 }
0x10a3   :  { %v14375_v3 = vpop.eup %14374 }
0x10a4   :  { %v14377_v61 = vpop.eup %14376  ;;  %v7081_v18 = vmul.f32 %v14375_v3, %v18450_v1  ;;  %13142 = vmatprep.mubr.bf16.mxu1 %v7110_v15 }
0x10a5   :  { %v7080_v10 = vmul.f32 %v14377_v61, %v18454_v53 }
0x10a7   :  { %v14379_v49 = vpop.eup %14378  ;;  %v7111_v13 = vpack.c.bf16 %v7081_v18, %v7080_v10 }
0x10a8   :  { %v14381_v62 = vpop.eup %14380  ;;  %v7083_v23 = vmul.f32 %v14379_v49, %v18464_v7 }
0x10a9   :  { %13143 = vmatmul.mubr.bf16.vlgmr.msra.gmra.mrb[168].mxu1 %v7111_v13  ;;  %v7082_v14 = vmul.f32 %v14381_v62, %v18468_v39 }
0x10aa   :  { %13175 = vmatpush3.bf16.msra.mxu1 %v7925_v50 }
0x10ab   :  { %v14383_v24 = vpop.eup %14382  ;;  %13176 = vmatprep.subr.bf16.mxu1 %v20593_v60  ;;  %v7112_v37 = vpack.c.bf16 %v7083_v23, %v7082_v14 }
0x10ac   :  { %v14385_v40 = vpop.eup %14384  ;;  %v7085_v27 = vmul.f32 %v14383_v24, %v18478_v42 }
0x10ad   :  { %13146 = vmatprep.mubr.bf16.mxu1 %v7112_v37  ;;  %v7084_v56 = vmul.f32 %v14385_v40, %v18481_v63 }
0x10ae   :  { %13177 = vmatpush3.bf16.msra.mxu1 %v7926_v58 }
0x10af   :  { %13178 = vmatprep.subr.bf16.mxu1 %v20593_v60  ;;  %v7113_v59 = vpack.c.bf16 %v7085_v27, %v7084_v56 }
0x10b1   :  { %13147 = vmatmul.mubr.bf16.gmra.mrb[172].mxu1 %v7113_v59 }
0x10b2   :  { %13179 = vmatpush3.bf16.msra.mxu1 %v7927_v57 }
0x10b3   :  { %13180 = vmatprep.subr.bf16.mxu1 %v20593_v60 }
0x10b6   :  { %13181 = vmatpush3.bf16.msra.mxu1 %v7928_v11 }
0x10b7   :  { %13198 = vmatprep.subr.bf16.mxu1 %v20593_v60 }
0x10c8   :  { %v6743_v1 = vpop.xlane.xlu0 %6742 }
0x10c9   :  { %14386 = vrsqrt.f32 %v6743_v1  ;;  %vm6848_vm4 = vcmp.eq.f32.partialorder %v6743_v1, inf  ;;  %v6851_v45 = vand.u32 2147483648, %v6743_v1  ;;  %vm6850_vm5 = vcmp.eq.f32.partialorder %v6743_v1, 0.0 }
0x10ca   :  { %v6745_v53 = vpop.xlane.xlu1 %6744 }
0x10cb   :  { %14388 = vrsqrt.f32 %v6745_v53  ;;  %vm6855_vm6 = vcmp.eq.f32.partialorder %v6745_v53, inf  ;;  %v6858_v26 = vand.u32 2147483648, %v6745_v53  ;;  %vm6857_vm7 = vcmp.eq.f32.partialorder %v6745_v53, 0.0 }
0x10cc   :  { %v6747_v9 = vpop.xlane.xlu0 %6746 }
0x10cd   :  { %14390 = vrsqrt.f32 %v6747_v9  ;;  %vm6862_vm8 = vcmp.eq.f32.partialorder %v6747_v9, inf  ;;  %v6865_v14 = vand.u32 2147483648, %v6747_v9  ;;  %vm6864_vm10 = vcmp.eq.f32.partialorder %v6747_v9, 0.0 }
0x10ce   :  { %v6749_v20 = vpop.xlane.xlu1 %6748 }
0x10cf   :  { %14392 = vrsqrt.f32 %v6749_v20  ;;  %vm6869_vm9 = vcmp.eq.f32.partialorder %v6749_v20, inf  ;;  %v6872_v37 = vand.u32 2147483648, %v6749_v20  ;;  %vm6871_vm11 = vcmp.eq.f32.partialorder %v6749_v20, 0.0 }
0x10d3   :  { %v14387_v38 = vpop.eup %14386 }
0x10d4   :  { %v6847_v7 = vmul.f32 %v14387_v38, %v6743_v1 }
0x10d5   :  { %v14389_v39 = vpop.eup %14388 }
0x10d6   :  { %v6849_v0 = vsel %vm6848_vm4, %v6743_v1, %v6847_v7  ;;  %v6854_v21 = vmul.f32 %v14389_v39, %v6745_v53 }
0x10d7   :  { %v14391_v42 = vpop.eup %14390  ;;  %v6852_v63 = vsel %vm6850_vm5, %v6851_v45, %v6849_v0 }
0x10d8   :  { %v7022_v3 = vmax.f32 %v6852_v63, 1e-12  ;;  %v6856_v15 = vsel %vm6855_vm6, %v6745_v53, %v6854_v21  ;;  %v6861_v61 = vmul.f32 %v14391_v42, %v6747_v9  ;;  %v6751_v18 = vpop.xlane.xlu0 %6750 }
0x10d9   :  { %v14393_v10 = vpop.eup %14392  ;;  %v6859_v49 = vsel %vm6857_vm7, %v6858_v26, %v6856_v15  ;;  %14394 = vrsqrt.f32 %v6751_v18  ;;  %vm6876_vm12 = vcmp.eq.f32.partialorder %v6751_v18, inf  ;;  %vm6878_vm13 = vcmp.eq.f32.partialorder %v6751_v18, 0.0 }
0x10da   :  { %v7023_v13 = vmax.f32 %v6859_v49, 1e-12  ;;  %v6863_v62 = vsel %vm6862_vm8, %v6747_v9, %v6861_v61  ;;  %v6868_v50 = vmul.f32 %v14393_v10, %v6749_v20  ;;  %v18707_v23 = vpop.xlane.xlu1 %6752  ;;  %v6879_v9 = vand.u32 2147483648, %v6751_v18 }
0x10db   :  { %14396 = vrsqrt.f32 %v18707_v23  ;;  %v6866_v58 = vsel %vm6864_vm10, %v6865_v14, %v6863_v62  ;;  %vm6883_vm14 = vcmp.eq.f32.partialorder %v18707_v23, inf  ;;  %vm6885_vm15 = vcmp.eq.f32.partialorder %v18707_v23, 0.0 }
0x10dc   :  { %14398 = vrcp.f32 %v7022_v3  ;;  %v6870_v24 = vsel %vm6869_vm9, %v6749_v20, %v6868_v50  ;;  %v18710_v40 = vpop.xlane.xlu0 %6754  ;;  %v7024_v59 = vmax.f32 %v6866_v58, 1e-12  ;;  %v6886_v38 = vand.u32 2147483648, %v18707_v23 }
0x10dd   :  { %14400 = vrsqrt.f32 %v18710_v40  ;;  %v6873_v27 = vsel %vm6871_vm11, %v6872_v37, %v6870_v24  ;;  %vm6890_vm0 = vcmp.eq.f32.partialorder %v18710_v40, inf  ;;  %vm6892_vm2 = vcmp.eq.f32.partialorder %v18710_v40, 0.0 }
0x10de   :  { %14402 = vrcp.f32 %v7023_v13  ;;  %v18713_v56 = vpop.xlane.xlu1 %6756  ;;  %v7025_v57 = vmax.f32 %v6873_v27, 1e-12  ;;  %v6893_v39 = vand.u32 2147483648, %v18710_v40 }
0x10df   :  { %14404 = vrsqrt.f32 %v18713_v56  ;;  %vm6897_vm3 = vcmp.eq.f32.partialorder %v18713_v56, inf  ;;  %vm6899_vm4 = vcmp.eq.f32.partialorder %v18713_v56, 0.0  ;;  %v6900_v15 = vand.u32 2147483648, %v18713_v56 }
0x10e1   :  { %v18716_v11 = vpop.xlane.xlu0 %6758 }
0x10e2   :  { %14406 = vrsqrt.f32 %v18716_v11  ;;  %v18719_v1 = vpop.xlane.xlu1 %6760  ;;  %vm6904_vm5 = vcmp.eq.f32.partialorder %v18716_v11, inf  ;;  %vm6906_vm6 = vcmp.eq.f32.partialorder %v18716_v11, 0.0  ;;  %v6907_v13 = vand.u32 2147483648, %v18716_v11 }
0x10e3   :  { %v14395_v53 = vpop.eup %14394  ;;  %14408 = vrsqrt.f32 %v18719_v1  ;;  %vm6911_vm7 = vcmp.eq.f32.partialorder %v18719_v1, inf  ;;  %vm6913_vm8 = vcmp.eq.f32.partialorder %v18719_v1, 0.0 }
0x10e4   :  { %14410 = vrcp.f32 %v7024_v59  ;;  %v6875_v20 = vmul.f32 %v14395_v53, %v6751_v18 }
0x10e5   :  { %v14397_v7 = vpop.eup %14396  ;;  %14412 = vrcp.f32 %v7025_v57  ;;  %v18729_v45 = vpop.xlane.xlu0 %6762 }
0x10e6   :  { %v14399_v0 = vpop.eup %14398  ;;  %v6877_v21 = vsel %vm6876_vm12, %v6751_v18, %v6875_v20  ;;  %v6882_v42 = vmul.f32 %v14397_v7, %v18707_v23  ;;  %14414 = vrsqrt.f32 %v18729_v45  ;;  %v18735_v63 = vpop.xlane.xlu1 %6764  ;;  %v6914_v18 = vand.u32 2147483648, %v18719_v1 }
0x10e7   :  { %v14401_v26 = vpop.eup %14400  ;;  %v6880_v3 = vsel %vm6878_vm13, %v6879_v9, %v6877_v21  ;;  %14416 = vrsqrt.f32 %v18735_v63  ;;  %v7086_v14 = vmul.f32 %v14399_v0, %v18495_v31  ;;  %vm6918_vm9 = vcmp.eq.f32.partialorder %v18729_v45, inf }
0x10e8   :  { %v14403_v61 = vpop.eup %14402  ;;  %v6884_v10 = vsel %vm6883_vm14, %v18707_v23, %v6882_v42  ;;  %v6889_v49 = vmul.f32 %v14401_v26, %v18710_v40  ;;  %v7026_v24 = vmax.f32 %v6880_v3, 1e-12  ;;  %vm6920_vm10 = vcmp.eq.f32.partialorder %v18729_v45, 0.0 }
0x10e9   :  { %v14405_v62 = vpop.eup %14404  ;;  %v18750_v50 = vpop.xlane.xlu0 %6766  ;;  %v6887_v37 = vsel %vm6885_vm15, %v6886_v38, %v6884_v10  ;;  %v7087_v31 = vmul.f32 %v14403_v61, %v18502_v54  ;;  %v6921_v9 = vand.u32 2147483648, %v18729_v45  ;;  %vm6925_vm11 = vcmp.eq.f32.partialorder %v18735_v63, inf }
0x10ea   :  { %v6891_v58 = vsel %vm6890_vm0, %v18710_v40, %v6889_v49  ;;  %v6896_v27 = vmul.f32 %v14405_v62, %v18713_v56  ;;  %v18759_v59 = vpop.xlane.xlu1 %6768  ;;  %14418 = vrsqrt.f32 %v18750_v50  ;;  %v7027_v38 = vmax.f32 %v6887_v37, 1e-12 }
0x10eb   :  { %v6894_v23 = vsel %vm6892_vm2, %v6893_v39, %v6891_v58  ;;  %vm6927_vm12 = vcmp.eq.f32.partialorder %v18735_v63, 0.0  ;;  %14420 = vrsqrt.f32 %v18759_v59  ;;  %v6928_v21 = vand.u32 2147483648, %v18735_v63 }
0x10ec   :  { %v14407_v57 = vpop.eup %14406  ;;  %v6898_v53 = vsel %vm6897_vm3, %v18713_v56, %v6896_v27  ;;  %14422 = vrcp.f32 %v7026_v24  ;;  %v7028_v3 = vmax.f32 %v6894_v23, 1e-12  ;;  %v7114_v10 = vpack.c.bf16 %v7087_v31, %v7086_v14 }
0x10ed   :  { %v14409_v20 = vpop.eup %14408  ;;  %v6903_v7 = vmul.f32 %v14407_v57, %v18716_v11  ;;  %v18775_v54 = vpop.xlane.xlu0 %6770  ;;  %v6901_v39 = vsel %vm6899_vm4, %v6900_v15, %v6898_v53  ;;  %vm6932_vm13 = vcmp.eq.f32.partialorder %v18750_v50, inf  ;;  %vm6934_vm14 = vcmp.eq.f32.partialorder %v18750_v50, 0.0 }
0x10ee   :  { %v14411_v40 = vpop.eup %14410  ;;  %v6910_v0 = vmul.f32 %v14409_v20, %v18719_v1  ;;  %v18781_v42 = vpop.xlane.xlu1 %6772  ;;  %14424 = vrsqrt.f32 %v18775_v54  ;;  %v7029_v24 = vmax.f32 %v6901_v39, 1e-12  ;;  %13150 = vmatprep.mubr.bf16.mxu1 %v7114_v10  ;;  %vm6939_vm15 = vcmp.eq.f32.partialorder %v18759_v59, inf }
0x10ef   :  { %v14413_v26 = vpop.eup %14412  ;;  %v6905_v61 = vsel %vm6904_vm5, %v18716_v11, %v6903_v7  ;;  %14426 = vrcp.f32 %v7027_v38  ;;  %vm6941_vm0 = vcmp.eq.f32.partialorder %v18759_v59, 0.0  ;;  %v6942_v53 = vand.u32 2147483648, %v18759_v59 }
0x10f0   :  { %v14415_v49 = vpop.eup %14414  ;;  %v6908_v56 = vsel %vm6906_vm6, %v6907_v13, %v6905_v61  ;;  %v6912_v15 = vsel %vm6911_vm7, %v18719_v1, %v6910_v0  ;;  %v6935_v13 = vand.u32 2147483648, %v18750_v50  ;;  %14428 = vrsqrt.f32 %v18781_v42 }
0x10f1   :  { %v14417_v62 = vpop.eup %14416  ;;  %v6915_v14 = vsel %vm6913_vm8, %v6914_v18, %v6912_v15  ;;  %v6917_v37 = vmul.f32 %v14415_v49, %v18729_v45  ;;  %v18797_v58 = vpop.xlane.xlu0 %6774  ;;  %14430 = vrcp.f32 %v7028_v3  ;;  %v7030_v31 = vmax.f32 %v6908_v56, 1e-12 }
0x10f2   :  { %v6924_v11 = vmul.f32 %v14417_v62, %v18735_v63  ;;  %v18803_v27 = vpop.xlane.xlu1 %6776  ;;  %v7031_v18 = vmax.f32 %v6915_v14, 1e-12  ;;  %14432 = vrcp.f32 %v7029_v24  ;;  %v7088_v7 = vmul.f32 %v14411_v40, %v18511_v46 }
0x10f3   :  { %v6919_v1 = vsel %vm6918_vm9, %v18729_v45, %v6917_v37  ;;  %v7089_v39 = vmul.f32 %v14413_v26, %v18517_v12  ;;  %vm6946_vm2 = vcmp.eq.f32.partialorder %v18775_v54, inf  ;;  %vm6948_vm3 = vcmp.eq.f32.partialorder %v18775_v54, 0.0 }
0x10f4   :  { %v6922_v57 = vsel %vm6920_vm10, %v6921_v9, %v6919_v1  ;;  %v6926_v23 = vsel %vm6925_vm11, %v18735_v63, %v6924_v11  ;;  %v14419_v20 = vpop.eup %14418  ;;  %14434 = vrsqrt.f32 %v18797_v58  ;;  %vm6953_vm4 = vcmp.eq.f32.partialorder %v18781_v42, inf }
0x10f5   :  { %v6929_v38 = vsel %vm6927_vm12, %v6928_v21, %v6926_v23  ;;  %v18819_v0 = vpop.xlane.xlu0 %6778  ;;  %v6931_v45 = vmul.f32 %v14419_v20, %v18750_v50  ;;  %v14421_v3 = vpop.eup %14420  ;;  %14436 = vrcp.f32 %v7030_v31  ;;  %v7032_v63 = vmax.f32 %v6922_v57, 1e-12 }
0x10f6   :  { %v6949_v21 = vand.u32 2147483648, %v18775_v54  ;;  %v7115_v46 = vpack.c.bf16 %v7089_v39, %v7088_v7  ;;  %v14423_v40 = vpop.eup %14422  ;;  %14438 = vrcp.f32 %v7031_v18  ;;  %v7033_v12 = vmax.f32 %v6929_v38, 1e-12 }
0x10f7   :  { %v18825_v9 = vpop.xlane.xlu1 %6780  ;;  %v6933_v26 = vsel %vm6932_vm13, %v18750_v50, %v6931_v45  ;;  %v6938_v61 = vmul.f32 %v14421_v3, %v18759_v59  ;;  %vm6955_vm5 = vcmp.eq.f32.partialorder %v18781_v42, 0.0  ;;  %14440 = vrsqrt.f32 %v18803_v27 }
0x10f8   :  { %v14425_v10 = vpop.eup %14424  ;;  %v6936_v49 = vsel %vm6934_vm14, %v6935_v13, %v6933_v26  ;;  %13151 = vmatmul.mubr.bf16.gmra.mrb[176].mxu1 %v7115_v46  ;;  %v6956_v24 = vand.u32 2147483648, %v18781_v42  ;;  %14442 = vrsqrt.f32 %v18819_v0  ;;  %vm6960_vm6 = vcmp.eq.f32.partialorder %v18797_v58, inf }
0x10f9   :  { %v18837_v56 = vpop.xlane.xlu0 %6782  ;;  %v6940_v15 = vsel %vm6939_vm15, %v18759_v59, %v6938_v61  ;;  %v6945_v62 = vmul.f32 %v14425_v10, %v18775_v54  ;;  %v14427_v50 = vpop.eup %14426  ;;  %14444 = vrcp.f32 %v7032_v63  ;;  %vm6962_vm7 = vcmp.eq.f32.partialorder %v18797_v58, 0.0 }
0x10fa   :  { %v6943_v14 = vsel %vm6941_vm0, %v6942_v53, %v6940_v15  ;;  %v14429_v11 = vpop.eup %14428  ;;  %14446 = vrcp.f32 %v7033_v12  ;;  %v7034_v13 = vmax.f32 %v6936_v49, 1e-12  ;;  %v6963_v23 = vand.u32 2147483648, %v18797_v58 }
0x10fb   :  { %v18849_v37 = vpop.xlane.xlu1 %6784  ;;  %v7035_v31 = vmax.f32 %v6943_v14, 1e-12  ;;  %v6947_v1 = vsel %vm6946_vm2, %v18775_v54, %v6945_v62  ;;  %v14431_v18 = vpop.eup %14430  ;;  %v6952_v59 = vmul.f32 %v14429_v11, %v18781_v42  ;;  %14448 = vrsqrt.f32 %v18825_v9 }
0x10fc   :  { %v6950_v57 = vsel %vm6948_vm3, %v6949_v21, %v6947_v1  ;;  %vm6967_vm8 = vcmp.eq.f32.partialorder %v18803_v27, inf  ;;  %vm6969_vm9 = vcmp.eq.f32.partialorder %v18803_v27, 0.0  ;;  %v6970_v53 = vand.u32 2147483648, %v18803_v27  ;;  %v14433_v20 = vpop.eup %14432 }
0x10fd   :  { %14450 = vrcp.f32 %v7035_v31  ;;  %v7036_v38 = vmax.f32 %v6950_v57, 1e-12  ;;  %v6954_v54 = vsel %vm6953_vm4, %v18781_v42, %v6952_v59  ;;  %vm6974_vm10 = vcmp.eq.f32.partialorder %v18819_v0, inf  ;;  %v18867_v7 = vpop.xlane.xlu0 %6786 }
0x10fe   :  { %14452 = vrsqrt.f32 %v18837_v56  ;;  %v14435_v39 = vpop.eup %14434  ;;  %v6957_v45 = vsel %vm6955_vm5, %v6956_v24, %v6954_v54  ;;  %vm6976_vm11 = vcmp.eq.f32.partialorder %v18819_v0, 0.0  ;;  %v6977_v3 = vand.u32 2147483648, %v18819_v0 }
0x10ff   :  { %14454 = vrcp.f32 %v7034_v13  ;;  %v14437_v63 = vpop.eup %14436  ;;  %v7037_v21 = vmax.f32 %v6957_v45, 1e-12  ;;  %v6959_v46 = vmul.f32 %v14435_v39, %v18797_v58  ;;  %vm6981_vm12 = vcmp.eq.f32.partialorder %v18825_v9, inf  ;;  %v18876_v12 = vpop.xlane.xlu1 %6788 }
0x1100   :  { %14456 = vrsqrt.f32 %v18849_v37  ;;  %v14439_v26 = vpop.eup %14438  ;;  %vm6983_vm13 = vcmp.eq.f32.partialorder %v18825_v9, 0.0  ;;  %v6984_v42 = vand.u32 2147483648, %v18825_v9  ;;  %v7090_v61 = vmul.f32 %v14423_v40, %v18529_v32 }
0x1101   :  { %v7091_v10 = vmul.f32 %v14427_v50, %v18536_v6  ;;  %14458 = vrsqrt.f32 %v18867_v7  ;;  %v14441_v49 = vpop.eup %14440  ;;  %v6961_v15 = vsel %vm6960_vm6, %v18797_v58, %v6959_v46  ;;  %vm6988_vm14 = vcmp.eq.f32.partialorder %v18837_v56, inf }
0x1102   :  { %14460 = vrcp.f32 %v7036_v38  ;;  %v6991_v62 = vand.u32 2147483648, %v18837_v56  ;;  %v14443_v24 = vpop.eup %14442  ;;  %v6964_v14 = vsel %vm6962_vm7, %v6963_v23, %v6961_v15  ;;  %v6966_v32 = vmul.f32 %v14441_v49, %v18803_v27 }
0x1103   :  { %vm6990_vm15 = vcmp.eq.f32.partialorder %v18837_v56, 0.0  ;;  %v7116_v6 = vpack.c.bf16 %v7091_v10, %v7090_v61  ;;  %14462 = vrsqrt.f32 %v18876_v12  ;;  %v14445_v40 = vpop.eup %14444  ;;  %v7038_v50 = vmax.f32 %v6964_v14, 1e-12 }
0x1104   :  { %14464 = vrcp.f32 %v7037_v21  ;;  %v6973_v11 = vmul.f32 %v14443_v24, %v18819_v0  ;;  %vm6995_vm0 = vcmp.eq.f32.partialorder %v18849_v37, inf  ;;  %v6998_v13 = vand.u32 2147483648, %v18849_v37  ;;  %v14447_v31 = vpop.eup %14446 }
0x1105   :  { %v6968_v58 = vsel %vm6967_vm8, %v18803_v27, %v6966_v32  ;;  %vm6997_vm2 = vcmp.eq.f32.partialorder %v18849_v37, 0.0  ;;  %13154 = vmatprep.mubr.bf16.mxu1 %v7116_v6  ;;  %vm7002_vm3 = vcmp.eq.f32.partialorder %v18867_v7, inf  ;;  %v7092_v1 = vmul.f32 %v14431_v18, %v18545_v41  ;;  %v14449_v59 = vpop.eup %14448 }
0x1106   :  { %v7093_v57 = vmul.f32 %v14433_v20, %v18552_v35  ;;  %14466 = vrcp.f32 %v7038_v50  ;;  %v6971_v23 = vsel %vm6969_vm9, %v6970_v53, %v6968_v58  ;;  %v6975_v38 = vsel %vm6974_vm10, %v18819_v0, %v6973_v11 }
0x1107   :  { %vm7004_vm4 = vcmp.eq.f32.partialorder %v18867_v7, 0.0  ;;  %v14451_v54 = vpop.eup %14450  ;;  %v7039_v39 = vmax.f32 %v6971_v23, 1e-12  ;;  %v6978_v45 = vsel %vm6976_vm11, %v6977_v3, %v6975_v38  ;;  %v6980_v41 = vmul.f32 %v14449_v59, %v18825_v9 }
0x1108   :  { %v7117_v18 = vpack.c.bf16 %v7093_v57, %v7092_v1  ;;  %v14453_v35 = vpop.eup %14452  ;;  %v7040_v20 = vmax.f32 %v6978_v45, 1e-12  ;;  %v7005_v21 = vand.u32 2147483648, %v18867_v7  ;;  %v7094_v27 = vmul.f32 %v14437_v63, %v18564_v5 }
0x1109   :  { %v7095_v53 = vmul.f32 %v14439_v26, %v18567_v4  ;;  %v14455_v46 = vpop.eup %14454  ;;  %14468 = vrcp.f32 %v7039_v39  ;;  %v6982_v61 = vsel %vm6981_vm12, %v18825_v9, %v6980_v41  ;;  %v6987_v0 = vmul.f32 %v14453_v35, %v18837_v56 }
0x110a   :  { %13155 = vmatmul.mubr.bf16.gmra.mrb[180].mxu1 %v7117_v18  ;;  %v7097_v3 = vmul.f32 %v14447_v31, %v18584_v25  ;;  %v14457_v10 = vpop.eup %14456  ;;  %v6985_v49 = vsel %vm6983_vm13, %v6984_v42, %v6982_v61  ;;  %vm7009_vm5 = vcmp.eq.f32.partialorder %v18876_v12, inf  ;;  %v7096_v26 = vmul.f32 %v14445_v40, %v18577_v19 }
0x110b   :  { %v7118_v63 = vpack.c.bf16 %v7095_v53, %v7094_v27  ;;  %v14459_v15 = vpop.eup %14458  ;;  %v7041_v24 = vmax.f32 %v6985_v49, 1e-12  ;;  %v6989_v14 = vsel %vm6988_vm14, %v18837_v56, %v6987_v0  ;;  %v6994_v32 = vmul.f32 %v14457_v10, %v18849_v37 }
0x110c   :  { %v7099_v6 = vmul.f32 %v14451_v54, %v18598_v34  ;;  %v14461_v50 = vpop.eup %14460  ;;  %14470 = vrcp.f32 %v7040_v20  ;;  %v6992_v9 = vsel %vm6990_vm15, %v6991_v62, %v6989_v14  ;;  %v7001_v42 = vmul.f32 %v14459_v15, %v18867_v7 }
0x110d   :  { %13158 = vmatprep.mubr.bf16.mxu1 %v7118_v63  ;;  %v7098_v40 = vmul.f32 %v14455_v46, %v18591_v33  ;;  %v14463_v11 = vpop.eup %14462  ;;  %14472 = vrcp.f32 %v7041_v24  ;;  %v7042_v31 = vmax.f32 %v6992_v9, 1e-12  ;;  %v6996_v58 = vsel %vm6995_vm0, %v18849_v37, %v6994_v32 }
0x110e   :  { %v7119_v1 = vpack.c.bf16 %v7097_v3, %v7096_v26  ;;  %v14465_v57 = vpop.eup %14464  ;;  %v6999_v59 = vsel %vm6997_vm2, %v6998_v13, %v6996_v58  ;;  %v7003_v56 = vsel %vm7002_vm3, %v18867_v7, %v7001_v42  ;;  %v7008_v62 = vmul.f32 %v14463_v11, %v18876_v12 }
0x110f   :  { %v7120_v23 = vpack.c.bf16 %v7099_v6, %v7098_v40  ;;  %14474 = vrcp.f32 %v7042_v31  ;;  %v7043_v38 = vmax.f32 %v6999_v59, 1e-12  ;;  %v7006_v54 = vsel %vm7004_vm4, %v7005_v21, %v7003_v56 }
0x1110   :  { %v7012_v39 = vand.u32 2147483648, %v18876_v12  ;;  %v14467_v45 = vpop.eup %14466  ;;  %v7010_v37 = vsel %vm7009_vm5, %v18876_v12, %v7008_v62  ;;  %vm7011_vm6 = vcmp.eq.f32.partialorder %v18876_v12, 0.0  ;;  %v7101_v41 = vmul.f32 %v14465_v57, %v18612_v36 }
0x1111   :  { %14476 = vrcp.f32 %v7043_v38  ;;  %v7044_v18 = vmax.f32 %v7006_v54, 1e-12  ;;  %v7100_v7 = vmul.f32 %v14461_v50, %v18605_v29  ;;  %v7102_v21 = vmul.f32 %v14467_v45, %v18619_v17 }
0x1112   :  { %v7013_v13 = vsel %vm7011_vm6, %v7012_v39, %v7010_v37  ;;  %13159 = vmatmul.mubr.bf16.gmra.mrb[184].mxu1 %v7119_v1  ;;  %vm7288_vm7 = vcmask 64512   ;;  %vm14916_vm8 = vmmov 0   ;;  %vm11111_vm9 = vcmask 1043456  }
0x1113   :  { %v7045_v35 = vmax.f32 %v7013_v13, 1e-12  ;;  %13162 = vmatprep.mubr.bf16.mxu1 %v7120_v23  ;;  %v14469_v20 = vpop.eup %14468  ;;  %v7121_v53 = vpack.c.bf16 %v7101_v41, %v7100_v7  ;;  %13194 = vmatprep.mubr.msk.bf16.mxu0 %vm14916_vm8, %v20593_v60  ;;  %vm11116_vm10 = vcmask 1045504  }
0x1114   :  { %v7103_v27 = vmul.f32 %v14469_v20, %v18626_v2 }
0x1115   :  { %14478 = vrcp.f32 %v7045_v35 }
0x1116   :  { %v14471_v46 = vpop.eup %14470  ;;  %14480 = vrcp.f32 %v7044_v18  ;;  %v7122_v12 = vpack.c.bf16 %v7103_v27, %v7102_v21 }
0x1117   :  { %v14473_v61 = vpop.eup %14472  ;;  %v7104_v49 = vmul.f32 %v14471_v46, %v18633_v16 }
0x1118   :  { %v7105_v3 = vmul.f32 %v14473_v61, %v18640_v55 }
0x1119   :  { %v14475_v0 = vpop.eup %14474 }
0x111a   :  { %13163 = vmatmul.mubr.bf16.gmra.mrb[188].mxu1 %v7121_v53  ;;  %v7106_v63 = vmul.f32 %v14475_v0, %v18647_v47  ;;  %v7123_v15 = vpack.c.bf16 %v7105_v3, %v7104_v49 }
0x111b   :  { %13166 = vmatprep.mubr.bf16.mxu1 %v7122_v12  ;;  %v14477_v10 = vpop.eup %14476 }
0x111c   :  { %v7107_v26 = vmul.f32 %v14477_v10, %v18654_v51 }
0x111e   :  { %v7124_v14 = vpack.c.bf16 %v7107_v26, %v7106_v63 }
0x111f   :  { %v14479_v24 = vpop.eup %14478 }
0x1120   :  { %v14481_v32 = vpop.eup %14480  ;;  %v7109_v6 = vmul.f32 %v14479_v24, %v18667_v30 }
0x1121   :  { %v7108_v50 = vmul.f32 %v14481_v32, %v18661_v52 }
0x1122   :  { %13167 = vmatmul.mubr.bf16.gmra.mrb[192].mxu1 %v7123_v15 }
0x1123   :  { %13170 = vmatprep.mubr.bf16.mxu1 %v7124_v14  ;;  %v7125_v9 = vpack.c.bf16 %v7109_v6, %v7108_v50 }
0x112a   :  { %13171 = vmatmul.mubr.bf16.gmra.mrb[196].mxu1 %v7125_v9 }
0x112b   :  { %13182 = vmatprep.mubr.msk.bf16.mxu1 %vm14916_vm8, %v20593_v60 }
0x117c   :  { %v18959_v42 = vpop.f32.mrb[168].mxu1 }
0x117d   :  { %20602 = vst [vmem:[#allocation87_spill] sm:$0xff] %v18959_v42  ;;  %v18961_v40 = vpop.f32.mrb[169].mxu1  ;;  %v18979_v59 = vsel %vm7288_vm7, %v18959_v42, -inf }
0x117e   :  { %20603 = vst [vmem:[#allocation47_spill] sm:$0xff] %v18961_v40  ;;  %v18963_v11 = vpop.f32.mrb[170].mxu1  ;;  %v18969_v58 = vsel %vm7288_vm7, %v18961_v40, -inf }
0x117f   :  { %20604 = vst [vmem:[#allocation28_spill] sm:$0xff] %v18963_v11  ;;  %v18965_v31 = vpop.f32.mrb[171].mxu1  ;;  %v18984_v62 = vsel %vm7288_vm7, %v18963_v11, -inf }
0x1180   :  { %20605 = vst [vmem:[#allocation30_spill] sm:$0xff] %v18965_v31  ;;  %v18973_v1 = vsel %vm7288_vm7, %v18965_v31, -inf }
0x1181   :  { %v7291_v57 = vmax.f32 %v18969_v58, %v18973_v1 }
0x1183   :  { %v7293_v56 = vmax.f32 %v7291_v57, %v18979_v59 }
0x1184   :  { %v18986_v23 = vpop.f32.mrb[172].mxu1 }
0x1185   :  { %20606 = vst [vmem:[#allocation107_spill] sm:$0xff] %v18986_v23  ;;  %v18988_v38 = vpop.f32.mrb[173].mxu1  ;;  %v7295_v54 = vmax.f32 %v7293_v56, %v18984_v62  ;;  %v19007_v35 = vsel %vm7288_vm7, %v18986_v23, -inf }
0x1186   :  { %20607 = vst [vmem:[#allocation46_spill] sm:$0xff] %v18988_v38  ;;  %v18993_v39 = vsel %vm7288_vm7, %v18988_v38, -inf  ;;  %v18995_v45 = vpop.f32.mrb[174].mxu1 }
0x1187   :  { %20608 = vst [vmem:[#allocation16_spill] sm:$0xff] %v18995_v45  ;;  %v7297_v37 = vmax.f32 %v7295_v54, %v18993_v39  ;;  %v18998_v13 = vpop.f32.mrb[175].mxu1  ;;  %v19012_v7 = vsel %vm7288_vm7, %v18995_v45, -inf }
0x1188   :  { %20609 = vst [vmem:[#allocation25_spill] sm:$0xff] %v18998_v13  ;;  %v19002_v41 = vsel %vm7288_vm7, %v18998_v13, -inf }
0x1189   :  { %v7299_v18 = vmax.f32 %v7297_v37, %v19002_v41 }
0x118b   :  { %v7301_v20 = vmax.f32 %v7299_v18, %v19007_v35 }
0x118d   :  { %v7303_v21 = vmax.f32 %v7301_v20, %v19012_v7 }
0x118f   :  { %v7304_v27 = vrot.slane %v7303_v21, 4 }
0x1191   :  { %v7305_v53 = vmax.f32 %v7303_v21, %v7304_v27 }
0x1193   :  { %v7306_v46 = vrot.slane %v7305_v53, 2 }
0x1195   :  { %v7307_v12 = vmax.f32 %v7305_v53, %v7306_v46 }
0x1197   :  { %v7308_v61 = vrot.slane %v7307_v12, 1 }
0x1199   :  { %v7309_v0 = vmax.f32 %v7307_v12, %v7308_v61 }
0x119b   :  { %v7373_v3 = vsub.f32 %v18961_v40, %v7309_v0  ;;  %v7374_v10 = vsub.f32 %v18965_v31, %v7309_v0  ;;  %v7375_v49 = vsub.f32 %v18959_v42, %v7309_v0  ;;  %v7376_v63 = vsub.f32 %v18963_v11, %v7309_v0 }
0x119c   :  { %v7377_v26 = vsub.f32 %v18988_v38, %v7309_v0  ;;  %v7378_v32 = vsub.f32 %v18998_v13, %v7309_v0  ;;  %v7379_v50 = vsub.f32 %v18986_v23, %v7309_v0  ;;  %v7380_v57 = vsub.f32 %v18995_v45, %v7309_v0 }
0x119d   :  { %v7405_v15 = vmul.f32 1.442695, %v7373_v3  ;;  %v7407_v24 = vmul.f32 1.442695, %v7374_v10  ;;  %v7409_v14 = vmul.f32 1.442695, %v7375_v49 }
0x119e   :  { %v7411_v6 = vmul.f32 1.442695, %v7376_v63  ;;  %v7413_v9 = vmul.f32 1.442695, %v7377_v26  ;;  %v7415_v56 = vmul.f32 1.442695, %v7378_v32 }
0x119f   :  { %14482 = vpow2.f32 %v7405_v15  ;;  %v7417_v54 = vmul.f32 1.442695, %v7379_v50  ;;  %v7419_v37 = vmul.f32 1.442695, %v7380_v57 }
0x11a0   :  { %14484 = vpow2.f32 %v7407_v24 }
0x11a1   :  { %14486 = vpow2.f32 %v7409_v14 }
0x11a2   :  { %14488 = vpow2.f32 %v7411_v6 }
0x11a3   :  { %14490 = vpow2.f32 %v7413_v9 }
0x11a4   :  { %14492 = vpow2.f32 %v7415_v56 }
0x11a5   :  { %14494 = vpow2.f32 %v7417_v54 }
0x11a6   :  { %14496 = vpow2.f32 %v7419_v37 }
0x11a9   :  { %v14483_v18 = vpop.eup %14482 }
0x11aa   :  { %v14485_v20 = vpop.eup %14484  ;;  %v7469_v21 = vsel %vm7288_vm7, %v14483_v18, 0.0 }
0x11ab   :  { %v14487_v27 = vpop.eup %14486  ;;  %v7470_v53 = vsel %vm7288_vm7, %v14485_v20, 0.0 }
0x11ac   :  { %v14489_v46 = vpop.eup %14488  ;;  %v7471_v12 = vadd.f32 %v7470_v53, %v7469_v21  ;;  %v7472_v61 = vsel %vm7288_vm7, %v14487_v27, 0.0 }
0x11ad   :  { %v14491_v0 = vpop.eup %14490  ;;  %v7474_v10 = vsel %vm7288_vm7, %v14489_v46, 0.0 }
0x11ae   :  { %v7473_v3 = vadd.f32 %v7472_v61, %v7471_v12  ;;  %v14493_v49 = vpop.eup %14492  ;;  %v7476_v26 = vsel %vm7288_vm7, %v14491_v0, 0.0 }
0x11af   :  { %v14495_v15 = vpop.eup %14494  ;;  %v7478_v14 = vsel %vm7288_vm7, %v14493_v49, 0.0 }
0x11b0   :  { %v7475_v63 = vadd.f32 %v7474_v10, %v7473_v3  ;;  %v14497_v32 = vpop.eup %14496  ;;  %v7480_v50 = vsel %vm7288_vm7, %v14495_v15, 0.0 }
0x11b1   :  { %v7482_v57 = vsel %vm7288_vm7, %v14497_v32, 0.0 }
0x11b2   :  { %v7477_v24 = vadd.f32 %v7476_v26, %v7475_v63 }
0x11b4   :  { %v7479_v6 = vadd.f32 %v7478_v14, %v7477_v24 }
0x11b6   :  { %v7481_v9 = vadd.f32 %v7480_v50, %v7479_v6 }
0x11b8   :  { %v7483_v56 = vadd.f32 %v7482_v57, %v7481_v9 }
0x11ba   :  { %v7484_v54 = vrot.slane %v7483_v56, 4 }
0x11bc   :  { %v7485_v37 = vadd.f32 %v7484_v54, %v7483_v56 }
0x11be   :  { %v7486_v21 = vrot.slane %v7485_v37, 2 }
0x11c0   :  { %v7487_v53 = vadd.f32 %v7486_v21, %v7485_v37 }
0x11c2   :  { %v7488_v12 = vrot.slane %v7487_v53, 1 }
0x11c4   :  { %v7489_v61 = vadd.f32 %v7488_v12, %v7487_v53 }
0x11c6   :  { %14498 = vrcp.f32 %v7489_v61 }
0x11cb   :  { %v19035_v3 = vpop.f32.mrb[176].mxu1 }
0x11cc   :  { %20610 = vst [vmem:[#allocation32_spill] sm:$0xff] %v19035_v3  ;;  %v19037_v10 = vpop.f32.mrb[177].mxu1 }
0x11cd   :  { %20611 = vst [vmem:[#allocation94_spill] sm:$0xff] %v19037_v10  ;;  %v19039_v63 = vpop.f32.mrb[178].mxu1  ;;  %v19049_v44 = vsel %vm7288_vm7, %v19037_v10, -inf }
0x11ce   :  { %20612 = vst [vmem:[#allocation36_spill] sm:$0xff] %v19039_v63  ;;  %v19041_v26 = vpop.f32.mrb[179].mxu1 }
0x11cf   :  { %20613 = vst [vmem:[#allocation49_spill] sm:$0xff] %v19041_v26  ;;  %v19045_v37 = vsel %vm7288_vm7, %v19041_v26, -inf }
0x11d0   :  { %v14499_v24 = vpop.eup %14498 }
0x11d1   :  { %v7557_v14 = vmul.f32 %v14499_v24, %v14483_v18  ;;  %v7558_v6 = vmul.f32 %v14499_v24, %v14485_v20  ;;  %v7559_v50 = vmul.f32 %v14499_v24, %v14487_v27  ;;  %v7560_v9 = vmul.f32 %v14499_v24, %v14489_v46 }
0x11d2   :  { %v7561_v57 = vmul.f32 %v14499_v24, %v14491_v0  ;;  %v7562_v56 = vmul.f32 %v14499_v24, %v14493_v49  ;;  %v7563_v54 = vmul.f32 %v14499_v24, %v14495_v15  ;;  %v7564_v53 = vmul.f32 %v14499_v24, %v14497_v32 }
0x11d3   :  { %v7909_v21 = vpack.c.bf16 %v7558_v6, %v7557_v14  ;;  %v7910_v12 = vpack.c.bf16 %v7560_v9, %v7559_v50  ;;  %v7312_v20 = vmax.f32 %v19049_v44, %v19045_v37  ;;  %v19055_v27 = vsel %vm7288_vm7, %v19035_v3, -inf }
0x11d4   :  { %v7911_v61 = vpack.c.bf16 %v7562_v56, %v7561_v57  ;;  %v7912_v18 = vpack.c.bf16 %v7564_v53, %v7563_v54  ;;  %v19060_v0 = vsel %vm7288_vm7, %v19039_v63, -inf }
0x11d5   :  { %7941 = vxpose.xlu0.c.b16.start [1/4] (short) (narrow) %v7909_v21, 16  ;;  %v7314_v46 = vmax.f32 %v7312_v20, %v19055_v27  ;;  %20614 = vst [vmem:[#allocation104_spill] sm:$0xff] %v19060_v0 }
0x11d7   :  { %v7316_v32 = vmax.f32 %v7314_v46, %v19060_v0 }
0x11d9   :  { %7942 = vxpose.xlu0.c.b16.cont [2/4] (short) (narrow) %v7910_v12, 16 }
0x11dd   :  { %v19062_v49 = vpop.f32.mrb[180].mxu1  ;;  %7943 = vxpose.xlu0.c.b16.cont [3/4] (short) (narrow) %v7911_v61, 16 }
0x11de   :  { %20615 = vst [vmem:[#allocation38_spill] sm:$0xff] %v19062_v49  ;;  %v19064_v15 = vpop.f32.mrb[181].mxu1  ;;  %v19083_v56 = vsel %vm7288_vm7, %v19062_v49, -inf }
0x11df   :  { %20616 = vst [vmem:[#allocation99_spill] sm:$0xff] %v19064_v15  ;;  %v19069_v24 = vsel %vm7288_vm7, %v19064_v15, -inf  ;;  %v19071_v14 = vpop.f32.mrb[182].mxu1 }
0x11e0   :  { %20617 = vst [vmem:[#allocation97_spill] sm:$0xff] %v19071_v14  ;;  %v7318_v6 = vmax.f32 %v7316_v32, %v19069_v24  ;;  %v19074_v50 = vpop.f32.mrb[183].mxu1  ;;  %v19088_v21 = vsel %vm7288_vm7, %v19071_v14, -inf }
0x11e1   :  { %20618 = vst [vmem:[#allocation98_spill] sm:$0xff] %v19074_v50  ;;  %v19078_v9 = vsel %vm7288_vm7, %v19074_v50, -inf  ;;  %7944 = vxpose.xlu0.c.b16.end [4/4] (short) (narrow) %v7912_v18, 16  ;;  %20620 = vst [vmem:[#allocation105_spill] sm:$0xff] %v19088_v21 }
0x11e2   :  { %20619 = vst [vmem:[#allocation96_spill] sm:$0xff] %v19078_v9  ;;  %v7320_v57 = vmax.f32 %v7318_v6, %v19078_v9 }
0x11e4   :  { %v7322_v54 = vmax.f32 %v7320_v57, %v19083_v56 }
0x11e5   :  { %v19090_v53 = vpop.f32.mrb[184].mxu1 }
0x11e6   :  { %20621 = vst [vmem:[#allocation39_spill] sm:$0xff] %v19090_v53  ;;  %v7324_v12 = vmax.f32 %v7322_v54, %v19088_v21  ;;  %v19093_v61 = vpop.f32.mrb[185].mxu1  ;;  %v19111_v54 = vsel %vm7288_vm7, %v19090_v53, -inf }
0x11e7   :  { %20622 = vst [vmem:[#allocation42_spill] sm:$0xff] %v19093_v61  ;;  %v19095_v20 = vpop.f32.mrb[186].mxu1  ;;  %v19101_v32 = vsel %vm7288_vm7, %v19093_v61, -inf }
0x11e8   :  { %20623 = vst [vmem:[#allocation109_spill] sm:$0xff] %v19095_v20  ;;  %v7325_v18 = vrot.slane %v7324_v12, 4  ;;  %v19097_v46 = vpop.f32.mrb[187].mxu1  ;;  %v19116_v43 = vsel %vm7288_vm7, %v19095_v20, -inf }
0x11e9   :  { %20624 = vst [vmem:[#allocation102_spill] sm:$0xff] %v19097_v46  ;;  %v19105_v6 = vsel %vm7288_vm7, %v19097_v46, -inf  ;;  %20626 = vst [vmem:[#allocation103_spill] sm:$0xff] %v19116_v43 }
0x11ea   :  { %20625 = vst [vmem:[#allocation100_spill] sm:$0xff] %v19105_v6  ;;  %v7326_v57 = vmax.f32 %v7324_v12, %v7325_v18  ;;  %v7333_v8 = vmax.f32 %v19101_v32, %v19105_v6 }
0x11ec   :  { %v7327_v22 = vrot.slane %v7326_v57, 2  ;;  %v7335_v28 = vmax.f32 %v7333_v8, %v19111_v54 }
0x11ed   :  { %v19118_v48 = vpop.f32.mrb[188].mxu1 }
0x11ee   :  { %20627 = vst [vmem:[#allocation101_spill] sm:$0xff] %v19118_v48  ;;  %v7328_v45 = vmax.f32 %v7326_v57, %v7327_v22  ;;  %v19120_v13 = vpop.f32.mrb[189].mxu1  ;;  %v7337_v12 = vmax.f32 %v7335_v28, %v19116_v43  ;;  %v19145_v51 = vsel %vm7288_vm7, %v19118_v48, -inf }
0x11ef   :  { %20628 = vst [vmem:[#allocation57_spill] sm:$0xff] %v19120_v13  ;;  %v19125_v18 = vsel %vm7288_vm7, %v19120_v13, -inf  ;;  %v19127_v11 = vpop.f32.mrb[190].mxu1  ;;  %20633 = vst [vmem:[#allocation40_spill] sm:$0xff] %v19145_v51 }
0x11f0   :  { %20629 = vst [vmem:[#allocation21_spill] sm:$0xff] %v19125_v18  ;;  %20630 = vst [vmem:[#allocation43_spill] sm:$0xff] %v19127_v11  ;;  %v7329_v31 = vrot.slane %v7328_v45, 1  ;;  %v7339_v8 = vmax.f32 %v7337_v12, %v19125_v18  ;;  %v19130_v23 = vpop.f32.mrb[191].mxu1 }
0x11f1   :  { %20631 = vst [vmem:[#allocation23_spill] sm:$0xff] %v19130_v23  ;;  %v19134_v38 = vsel %vm7288_vm7, %v19130_v23, -inf }
0x11f2   :  { %20632 = vst [vmem:[#allocation110_spill] sm:$0xff] %v19134_v38  ;;  %v7330_v22 = vmax.f32 %v7328_v45, %v7329_v31  ;;  %v7341_v57 = vmax.f32 %v7339_v8, %v19134_v38 }
0x11f4   :  { %v7381_v28 = vsub.f32 %v19037_v10, %v7330_v22  ;;  %v7382_v42 = vsub.f32 %v19041_v26, %v7330_v22  ;;  %v7383_v40 = vsub.f32 %v19035_v3, %v7330_v22  ;;  %v7384_v30 = vsub.f32 %v19039_v63, %v7330_v22 }
0x11f5   :  { %v7385_v52 = vsub.f32 %v19064_v15, %v7330_v22  ;;  %v7386_v12 = vsub.f32 %v19074_v50, %v7330_v22  ;;  %v19147_v47 = vpop.f32.mrb[192].mxu1  ;;  %v7343_v10 = vmax.f32 %v7341_v57, %v19145_v51  ;;  %v19152_v3 = vsel %vm7288_vm7, %v19127_v11, -inf }
0x11f6   :  { %20634 = vst [vmem:[#allocation55_spill] sm:$0xff] %v19147_v47  ;;  %v7421_v31 = vmul.f32 1.442695, %v7381_v28  ;;  %v7423_v45 = vmul.f32 1.442695, %v7382_v42  ;;  %20635 = vst [vmem:[#allocation106_spill] sm:$0xff] %v19152_v3  ;;  %v7387_v38 = vsub.f32 %v19062_v49, %v7330_v22 }
0x11f7   :  { %v7425_v8 = vmul.f32 1.442695, %v7383_v40  ;;  %v7427_v26 = vmul.f32 1.442695, %v7384_v30  ;;  %v7429_v63 = vmul.f32 1.442695, %v7385_v52  ;;  %v7345_v50 = vmax.f32 %v7343_v10, %v19152_v3 }
0x11f8   :  { %14500 = vpow2.f32 %v7421_v31  ;;  %v19155_v15 = vpop.f32.mrb[193].mxu1  ;;  %v7431_v42 = vmul.f32 1.442695, %v7386_v12  ;;  %v7388_v30 = vsub.f32 %v19071_v14, %v7330_v22  ;;  %v7433_v12 = vmul.f32 1.442695, %v7387_v38 }
0x11f9   :  { %20636 = vst [vmem:[#allocation61_spill] sm:$0xff] %v19155_v15  ;;  %14502 = vpow2.f32 %v7423_v45  ;;  %v19158_v55 = vpop.f32.mrb[194].mxu1  ;;  %v7346_v40 = vrot.slane %v7345_v50, 4  ;;  %v19165_v52 = vsel %vm7288_vm7, %v19155_v15, -inf  ;;  %v19175_v45 = vsel %vm7288_vm7, %v19147_v47, -inf }
0x11fa   :  { %20637 = vst [vmem:[#allocation63_spill] sm:$0xff] %v19158_v55  ;;  %14504 = vpow2.f32 %v7425_v8  ;;  %v19160_v57 = vpop.f32.mrb[195].mxu1  ;;  %20640 = vst [vmem:[#allocation68_spill] sm:$0xff] %v19175_v45  ;;  %v7435_v49 = vmul.f32 1.442695, %v7388_v30 }
0x11fb   :  { %20638 = vst [vmem:[#allocation58_spill] sm:$0xff] %v19160_v57  ;;  %14506 = vpow2.f32 %v7427_v26  ;;  %v19169_v10 = vsel %vm7288_vm7, %v19160_v57, -inf  ;;  %v7347_v28 = vmax.f32 %v7345_v50, %v7346_v40 }
0x11fc   :  { %20639 = vst [vmem:[#allocation64_spill] sm:$0xff] %v19169_v10  ;;  %14508 = vpow2.f32 %v7429_v63  ;;  %v7354_v31 = vmax.f32 %v19165_v52, %v19169_v10  ;;  %v19184_v63 = vsel %vm7288_vm7, %v19158_v55, -inf }
0x11fd   :  { %v19177_v22 = vpop.f32.mrb[196].mxu1  ;;  %14510 = vpow2.f32 %v7431_v42  ;;  %v7348_v26 = vrot.slane %v7347_v28, 2  ;;  %20641 = vst [vmem:[#allocation66_spill] sm:$0xff] %v19184_v63 }
0x11fe   :  { %v7356_v8 = vmax.f32 %v7354_v31, %v19175_v45  ;;  %v19180_v14 = vpop.f32.mrb[197].mxu1  ;;  %14512 = vpow2.f32 %v7433_v12 }
0x11ff   :  { %v19188_v38 = vsel %vm7288_vm7, %v19180_v14, -inf  ;;  %v19190_v50 = vpop.f32.mrb[198].mxu1  ;;  %v7349_v40 = vmax.f32 %v7347_v28, %v7348_v26  ;;  %14514 = vpow2.f32 %v7435_v49 }
0x1200   :  { %20642 = vst [vmem:[#allocation67_spill] sm:$0xff] %v19188_v38  ;;  %v7358_v3 = vmax.f32 %v7356_v8, %v19184_v63  ;;  %v19193_v42 = vpop.f32.mrb[199].mxu1 }
0x1201   :  { %20643 = vst [vmem:[#allocation59_spill] sm:$0xff] %v19193_v42  ;;  %v7350_v16 = vrot.slane %v7349_v40, 1  ;;  %v19200_v43 = vsel %vm7288_vm7, %v19193_v42, -inf }
0x1202   :  { %v19195_v31 = vpop.eup %14500  ;;  %v7360_v30 = vmax.f32 %v7358_v3, %v19188_v38  ;;  %20644 = vst [vmem:[#allocation69_spill] sm:$0xff] %v19200_v43 }
0x1203   :  { %v19202_v2 = vpop.eup %14502  ;;  %v7490_v28 = vsel %vm7288_vm7, %v19195_v31, 0.0  ;;  %v7351_v8 = vmax.f32 %v7349_v40, %v7350_v16 }
0x1204   :  { %v19206_v26 = vpop.eup %14504  ;;  %v7491_v12 = vsel %vm7288_vm7, %v19202_v2, 0.0  ;;  %v7362_v3 = vmax.f32 %v7360_v30, %v19200_v43 }
0x1205   :  { %v19210_v63 = vpop.eup %14506  ;;  %v7492_v17 = vadd.f32 %v7491_v12, %v7490_v28  ;;  %v7493_v51 = vsel %vm7288_vm7, %v19206_v26, 0.0  ;;  %v7389_v49 = vsub.f32 %v19093_v61, %v7351_v8  ;;  %v7390_v6 = vsub.f32 %v19097_v46, %v7351_v8 }
0x1206   :  { %v19213_v10 = vpop.eup %14508  ;;  %v7391_v38 = vsub.f32 %v19090_v53, %v7351_v8  ;;  %v7392_v18 = vsub.f32 %v19095_v20, %v7351_v8  ;;  %v7495_v40 = vsel %vm7288_vm7, %v19210_v63, 0.0  ;;  %v7393_v30 = vsub.f32 %v19120_v13, %v7351_v8 }
0x1207   :  { %v7494_v21 = vadd.f32 %v7493_v51, %v7492_v17  ;;  %v19221_v16 = vpop.eup %14510  ;;  %v19228_v28 = vsel %vm7288_vm7, %v19177_v22, -inf  ;;  %v7497_v46 = vsel %vm7288_vm7, %v19213_v10, 0.0  ;;  %v7437_v61 = vmul.f32 1.442695, %v7389_v49 }
0x1208   :  { %20645 = vst [vmem:[#allocation60_spill] sm:$0xff] %v19228_v28  ;;  %v7439_v53 = vmul.f32 1.442695, %v7390_v6  ;;  %v7394_v17 = vsub.f32 %v19130_v23, %v7351_v8  ;;  %v7441_v51 = vmul.f32 1.442695, %v7391_v38  ;;  %v7364_v43 = vmax.f32 %v7362_v3, %v19228_v28  ;;  %v19234_v0 = vpop.eup %14512 }
0x1209   :  { %v7496_v12 = vadd.f32 %v7495_v40, %v7494_v21  ;;  %v7443_v20 = vmul.f32 1.442695, %v7392_v18  ;;  %v7499_v13 = vsel %vm7288_vm7, %v19221_v16, 0.0  ;;  %14516 = vpow2.f32 %v7437_v61  ;;  %v19244_v18 = vpop.eup %14514 }
0x120a   :  { %v19240_v21 = vsel %vm7288_vm7, %v19190_v50, -inf  ;;  %v7395_v49 = vsub.f32 %v19118_v48, %v7351_v8  ;;  %14518 = vpow2.f32 %v7439_v53  ;;  %v7445_v6 = vmul.f32 1.442695, %v7393_v30 }
0x120b   :  { %v7498_v45 = vadd.f32 %v7497_v46, %v7496_v12  ;;  %20646 = vst [vmem:[#allocation62_spill] sm:$0xff] %v19240_v21  ;;  %v7366_v38 = vmax.f32 %v7364_v43, %v19240_v21  ;;  %v7396_v40 = vsub.f32 %v19127_v11, %v7351_v8  ;;  %14520 = vpow2.f32 %v7441_v51 }
0x120c   :  { %v7501_v46 = vsel %vm7288_vm7, %v19234_v0, 0.0  ;;  %14522 = vpow2.f32 %v7443_v20  ;;  %v7447_v61 = vmul.f32 1.442695, %v7394_v17  ;;  %v7503_v48 = vsel %vm7288_vm7, %v19244_v18, 0.0 }
0x120d   :  { %v7500_v3 = vadd.f32 %v7499_v13, %v7498_v45  ;;  %v7367_v12 = vrot.slane %v7366_v38, 4  ;;  %14524 = vpow2.f32 %v7445_v6  ;;  %v7449_v53 = vmul.f32 1.442695, %v7395_v49 }
0x120e   :  { %14526 = vpow2.f32 %v7447_v61  ;;  %v7451_v21 = vmul.f32 1.442695, %v7396_v40 }
0x120f   :  { %v7502_v23 = vadd.f32 %v7501_v46, %v7500_v3  ;;  %v7368_v30 = vmax.f32 %v7366_v38, %v7367_v12  ;;  %14528 = vpow2.f32 %v7449_v53 }
0x1210   :  { %14530 = vpow2.f32 %v7451_v21 }
0x1211   :  { %v7504_v43 = vadd.f32 %v7503_v48, %v7502_v23  ;;  %v7369_v13 = vrot.slane %v7368_v30, 2 }
0x1213   :  { %v7505_v45 = vrot.slane %v7504_v43, 4  ;;  %v7370_v8 = vmax.f32 %v7368_v30, %v7369_v13  ;;  %v19251_v51 = vpop.eup %14516 }
0x1214   :  { %v19253_v20 = vpop.eup %14518  ;;  %v7511_v17 = vsel %vm7288_vm7, %v19251_v51, 0.0 }
0x1215   :  { %v7506_v11 = vadd.f32 %v7505_v45, %v7504_v43  ;;  %v7371_v3 = vrot.slane %v7370_v8, 1  ;;  %v19257_v6 = vpop.eup %14520  ;;  %v7512_v48 = vsel %vm7288_vm7, %v19253_v20, 0.0 }
0x1216   :  { %v19261_v23 = vpop.eup %14522  ;;  %v7513_v38 = vadd.f32 %v7512_v48, %v7511_v17  ;;  %v7514_v61 = vsel %vm7288_vm7, %v19257_v6, 0.0 }
0x1217   :  { %v7507_v49 = vrot.slane %v7506_v11, 2  ;;  %v7372_v40 = vmax.f32 %v7370_v8, %v7371_v3  ;;  %v19265_v12 = vpop.eup %14524  ;;  %v7516_v13 = vsel %vm7288_vm7, %v19261_v23, 0.0 }
0x1218   :  { %v7515_v21 = vadd.f32 %v7514_v61, %v7513_v38  ;;  %v19273_v8 = vpop.eup %14526 }
0x1219   :  { %v7508_v46 = vadd.f32 %v7507_v49, %v7506_v11  ;;  %v7397_v53 = vsub.f32 %v19155_v15, %v7372_v40  ;;  %v7398_v30 = vsub.f32 %v19160_v57, %v7372_v40  ;;  %v7399_v45 = vsub.f32 %v19147_v47, %v7372_v40  ;;  %v19278_v38 = vpop.eup %14528 }
0x121a   :  { %v7400_v17 = vsub.f32 %v19158_v55, %v7372_v40  ;;  %v7517_v11 = vadd.f32 %v7516_v13, %v7515_v21  ;;  %v7518_v49 = vsel %vm7288_vm7, %v19265_v12, 0.0  ;;  %v7401_v48 = vsub.f32 %v19180_v14, %v7372_v40  ;;  %v19283_v21 = vpop.eup %14530 }
0x121b   :  { %v7509_v43 = vrot.slane %v7508_v46, 1  ;;  %v7453_v57 = vmul.f32 1.442695, %v7397_v53  ;;  %v7455_v15 = vmul.f32 1.442695, %v7398_v30  ;;  %v7520_v47 = vsel %vm7288_vm7, %v19273_v8, 0.0 }
0x121c   :  { %v7519_v61 = vadd.f32 %v7518_v49, %v7517_v11  ;;  %v7457_v28 = vmul.f32 1.442695, %v7399_v45  ;;  %v7402_v55 = vsub.f32 %v19193_v42, %v7372_v40  ;;  %v7459_v9 = vmul.f32 1.442695, %v7400_v17 }
0x121d   :  { %v7510_v3 = vadd.f32 %v7509_v43, %v7508_v46  ;;  %v7403_v43 = vsub.f32 %v19177_v22, %v7372_v40  ;;  %v7522_v13 = vsel %vm7288_vm7, %v19278_v38, 0.0  ;;  %v7404_v53 = vsub.f32 %v19190_v50, %v7372_v40 }
0x121e   :  { %v7521_v46 = vadd.f32 %v7520_v47, %v7519_v61  ;;  %v7461_v30 = vmul.f32 1.442695, %v7401_v48  ;;  %v7524_v11 = vsel %vm7288_vm7, %v19283_v21, 0.0  ;;  %v7463_v17 = vmul.f32 1.442695, %v7402_v55 }
0x121f   :  { %14532 = vrcp.f32 %v7510_v3  ;;  %v7465_v49 = vmul.f32 1.442695, %v7403_v43  ;;  %v7467_v47 = vmul.f32 1.442695, %v7404_v53 }
0x1220   :  { %14534 = vpow2.f32 %v7453_v57  ;;  %v7523_v45 = vadd.f32 %v7522_v13, %v7521_v46 }
0x1221   :  { %14536 = vpow2.f32 %v7455_v15 }
0x1222   :  { %14538 = vpow2.f32 %v7457_v28  ;;  %v7525_v3 = vadd.f32 %v7524_v11, %v7523_v45 }
0x1223   :  { %14540 = vpow2.f32 %v7459_v9 }
0x1224   :  { %14542 = vpow2.f32 %v7461_v30  ;;  %v7526_v61 = vrot.slane %v7525_v3, 4 }
0x1225   :  { %14544 = vpow2.f32 %v7463_v17 }
0x1226   :  { %v7527_v57 = vadd.f32 %v7526_v61, %v7525_v3  ;;  %14546 = vpow2.f32 %v7465_v49 }
0x1227   :  { %14548 = vpow2.f32 %v7467_v47 }
0x1228   :  { %v7528_v15 = vrot.slane %v7527_v57, 2 }
0x1229   :  { %v14533_v42 = vpop.eup %14532 }
0x122a   :  { %v19291_v40 = vpop.eup %14534  ;;  %v7565_v28 = vmul.f32 %v14533_v42, %v19195_v31  ;;  %v7566_v48 = vmul.f32 %v14533_v42, %v19202_v2  ;;  %v7567_v9 = vmul.f32 %v14533_v42, %v19206_v26  ;;  %v7568_v43 = vmul.f32 %v14533_v42, %v19210_v63 }
0x122b   :  { %v19296_v55 = vpop.eup %14536  ;;  %v7532_v46 = vsel %vm7288_vm7, %v19291_v40, 0.0  ;;  %v7569_v13 = vmul.f32 %v14533_v42, %v19213_v10  ;;  %v7570_v53 = vmul.f32 %v14533_v42, %v19221_v16  ;;  %v7529_v45 = vadd.f32 %v7528_v15, %v7527_v57 }
0x122c   :  { %v19303_v30 = vpop.eup %14538  ;;  %v7533_v31 = vsel %vm7288_vm7, %v19296_v55, 0.0  ;;  %v7913_v2 = vpack.c.bf16 %v7566_v48, %v7565_v28  ;;  %v7571_v26 = vmul.f32 %v14533_v42, %v19234_v0  ;;  %v7914_v3 = vpack.c.bf16 %v7568_v43, %v7567_v9 }
0x122d   :  { %v19308_v11 = vpop.eup %14540  ;;  %v7534_v17 = vadd.f32 %v7533_v31, %v7532_v46  ;;  %v7915_v49 = vpack.c.bf16 %v7570_v53, %v7569_v13  ;;  %v7530_v47 = vrot.slane %v7529_v45, 1  ;;  %v7535_v10 = vsel %vm7288_vm7, %v19303_v30, 0.0 }
0x122e   :  { %8000 = vxpose.xlu1.c.b16.start [1/4] (short) (narrow) %v7913_v2, 16  ;;  %v7572_v63 = vmul.f32 %v14533_v42, %v19244_v18  ;;  %v19313_v16 = vpop.eup %14542  ;;  %v7537_v15 = vsel %vm7288_vm7, %v19308_v11, 0.0 }
0x122f   :  { %v7536_v61 = vadd.f32 %v7535_v10, %v7534_v17  ;;  %v7531_v57 = vadd.f32 %v7530_v47, %v7529_v45  ;;  %v14545_v28 = vpop.eup %14544  ;;  %v7539_v9 = vsel %vm7288_vm7, %v19313_v16, 0.0  ;;  %v7933_v47 = vpack.c.bf16 %v18567_v4, %v18564_v5 }
0x1230   :  { %v7916_v0 = vpack.c.bf16 %v7572_v63, %v7571_v26  ;;  %v14547_v46 = vpop.eup %14546  ;;  %v7541_v42 = vsel %vm7288_vm7, %v14545_v28, 0.0 }
0x1231   :  { %v7538_v48 = vadd.f32 %v7537_v15, %v7536_v61  ;;  %14550 = vrcp.f32 %v7531_v57  ;;  %v14549_v43 = vpop.eup %14548  ;;  %v7543_v53 = vsel %vm7288_vm7, %v14547_v46, 0.0 }
0x1232   :  { %8001 = vxpose.xlu1.c.b16.cont [2/4] (short) (narrow) %v7914_v3, 16  ;;  %v7545_v31 = vsel %vm7288_vm7, %v14549_v43, 0.0 }
0x1233   :  { %v7540_v13 = vadd.f32 %v7539_v9, %v7538_v48 }
0x1235   :  { %v7542_v18 = vadd.f32 %v7541_v42, %v7540_v13 }
0x1236   :  { %8002 = vxpose.xlu1.c.b16.cont [3/4] (short) (narrow) %v7915_v49, 16 }
0x1237   :  { %v7544_v45 = vadd.f32 %v7543_v53, %v7542_v18 }
0x1239   :  { %v7546_v2 = vadd.f32 %v7545_v31, %v7544_v45 }
0x123a   :  { %8003 = vxpose.xlu1.c.b16.end [4/4] (short) (narrow) %v7916_v0, 16 }
0x123b   :  { %v7547_v26 = vrot.slane %v7546_v2, 4  ;;  %v7949_v17 = vpop.trf.xlu0  ;;  %v14551_v10 = vpop.eup %14550 }
0x123c   :  { %13183 = vmatmul.mubr.msk.bf16.vlgmr.msra.gmra.mrb[200].mxu1 %vm1506_vm1, %v7949_v17  ;;  %v7573_v63 = vmul.f32 %v14551_v10, %v19251_v51  ;;  %v7574_v61 = vmul.f32 %v14551_v10, %v19253_v20  ;;  %v7575_v49 = vmul.f32 %v14551_v10, %v19257_v6  ;;  %v7576_v57 = vmul.f32 %v14551_v10, %v19261_v23  ;;  %v20667_v17 = vld [vmem:[#allocation88_spill] sm:$0xff] }
0x123d   :  { %v7548_v3 = vadd.f32 %v7547_v26, %v7546_v2  ;;  %13199 = vmatpush3.bf16.msra.mxu1 %v7933_v47  ;;  %v7577_v15 = vmul.f32 %v14551_v10, %v19265_v12  ;;  %v7578_v0 = vmul.f32 %v14551_v10, %v19273_v8  ;;  %v7579_v5 = vmul.f32 %v14551_v10, %v19278_v38 }
0x123e   :  { %13200 = vmatprep.subr.bf16.mxu1 %v20593_v60  ;;  %v7917_v48 = vpack.c.bf16 %v7574_v61, %v7573_v63  ;;  %v7580_v9 = vmul.f32 %v14551_v10, %v19283_v21  ;;  %v7934_v51 = vpack.c.bf16 %v18584_v25, %v18577_v19  ;;  %13206 = vmatprep.mubr.msk.bf16.mxu1 %vm14916_vm8, %v20593_v60  ;;  %v20668_v10 = vld [vmem:[#allocation69_spill] sm:$0xff]  ;;  %v20670_v61 = vmov 0  }
0x123f   :  { %v7549_v4 = vrot.slane %v7548_v3, 2  ;;  %v7918_v20 = vpack.c.bf16 %v7576_v57, %v7575_v49  ;;  %v7919_v6 = vpack.c.bf16 %v7578_v0, %v7577_v15  ;;  %v7935_v38 = vpack.c.bf16 %v18598_v34, %v18591_v33  ;;  %v20671_v49 = vld [vmem:[#allocation62_spill] sm:$0xff]  ;;  %v13397_v0 = vld [vmem:[#allocation8 + $0x8] ss:$16 sps:$4 sm:$0xff]  }
0x1240   :  { %8059 = vxpose.xlu0.c.b16.start [1/4] (short) (narrow) %v7917_v48, 16  ;;  %v7920_v12 = vpack.c.bf16 %v7580_v9, %v7579_v5  ;;  %v7936_v19 = vpack.c.bf16 %v18612_v36, %v18605_v29  ;;  %v13396_v15 = vld [vmem:[#allocation8 + $0x4] ss:$16 sps:$4 sm:$0xff]   ;;  %v13399_v5 = vld [vmem:[#allocation8 + $0xc] ss:$16 sps:$4 sm:$0xff]  }
0x1241   :  { %v7550_v23 = vadd.f32 %v7549_v4, %v7548_v3  ;;  %13201 = vmatpush3.bf16.msra.mxu1 %v7934_v51  ;;  %v20669_v3 = vld [vmem:[#allocation106_spill] sm:$0xff]  ;;  %v13405_v48 = vld [vmem:[#allocation8 + $0x2c] ss:$16 sps:$4 sm:$0xff]   ;;  %v13403_v51 = vld [vmem:[#allocation8 + $0x28] ss:$16 sps:$4 sm:$0xff]  }
0x1242   :  { %13202 = vmatprep.subr.bf16.mxu1 %v20593_v60  ;;  %v13402_v4 = vld [vmem:[#allocation8 + $0x24] ss:$16 sps:$4 sm:$0xff]   ;;  %v13400_v9 = vld [vmem:[#allocation8 + $0x20] ss:$16 sps:$4 sm:$0xff]  }
0x1243   :  { %v7551_v8 = vrot.slane %v7550_v23, 1 }
0x1244   :  { %8060 = vxpose.xlu0.c.b16.cont [2/4] (short) (narrow) %v7918_v20, 16  ;;  %v13408_v20 = vld [vmem:[#allocation8 + $0x44] ss:$16 sps:$4 sm:$0xff]  }
0x1245   :  { %v7552_v13 = vadd.f32 %v7551_v8, %v7550_v23  ;;  %13203 = vmatpush3.bf16.msra.mxu1 %v7935_v38  ;;  %v13406_v23 = vld [vmem:[#allocation8 + $0x40] ss:$16 sps:$4 sm:$0xff]   ;;  %v13414_v8 = vld [vmem:[#allocation8 + $0x64] ss:$16 sps:$4 sm:$0xff]   ;;  %v13417_v38 = vld [vmem:[#allocation8 + $0x6c] ss:$16 sps:$4 sm:$0xff]  }
0x1246   :  { %13204 = vmatprep.subr.bf16.mxu1 %v20593_v60 }
0x1247   :  { %14552 = vrcp.f32 %v7552_v13  ;;  %v13412_v13 = vld [vmem:[#allocation8 + $0x60] ss:$16 sps:$4 sm:$0xff]  }
0x1248   :  { %8061 = vxpose.xlu0.c.b16.cont [3/4] (short) (narrow) %v7919_v6, 16  ;;  %v13411_v6 = vld [vmem:[#allocation8 + $0x4c] ss:$16 sps:$4 sm:$0xff]  }
0x1249   :  { %13205 = vmatpush3.bf16.msra.mxu1 %v7936_v19  ;;  %v13415_v19 = vld [vmem:[#allocation8 + $0x68] ss:$16 sps:$4 sm:$0xff]  }
0x124a   :  { %8594 = vmatprep.subr.bf16.mxu1 %v13396_v15 }
0x124c   :  { %8062 = vxpose.xlu0.c.b16.end [4/4] (short) (narrow) %v7920_v12, 16  ;;  %v13409_v12 = vld [vmem:[#allocation8 + $0x48] ss:$16 sps:$4 sm:$0xff]  }
0x1251   :  { %v14553_v25 = vpop.eup %14552 }
0x1252   :  { %v7581_v21 = vmul.f32 %v14553_v25, %v19291_v40  ;;  %v7582_v42 = vmul.f32 %v14553_v25, %v19296_v55  ;;  %v7583_v18 = vmul.f32 %v14553_v25, %v19303_v30  ;;  %v7584_v33 = vmul.f32 %v14553_v25, %v19308_v11  ;;  %v20661_v40 = vld [vmem:[#allocation108_spill] sm:$0xff]  ;;  %v20662_v30 = vld [vmem:[#allocation66_spill] sm:$0xff]  ;;  %v20663_v11 = vld [vmem:[#allocation33_spill] sm:$0xff] }
0x1253   :  { %v7585_v34 = vmul.f32 %v14553_v25, %v19313_v16  ;;  %v7586_v53 = vmul.f32 %v14553_v25, %v14545_v28  ;;  %v7587_v45 = vmul.f32 %v14553_v25, %v14547_v46  ;;  %v7588_v31 = vmul.f32 %v14553_v25, %v14549_v43  ;;  %v20664_v16 = vld [vmem:[#allocation35_spill] sm:$0xff]  ;;  %v20665_v46 = vld [vmem:[#allocation110_spill] sm:$0xff]  ;;  %v20666_v43 = vld [vmem:[#allocation53_spill] sm:$0xff] }
0x1254   :  { %v7921_v2 = vpack.c.bf16 %v7582_v42, %v7581_v21  ;;  %v7922_v26 = vpack.c.bf16 %v7584_v33, %v7583_v18  ;;  %v7939_v28 = vpack.c.bf16 %v20664_v16, %v20663_v11  ;;  %v7940_v47 = vpack.c.bf16 %v20667_v17, %v20666_v43  ;;  %v13420_v25 = vld [vmem:[#allocation8 + $0x84] ss:$16 sps:$4 sm:$0xff]   ;;  %v13423_v21 = vld [vmem:[#allocation8 + $0x8c] ss:$16 sps:$4 sm:$0xff]   ;;  %v13418_v42 = vld [vmem:[#allocation8 + $0x80] ss:$16 sps:$4 sm:$0xff]  }
0x1255   :  { %v7923_v29 = vpack.c.bf16 %v7586_v53, %v7585_v34  ;;  %v7924_v36 = vpack.c.bf16 %v7588_v31, %v7587_v45  ;;  %v13421_v18 = vld [vmem:[#allocation8 + $0x88] ss:$16 sps:$4 sm:$0xff]   ;;  %v20679_v43 = vld [vmem:[#allocation28_spill] sm:$0xff] }
0x1256   :  { %8118 = vxpose.xlu1.c.b16.start [1/4] (short) (narrow) %v7921_v2, 16  ;;  %v20672_v34 = vld [vmem:[#allocation47_spill] sm:$0xff] }
0x1257   :  { %v20673_v2 = vld [vmem:[#allocation87_spill] sm:$0xff] }
0x1259   :  { %7589 = vmax.xlane.f32.xlu0 %v18969_v58  ;;  %v20648_v58 = vld [vmem:[#allocation68_spill] sm:$0xff] }
0x125a   :  { %8119 = vxpose.xlu1.c.b16.cont [2/4] (short) (narrow) %v7922_v26, 16 }
0x125d   :  { %7593 = vmax.xlane.f32.xlu0 %v18979_v59  ;;  %v20650_v59 = vld [vmem:[#allocation21_spill] sm:$0xff] }
0x125e   :  { %8120 = vxpose.xlu1.c.b16.cont [3/4] (short) (narrow) %v7923_v29, 16 }
0x1261   :  { %7597 = vmax.xlane.f32.xlu0 %v18993_v39  ;;  %v20652_v39 = vld [vmem:[#allocation67_spill] sm:$0xff] }
0x1262   :  { %8121 = vxpose.xlu1.c.b16.end [4/4] (short) (narrow) %v7924_v36, 16 }
0x1265   :  { %7601 = vmax.xlane.f32.xlu0 %v19007_v35  ;;  %v20654_v35 = vld [vmem:[#allocation40_spill] sm:$0xff] }
0x1269   :  { %7605 = vmax.xlane.f32.xlu0 %v19049_v44  ;;  %v20647_v44 = vld [vmem:[#allocation96_spill] sm:$0xff] }
0x126d   :  { %7613 = vmax.xlane.f32.xlu0 %v19069_v24  ;;  %v20657_v24 = vld [vmem:[#allocation29_spill] sm:$0xff] }
0x126f   :  { %7591 = vmax.xlane.f32.xlu1 %v18973_v1  ;;  %v20649_v1 = vld [vmem:[#allocation104_spill] sm:$0xff] }
0x1271   :  { %7609 = vmax.xlane.f32.xlu0 %v19055_v27  ;;  %v20656_v27 = vld [vmem:[#allocation93_spill] sm:$0xff] }
0x1273   :  { %7595 = vmax.xlane.f32.xlu1 %v18984_v62  ;;  %v20651_v62 = vld [vmem:[#allocation105_spill] sm:$0xff] }
0x1275   :  { %7617 = vmax.xlane.f32.xlu0 %v19083_v56  ;;  %v7937_v56 = vpack.c.bf16 %v20657_v24, %v20656_v27 }
0x1277   :  { %7599 = vmax.xlane.f32.xlu1 %v19002_v41  ;;  %v20653_v41 = vld [vmem:[#allocation100_spill] sm:$0xff] }
0x1279   :  { %7621 = vmax.xlane.f32.xlu0 %v19101_v32  ;;  %v20658_v32 = vld [vmem:[#allocation60_spill] sm:$0xff] }
0x127b   :  { %7603 = vmax.xlane.f32.xlu1 %v19012_v7  ;;  %v20655_v7 = vld [vmem:[#allocation64_spill] sm:$0xff] }
0x127d   :  { %7637 = vmax.xlane.f32.xlu0 %v19165_v52  ;;  %v20660_v52 = vld [vmem:[#allocation19_spill] sm:$0xff] }
0x127e   :  { %v7938_v55 = vpack.c.bf16 %v20661_v40, %v20660_v52  ;;  %v20677_v40 = vld [vmem:[#allocation94_spill] sm:$0xff] }
0x127f   :  { %7607 = vmax.xlane.f32.xlu1 %v19045_v37 }
0x1281   :  { %7625 = vmax.xlane.f32.xlu0 %v19111_v54  ;;  %v20659_v54 = vld [vmem:[#allocation103_spill] sm:$0xff] }
0x1283   :  { %7615 = vmax.xlane.f32.xlu1 %v20647_v44  ;;  %v20674_v44 = vld [vmem:[#allocation46_spill] sm:$0xff] }
0x1285   :  { %7641 = vmax.xlane.f32.xlu0 %v20648_v58 }
0x1287   :  { %7611 = vmax.xlane.f32.xlu1 %v20649_v1 }
0x1289   :  { %7629 = vmax.xlane.f32.xlu0 %v20650_v59  ;;  %v20675_v59 = vld [vmem:[#allocation107_spill] sm:$0xff] }
0x128b   :  { %7619 = vmax.xlane.f32.xlu1 %v20651_v62 }
0x128d   :  { %7645 = vmax.xlane.f32.xlu0 %v20652_v39 }
0x128f   :  { %7623 = vmax.xlane.f32.xlu1 %v20653_v41 }
0x1291   :  { %7633 = vmax.xlane.f32.xlu0 %v20654_v35 }
0x1293   :  { %7639 = vmax.xlane.f32.xlu1 %v20655_v7 }
0x1294   :  { %v8008_v37 = vpop.trf.xlu1 }
0x1295   :  { %13195 = vmatmul.mubr.msk.bf16.vlgmr.msra.gmra.mrb[216].mxu0 %vm1506_vm1, %v8008_v37  ;;  %7649 = vmax.xlane.f32.xlu0 %v20658_v32 }
0x1296   :  { %13211 = vmatpush3.bf16.msra.mxu0 %v7937_v56  ;;  %13218 = vmatprep.mubr.msk.bf16.mxu0 %vm14916_vm8, %v20593_v60 }
0x1297   :  { %7627 = vmax.xlane.f32.xlu1 %v20659_v54  ;;  %13212 = vmatprep.subr.bf16.mxu0 %v20593_v60  ;;  %v20676_v54 = vld [vmem:[#allocation30_spill] sm:$0xff] }
0x129a   :  { %13213 = vmatpush3.bf16.msra.mxu0 %v7938_v55 }
0x129b   :  { %7643 = vmax.xlane.f32.xlu1 %v20662_v30  ;;  %13214 = vmatprep.subr.bf16.mxu0 %v20593_v60 }
0x129e   :  { %13215 = vmatpush3.bf16.msra.mxu0 %v7939_v28  ;;  %v20678_v28 = vld [vmem:[#allocation32_spill] sm:$0xff] }
0x129f   :  { %7631 = vmax.xlane.f32.xlu1 %v20665_v46  ;;  %13216 = vmatprep.subr.bf16.mxu0 %v20593_v60  ;;  %v13394_v60 = vld [vmem:[#allocation8] ss:$16 sps:$4 sm:$0xff]  }
0x12a2   :  { %13217 = vmatpush3.bf16.msra.mxu0 %v7940_v47 }
0x12a3   :  { %7647 = vmax.xlane.f32.xlu1 %v20668_v10  ;;  %8635 = vmatprep.subr.bf16.mxu0 %v13399_v5 }
0x12a6   :  { %v8067_v63 = vpop.trf.xlu0 }
0x12a7   :  { %7635 = vmax.xlane.f32.xlu1 %v20669_v3  ;;  %13207 = vmatmul.mubr.msk.bf16.vlgmr.msra.gmra.mrb[204].mxu1 %vm1506_vm1, %v8067_v63 }
0x12a8   :  { %8626 = vmatprep.mubr.bf16.mxu1 %v20670_v61  ;;  %8595 = vmatpush1.bf16.msra.mxu1 %v13394_v60 }
0x12a9   :  { %8596 = vmatprep.subr.bf16.mxu1 %v13402_v4  ;;  %v20681_v4 = vld [vmem:[#allocation99_spill] sm:$0xff] }
0x12ab   :  { %7651 = vmax.xlane.f32.xlu1 %v20671_v49 }
0x12ac   :  { %8597 = vmatpush1.bf16.msra.mxu1 %v13400_v9 }
0x12ad   :  { %8598 = vmatprep.subr.bf16.mxu1 %v13408_v20  ;;  %v20682_v20 = vld [vmem:[#allocation25_spill] sm:$0xff] }
0x12b0   :  { %8599 = vmatpush1.bf16.msra.mxu1 %v13406_v23 }
0x12b1   :  { %8600 = vmatprep.subr.bf16.mxu1 %v13414_v8  ;;  %v13426_v8 = vld [vmem:[#allocation8 + $0xa4] ss:$16 sps:$4 sm:$0xff]  }
0x12b4   :  { %8601 = vmatpush1.bf16.msra.mxu1 %v13412_v13  ;;  %v13427_v13 = vld [vmem:[#allocation8 + $0xa8] ss:$16 sps:$4 sm:$0xff]  }
0x12b5   :  { %8602 = vmatprep.subr.bf16.mxu1 %v13420_v25  ;;  %v20683_v25 = vld [vmem:[#allocation16_spill] sm:$0xff] }
0x12b8   :  { %8603 = vmatpush1.bf16.msra.mxu1 %v13418_v42 }
0x12b9   :  { %8604 = vmatprep.subr.bf16.mxu1 %v13426_v8 }
0x12bc   :  { %v8126_v57 = vpop.trf.xlu1 }
0x12bd   :  { %13219 = vmatmul.mubr.msk.bf16.vlgmr.msra.gmra.mrb[220].mxu0 %vm1506_vm1, %v8126_v57  ;;  %vm11106_vm1 = vcmask 1041408  }
0x12be   :  { %8667 = vmatprep.mubr.bf16.mxu0 %v20670_v61  ;;  %8636 = vmatpush1.bf16.msra.mxu0 %v13397_v0  ;;  %v20680_v0 = vld [vmem:[#allocation38_spill] sm:$0xff] }
0x12bf   :  { %8637 = vmatprep.subr.bf16.mxu0 %v13405_v48 }
0x12c2   :  { %8638 = vmatpush1.bf16.msra.mxu0 %v13403_v51  ;;  %v13424_v51 = vld [vmem:[#allocation8 + $0xa0] ss:$16 sps:$4 sm:$0xff]  }
0x12c3   :  { %8639 = vmatprep.subr.bf16.mxu0 %v13411_v6  ;;  %8605 = vmatpush1.bf16.msra.mxu1 %v13424_v51 }
0x12c6   :  { %8640 = vmatpush1.bf16.msra.mxu0 %v13409_v12 }
0x12c7   :  { %8641 = vmatprep.subr.bf16.mxu0 %v13417_v38 }
0x12ca   :  { %8642 = vmatpush1.bf16.msra.mxu0 %v13415_v19  ;;  %v13429_v19 = vld [vmem:[#allocation8 + $0xac] ss:$16 sps:$4 sm:$0xff]  }
0x12cb   :  { %8643 = vmatprep.subr.bf16.mxu0 %v13423_v21 }
0x12ce   :  { %8644 = vmatpush1.bf16.msra.mxu0 %v13421_v18 }
0x12cf   :  { %8645 = vmatprep.subr.bf16.mxu0 %v13429_v19  ;;  %v13436_v19 = vld [vmem:[#allocation8 + $0xe0] ss:$16 sps:$4 sm:$0xff]  }
0x12d2   :  { %8646 = vmatpush1.bf16.msra.mxu0 %v13427_v13 }
0x12e6   :  { %v7590_v33 = vpop.xlane.xlu0 %7589 }
0x12e7   :  { %v7653_v53 = vsub.f32 %v20672_v34, %v7590_v33 }
0x12e9   :  { %v7685_v45 = vmul.f32 1.442695, %v7653_v53 }
0x12ea   :  { %v7594_v31 = vpop.xlane.xlu0 %7593 }
0x12eb   :  { %14554 = vpow2.f32 %v7685_v45  ;;  %v7655_v26 = vsub.f32 %v20673_v2, %v7594_v31 }
0x12ed   :  { %v7689_v29 = vmul.f32 1.442695, %v7655_v26  ;;  %v20684_v26 = vld [vmem:[#allocation42_spill] sm:$0xff] }
0x12ee   :  { %v7598_v36 = vpop.xlane.xlu0 %7597 }
0x12ef   :  { %14556 = vpow2.f32 %v7689_v29  ;;  %v7657_v58 = vsub.f32 %v20674_v44, %v7598_v36 }
0x12f1   :  { %v7693_v41 = vmul.f32 1.442695, %v7657_v58 }
0x12f2   :  { %v7602_v1 = vpop.xlane.xlu0 %7601 }
0x12f3   :  { %v7659_v62 = vsub.f32 %v20675_v59, %v7602_v1 }
0x12f5   :  { %v19403_v39 = vpop.eup %14554  ;;  %v7697_v35 = vmul.f32 1.442695, %v7659_v62 }
0x12f6   :  { %v7606_v7 = vpop.xlane.xlu0 %7605  ;;  %v7749_v37 = vsel %vm7288_vm7, %v19403_v39, 0.0 }
0x12f7   :  { %14558 = vpow2.f32 %v7697_v35  ;;  %7750 = vadd.xlane.f32.xlu0 %v7749_v37  ;;  %v7661_v55 = vsub.f32 %v20677_v40, %v7606_v7  ;;  %v20685_v35 = vld [vmem:[#allocation39_spill] sm:$0xff] }
0x12f8   :  { %14560 = vpow2.f32 %v7693_v41 }
0x12f9   :  { %v19407_v27 = vpop.eup %14556  ;;  %v7701_v10 = vmul.f32 1.442695, %v7661_v55 }
0x12fa   :  { %v7614_v24 = vpop.xlane.xlu0 %7613  ;;  %v7755_v56 = vsel %vm7288_vm7, %v19407_v27, 0.0 }
0x12fb   :  { %7756 = vadd.xlane.f32.xlu0 %v7755_v56  ;;  %v7665_v48 = vsub.f32 %v20681_v4, %v7614_v24 }
0x12fc   :  { %v7592_v32 = vpop.xlane.xlu1 %7591 }
0x12fd   :  { %v7654_v52 = vsub.f32 %v20676_v54, %v7592_v32  ;;  %v7709_v42 = vmul.f32 1.442695, %v7665_v48 }
0x12fe   :  { %v7610_v11 = vpop.xlane.xlu0 %7609 }
0x12ff   :  { %v7687_v30 = vmul.f32 1.442695, %v7654_v52  ;;  %v7663_v46 = vsub.f32 %v20678_v28, %v7610_v11  ;;  %v20686_v52 = vld [vmem:[#allocation49_spill] sm:$0xff]  ;;  %v13432_v28 = vld [vmem:[#allocation8 + $0xc4] ss:$16 sps:$4 sm:$0xff]  }
0x1300   :  { %v7596_v16 = vpop.xlane.xlu1 %7595  ;;  %8606 = vmatprep.subr.bf16.mxu1 %v13432_v28  ;;  %v20694_v28 = vld [vmem:[#allocation102_spill] sm:$0xff] }
0x1301   :  { %14562 = vpow2.f32 %v7687_v30  ;;  %v7656_v17 = vsub.f32 %v20679_v43, %v7596_v16  ;;  %v19415_v47 = vpop.eup %14558  ;;  %v7705_v3 = vmul.f32 1.442695, %v7663_v46  ;;  %v13435_v46 = vld [vmem:[#allocation8 + $0xcc] ss:$16 sps:$4 sm:$0xff]   ;;  %v20687_v43 = vld [vmem:[#allocation36_spill] sm:$0xff] }
0x1302   :  { %v7618_v49 = vpop.xlane.xlu0 %7617  ;;  %v7767_v57 = vsel %vm7288_vm7, %v19415_v47, 0.0  ;;  %v19419_v60 = vpop.eup %14560  ;;  %8647 = vmatprep.subr.bf16.mxu0 %v13435_v46 }
0x1303   :  { %v7691_v63 = vmul.f32 1.442695, %v7656_v17  ;;  %14564 = vpow2.f32 %v7705_v3  ;;  %v7667_v5 = vsub.f32 %v20680_v0, %v7618_v49  ;;  %7768 = vadd.xlane.f32.xlu0 %v7767_v57  ;;  %v7761_v12 = vsel %vm7288_vm7, %v19419_v60, 0.0  ;;  %v13433_v3 = vld [vmem:[#allocation8 + $0xc8] ss:$16 sps:$4 sm:$0xff]  }
0x1304   :  { %v7600_v15 = vpop.xlane.xlu1 %7599  ;;  %8648 = vmatpush1.bf16.msra.mxu0 %v13433_v3 }
0x1305   :  { %14566 = vpow2.f32 %v7691_v63  ;;  %v7713_v9 = vmul.f32 1.442695, %v7667_v5  ;;  %v7658_v6 = vsub.f32 %v20682_v20, %v7600_v15  ;;  %v20688_v63 = vld [vmem:[#allocation55_spill] sm:$0xff]  ;;  %v20689_v20 = vld [vmem:[#allocation57_spill] sm:$0xff] }
0x1306   :  { %14568 = vpow2.f32 %v7701_v10  ;;  %v7622_v23 = vpop.xlane.xlu0 %7621  ;;  %v13430_v10 = vld [vmem:[#allocation8 + $0xc0] ss:$16 sps:$4 sm:$0xff]  }
0x1307   :  { %7762 = vadd.xlane.f32.xlu0 %v7761_v12  ;;  %14570 = vpow2.f32 %v7713_v9  ;;  %v7695_v33 = vmul.f32 1.442695, %v7658_v6  ;;  %v7669_v29 = vsub.f32 %v20684_v26, %v7622_v23  ;;  %8607 = vmatpush1.bf16.msra.mxu1 %v13430_v10  ;;  %v13438_v23 = vld [vmem:[#allocation8 + $0xe4] ss:$16 sps:$4 sm:$0xff]   ;;  %v13441_v12 = vld [vmem:[#allocation8 + $0xec] ss:$16 sps:$4 sm:$0xff]  }
0x1308   :  { %v7604_v38 = vpop.xlane.xlu1 %7603  ;;  %8608 = vmatprep.subr.bf16.mxu1 %v13438_v23  ;;  %8649 = vmatprep.subr.bf16.mxu0 %v13441_v12 }
0x1309   :  { %v7660_v21 = vsub.f32 %v20683_v25, %v7604_v38  ;;  %v7717_v56 = vmul.f32 1.442695, %v7669_v29  ;;  %v20690_v38 = vld [vmem:[#allocation97_spill] sm:$0xff] }
0x130a   :  { %v19429_v53 = vpop.xlane.xlu0 %7637  ;;  %v13439_v25 = vld [vmem:[#allocation8 + $0xe8] ss:$16 sps:$4 sm:$0xff]  }
0x130b   :  { %v19427_v18 = vpop.eup %14562  ;;  %v7699_v34 = vmul.f32 1.442695, %v7660_v21  ;;  %v20691_v21 = vld [vmem:[#allocation61_spill] sm:$0xff]  ;;  %8609 = vmatpush1.bf16.msra.mxu1 %v13436_v19  ;;  %8650 = vmatpush1.bf16.msra.mxu0 %v13439_v25 }
0x130c   :  { %v7608_v45 = vpop.xlane.xlu1 %7607  ;;  %v7752_v31 = vsel %vm7288_vm7, %v19427_v18, 0.0 }
0x130d   :  { %14572 = vpow2.f32 %v7699_v34  ;;  %7753 = vadd.xlane.f32.xlu1 %v7752_v31  ;;  %v19433_v2 = vpop.eup %14564  ;;  %v7662_v40 = vsub.f32 %v20686_v52, %v7608_v45  ;;  %v13444_v45 = vld [vmem:[#allocation8 + $0x104] ss:$16 sps:$4 sm:$0xff]   ;;  %v20693_v52 = vld [vmem:[#allocation101_spill] sm:$0xff] }
0x130e   :  { %14574 = vpow2.f32 %v7709_v42  ;;  %v7626_v44 = vpop.xlane.xlu0 %7625  ;;  %v7779_v58 = vsel %vm7288_vm7, %v19433_v2, 0.0  ;;  %v7677_v42 = vsub.f32 %v20691_v21, %v19429_v53  ;;  %v20692_v31 = vld [vmem:[#allocation98_spill] sm:$0xff]  ;;  %8861 = vmatprep.subr.bf16.mxu1 %v13444_v45 }
0x130f   :  { %v19436_v36 = vpop.eup %14566  ;;  %14576 = vpow2.f32 %v7695_v33  ;;  %v19440_v1 = vpop.f32.mrb[200].mxu1  ;;  %v7671_v7 = vsub.f32 %v20685_v35, %v7626_v44  ;;  %7780 = vadd.xlane.f32.xlu0 %v7779_v58  ;;  %v7703_v15 = vmul.f32 1.442695, %v7662_v40 }
0x1310   :  { %v19442_v59 = vpop.eup %14568  ;;  %v19444_v62 = vpop.xlane.xlu1 %7615  ;;  %v7758_v41 = vsel %vm7288_vm7, %v19436_v36, 0.0 }
0x1311   :  { %v13184_v37 = vpop.f32.mrb[201].mxu1  ;;  %7759 = vadd.xlane.f32.xlu1 %v7758_v41  ;;  %v7721_v32 = vmul.f32 1.442695, %v7671_v7  ;;  %v7773_v30 = vsel %vm7288_vm7, %v19442_v59, 0.0  ;;  %v19452_v11 = vpop.eup %14570  ;;  %v7666_v26 = vsub.f32 %v20692_v31, %v19444_v62  ;;  %v13447_v41 = vld [vmem:[#allocation8 + $0x10c] ss:$16 sps:$4 sm:$0xff]  }
0x1312   :  { %v7997_v24 = vpop.f32.mrb[202].mxu1  ;;  %v7642_v55 = vpop.xlane.xlu0 %7641  ;;  %v7791_v4 = vsel %vm7288_vm7, %v19452_v11, 0.0  ;;  %8902 = vmatprep.subr.bf16.mxu0 %v13447_v41  ;;  %v7733_v62 = vmul.f32 1.442695, %v7677_v42  ;;  %v20698_v31 = vld [vmem:[#allocation58_spill] sm:$0xff] }
0x1313   :  { %v13185_v54 = vpop.f32.mrb[203].mxu1  ;;  %14578 = vpow2.f32 %v7721_v32  ;;  %7774 = vadd.xlane.f32.xlu0 %v7773_v30  ;;  %v7679_v49 = vsub.f32 %v20688_v63, %v7642_v55  ;;  %v7711_v37 = vmul.f32 1.442695, %v7666_v26 }
0x1314   :  { %v7612_v16 = vpop.xlane.xlu1 %7611  ;;  %14580 = vpow2.f32 %v7717_v56 }
0x1315   :  { %v7664_v17 = vsub.f32 %v20687_v43, %v7612_v16  ;;  %v7737_v33 = vmul.f32 1.442695, %v7679_v49  ;;  %v20695_v49 = vld [vmem:[#allocation109_spill] sm:$0xff] }
0x1316   :  { %v7630_v5 = vpop.xlane.xlu0 %7629 }
0x1317   :  { %v19456_v57 = vpop.eup %14572  ;;  %v7707_v0 = vmul.f32 1.442695, %v7664_v17  ;;  %v7673_v6 = vsub.f32 %v20689_v20, %v7630_v5  ;;  %7792 = vadd.xlane.f32.xlu0 %v7791_v4 }
0x1318   :  { %v19460_v48 = vpop.eup %14574  ;;  %v7620_v9 = vpop.xlane.xlu1 %7619  ;;  %v7770_v51 = vsel %vm7288_vm7, %v19456_v57, 0.0 }
0x1319   :  { %v19465_v8 = vpop.eup %14576  ;;  %14582 = vpow2.f32 %v7707_v0  ;;  %v7668_v13 = vsub.f32 %v20690_v38, %v7620_v9  ;;  %7771 = vadd.xlane.f32.xlu1 %v7770_v51  ;;  %v7725_v34 = vmul.f32 1.442695, %v7673_v6  ;;  %v7785_v58 = vsel %vm7288_vm7, %v19460_v48, 0.0 }
0x131a   :  { %14584 = vpow2.f32 %v7703_v15  ;;  %v7646_v44 = vpop.xlane.xlu0 %7645  ;;  %v7764_v53 = vsel %vm7288_vm7, %v19465_v8, 0.0 }
0x131b   :  { %v7715_v29 = vmul.f32 1.442695, %v7668_v13  ;;  %14586 = vpow2.f32 %v7725_v34  ;;  %7786 = vadd.xlane.f32.xlu0 %v7785_v58  ;;  %v7681_v55 = vsub.f32 %v19180_v14, %v7646_v44  ;;  %v20697_v34 = vld [vmem:[#allocation23_spill] sm:$0xff] }
0x131c   :  { %v7624_v35 = vpop.xlane.xlu1 %7623  ;;  %14588 = vpow2.f32 %v7737_v33 }
0x131d   :  { %7765 = vadd.xlane.f32.xlu1 %v7764_v53  ;;  %v19476_v7 = vpop.eup %14578  ;;  %14590 = vpow2.f32 %v7715_v29  ;;  %v7670_v46 = vsub.f32 %v20694_v28, %v7624_v35  ;;  %v7741_v0 = vmul.f32 1.442695, %v7681_v55  ;;  %v20699_v55 = vld [vmem:[#allocation43_spill] sm:$0xff] }
0x131e   :  { %v7634_v24 = vpop.xlane.xlu0 %7633  ;;  %v7803_v56 = vsel %vm7288_vm7, %v19476_v7, 0.0  ;;  %v19480_v32 = vpop.eup %14580  ;;  %14592 = vpow2.f32 %v7733_v62  ;;  %v20700_v28 = vld [vmem:[#allocation59_spill] sm:$0xff] }
0x131f   :  { %v7675_v40 = vsub.f32 %v20693_v52, %v7634_v24  ;;  %7804 = vadd.xlane.f32.xlu0 %v7803_v56  ;;  %14594 = vpow2.f32 %v7711_v37  ;;  %v7797_v17 = vsel %vm7288_vm7, %v19480_v32, 0.0  ;;  %v7719_v4 = vmul.f32 1.442695, %v7670_v46 }
0x1320   :  { %v7640_v54 = vpop.xlane.xlu1 %7639 }
0x1321   :  { %v7729_v30 = vmul.f32 1.442695, %v7675_v40  ;;  %v7678_v26 = vsub.f32 %v20698_v31, %v7640_v54 }
0x1322   :  { %v7650_v43 = vpop.xlane.xlu0 %7649 }
0x1323   :  { %v19484_v16 = vpop.eup %14582  ;;  %7798 = vadd.xlane.f32.xlu0 %v7797_v17  ;;  %14596 = vpow2.f32 %v7729_v30  ;;  %v7683_v5 = vsub.f32 %v19177_v22, %v7650_v43  ;;  %v20696_v22 = vld [vmem:[#allocation63_spill] sm:$0xff]  ;;  %v7735_v37 = vmul.f32 1.442695, %v7678_v26  ;;  %v8188_v26 = vlaneseq }
0x1324   :  { %v7628_v10 = vpop.xlane.xlu1 %7627  ;;  %v7782_v3 = vsel %vm7288_vm7, %v19484_v16, 0.0  ;;  %v19491_v63 = vpop.eup %14584 }
0x1325   :  { %v7672_v15 = vsub.f32 %v20695_v49, %v7628_v10  ;;  %7783 = vadd.xlane.f32.xlu1 %v7782_v3  ;;  %v19494_v14 = vpop.eup %14586  ;;  %v7776_v23 = vsel %vm7288_vm7, %v19491_v63, 0.0  ;;  %v7745_v38 = vmul.f32 1.442695, %v7683_v5 }
0x1326   :  { %v7809_v51 = vsel %vm7288_vm7, %v19494_v14, 0.0  ;;  %v19499_v20 = vpop.eup %14588 }
0x1327   :  { %v7723_v9 = vmul.f32 1.442695, %v7672_v15  ;;  %7810 = vadd.xlane.f32.xlu0 %v7809_v51  ;;  %v19503_v12 = vpop.eup %14590  ;;  %v7827_v19 = vsel %vm7288_vm7, %v19499_v20, 0.0 }
0x1328   :  { %v7644_v6 = vpop.xlane.xlu1 %7643  ;;  %v19508_v25 = vpop.eup %14592  ;;  %v7794_v42 = vsel %vm7288_vm7, %v19503_v12, 0.0 }
0x1329   :  { %14598 = vpow2.f32 %v7723_v9  ;;  %7777 = vadd.xlane.f32.xlu1 %v7776_v23  ;;  %v7680_v13 = vsub.f32 %v20696_v22, %v7644_v6  ;;  %v19512_v33 = vpop.eup %14594  ;;  %v7821_v58 = vsel %vm7288_vm7, %v19508_v25, 0.0 }
0x132a   :  { %14600 = vpow2.f32 %v7741_v0  ;;  %v7788_v53 = vsel %vm7288_vm7, %v19512_v33, 0.0 }
0x132b   :  { %14602 = vpow2.f32 %v7719_v4  ;;  %7828 = vadd.xlane.f32.xlu0 %v7827_v19  ;;  %v7739_v29 = vmul.f32 1.442695, %v7680_v13 }
0x132c   :  { %v7632_v21 = vpop.xlane.xlu1 %7631  ;;  %14604 = vpow2.f32 %v7745_v38 }
0x132d   :  { %v7674_v45 = vsub.f32 %v20697_v34, %v7632_v21  ;;  %7795 = vadd.xlane.f32.xlu1 %v7794_v42  ;;  %v19518_v41 = vpop.eup %14596 }
0x132e   :  { %v7815_v24 = vsel %vm7288_vm7, %v19518_v41, 0.0 }
0x132f   :  { %v7727_v44 = vmul.f32 1.442695, %v7674_v45  ;;  %7822 = vadd.xlane.f32.xlu0 %v7821_v58  ;;  %v14917_v45 = vmov 1966171168   ;;  %v8177_v58 = vpack.c.bf16 %v19440_v1, %v19440_v1 }
0x1330   :  { %v7648_v35 = vpop.xlane.xlu1 %7647  ;;  %v8186_v31 = vunpack.c.l.s4 %v14917_v45 }
0x1331   :  { %14606 = vpow2.f32 %v7727_v44  ;;  %7789 = vadd.xlane.f32.xlu1 %v7788_v53  ;;  %v7682_v46 = vsub.f32 %v20700_v28, %v7648_v35  ;;  %v19567_v44 = vshrl.u32 %v8188_v26, 7 }
0x1332   :  { %14608 = vpow2.f32 %v7739_v29  ;;  %v8187_v29 = vunpack.c.0.s8 %v8186_v31 }
0x1333   :  { %v19522_v62 = vpop.eup %14598  ;;  %7816 = vadd.xlane.f32.xlu0 %v7815_v24  ;;  %14610 = vpow2.f32 %v7735_v37  ;;  %v7743_v0 = vmul.f32 1.442695, %v7682_v46 }
0x1334   :  { %v19526_v56 = vpop.eup %14600  ;;  %v7636_v54 = vpop.xlane.xlu1 %7635  ;;  %v7806_v52 = vsel %vm7288_vm7, %v19522_v62, 0.0  ;;  %v19572_v35 = vsub.s32 %v8187_v29, %v19567_v44 }
0x1335   :  { %v19530_v40 = vpop.eup %14602  ;;  %v7676_v30 = vsub.f32 %v20699_v55, %v7636_v54  ;;  %7807 = vadd.xlane.f32.xlu1 %v7806_v52  ;;  %v7833_v17 = vsel %vm7288_vm7, %v19526_v56, 0.0 }
0x1336   :  { %v19536_v10 = vpop.eup %14604  ;;  %v7800_v49 = vsel %vm7288_vm7, %v19530_v40, 0.0  ;;  %v8191_v53 = vrot.slane %v8177_v58, %v19572_v35 }
0x1337   :  { %v7731_v43 = vmul.f32 1.442695, %v7676_v30  ;;  %7834 = vadd.xlane.f32.xlu0 %v7833_v17  ;;  %v7839_v4 = vsel %vm7288_vm7, %v19536_v10, 0.0 }
0x1338   :  { %v7652_v3 = vpop.xlane.xlu1 %7651  ;;  %v8192_v24 = vcombine.high %v8191_v53, %v8191_v53  ;;  %v8199_v28 = vrot.slane %v8191_v53, %v19572_v35 }
0x1339   :  { %7801 = vadd.xlane.f32.xlu1 %v7800_v49  ;;  %14612 = vpow2.f32 %v7731_v43  ;;  %v7684_v5 = vsub.f32 %v19190_v50, %v7652_v3 }
0x133a   :  { %14614 = vpow2.f32 %v7743_v0  ;;  %v8206_v17 = vrot.slane %v8192_v24, %v19572_v35 }
0x133b   :  { %v19540_v15 = vpop.eup %14606  ;;  %7840 = vadd.xlane.f32.xlu0 %v7839_v4  ;;  %v7747_v6 = vmul.f32 1.442695, %v7684_v5 }
0x133c   :  { %v7812_v9 = vsel %vm7288_vm7, %v19540_v15, 0.0  ;;  %v19547_v51 = vpop.eup %14608 }
0x133d   :  { %7813 = vadd.xlane.f32.xlu1 %v7812_v9  ;;  %v7830_v23 = vsel %vm7288_vm7, %v19547_v51, 0.0  ;;  %v19551_v38 = vpop.eup %14610  ;;  %14616 = vpow2.f32 %v7747_v6 }
0x133e   :  { %v7824_v50 = vsel %vm7288_vm7, %v19551_v38, 0.0 }
0x1341   :  { %7831 = vadd.xlane.f32.xlu1 %v7830_v23 }
0x1343   :  { %v19555_v22 = vpop.eup %14612 }
0x1344   :  { %v7818_v13 = vsel %vm7288_vm7, %v19555_v22, 0.0  ;;  %v19559_v19 = vpop.eup %14614 }
0x1345   :  { %7825 = vadd.xlane.f32.xlu1 %v7824_v50  ;;  %v7836_v21 = vsel %vm7288_vm7, %v19559_v19, 0.0 }
0x1347   :  { %v19563_v42 = vpop.eup %14616 }
0x1348   :  { %v7842_v34 = vsel %vm7288_vm7, %v19563_v42, 0.0 }
0x1349   :  { %7819 = vadd.xlane.f32.xlu1 %v7818_v13 }
0x134d   :  { %7837 = vadd.xlane.f32.xlu1 %v7836_v21 }
0x1351   :  { %7843 = vadd.xlane.f32.xlu1 %v7842_v34 }
0x1368   :  { %v8053_v37 = vpop.f32.mrb[216].mxu0 }
0x1369   :  { %v8178_v54 = vpack.c.bf16 %v8053_v37, %v8053_v37  ;;  %v11713_v52 = vpack.c.bf16 %v8053_v37, %v19440_v1  ;;  %v13196_v55 = vpop.f32.mrb[217].mxu0 }
0x136a   :  { %v8056_v30 = vpop.f32.mrb[218].mxu0 }
0x136b   :  { %v8213_v46 = vrot.slane %v8178_v54, %v19572_v35  ;;  %v13197_v43 = vpop.f32.mrb[219].mxu0  ;;  %v8417_v53 = vrot.slane %v11713_v52, %v19572_v35 }
0x136d   :  { %v8214_v3 = vcombine.high %v8213_v46, %v8213_v46  ;;  %v8221_v49 = vrot.slane %v8213_v46, %v19572_v35 }
0x136f   :  { %v8228_v0 = vrot.slane %v8214_v3, %v19572_v35  ;;  %v11779_v5 = vcombine.high %v8199_v28, %v8221_v49  ;;  %v13442_v3 = vld [vmem:[#allocation8 + $0x100] ss:$16 sps:$4 sm:$0xff]   ;;  %v13445_v49 = vld [vmem:[#allocation8 + $0x108] ss:$16 sps:$4 sm:$0xff]  }
0x1371   :  { %v8676_v4 = vcombine.low %v8206_v17, %v8228_v0  ;;  %v11813_v9 = vcombine.high %v8206_v17, %v8228_v0 }
0x137a   :  { %v8112_v6 = vpop.f32.mrb[204].mxu1 }
0x137b   :  { %v13208_v23 = vpop.f32.mrb[205].mxu1  ;;  %v8179_v13 = vpack.c.bf16 %v8112_v6, %v8112_v6 }
0x137c   :  { %v8115_v1 = vpop.f32.mrb[206].mxu1  ;;  %v13450_v23 = vld [vmem:[#allocation8 + $0x124] ss:$16 sps:$4 sm:$0xff]  }
0x137d   :  { %v13209_v50 = vpop.f32.mrb[207].mxu1  ;;  %v8235_v21 = vrot.slane %v8179_v13, %v19572_v35  ;;  %v13453_v1 = vld [vmem:[#allocation8 + $0x12c] ss:$16 sps:$4 sm:$0xff]  }
0x137e   :  { %v8951_v50 = vrot.slane %v11779_v5, %v19572_v35  ;;  %v13456_v5 = vld [vmem:[#allocation8 + $0x144] ss:$16 sps:$4 sm:$0xff]  }
0x137f   :  { %v8236_v45 = vcombine.high %v8235_v21, %v8235_v21  ;;  %v8243_v37 = vrot.slane %v8235_v21, %v19572_v35 }
0x1381   :  { %v8250_v28 = vrot.slane %v8236_v45, %v19572_v35 }
0x1384   :  { %v19586_v30 = vpop.xlane.xlu0 %7750 }
0x1388   :  { %v7757_v45 = vpop.xlane.xlu0 %7756 }
0x1389   :  { %14618 = vrcp.f32 %v7757_v45  ;;  %v13474_v45 = vld [vmem:[#allocation8 + $0x1a4] ss:$16 sps:$4 sm:$0xff]  }
0x1390   :  { %v8171_v34 = vpop.f32.mrb[220].mxu0 }
0x1391   :  { %v8180_v31 = vpack.c.bf16 %v8171_v34, %v8171_v34  ;;  %v11714_v26 = vpack.c.bf16 %v8171_v34, %v8112_v6  ;;  %v13220_v29 = vpop.f32.mrb[221].mxu0 }
0x1392   :  { %v8174_v58 = vpop.f32.mrb[222].mxu0  ;;  %v13451_v29 = vld [vmem:[#allocation8 + $0x128] ss:$16 sps:$4 sm:$0xff]  }
0x1393   :  { %v8257_v24 = vrot.slane %v8180_v31, %v19572_v35  ;;  %v8424_v54 = vrot.slane %v11714_v26, %v19572_v35  ;;  %v13221_v55 = vpop.f32.mrb[223].mxu0  ;;  %v13448_v26 = vld [vmem:[#allocation8 + $0x120] ss:$16 sps:$4 sm:$0xff]   ;;  %v19597_v58 = vrot.slane %v8676_v4, %v19572_v35 }
0x1395   :  { %v8258_v46 = vcombine.high %v8257_v24, %v8257_v24  ;;  %v8265_v43 = vrot.slane %v8257_v24, %v19572_v35  ;;  %v8425_v17 = vcombine.low %v8417_v53, %v8424_v54  ;;  %v19600_v53 = vrot.slane %v11813_v9, %v19572_v35 }
0x1397   :  { %v8272_v0 = vrot.slane %v8258_v46, %v19572_v35  ;;  %v11780_v52 = vcombine.high %v8243_v37, %v8265_v43  ;;  %v8432_v6 = vrot.slane %v8425_v17, %v19572_v35  ;;  %v13459_v37 = vld [vmem:[#allocation8 + $0x14c] ss:$16 sps:$4 sm:$0xff]   ;;  %v13454_v46 = vld [vmem:[#allocation8 + $0x140] ss:$16 sps:$4 sm:$0xff]   ;;  %v13457_v43 = vld [vmem:[#allocation8 + $0x148] ss:$16 sps:$4 sm:$0xff]  }
0x1398   :  { %v13462_v17 = vld [vmem:[#allocation8 + $0x164] ss:$16 sps:$4 sm:$0xff]  }
0x1399   :  { %v8677_v13 = vcombine.low %v8250_v28, %v8272_v0  ;;  %v8958_v21 = vrot.slane %v11780_v52, %v19572_v35  ;;  %v11814_v34 = vcombine.high %v8250_v28, %v8272_v0  ;;  %8627 = vmatmul.mubr.bf16.vlgmr.msra.gmra.mrb[208].mxu1 %v8432_v6  ;;  %8668 = vmatmul.mubr.bf16.vlgmr.msra.gmra.mrb[224].mxu0 %v8432_v6  ;;  %v13460_v0 = vld [vmem:[#allocation8 + $0x160] ss:$16 sps:$4 sm:$0xff]   ;;  %v13463_v52 = vld [vmem:[#allocation8 + $0x168] ss:$16 sps:$4 sm:$0xff]   ;;  %v13468_v6 = vld [vmem:[#allocation8 + $0x184] ss:$16 sps:$4 sm:$0xff]  }
0x139a   :  { %8862 = vmatpush1.bf16.msra.mxu1 %v13442_v3  ;;  %8903 = vmatpush1.bf16.msra.mxu0 %v13445_v49  ;;  %v19594_v31 = vpop.xlane.xlu1 %7753  ;;  %v13465_v3 = vld [vmem:[#allocation8 + $0x16c] ss:$16 sps:$4 sm:$0xff]   ;;  %v7769_v49 = vpop.xlane.xlu0 %7768 }
0x139b   :  { %8863 = vmatprep.subr.bf16.mxu1 %v13450_v23  ;;  %8904 = vmatprep.subr.bf16.mxu0 %v13453_v1  ;;  %v19603_v24 = vrot.slane %v8677_v13, %v19572_v35  ;;  %v19605_v54 = vcombine.low %v8951_v50, %v8958_v21  ;;  %v19608_v55 = vrot.slane %v11814_v34, %v19572_v35  ;;  %v13471_v23 = vld [vmem:[#allocation8 + $0x18c] ss:$16 sps:$4 sm:$0xff]   ;;  %v13466_v13 = vld [vmem:[#allocation8 + $0x180] ss:$16 sps:$4 sm:$0xff]   ;;  %v13469_v21 = vld [vmem:[#allocation8 + $0x188] ss:$16 sps:$4 sm:$0xff]   ;;  %v14619_v34 = vpop.eup %14618 }
0x139c   :  { %8893 = vmatprep.mubr.bf16.mxu1 %v20670_v61  ;;  %8934 = vmatprep.mubr.bf16.mxu0 %v20670_v61 }
0x139d   :  { %v8692_v4 = vcombine.low %v19597_v58, %v19603_v24  ;;  %v9226_v9 = vcombine.low %v19600_v53, %v19608_v55  ;;  %v13599_v53 = vld [vmem:[#allocation10 + $0xd8] sm:$0xff]  }
0x139e   :  { %8864 = vmatpush1.bf16.msra.mxu1 %v13448_v26  ;;  %8905 = vmatpush1.bf16.msra.mxu0 %v13451_v29  ;;  %v7760_v28 = vpop.xlane.xlu1 %7759  ;;  %v7763_v1 = vpop.xlane.xlu0 %7762  ;;  %v13477_v26 = vld [vmem:[#allocation8 + $0x1ac] ss:$16 sps:$4 sm:$0xff]  }
0x139f   :  { %14620 = vrcp.f32 %v7760_v28  ;;  %8865 = vmatprep.subr.bf16.mxu1 %v13456_v5  ;;  %8906 = vmatprep.subr.bf16.mxu0 %v13459_v37  ;;  %v19617_v5 = vmul.f32 %v14619_v34, %v19407_v27  ;;  %v13478_v27 = vld [vmem:[#allocation8 + $0x1c0] ss:$16 sps:$4 sm:$0xff]   ;;  %v13600_v55 = vld [vmem:[#allocation10 + $0x18] sm:$0xff]  }
0x13a0   :  { %14622 = vrcp.f32 %v7769_v49 }
0x13a2   :  { %8866 = vmatpush1.bf16.msra.mxu1 %v13454_v46  ;;  %8907 = vmatpush1.bf16.msra.mxu0 %v13457_v43  ;;  %v13472_v46 = vld [vmem:[#allocation8 + $0x1a0] ss:$16 sps:$4 sm:$0xff]   ;;  %v13475_v43 = vld [vmem:[#allocation8 + $0x1a8] ss:$16 sps:$4 sm:$0xff]  }
0x13a3   :  { %8867 = vmatprep.subr.bf16.mxu1 %v13462_v17  ;;  %8908 = vmatprep.subr.bf16.mxu0 %v13465_v3  ;;  %v13480_v17 = vld [vmem:[#allocation8 + $0x1c4] ss:$16 sps:$4 sm:$0xff]   ;;  %v13483_v3 = vld [vmem:[#allocation8 + $0x1cc] ss:$16 sps:$4 sm:$0xff]  }
0x13a6   :  { %8868 = vmatpush1.bf16.msra.mxu1 %v13460_v0  ;;  %8909 = vmatpush1.bf16.msra.mxu0 %v13463_v52  ;;  %v7772_v50 = vpop.xlane.xlu1 %7771  ;;  %v7781_v0 = vpop.xlane.xlu0 %7780  ;;  %v13481_v52 = vld [vmem:[#allocation8 + $0x1c8] ss:$16 sps:$4 sm:$0xff]  }
0x13a7   :  { %14624 = vrcp.f32 %v7772_v50  ;;  %8869 = vmatprep.subr.bf16.mxu1 %v13468_v6  ;;  %8910 = vmatprep.subr.bf16.mxu0 %v13471_v23  ;;  %v13486_v6 = vld [vmem:[#allocation8 + $0x1e4] ss:$16 sps:$4 sm:$0xff]   ;;  %v13489_v23 = vld [vmem:[#allocation8 + $0x1ec] ss:$16 sps:$4 sm:$0xff]  }
0x13a8   :  { %14626 = vrcp.f32 %v7763_v1 }
0x13a9   :  { %v14621_v29 = vpop.eup %14620 }
0x13aa   :  { %v19620_v37 = vmul.f32 %v14621_v29, %v19436_v36  ;;  %8870 = vmatpush1.bf16.msra.mxu1 %v13466_v13  ;;  %8911 = vmatpush1.bf16.msra.mxu0 %v13469_v21  ;;  %v7766_v28 = vpop.xlane.xlu1 %7765  ;;  %v14623_v36 = vpop.eup %14622  ;;  %v13484_v13 = vld [vmem:[#allocation8 + $0x1e0] ss:$16 sps:$4 sm:$0xff]   ;;  %v13487_v21 = vld [vmem:[#allocation8 + $0x1e8] ss:$16 sps:$4 sm:$0xff]   ;;  %v13492_v29 = vld [vmem:[#allocation8 + $0x204] ss:$16 sps:$4 sm:$0xff]  }
0x13ab   :  { %14628 = vrcp.f32 %v7766_v28  ;;  %8871 = vmatprep.subr.bf16.mxu1 %v13474_v45  ;;  %8912 = vmatprep.subr.bf16.mxu0 %v13477_v26  ;;  %v19625_v34 = vmul.f32 %v14623_v36, %v19415_v47  ;;  %v13495_v28 = vld [vmem:[#allocation8 + $0x20c] ss:$16 sps:$4 sm:$0xff]  }
0x13ac   :  { %v11122_v49 = vpack.c.bf16 %v19620_v37, %v19617_v5  ;;  %14630 = vrcp.f32 %v7781_v0  ;;  %v8699_v0 = vrot.slane %v8692_v4, %v19572_v35 }
0x13ae   :  { %8872 = vmatpush1.bf16.msra.mxu1 %v13472_v46  ;;  %8913 = vmatpush1.bf16.msra.mxu0 %v13475_v43  ;;  %v13622_v46 = vld [vmem:[#allocation10 + $0x148] sm:$0xff]  }
0x13af   :  { %8873 = vmatprep.subr.bf16.mxu1 %v13480_v17  ;;  %8914 = vmatprep.subr.bf16.mxu0 %v13483_v3  ;;  %v13490_v17 = vld [vmem:[#allocation8 + $0x200] ss:$16 sps:$4 sm:$0xff]   ;;  %v13493_v3 = vld [vmem:[#allocation8 + $0x208] ss:$16 sps:$4 sm:$0xff]  }
0x13b1   :  { %v14625_v1 = vpop.eup %14624 }
0x13b2   :  { %8874 = vmatpush1.bf16.msra.mxu1 %v13478_v27  ;;  %8915 = vmatpush1.bf16.msra.mxu0 %v13481_v52  ;;  %v7784_v50 = vpop.xlane.xlu1 %7783  ;;  %v19628_v45 = vmul.f32 %v14625_v1, %v19456_v57  ;;  %v14627_v26 = vpop.eup %14626  ;;  %v13498_v27 = vld [vmem:[#allocation8 + $0x224] ss:$16 sps:$4 sm:$0xff]   ;;  %v13501_v52 = vld [vmem:[#allocation8 + $0x22c] ss:$16 sps:$4 sm:$0xff]  }
0x13b3   :  { %14632 = vrcp.f32 %v7784_v50  ;;  %8875 = vmatprep.subr.bf16.mxu1 %v13486_v6  ;;  %8916 = vmatprep.subr.bf16.mxu0 %v13489_v23  ;;  %v19633_v47 = vmul.f32 %v14627_v26, %v19419_v60  ;;  %v13496_v60 = vld [vmem:[#allocation8 + $0x220] ss:$16 sps:$4 sm:$0xff]   ;;  %v13499_v6 = vld [vmem:[#allocation8 + $0x228] ss:$16 sps:$4 sm:$0xff]   ;;  %v13504_v23 = vld [vmem:[#allocation8 + $0x244] ss:$16 sps:$4 sm:$0xff]  }
0x13b4   :  { %v13507_v1 = vld [vmem:[#allocation8 + $0x24c] ss:$16 sps:$4 sm:$0xff]   ;;  %v13502_v50 = vld [vmem:[#allocation8 + $0x240] ss:$16 sps:$4 sm:$0xff]  }
0x13b5   :  { %v14629_v43 = vpop.eup %14628  ;;  %v13513_v26 = vld [vmem:[#allocation8 + $0x26c] ss:$16 sps:$4 sm:$0xff]  }
0x13b6   :  { %8876 = vmatpush1.bf16.msra.mxu1 %v13484_v13  ;;  %8917 = vmatpush1.bf16.msra.mxu0 %v13487_v21  ;;  %v19636_v57 = vmul.f32 %v14629_v43, %v19465_v8  ;;  %v14631_v8 = vpop.eup %14630  ;;  %v13505_v13 = vld [vmem:[#allocation8 + $0x248] ss:$16 sps:$4 sm:$0xff]   ;;  %v13510_v21 = vld [vmem:[#allocation8 + $0x264] ss:$16 sps:$4 sm:$0xff]  }
0x13b7   :  { %9128 = vmatprep.subr.bf16.mxu1 %v13492_v29  ;;  %9169 = vmatprep.subr.bf16.mxu0 %v13495_v28  ;;  %v19647_v24 = vmul.f32 %v14631_v8, %v19433_v2  ;;  %v13508_v28 = vld [vmem:[#allocation8 + $0x260] ss:$16 sps:$4 sm:$0xff]   ;;  %v13511_v43 = vld [vmem:[#allocation8 + $0x268] ss:$16 sps:$4 sm:$0xff]   ;;  %v13516_v2 = vld [vmem:[#allocation8 + $0x284] ss:$16 sps:$4 sm:$0xff]  }
0x13b8   :  { %v13531_v8 = vld [vmem:[#allocation8 + $0x2cc] ss:$16 sps:$4 sm:$0xff]  }
0x13b9   :  { %8894 = vmatmul.mubr.bf16.vlgmr.msra.gmra.mrb[212].mxu1 %v8699_v0  ;;  %8935 = vmatmul.mubr.bf16.vlgmr.msra.gmra.mrb[228].mxu0 %v8699_v0  ;;  %v13522_v0 = vld [vmem:[#allocation8 + $0x2a4] ss:$16 sps:$4 sm:$0xff]  }
0x13ba   :  { %9129 = vmatpush1.bf16.msra.mxu1 %v13490_v17  ;;  %9170 = vmatpush1.bf16.msra.mxu0 %v13493_v3  ;;  %v13514_v17 = vld [vmem:[#allocation8 + $0x280] ss:$16 sps:$4 sm:$0xff]   ;;  %v13517_v3 = vld [vmem:[#allocation8 + $0x288] ss:$16 sps:$4 sm:$0xff]  }
0x13bb   :  { %9130 = vmatprep.subr.bf16.mxu1 %v13498_v27  ;;  %9171 = vmatprep.subr.bf16.mxu0 %v13501_v52  ;;  %v13525_v27 = vld [vmem:[#allocation8 + $0x2ac] ss:$16 sps:$4 sm:$0xff]   ;;  %v13520_v52 = vld [vmem:[#allocation8 + $0x2a0] ss:$16 sps:$4 sm:$0xff]  }
0x13bc   :  { %9160 = vmatprep.mubr.bf16.mxu1 %v20670_v61  ;;  %9201 = vmatprep.mubr.bf16.mxu0 %v20670_v61 }
0x13bd   :  { %v14633_v58 = vpop.eup %14632 }
0x13be   :  { %v19650_v4 = vmul.f32 %v14633_v58, %v19484_v16  ;;  %9131 = vmatpush1.bf16.msra.mxu1 %v13496_v60  ;;  %9172 = vmatpush1.bf16.msra.mxu0 %v13499_v6  ;;  %v13519_v16 = vld [vmem:[#allocation8 + $0x28c] ss:$16 sps:$4 sm:$0xff]   ;;  %v13523_v60 = vld [vmem:[#allocation8 + $0x2a8] ss:$16 sps:$4 sm:$0xff]   ;;  %v13528_v6 = vld [vmem:[#allocation8 + $0x2c4] ss:$16 sps:$4 sm:$0xff]  }
0x13bf   :  { %9132 = vmatprep.subr.bf16.mxu1 %v13504_v23  ;;  %9173 = vmatprep.subr.bf16.mxu0 %v13507_v1  ;;  %v13526_v23 = vld [vmem:[#allocation8 + $0x2c0] ss:$16 sps:$4 sm:$0xff]   ;;  %v13529_v1 = vld [vmem:[#allocation8 + $0x2c8] ss:$16 sps:$4 sm:$0xff]   ;;  %v13534_v58 = vld [vmem:[#allocation8 + $0x2e4] ss:$16 sps:$4 sm:$0xff]  }
0x13c2   :  { %9133 = vmatpush1.bf16.msra.mxu1 %v13502_v50  ;;  %9174 = vmatpush1.bf16.msra.mxu0 %v13505_v13  ;;  %v13537_v50 = vld [vmem:[#allocation8 + $0x2ec] ss:$16 sps:$4 sm:$0xff]   ;;  %v13532_v13 = vld [vmem:[#allocation8 + $0x2e0] ss:$16 sps:$4 sm:$0xff]  }
0x13c3   :  { %9134 = vmatprep.subr.bf16.mxu1 %v13510_v21  ;;  %9175 = vmatprep.subr.bf16.mxu0 %v13513_v26  ;;  %v13535_v21 = vld [vmem:[#allocation8 + $0x2e8] ss:$16 sps:$4 sm:$0xff]   ;;  %v13540_v26 = vld [vmem:[#allocation8 + $0x304] ss:$16 sps:$4 sm:$0xff]  }
0x13c6   :  { %9135 = vmatpush1.bf16.msra.mxu1 %v13508_v28  ;;  %9176 = vmatpush1.bf16.msra.mxu0 %v13511_v43  ;;  %v13543_v28 = vld [vmem:[#allocation8 + $0x30c] ss:$16 sps:$4 sm:$0xff]   ;;  %v13538_v43 = vld [vmem:[#allocation8 + $0x300] ss:$16 sps:$4 sm:$0xff]  }
0x13c7   :  { %9136 = vmatprep.subr.bf16.mxu1 %v13516_v2  ;;  %9177 = vmatprep.subr.bf16.mxu0 %v13519_v16  ;;  %v13541_v2 = vld [vmem:[#allocation8 + $0x308] ss:$16 sps:$4 sm:$0xff]   ;;  %v8966_v16 = vrot.slane %v19605_v54, %v19572_v35  ;;  %v13550_v54 = vld [vmem:[#allocation8 + $0x340] ss:$16 sps:$4 sm:$0xff]  }
0x13ca   :  { %9137 = vmatpush1.bf16.msra.mxu1 %v13514_v17  ;;  %9178 = vmatpush1.bf16.msra.mxu0 %v13517_v3  ;;  %v13546_v17 = vld [vmem:[#allocation8 + $0x324] ss:$16 sps:$4 sm:$0xff]   ;;  %v13549_v3 = vld [vmem:[#allocation8 + $0x32c] ss:$16 sps:$4 sm:$0xff]  }
0x13cb   :  { %9138 = vmatprep.subr.bf16.mxu1 %v13522_v0  ;;  %9179 = vmatprep.subr.bf16.mxu0 %v13525_v27  ;;  %v13544_v0 = vld [vmem:[#allocation8 + $0x320] ss:$16 sps:$4 sm:$0xff]   ;;  %v13547_v27 = vld [vmem:[#allocation8 + $0x328] ss:$16 sps:$4 sm:$0xff]  }
0x13ce   :  { %9139 = vmatpush1.bf16.msra.mxu1 %v13520_v52  ;;  %9180 = vmatpush1.bf16.msra.mxu0 %v13523_v60  ;;  %v13552_v52 = vld [vmem:[#allocation8 + $0x344] ss:$16 sps:$4 sm:$0xff]   ;;  %v13555_v60 = vld [vmem:[#allocation8 + $0x34c] ss:$16 sps:$4 sm:$0xff]  }
0x13cf   :  { %9140 = vmatprep.subr.bf16.mxu1 %v13528_v6  ;;  %9181 = vmatprep.subr.bf16.mxu0 %v13531_v8  ;;  %v13553_v6 = vld [vmem:[#allocation8 + $0x348] ss:$16 sps:$4 sm:$0xff]   ;;  %v13558_v8 = vld [vmem:[#allocation8 + $0x364] ss:$16 sps:$4 sm:$0xff]  }
0x13d2   :  { %9141 = vmatpush1.bf16.msra.mxu1 %v13526_v23  ;;  %9182 = vmatpush1.bf16.msra.mxu0 %v13529_v1  ;;  %v13561_v23 = vld [vmem:[#allocation8 + $0x36c] ss:$16 sps:$4 sm:$0xff]   ;;  %v13556_v1 = vld [vmem:[#allocation8 + $0x360] ss:$16 sps:$4 sm:$0xff]  }
0x13d3   :  { %9142 = vmatprep.subr.bf16.mxu1 %v13534_v58  ;;  %9183 = vmatprep.subr.bf16.mxu0 %v13537_v50  ;;  %v13559_v58 = vld [vmem:[#allocation8 + $0x368] ss:$16 sps:$4 sm:$0xff]   ;;  %v13564_v50 = vld [vmem:[#allocation8 + $0x384] ss:$16 sps:$4 sm:$0xff]  }
0x13d6   :  { %9143 = vmatpush1.bf16.msra.mxu1 %v13532_v13  ;;  %9184 = vmatpush1.bf16.msra.mxu0 %v13535_v21  ;;  %v13567_v13 = vld [vmem:[#allocation8 + $0x38c] ss:$16 sps:$4 sm:$0xff]   ;;  %v13562_v21 = vld [vmem:[#allocation8 + $0x380] ss:$16 sps:$4 sm:$0xff]  }
0x13d7   :  { %9395 = vmatprep.subr.bf16.mxu1 %v13540_v26  ;;  %9436 = vmatprep.subr.bf16.mxu0 %v13543_v28  ;;  %v13570_v26 = vld [vmem:[#allocation8 + $0x3a4] ss:$16 sps:$4 sm:$0xff]   ;;  %v13573_v28 = vld [vmem:[#allocation8 + $0x3ac] ss:$16 sps:$4 sm:$0xff]  }
0x13d9   :  { %9161 = vmatmul.mubr.bf16.vlgmr.msra.gmra.mrb[216].mxu1 %v8966_v16  ;;  %9202 = vmatmul.mubr.bf16.vlgmr.msra.gmra.mrb[232].mxu0 %v8966_v16  ;;  %v13576_v16 = vld [vmem:[#allocation8 + $0x3c4] ss:$16 sps:$4 sm:$0xff]  }
0x13da   :  { %9396 = vmatpush1.bf16.msra.mxu1 %v13538_v43  ;;  %9437 = vmatpush1.bf16.msra.mxu0 %v13541_v2  ;;  %v13568_v43 = vld [vmem:[#allocation8 + $0x3a0] ss:$16 sps:$4 sm:$0xff]   ;;  %v13571_v2 = vld [vmem:[#allocation8 + $0x3a8] ss:$16 sps:$4 sm:$0xff]  }
0x13db   :  { %9397 = vmatprep.subr.bf16.mxu1 %v13546_v17  ;;  %9438 = vmatprep.subr.bf16.mxu0 %v13549_v3  ;;  %v13579_v17 = vld [vmem:[#allocation8 + $0x3cc] ss:$16 sps:$4 sm:$0xff]   ;;  %v13574_v3 = vld [vmem:[#allocation8 + $0x3c0] ss:$16 sps:$4 sm:$0xff]  }
0x13dc   :  { %9427 = vmatprep.mubr.bf16.mxu1 %v20670_v61  ;;  %9468 = vmatprep.mubr.bf16.mxu0 %v20670_v61  ;;  %v13565_v61 = vld [vmem:[#allocation8 + $0x388] ss:$16 sps:$4 sm:$0xff]  }
0x13de   :  { %9398 = vmatpush1.bf16.msra.mxu1 %v13544_v0  ;;  %9439 = vmatpush1.bf16.msra.mxu0 %v13547_v27  ;;  %v13577_v0 = vld [vmem:[#allocation8 + $0x3c8] ss:$16 sps:$4 sm:$0xff]   ;;  %v13582_v27 = vld [vmem:[#allocation8 + $0x3e4] ss:$16 sps:$4 sm:$0xff]  }
0x13df   :  { %9399 = vmatprep.subr.bf16.mxu1 %v13552_v52  ;;  %9440 = vmatprep.subr.bf16.mxu0 %v13555_v60  ;;  %v13585_v52 = vld [vmem:[#allocation8 + $0x3ec] ss:$16 sps:$4 sm:$0xff]   ;;  %v13580_v60 = vld [vmem:[#allocation8 + $0x3e0] ss:$16 sps:$4 sm:$0xff]  }
0x13e2   :  { %9400 = vmatpush1.bf16.msra.mxu1 %v13550_v54  ;;  %9441 = vmatpush1.bf16.msra.mxu0 %v13553_v6  ;;  %v13583_v54 = vld [vmem:[#allocation8 + $0x3e8] ss:$16 sps:$4 sm:$0xff]   ;;  %v13586_v6 = vld [vmem:[#allocation10 + $0x40] sm:$0xff]  }
0x13e3   :  { %9401 = vmatprep.subr.bf16.mxu1 %v13558_v8  ;;  %9442 = vmatprep.subr.bf16.mxu0 %v13561_v23  ;;  %v13587_v8 = vld [vmem:[#allocation10 + $0xc0] sm:$0xff]  }
0x13e4   :  { %v13588_v23 = vld [vmem:[#allocation10] sm:$0xff]  }
0x13e6   :  { %9402 = vmatpush1.bf16.msra.mxu1 %v13556_v1  ;;  %9443 = vmatpush1.bf16.msra.mxu0 %v13559_v58  ;;  %v13589_v1 = vld [vmem:[#allocation10 + $0x80] sm:$0xff]   ;;  %v9233_v58 = vrot.slane %v9226_v9, %v19572_v35  ;;  %v13598_v35 = vld [vmem:[#allocation10 + $0x58] sm:$0xff]  }
0x13e7   :  { %9403 = vmatprep.subr.bf16.mxu1 %v13564_v50  ;;  %9444 = vmatprep.subr.bf16.mxu0 %v13567_v13  ;;  %v13590_v50 = vld [vmem:[#allocation10 + $0x48] sm:$0xff]   ;;  %v13601_v9 = vld [vmem:[#allocation10 + $0x98] sm:$0xff]  }
0x13e8   :  { %v13591_v13 = vld [vmem:[#allocation10 + $0xc8] sm:$0xff]  }
0x13ea   :  { %9404 = vmatpush1.bf16.msra.mxu1 %v13562_v21  ;;  %9445 = vmatpush1.bf16.msra.mxu0 %v13565_v61  ;;  %v13592_v21 = vld [vmem:[#allocation10 + $0x8] sm:$0xff]  }
0x13eb   :  { %9405 = vmatprep.subr.bf16.mxu1 %v13570_v26  ;;  %9446 = vmatprep.subr.bf16.mxu0 %v13573_v28  ;;  %v13593_v61 = vld [vmem:[#allocation10 + $0x88] sm:$0xff]   ;;  %v13594_v26 = vld [vmem:[#allocation10 + $0x50] sm:$0xff]  }
0x13ec   :  { %v13595_v28 = vld [vmem:[#allocation10 + $0xd0] sm:$0xff]  }
0x13ee   :  { %9406 = vmatpush1.bf16.msra.mxu1 %v13568_v43  ;;  %9447 = vmatpush1.bf16.msra.mxu0 %v13571_v2  ;;  %v13596_v43 = vld [vmem:[#allocation10 + $0x10] sm:$0xff]  }
0x13ef   :  { %9407 = vmatprep.subr.bf16.mxu1 %v13576_v16  ;;  %9448 = vmatprep.subr.bf16.mxu0 %v13579_v17  ;;  %v13597_v2 = vld [vmem:[#allocation10 + $0x90] sm:$0xff]   ;;  %v13602_v16 = vld [vmem:[#allocation10 + $0x60] sm:$0xff]  }
0x13f0   :  { %v13603_v17 = vld [vmem:[#allocation10 + $0xe0] sm:$0xff]  }
0x13f2   :  { %9408 = vmatpush1.bf16.msra.mxu1 %v13574_v3  ;;  %9449 = vmatpush1.bf16.msra.mxu0 %v13577_v0  ;;  %v13604_v3 = vld [vmem:[#allocation10 + $0x20] sm:$0xff]  }
0x13f3   :  { %9409 = vmatprep.subr.bf16.mxu1 %v13582_v27  ;;  %9450 = vmatprep.subr.bf16.mxu0 %v13585_v52  ;;  %v13605_v0 = vld [vmem:[#allocation10 + $0xa0] sm:$0xff]   ;;  %v13606_v27 = vld [vmem:[#allocation10 + $0x68] sm:$0xff]  }
0x13f4   :  { %v13607_v52 = vld [vmem:[#allocation10 + $0xe8] sm:$0xff]  }
0x13f6   :  { %9410 = vmatpush1.bf16.msra.mxu1 %v13580_v60  ;;  %9451 = vmatpush1.bf16.msra.mxu0 %v13583_v54  ;;  %v13608_v60 = vld [vmem:[#allocation10 + $0x28] sm:$0xff]  }
0x13f7   :  { %12336 = vmatprep.subr.bf16.mxu1 %v13586_v6  ;;  %12358 = vmatprep.subr.bf16.mxu0 %v13587_v8  ;;  %v13609_v54 = vld [vmem:[#allocation10 + $0xa8] sm:$0xff]   ;;  %v13610_v6 = vld [vmem:[#allocation10 + $0x70] sm:$0xff]  }
0x13f8   :  { %v13611_v8 = vld [vmem:[#allocation10 + $0xf0] sm:$0xff]  }
0x13f9   :  { %9428 = vmatmul.mubr.bf16.vlgmr.msra.gmra.mrb[220].mxu1 %v9233_v58  ;;  %9469 = vmatmul.mubr.bf16.vlgmr.msra.gmra.mrb[236].mxu0 %v9233_v58  ;;  %v13614_v58 = vld [vmem:[#allocation10 + $0x78] sm:$0xff]  }
0x13fa   :  { %12337 = vmatpush3.bf16.msra.mxu1 %v13588_v23  ;;  %12359 = vmatpush3.bf16.msra.mxu0 %v13589_v1  ;;  %v13612_v23 = vld [vmem:[#allocation10 + $0x30] sm:$0xff]  }
0x13fb   :  { %12338 = vmatprep.subr.bf16.mxu1 %v13590_v50  ;;  %12360 = vmatprep.subr.bf16.mxu0 %v13591_v13  ;;  %v13613_v1 = vld [vmem:[#allocation10 + $0xb0] sm:$0xff]   ;;  %v13615_v50 = vld [vmem:[#allocation10 + $0xf8] sm:$0xff]  }
0x13fc   :  { %v13616_v13 = vld [vmem:[#allocation10 + $0x38] sm:$0xff]  }
0x13fe   :  { %12339 = vmatpush3.bf16.msra.mxu1 %v13592_v21  ;;  %12361 = vmatpush3.bf16.msra.mxu0 %v13593_v61  ;;  %v13617_v21 = vld [vmem:[#allocation10 + $0xb8] sm:$0xff]   ;;  %v13618_v61 = vld [vmem:[#allocation10 + $0x140] sm:$0xff]  }
0x13ff   :  { %12340 = vmatprep.subr.bf16.mxu1 %v13594_v26  ;;  %12362 = vmatprep.subr.bf16.mxu0 %v13595_v28  ;;  %v13619_v26 = vld [vmem:[#allocation10 + $0x1c0] sm:$0xff]  }
0x1402   :  { %12341 = vmatpush3.bf16.msra.mxu1 %v13596_v43  ;;  %12363 = vmatpush3.bf16.msra.mxu0 %v13597_v2 }
0x1403   :  { %12342 = vmatprep.subr.bf16.mxu1 %v13598_v35  ;;  %12364 = vmatprep.subr.bf16.mxu0 %v13599_v53 }
0x1406   :  { %12343 = vmatpush3.bf16.msra.mxu1 %v13600_v55  ;;  %12365 = vmatpush3.bf16.msra.mxu0 %v13601_v9 }
0x1407   :  { %12344 = vmatprep.subr.bf16.mxu1 %v13602_v16  ;;  %12366 = vmatprep.subr.bf16.mxu0 %v13603_v17 }
0x140a   :  { %12345 = vmatpush3.bf16.msra.mxu1 %v13604_v3  ;;  %12367 = vmatpush3.bf16.msra.mxu0 %v13605_v0 }
0x140b   :  { %12346 = vmatprep.subr.bf16.mxu1 %v13606_v27  ;;  %12368 = vmatprep.subr.bf16.mxu0 %v13607_v52 }
0x140e   :  { %12347 = vmatpush3.bf16.msra.mxu1 %v13608_v60  ;;  %12369 = vmatpush3.bf16.msra.mxu0 %v13609_v54 }
0x140f   :  { %12348 = vmatprep.subr.bf16.mxu1 %v13610_v6  ;;  %12370 = vmatprep.subr.bf16.mxu0 %v13611_v8 }
0x1412   :  { %12349 = vmatpush3.bf16.msra.mxu1 %v13612_v23  ;;  %12371 = vmatpush3.bf16.msra.mxu0 %v13613_v1 }
0x1413   :  { %12350 = vmatprep.subr.bf16.mxu1 %v13614_v58  ;;  %12372 = vmatprep.subr.bf16.mxu0 %v13615_v50 }
0x1416   :  { %12351 = vmatpush3.bf16.msra.mxu1 %v13616_v13  ;;  %12373 = vmatpush3.bf16.msra.mxu0 %v13617_v21 }
0x1417   :  { %12380 = vmatprep.subr.bf16.mxu1 %v13618_v61  ;;  %12402 = vmatprep.subr.bf16.mxu0 %v13619_v26 }
0x146c   :  { %v8628_v28 = vpop.f32.mrb[208].mxu1  ;;  %v8669_v43 = vpop.f32.mrb[224].mxu0 }
0x146d   :  { %v9494_v2 = vmul.f32 0.70710677, %v8628_v28  ;;  %v9496_v35 = vmul.f32 0.70710677, %v8669_v43  ;;  %v8630_v53 = vpop.f32.mrb[209].mxu1  ;;  %v8671_v55 = vpop.f32.mrb[225].mxu0 }
0x146e   :  { %v9495_v9 = vmul.f32 0.70710677, %v8630_v53  ;;  %v8632_v16 = vpop.f32.mrb[210].mxu1  ;;  %v8673_v17 = vpop.f32.mrb[226].mxu0  ;;  %v9497_v3 = vmul.f32 0.70710677, %v8671_v55 }
0x146f   :  { %14634 = verf.f32 %v9494_v2  ;;  %v8633_v0 = vpop.f32.mrb[211].mxu1  ;;  %v8674_v27 = vpop.f32.mrb[227].mxu0  ;;  %v9477_v8 = vmul.f32 0.5, %v8628_v28  ;;  %v9479_v58 = vmul.f32 0.5, %v8669_v43  ;;  %v9478_v50 = vmul.f32 0.5, %v8630_v53  ;;  %v13623_v28 = vld [vmem:[#allocation10 + $0x1c8] sm:$0xff]  }
0x1470   :  { %14636 = verf.f32 %v9496_v35  ;;  %v9480_v61 = vmul.f32 0.5, %v8671_v55  ;;  %v13620_v0 = vld [vmem:[#allocation10 + $0x100] sm:$0xff]   ;;  %v13624_v43 = vld [vmem:[#allocation10 + $0x108] sm:$0xff]   ;;  %v13626_v55 = vld [vmem:[#allocation10 + $0x150] sm:$0xff]  }
0x1471   :  { %14638 = verf.f32 %v9495_v9  ;;  %v13621_v27 = vld [vmem:[#allocation10 + $0x180] sm:$0xff]   ;;  %v13625_v53 = vld [vmem:[#allocation10 + $0x188] sm:$0xff]  }
0x1472   :  { %14640 = verf.f32 %v9497_v3 }
0x1479   :  { %v14635_v52 = vpop.eup %14634 }
0x147a   :  { %v14637_v60 = vpop.eup %14636  ;;  %v9526_v54 = vadd.f32 1.0, %v14635_v52 }
0x147b   :  { %v14639_v6 = vpop.eup %14638  ;;  %v9528_v23 = vadd.f32 1.0, %v14637_v60  ;;  %v13627_v60 = vld [vmem:[#allocation10 + $0x1d0] sm:$0xff]  }
0x147c   :  { %v14641_v1 = vpop.eup %14640  ;;  %v9527_v13 = vadd.f32 1.0, %v14639_v6  ;;  %v9542_v21 = vmul.f32 %v9526_v54, %v9477_v8  ;;  %v13628_v54 = vld [vmem:[#allocation10 + $0x110] sm:$0xff]   ;;  %v13630_v8 = vld [vmem:[#allocation10 + $0x158] sm:$0xff]  }
0x147d   :  { %v9529_v26 = vadd.f32 1.0, %v14641_v1  ;;  %v9544_v2 = vmul.f32 %v9528_v23, %v9479_v58  ;;  %v13629_v6 = vld [vmem:[#allocation10 + $0x190] sm:$0xff]   ;;  %v13631_v23 = vld [vmem:[#allocation10 + $0x1d8] sm:$0xff]  }
0x147e   :  { %v9543_v35 = vmul.f32 %v9527_v13, %v9478_v50  ;;  %v9558_v9 = vpack.c.bf16 %v9542_v21, %v9542_v21  ;;  %v13632_v50 = vld [vmem:[#allocation10 + $0x118] sm:$0xff]  }
0x147f   :  { %v9545_v16 = vmul.f32 %v9529_v26, %v9480_v61  ;;  %v9560_v52 = vpack.c.bf16 %v9544_v2, %v9544_v2  ;;  %v13634_v61 = vld [vmem:[#allocation10 + $0x160] sm:$0xff]  }
0x1480   :  { %v9559_v17 = vpack.c.bf16 %v9543_v35, %v9543_v35  ;;  %v13635_v35 = vld [vmem:[#allocation10 + $0x1e0] sm:$0xff]  }
0x1481   :  { %v9561_v3 = vpack.c.bf16 %v9545_v16, %v9545_v16 }
0x1482   :  { %10054 = vmatprep.mubr.bf16.mxu1 %v9559_v17 }
0x1483   :  { %10094 = vmatprep.mubr.bf16.mxu0 %v9561_v3  ;;  %10055 = vmatmul.mubr.bf16.vlgmr.msra.gmra.mrb[224].mxu1 %v9558_v9 }
0x1484   :  { %10095 = vmatmul.mubr.bf16.vlgmr.msra.gmra.mrb[240].mxu0 %v9560_v52  ;;  %12381 = vmatpush3.bf16.msra.mxu1 %v13620_v0  ;;  %v13636_v52 = vld [vmem:[#allocation10 + $0x120] sm:$0xff]  }
0x1485   :  { %12403 = vmatpush3.bf16.msra.mxu0 %v13621_v27  ;;  %12382 = vmatprep.subr.bf16.mxu1 %v13622_v46  ;;  %v13633_v46 = vld [vmem:[#allocation10 + $0x198] sm:$0xff]  }
0x1486   :  { %12404 = vmatprep.subr.bf16.mxu0 %v13623_v28  ;;  %v13637_v28 = vld [vmem:[#allocation10 + $0x1a0] sm:$0xff]  }
0x1488   :  { %12383 = vmatpush3.bf16.msra.mxu1 %v13624_v43  ;;  %v13638_v43 = vld [vmem:[#allocation10 + $0x168] sm:$0xff]  }
0x1489   :  { %12405 = vmatpush3.bf16.msra.mxu0 %v13625_v53  ;;  %12384 = vmatprep.subr.bf16.mxu1 %v13626_v55  ;;  %v13639_v53 = vld [vmem:[#allocation10 + $0x1e8] sm:$0xff]  }
0x148a   :  { %12406 = vmatprep.subr.bf16.mxu0 %v13627_v60  ;;  %v13640_v55 = vld [vmem:[#allocation10 + $0x128] sm:$0xff]  }
0x148b   :  { %v13641_v60 = vld [vmem:[#allocation10 + $0x1a8] sm:$0xff]  }
0x148c   :  { %12385 = vmatpush3.bf16.msra.mxu1 %v13628_v54  ;;  %v8895_v1 = vpop.f32.mrb[212].mxu1  ;;  %v8936_v58 = vpop.f32.mrb[228].mxu0  ;;  %v13642_v54 = vld [vmem:[#allocation10 + $0x170] sm:$0xff]  }
0x148d   :  { %12407 = vmatpush3.bf16.msra.mxu0 %v13629_v6  ;;  %v9498_v13 = vmul.f32 0.70710677, %v8895_v1  ;;  %v9500_v21 = vmul.f32 0.70710677, %v8936_v58  ;;  %12386 = vmatprep.subr.bf16.mxu1 %v13630_v8  ;;  %v8897_v26 = vpop.f32.mrb[213].mxu1  ;;  %v8938_v2 = vpop.f32.mrb[229].mxu0 }
0x148e   :  { %12408 = vmatprep.subr.bf16.mxu0 %v13631_v23  ;;  %v9499_v16 = vmul.f32 0.70710677, %v8897_v26  ;;  %v8899_v17 = vpop.f32.mrb[214].mxu1  ;;  %v8940_v0 = vpop.f32.mrb[230].mxu0  ;;  %v9501_v9 = vmul.f32 0.70710677, %v8938_v2 }
0x148f   :  { %14642 = verf.f32 %v9498_v13  ;;  %v8900_v3 = vpop.f32.mrb[215].mxu1  ;;  %v8941_v27 = vpop.f32.mrb[231].mxu0  ;;  %v13643_v6 = vld [vmem:[#allocation10 + $0x1f0] sm:$0xff]   ;;  %v13646_v13 = vld [vmem:[#allocation10 + $0x178] sm:$0xff]  }
0x1490   :  { %14644 = verf.f32 %v9500_v21  ;;  %12387 = vmatpush3.bf16.msra.mxu1 %v13632_v50  ;;  %v13644_v8 = vld [vmem:[#allocation10 + $0x130] sm:$0xff]   ;;  %v9482_v3 = vmul.f32 0.5, %v8897_v26 }
0x1491   :  { %14646 = verf.f32 %v9499_v16  ;;  %12409 = vmatpush3.bf16.msra.mxu0 %v13633_v46  ;;  %12388 = vmatprep.subr.bf16.mxu1 %v13634_v61  ;;  %v13645_v50 = vld [vmem:[#allocation10 + $0x1b0] sm:$0xff]   ;;  %v13647_v61 = vld [vmem:[#allocation10 + $0x1f8] sm:$0xff]   ;;  %v9481_v16 = vmul.f32 0.5, %v8895_v1 }
0x1492   :  { %14648 = verf.f32 %v9501_v9  ;;  %12410 = vmatprep.subr.bf16.mxu0 %v13635_v35  ;;  %v9483_v9 = vmul.f32 0.5, %v8936_v58 }
0x1494   :  { %12389 = vmatpush3.bf16.msra.mxu1 %v13636_v52  ;;  %v13648_v52 = vld [vmem:[#allocation10 + $0x138] sm:$0xff]  }
0x1495   :  { %12411 = vmatpush3.bf16.msra.mxu0 %v13637_v28  ;;  %12390 = vmatprep.subr.bf16.mxu1 %v13638_v43  ;;  %v9484_v43 = vmul.f32 0.5, %v8938_v2 }
0x1496   :  { %12412 = vmatprep.subr.bf16.mxu0 %v13639_v53 }
0x1498   :  { %12391 = vmatpush3.bf16.msra.mxu1 %v13640_v55  ;;  %v13649_v55 = vld [vmem:[#allocation10 + $0x1b8] sm:$0xff]  }
0x1499   :  { %v14643_v23 = vpop.eup %14642  ;;  %12413 = vmatpush3.bf16.msra.mxu0 %v13641_v60  ;;  %12392 = vmatprep.subr.bf16.mxu1 %v13642_v54  ;;  %v13650_v60 = vld [vmem:[#allocation10 + $0x240] sm:$0xff]  }
0x149a   :  { %v14645_v21 = vpop.eup %14644  ;;  %v9530_v46 = vadd.f32 1.0, %v14643_v23  ;;  %12414 = vmatprep.subr.bf16.mxu0 %v13643_v6  ;;  %v13651_v6 = vld [vmem:[#allocation10 + $0x2c0] sm:$0xff]  }
0x149b   :  { %v14647_v35 = vpop.eup %14646  ;;  %v9532_v17 = vadd.f32 1.0, %v14645_v21  ;;  %v13652_v21 = vld [vmem:[#allocation10 + $0x200] sm:$0xff]  }
0x149c   :  { %v14649_v0 = vpop.eup %14648  ;;  %v9531_v27 = vadd.f32 1.0, %v14647_v35  ;;  %12393 = vmatpush3.bf16.msra.mxu1 %v13644_v8  ;;  %v9546_v28 = vmul.f32 %v9530_v46, %v9481_v16  ;;  %v13653_v8 = vld [vmem:[#allocation10 + $0x280] sm:$0xff]   ;;  %v13654_v46 = vld [vmem:[#allocation10 + $0x248] sm:$0xff]   ;;  %v13658_v35 = vld [vmem:[#allocation10 + $0x250] sm:$0xff]  }
0x149d   :  { %v9533_v53 = vadd.f32 1.0, %v14649_v0  ;;  %12415 = vmatpush3.bf16.msra.mxu0 %v13645_v50  ;;  %12394 = vmatprep.subr.bf16.mxu1 %v13646_v13  ;;  %v9548_v54 = vmul.f32 %v9532_v17, %v9483_v9  ;;  %v13655_v50 = vld [vmem:[#allocation10 + $0x2c8] sm:$0xff]   ;;  %v13659_v16 = vld [vmem:[#allocation10 + $0x2d0] sm:$0xff]   ;;  %v13662_v0 = vld [vmem:[#allocation10 + $0x258] sm:$0xff]  }
0x149e   :  { %v9547_v23 = vmul.f32 %v9531_v27, %v9482_v3  ;;  %12416 = vmatprep.subr.bf16.mxu0 %v13647_v61  ;;  %v9562_v58 = vpack.c.bf16 %v9546_v28, %v9546_v28  ;;  %v13656_v13 = vld [vmem:[#allocation10 + $0x208] sm:$0xff]   ;;  %v13661_v17 = vld [vmem:[#allocation10 + $0x290] sm:$0xff]   ;;  %v13663_v9 = vld [vmem:[#allocation10 + $0x2d8] sm:$0xff]  }
0x149f   :  { %v9549_v36 = vmul.f32 %v9533_v53, %v9484_v43  ;;  %v9564_v2 = vpack.c.bf16 %v9548_v54, %v9548_v54  ;;  %v13657_v61 = vld [vmem:[#allocation10 + $0x288] sm:$0xff]   ;;  %v13665_v53 = vld [vmem:[#allocation10 + $0x298] sm:$0xff]  }
0x14a0   :  { %12395 = vmatpush3.bf16.msra.mxu1 %v13648_v52  ;;  %v9563_v1 = vpack.c.bf16 %v9547_v23, %v9547_v23  ;;  %v13664_v52 = vld [vmem:[#allocation10 + $0x218] sm:$0xff]   ;;  %v13667_v23 = vld [vmem:[#allocation10 + $0x2e0] sm:$0xff]  }
0x14a1   :  { %12417 = vmatpush3.bf16.msra.mxu0 %v13649_v55  ;;  %v9565_v26 = vpack.c.bf16 %v9549_v36, %v9549_v36  ;;  %12424 = vmatprep.subr.bf16.mxu1 %v13650_v60  ;;  %v13660_v36 = vld [vmem:[#allocation10 + $0x210] sm:$0xff]   ;;  %v13666_v55 = vld [vmem:[#allocation10 + $0x260] sm:$0xff]  }
0x14a2   :  { %10326 = vmatprep.mubr.bf16.mxu1 %v9563_v1  ;;  %12446 = vmatprep.subr.bf16.mxu0 %v13651_v6 }
0x14a3   :  { %10366 = vmatprep.mubr.bf16.mxu0 %v9565_v26  ;;  %10327 = vmatmul.mubr.bf16.vlgmr.msra.gmra.mrb[228].mxu1 %v9562_v58 }
0x14a4   :  { %10367 = vmatmul.mubr.bf16.vlgmr.msra.gmra.mrb[244].mxu0 %v9564_v2  ;;  %12425 = vmatpush3.bf16.msra.mxu1 %v13652_v21  ;;  %v13669_v2 = vld [vmem:[#allocation10 + $0x2a0] sm:$0xff]  }
0x14a5   :  { %12447 = vmatpush3.bf16.msra.mxu0 %v13653_v8  ;;  %12426 = vmatprep.subr.bf16.mxu1 %v13654_v46  ;;  %v13668_v46 = vld [vmem:[#allocation10 + $0x220] sm:$0xff]  }
0x14a6   :  { %12448 = vmatprep.subr.bf16.mxu0 %v13655_v50  ;;  %v13670_v50 = vld [vmem:[#allocation10 + $0x268] sm:$0xff]  }
0x14a8   :  { %12427 = vmatpush3.bf16.msra.mxu1 %v13656_v13  ;;  %v13671_v13 = vld [vmem:[#allocation10 + $0x2e8] sm:$0xff]  }
0x14a9   :  { %12449 = vmatpush3.bf16.msra.mxu0 %v13657_v61  ;;  %12428 = vmatprep.subr.bf16.mxu1 %v13658_v35  ;;  %v13672_v61 = vld [vmem:[#allocation10 + $0x228] sm:$0xff]  }
0x14aa   :  { %12450 = vmatprep.subr.bf16.mxu0 %v13659_v16  ;;  %v13673_v35 = vld [vmem:[#allocation10 + $0x2a8] sm:$0xff]   ;;  %v13674_v16 = vld [vmem:[#allocation10 + $0x270] sm:$0xff]  }
0x14ac   :  { %12429 = vmatpush3.bf16.msra.mxu1 %v13660_v36  ;;  %v9162_v3 = vpop.f32.mrb[216].mxu1  ;;  %v9203_v27 = vpop.f32.mrb[232].mxu0  ;;  %v13675_v36 = vld [vmem:[#allocation10 + $0x2f0] sm:$0xff]  }
0x14ad   :  { %12451 = vmatpush3.bf16.msra.mxu0 %v13661_v17  ;;  %v9502_v28 = vmul.f32 0.70710677, %v9162_v3  ;;  %v9504_v43 = vmul.f32 0.70710677, %v9203_v27  ;;  %12430 = vmatprep.subr.bf16.mxu1 %v13662_v0  ;;  %v9164_v60 = vpop.f32.mrb[217].mxu1  ;;  %v9205_v54 = vpop.f32.mrb[233].mxu0 }
0x14ae   :  { %12452 = vmatprep.subr.bf16.mxu0 %v13663_v9  ;;  %v9503_v6 = vmul.f32 0.70710677, %v9164_v60  ;;  %v9166_v1 = vpop.f32.mrb[218].mxu1  ;;  %v9207_v21 = vpop.f32.mrb[234].mxu0  ;;  %v9505_v58 = vmul.f32 0.70710677, %v9205_v54 }
0x14af   :  { %14650 = verf.f32 %v9502_v28  ;;  %v9167_v26 = vpop.f32.mrb[219].mxu1  ;;  %v9208_v8 = vpop.f32.mrb[235].mxu0  ;;  %v13676_v17 = vld [vmem:[#allocation10 + $0x230] sm:$0xff]   ;;  %v9487_v21 = vmul.f32 0.5, %v9203_v27 }
0x14b0   :  { %14652 = verf.f32 %v9504_v43  ;;  %12431 = vmatpush3.bf16.msra.mxu1 %v13664_v52  ;;  %v13677_v9 = vld [vmem:[#allocation10 + $0x2b0] sm:$0xff]   ;;  %v13678_v52 = vld [vmem:[#allocation10 + $0x278] sm:$0xff]  }
0x14b1   :  { %14654 = verf.f32 %v9503_v6  ;;  %12453 = vmatpush3.bf16.msra.mxu0 %v13665_v53  ;;  %12432 = vmatprep.subr.bf16.mxu1 %v13666_v55  ;;  %v13679_v53 = vld [vmem:[#allocation10 + $0x2f8] sm:$0xff]  }
0x14b2   :  { %14656 = verf.f32 %v9505_v58  ;;  %12454 = vmatprep.subr.bf16.mxu0 %v13667_v23  ;;  %v9485_v23 = vmul.f32 0.5, %v9162_v3  ;;  %v9486_v58 = vmul.f32 0.5, %v9164_v60  ;;  %v13680_v8 = vld [vmem:[#allocation10 + $0x238] sm:$0xff]  }
0x14b3   :  { %14658 = vrcp.f32 %v19594_v31  ;;  %v13700_v31 = vld [vmem:[#allocation10 + $0x320] sm:$0xff]  }
0x14b4   :  { %12433 = vmatpush3.bf16.msra.mxu1 %v13668_v46 }
0x14b5   :  { %12455 = vmatpush3.bf16.msra.mxu0 %v13669_v2  ;;  %12434 = vmatprep.subr.bf16.mxu1 %v13670_v50  ;;  %v9488_v2 = vmul.f32 0.5, %v9205_v54 }
0x14b6   :  { %12456 = vmatprep.subr.bf16.mxu0 %v13671_v13  ;;  %v13681_v13 = vld [vmem:[#allocation10 + $0x2b8] sm:$0xff]  }
0x14b8   :  { %12435 = vmatpush3.bf16.msra.mxu1 %v13672_v61  ;;  %v13682_v61 = vld [vmem:[#allocation10 + $0x340] sm:$0xff]  }
0x14b9   :  { %v14651_v0 = vpop.eup %14650  ;;  %12457 = vmatpush3.bf16.msra.mxu0 %v13673_v35  ;;  %12436 = vmatprep.subr.bf16.mxu1 %v13674_v16 }
0x14ba   :  { %v14653_v28 = vpop.eup %14652  ;;  %v9534_v43 = vadd.f32 1.0, %v14651_v0  ;;  %12458 = vmatprep.subr.bf16.mxu0 %v13675_v36  ;;  %v13683_v36 = vld [vmem:[#allocation10 + $0x3c0] sm:$0xff]  }
0x14bb   :  { %v14655_v55 = vpop.eup %14654  ;;  %v9536_v6 = vadd.f32 1.0, %v14653_v28  ;;  %v13684_v28 = vld [vmem:[#allocation10 + $0x300] sm:$0xff]  }
0x14bc   :  { %v14657_v1 = vpop.eup %14656  ;;  %v9535_v26 = vadd.f32 1.0, %v14655_v55  ;;  %12437 = vmatpush3.bf16.msra.mxu1 %v13676_v17  ;;  %v9550_v46 = vmul.f32 %v9534_v43, %v9485_v23  ;;  %v13685_v17 = vld [vmem:[#allocation10 + $0x380] sm:$0xff]   ;;  %v13686_v43 = vld [vmem:[#allocation10 + $0x348] sm:$0xff]   ;;  %v13690_v55 = vld [vmem:[#allocation10 + $0x350] sm:$0xff]  }
0x14bd   :  { %v9537_v50 = vadd.f32 1.0, %v14657_v1  ;;  %12459 = vmatpush3.bf16.msra.mxu0 %v13677_v9  ;;  %12438 = vmatprep.subr.bf16.mxu1 %v13678_v52  ;;  %v9552_v35 = vmul.f32 %v9536_v6, %v9487_v21  ;;  %v13687_v9 = vld [vmem:[#allocation10 + $0x3c8] sm:$0xff]   ;;  %v13691_v23 = vld [vmem:[#allocation10 + $0x3d0] sm:$0xff]   ;;  %v13694_v21 = vld [vmem:[#allocation10 + $0x358] sm:$0xff]  }
0x14be   :  { %v9551_v16 = vmul.f32 %v9535_v26, %v9486_v58  ;;  %12460 = vmatprep.subr.bf16.mxu0 %v13679_v53  ;;  %v9566_v27 = vpack.c.bf16 %v9550_v46, %v9550_v46  ;;  %v13688_v52 = vld [vmem:[#allocation10 + $0x308] sm:$0xff]   ;;  %v13692_v6 = vld [vmem:[#allocation10 + $0x310] sm:$0xff]   ;;  %v13695_v58 = vld [vmem:[#allocation10 + $0x3d8] sm:$0xff]   ;;  %v7778_v26 = vpop.xlane.xlu1 %7777 }
0x14bf   :  { %v9553_v0 = vmul.f32 %v9537_v50, %v9488_v2  ;;  %v9568_v54 = vpack.c.bf16 %v9552_v35, %v9552_v35  ;;  %v13689_v53 = vld [vmem:[#allocation10 + $0x388] sm:$0xff]   ;;  %v13693_v1 = vld [vmem:[#allocation10 + $0x390] sm:$0xff]   ;;  %v13696_v2 = vld [vmem:[#allocation10 + $0x318] sm:$0xff]   ;;  %14660 = vrcp.f32 %v7778_v26 }
0x14c0   :  { %12439 = vmatpush3.bf16.msra.mxu1 %v13680_v8  ;;  %v9567_v3 = vpack.c.bf16 %v9551_v16, %v9551_v16  ;;  %v13698_v35 = vld [vmem:[#allocation10 + $0x360] sm:$0xff]   ;;  %v13708_v26 = vld [vmem:[#allocation10 + $0x330] sm:$0xff]  }
0x14c1   :  { %12461 = vmatpush3.bf16.msra.mxu0 %v13681_v13  ;;  %v9569_v60 = vpack.c.bf16 %v9553_v0, %v9553_v0  ;;  %12468 = vmatprep.subr.bf16.mxu1 %v13682_v61  ;;  %v13697_v61 = vld [vmem:[#allocation10 + $0x398] sm:$0xff]   ;;  %v13699_v0 = vld [vmem:[#allocation10 + $0x3e0] sm:$0xff]  }
0x14c2   :  { %10598 = vmatprep.mubr.bf16.mxu1 %v9567_v3  ;;  %12490 = vmatprep.subr.bf16.mxu0 %v13683_v36 }
0x14c3   :  { %10638 = vmatprep.mubr.bf16.mxu0 %v9569_v60  ;;  %10599 = vmatmul.mubr.bf16.vlgmr.msra.gmra.mrb[232].mxu1 %v9566_v27 }
0x14c4   :  { %10639 = vmatmul.mubr.bf16.vlgmr.msra.gmra.mrb[248].mxu0 %v9568_v54  ;;  %12469 = vmatpush3.bf16.msra.mxu1 %v13684_v28  ;;  %v7775_v54 = vpop.xlane.xlu0 %7774 }
0x14c5   :  { %12491 = vmatpush3.bf16.msra.mxu0 %v13685_v17  ;;  %12470 = vmatprep.subr.bf16.mxu1 %v13686_v43 }
0x14c6   :  { %12492 = vmatprep.subr.bf16.mxu0 %v13687_v9  ;;  %v13701_v9 = vld [vmem:[#allocation10 + $0x3a0] sm:$0xff]  }
0x14c8   :  { %12471 = vmatpush3.bf16.msra.mxu1 %v13688_v52  ;;  %v13702_v52 = vld [vmem:[#allocation10 + $0x368] sm:$0xff]  }
0x14c9   :  { %12493 = vmatpush3.bf16.msra.mxu0 %v13689_v53  ;;  %12472 = vmatprep.subr.bf16.mxu1 %v13690_v55  ;;  %v13703_v53 = vld [vmem:[#allocation10 + $0x3e8] sm:$0xff]  }
0x14ca   :  { %12494 = vmatprep.subr.bf16.mxu0 %v13691_v23  ;;  %v13704_v55 = vld [vmem:[#allocation10 + $0x328] sm:$0xff]  }
0x14cb   :  { %v13705_v23 = vld [vmem:[#allocation10 + $0x3a8] sm:$0xff]  }
0x14cc   :  { %12473 = vmatpush3.bf16.msra.mxu1 %v13692_v6  ;;  %v9429_v8 = vpop.f32.mrb[220].mxu1  ;;  %v9470_v46 = vpop.f32.mrb[236].mxu0  ;;  %v13706_v6 = vld [vmem:[#allocation10 + $0x370] sm:$0xff]  }
0x14cd   :  { %12495 = vmatpush3.bf16.msra.mxu0 %v13693_v1  ;;  %v9506_v50 = vmul.f32 0.70710677, %v9429_v8  ;;  %v9508_v13 = vmul.f32 0.70710677, %v9470_v46  ;;  %12474 = vmatprep.subr.bf16.mxu1 %v13694_v21  ;;  %v9431_v16 = vpop.f32.mrb[221].mxu1  ;;  %v9472_v36 = vpop.f32.mrb[237].mxu0 }
0x14ce   :  { %12496 = vmatprep.subr.bf16.mxu0 %v13695_v58  ;;  %v9507_v3 = vmul.f32 0.70710677, %v9431_v16  ;;  %v9433_v28 = vpop.f32.mrb[222].mxu1  ;;  %v9474_v27 = vpop.f32.mrb[238].mxu0  ;;  %v9509_v60 = vmul.f32 0.70710677, %v9472_v36 }
0x14cf   :  { %14662 = verf.f32 %v9506_v50  ;;  %v9434_v17 = vpop.f32.mrb[223].mxu1  ;;  %v9475_v43 = vpop.f32.mrb[239].mxu0  ;;  %v13707_v1 = vld [vmem:[#allocation10 + $0x3f0] sm:$0xff]  }
0x14d0   :  { %14664 = verf.f32 %v9508_v13  ;;  %12475 = vmatpush3.bf16.msra.mxu1 %v13696_v2  ;;  %v14659_v21 = vpop.eup %14658  ;;  %v13709_v50 = vld [vmem:[#allocation10 + $0x3b0] sm:$0xff]   ;;  %v13710_v13 = vld [vmem:[#allocation10 + $0x378] sm:$0xff]   ;;  %v9490_v17 = vmul.f32 0.5, %v9431_v16 }
0x14d1   :  { %14666 = verf.f32 %v9507_v3  ;;  %12497 = vmatpush3.bf16.msra.mxu0 %v13697_v61  ;;  %12476 = vmatprep.subr.bf16.mxu1 %v13698_v35  ;;  %v14661_v58 = vpop.eup %14660  ;;  %v13711_v35 = vld [vmem:[#allocation10 + $0x3f8] sm:$0xff]   ;;  %v9489_v3 = vmul.f32 0.5, %v9429_v8  ;;  %v7878_v8 = vmul.f32 %v14659_v21, %v19427_v18 }
0x14d2   :  { %14668 = verf.f32 %v9509_v60  ;;  %12498 = vmatprep.subr.bf16.mxu0 %v13699_v0  ;;  %v9491_v60 = vmul.f32 0.5, %v9470_v46  ;;  %v7886_v46 = vmul.f32 %v14661_v58, %v19491_v63 }
0x14d3   :  { %14670 = vrcp.f32 %v19586_v30 }
0x14d4   :  { %14672 = vrcp.f32 %v7775_v54  ;;  %12477 = vmatpush3.bf16.msra.mxu1 %v13700_v31  ;;  %v13712_v31 = vld [vmem:[#allocation10 + $0x338] sm:$0xff]  }
0x14d5   :  { %12499 = vmatpush3.bf16.msra.mxu0 %v13701_v9  ;;  %12478 = vmatprep.subr.bf16.mxu1 %v13702_v52  ;;  %v9492_v52 = vmul.f32 0.5, %v9472_v36 }
0x14d6   :  { %12500 = vmatprep.subr.bf16.mxu0 %v13703_v53 }
0x14d8   :  { %12479 = vmatpush3.bf16.msra.mxu1 %v13704_v55  ;;  %v13713_v55 = vld [vmem:[#allocation10 + $0x3b8] sm:$0xff]  }
0x14d9   :  { %v14663_v2 = vpop.eup %14662  ;;  %12501 = vmatpush3.bf16.msra.mxu0 %v13705_v23  ;;  %12480 = vmatprep.subr.bf16.mxu1 %v13706_v6 }
0x14da   :  { %v14665_v61 = vpop.eup %14664  ;;  %v9538_v30 = vadd.f32 1.0, %v14663_v2  ;;  %12502 = vmatprep.subr.bf16.mxu0 %v13707_v1 }
0x14db   :  { %v14667_v0 = vpop.eup %14666  ;;  %v9540_v28 = vadd.f32 1.0, %v14665_v61 }
0x14dc   :  { %v14669_v27 = vpop.eup %14668  ;;  %v9539_v43 = vadd.f32 1.0, %v14667_v0  ;;  %12481 = vmatpush3.bf16.msra.mxu1 %v13708_v26  ;;  %v9554_v9 = vmul.f32 %v9538_v30, %v9489_v3 }
0x14dd   :  { %v14671_v54 = vpop.eup %14670  ;;  %v9541_v53 = vadd.f32 1.0, %v14669_v27  ;;  %12503 = vmatpush3.bf16.msra.mxu0 %v13709_v50  ;;  %12482 = vmatprep.subr.bf16.mxu1 %v13710_v13  ;;  %v9556_v6 = vmul.f32 %v9540_v28, %v9491_v60 }
0x14de   :  { %v14673_v23 = vpop.eup %14672  ;;  %v9555_v1 = vmul.f32 %v9539_v43, %v9490_v17  ;;  %12504 = vmatprep.subr.bf16.mxu0 %v13711_v35  ;;  %v7877_v26 = vmul.f32 %v14671_v54, %v19403_v39  ;;  %v9570_v61 = vpack.c.bf16 %v9554_v9, %v9554_v9  ;;  %v14918_v17 = vmov 1983009808  }
0x14df   :  { %v9557_v2 = vmul.f32 %v9541_v53, %v9492_v52  ;;  %v7885_v50 = vmul.f32 %v14673_v23, %v19442_v59  ;;  %v9572_v13 = vpack.c.bf16 %v9556_v6, %v9556_v6  ;;  %v10921_v43 = vunpack.c.l.s4 %v14918_v17 }
0x14e0   :  { %12483 = vmatpush3.bf16.msra.mxu1 %v13712_v31  ;;  %v9571_v16 = vpack.c.bf16 %v9555_v1, %v9555_v1  ;;  %v11121_v30 = vpack.c.bf16 %v7878_v8, %v7877_v26 }
0x14e1   :  { %12505 = vmatpush3.bf16.msra.mxu0 %v13713_v55  ;;  %v9573_v36 = vpack.c.bf16 %v9557_v2, %v9557_v2  ;;  %v11125_v35 = vpack.c.bf16 %v7886_v46, %v7885_v50  ;;  %v10922_v31 = vunpack.c.0.s8 %v10921_v43  ;;  %v19681_v43 = vpop.xlane.xlu1 %7795 }
0x14e2   :  { %10870 = vmatprep.mubr.bf16.mxu1 %v9571_v16 }
0x14e3   :  { %10910 = vmatprep.mubr.bf16.mxu0 %v9573_v36  ;;  %10871 = vmatmul.mubr.bf16.vlgmr.msra.gmra.mrb[236].mxu1 %v9570_v61  ;;  %v19671_v53 = vsub.s32 %v10922_v31, %v19567_v44  ;;  %v19683_v31 = vpop.xlane.xlu0 %7792 }
0x14e4   :  { %10911 = vmatmul.mubr.bf16.vlgmr.msra.gmra.mrb[252].mxu0 %v9572_v13  ;;  %13224 = vmatprep.mubr.msk.bf16.mxu1 %vm7288_vm7, %v11121_v30 }
0x14e5   :  { %13234 = vmatprep.mubr.msk.bf16.mxu0 %vm7288_vm7, %v11125_v35 }
0x1556   :  { %v12352_v18 = vpop.f32.mrb[224].mxu1 }
0x1557   :  { %v12374_v63 = vpop.f32.mrb[240].mxu0  ;;  %v12353_v21 = vpop.f32.mrb[225].mxu1 }
0x1558   :  { %v12354_v39 = vadd.f32 %v12353_v21, %v12352_v18  ;;  %v12375_v58 = vpop.f32.mrb[241].mxu0  ;;  %v12355_v0 = vpop.f32.mrb[226].mxu1 }
0x1559   :  { %v12376_v3 = vadd.f32 %v12375_v58, %v12374_v63  ;;  %v12377_v28 = vpop.f32.mrb[242].mxu0  ;;  %v12356_v59 = vpop.f32.mrb[227].mxu1 }
0x155a   :  { %v12378_v27 = vpop.f32.mrb[243].mxu0 }
0x155b   :  { %v10097_v60 = vadd.f32 %v12376_v3, %v12354_v39 }
0x155d   :  { %v10919_v46 = vcombine.high %v10097_v60, %v10097_v60  ;;  %v10926_v61 = vrot.slane %v10097_v60, %v19671_v53 }
0x155f   :  { %v10933_v13 = vrot.slane %v10919_v46, %v19671_v53  ;;  %v10934_v18 = vcombine.high %v10926_v61, %v10926_v61 }
0x1561   :  { %v10935_v0 = vcombine.high %v10933_v13, %v10933_v13 }
0x1576   :  { %v12396_v54 = vpop.f32.mrb[228].mxu1 }
0x1577   :  { %v12418_v9 = vpop.f32.mrb[244].mxu0  ;;  %v12397_v52 = vpop.f32.mrb[229].mxu1 }
0x1578   :  { %v12398_v55 = vadd.f32 %v12397_v52, %v12396_v54  ;;  %v12419_v23 = vpop.f32.mrb[245].mxu0  ;;  %v12399_v6 = vpop.f32.mrb[230].mxu1 }
0x1579   :  { %v12420_v1 = vadd.f32 %v12419_v23, %v12418_v9  ;;  %v12421_v8 = vpop.f32.mrb[246].mxu0  ;;  %v12400_v2 = vpop.f32.mrb[231].mxu1 }
0x157a   :  { %v12422_v16 = vpop.f32.mrb[247].mxu0  ;;  %v7790_v54 = vpop.xlane.xlu1 %7789 }
0x157b   :  { %v10369_v26 = vadd.f32 %v12420_v1, %v12398_v55  ;;  %v7787_v9 = vpop.xlane.xlu0 %7786 }
0x157d   :  { %v10941_v36 = vcombine.high %v10369_v26, %v10369_v26  ;;  %v10948_v50 = vrot.slane %v10369_v26, %v19671_v53 }
0x157e   :  { %v19685_v52 = vpop.xlane.xlu1 %7807 }
0x157f   :  { %v10955_v30 = vrot.slane %v10941_v36, %v19671_v53  ;;  %v10994_v44 = vcombine.low %v10948_v50, %v10948_v50  ;;  %v11975_v35 = vcombine.high %v10948_v50, %v10948_v50  ;;  %v19687_v50 = vpop.xlane.xlu0 %7804 }
0x1581   :  { %v11001_v63 = vrot.slane %v10994_v44, %v19671_v53  ;;  %v11009_v21 = vrot.slane %v11975_v35, %v19671_v53  ;;  %v11010_v39 = vcombine.low %v10955_v30, %v10955_v30  ;;  %v11976_v58 = vcombine.high %v10955_v30, %v10955_v30 }
0x1582   :  { %v19690_v44 = vpop.xlane.xlu1 %7801 }
0x1583   :  { %v11017_v3 = vrot.slane %v11010_v39, %v19671_v53  ;;  %v11025_v28 = vrot.slane %v11976_v58, %v19671_v53  ;;  %v11107_v59 = vsel %vm11106_vm1, %v10926_v61, %v11001_v63  ;;  %v11108_v27 = vsel %vm11106_vm1, %v10934_v18, %v11009_v21 }
0x1585   :  { %v11110_v60 = vsel %vm11106_vm1, %v10935_v0, %v11025_v28  ;;  %v11109_v17 = vsel %vm11106_vm1, %v10933_v13, %v11017_v3  ;;  %v19696_v3 = vpop.xlane.xlu0 %7798 }
0x1596   :  { %v12440_v55 = vpop.f32.mrb[232].mxu1 }
0x1597   :  { %v12462_v23 = vpop.f32.mrb[248].mxu0  ;;  %v12441_v6 = vpop.f32.mrb[233].mxu1 }
0x1598   :  { %v12442_v1 = vadd.f32 %v12441_v6, %v12440_v55  ;;  %v12463_v8 = vpop.f32.mrb[249].mxu0  ;;  %v12443_v2 = vpop.f32.mrb[234].mxu1 }
0x1599   :  { %v12464_v46 = vadd.f32 %v12463_v8, %v12462_v23  ;;  %v12465_v16 = vpop.f32.mrb[250].mxu0  ;;  %v12444_v26 = vpop.f32.mrb[235].mxu1 }
0x159a   :  { %v12466_v61 = vpop.f32.mrb[251].mxu0  ;;  %v19705_v26 = vpop.xlane.xlu0 %7810 }
0x159b   :  { %v10641_v36 = vadd.f32 %v12464_v46, %v12442_v1  ;;  %v19700_v1 = vpop.xlane.xlu1 %7813 }
0x159d   :  { %v10959_v13 = vcombine.high %v10641_v36, %v10641_v36  ;;  %v10966_v30 = vrot.slane %v10641_v36, %v19671_v53 }
0x159e   :  { %v7829_v36 = vpop.xlane.xlu0 %7828 }
0x159f   :  { %v10973_v35 = vrot.slane %v10959_v13, %v19671_v53  ;;  %v10974_v18 = vcombine.high %v10966_v30, %v10966_v30  ;;  %v11036_v63 = vrot.slane %v10966_v30, %v19671_v53  ;;  %v7832_v61 = vpop.xlane.xlu1 %7831 }
0x15a1   :  { %v10975_v21 = vcombine.high %v10973_v35, %v10973_v35  ;;  %v11037_v39 = vcombine.low %v11036_v63, %v11036_v63  ;;  %v11044_v58 = vrot.slane %v10974_v18, %v19671_v53  ;;  %v11052_v0 = vrot.slane %v10973_v35, %v19671_v53 }
0x15a2   :  { %v7823_v30 = vpop.xlane.xlu0 %7822 }
0x15a3   :  { %v11045_v28 = vcombine.low %v11044_v58, %v11044_v58  ;;  %v11053_v55 = vcombine.low %v11052_v0, %v11052_v0  ;;  %v11060_v23 = vrot.slane %v10975_v21, %v19671_v53  ;;  %v11112_v6 = vsel %vm11111_vm9, %v11107_v59, %v11037_v39  ;;  %v7826_v13 = vpop.xlane.xlu1 %7825 }
0x15a4   :  { %14674 = vrcp.f32 %v7826_v13 }
0x15a5   :  { %v11061_v8 = vcombine.low %v11060_v23, %v11060_v23  ;;  %v11113_v2 = vsel %vm11111_vm9, %v11108_v27, %v11045_v28  ;;  %v11114_v46 = vsel %vm11111_vm9, %v11109_v17, %v11053_v55  ;;  %14676 = vrcp.f32 %v7787_v9 }
0x15a6   :  { %v19709_v55 = vpop.xlane.xlu0 %7816  ;;  %14678 = vrcp.f32 %v7823_v30 }
0x15a7   :  { %v11115_v16 = vsel %vm11111_vm9, %v11110_v60, %v11061_v8  ;;  %v19707_v35 = vpop.xlane.xlu1 %7819  ;;  %14680 = vrcp.f32 %v7829_v36 }
0x15a8   :  { %14682 = vrcp.f32 %v7790_v54 }
0x15a9   :  { %14684 = vrcp.f32 %v7832_v61 }
0x15ab   :  { %v7838_v29 = vpop.xlane.xlu1 %7837 }
0x15ac   :  { %14686 = vrcp.f32 %v7838_v29 }
0x15b6   :  { %v12484_v18 = vpop.f32.mrb[236].mxu1 }
0x15b7   :  { %v12506_v63 = vpop.f32.mrb[252].mxu0  ;;  %v12485_v59 = vpop.f32.mrb[237].mxu1 }
0x15b8   :  { %v12486_v21 = vadd.f32 %v12485_v59, %v12484_v18  ;;  %v12507_v39 = vpop.f32.mrb[253].mxu0  ;;  %v12487_v58 = vpop.f32.mrb[238].mxu1 }
0x15b9   :  { %v12508_v0 = vadd.f32 %v12507_v39, %v12506_v63  ;;  %v12509_v27 = vpop.f32.mrb[254].mxu0  ;;  %v12488_v28 = vpop.f32.mrb[239].mxu1 }
0x15ba   :  { %v12510_v17 = vpop.f32.mrb[255].mxu0  ;;  %v7835_v63 = vpop.xlane.xlu0 %7834 }
0x15bb   :  { %v10913_v60 = vadd.f32 %v12508_v0, %v12486_v21  ;;  %14688 = vrcp.f32 %v7835_v63  ;;  %v14675_v0 = vpop.eup %14674 }
0x15bc   :  { %14690 = vrcp.f32 %v19683_v31 }
0x15bd   :  { %v10977_v23 = vcombine.high %v10913_v60, %v10913_v60  ;;  %v10984_v8 = vrot.slane %v10913_v60, %v19671_v53  ;;  %14692 = vrcp.f32 %v19681_v43 }
0x15bf   :  { %v10991_v18 = vrot.slane %v10977_v23, %v19671_v53  ;;  %v11066_v59 = vcombine.low %v10984_v8, %v10984_v8  ;;  %v11977_v58 = vcombine.high %v10984_v8, %v10984_v8  ;;  %v14677_v23 = vpop.eup %14676  ;;  %v7844_v8 = vpop.xlane.xlu1 %7843 }
0x15c0   :  { %14694 = vrcp.f32 %v7844_v8 }
0x15c1   :  { %v11073_v39 = vrot.slane %v11066_v59, %v19671_v53  ;;  %v11082_v27 = vrot.slane %v11977_v58, %v19671_v53  ;;  %v11084_v13 = vcombine.low %v10991_v18, %v10991_v18  ;;  %v11978_v21 = vcombine.high %v10991_v18, %v10991_v18  ;;  %v14679_v59 = vpop.eup %14678 }
0x15c2   :  { %v14681_v63 = vpop.eup %14680  ;;  %14696 = vrcp.f32 %v19690_v44 }
0x15c3   :  { %v11074_v9 = vcombine.low %v11073_v39, %v11073_v39  ;;  %v11083_v30 = vcombine.low %v11082_v27, %v11082_v27  ;;  %v11091_v36 = vrot.slane %v11084_v13, %v19671_v53  ;;  %v11100_v54 = vrot.slane %v11978_v21, %v19671_v53  ;;  %v7841_v39 = vpop.xlane.xlu0 %7840  ;;  %v14683_v13 = vpop.eup %14682 }
0x15c4   :  { %v7902_v27 = vmul.f32 %v14675_v0, %v19551_v38  ;;  %v14685_v43 = vpop.eup %14684  ;;  %14698 = vrcp.f32 %v7841_v39  ;;  %v20701_v38 = vpack.c.bf16 %v19650_v4, %v19647_v24  ;;  %v20702_v21 = vpack.c.bf16 %v19636_v57, %v19633_v47 }
0x15c5   :  { %v11092_v28 = vcombine.low %v11091_v36, %v11091_v36  ;;  %v11101_v17 = vcombine.low %v11100_v54, %v11100_v54  ;;  %v11117_v61 = vsel %vm11116_vm10, %v11112_v6, %v11074_v9  ;;  %v11118_v60 = vsel %vm11116_vm10, %v11113_v2, %v11083_v30 }
0x15c6   :  { %v11137_v29 = vpack.c.bf16 %v11117_v61, %v11117_v61  ;;  %v11138_v18 = vpack.c.bf16 %v11118_v60, %v11118_v60  ;;  %14700 = vrcp.f32 %v19696_v3  ;;  %v7904_v5 = vmul.f32 %v14685_v43, %v19547_v51 }
0x15c7   :  { %v11120_v58 = vsel %vm11116_vm10, %v11115_v16, %v11101_v17  ;;  %v11119_v53 = vsel %vm11116_vm10, %v11114_v46, %v11092_v28  ;;  %v7901_v46 = vmul.f32 %v14679_v59, %v19508_v25  ;;  %v14687_v16 = vpop.eup %14686  ;;  %v7890_v37 = vmul.f32 %v14683_v13, %v19512_v33 }
0x15c8   :  { %13328 = vmatprep.subr.msk.bf16.mxu1 %vm11111_vm9, %v11137_v29  ;;  %13329 = vmatprep.subr.msk.bf16.mxu0 %vm11111_vm9, %v11138_v18  ;;  %v11154_v6 = vsel %vm11111_vm9, %v11137_v29, 0  ;;  %v11234_v31 = vsel %vm11111_vm9, %v11138_v18, 0  ;;  %v11140_v2 = vpack.c.bf16 %v11120_v58, %v11120_v58  ;;  %v11139_v3 = vpack.c.bf16 %v11119_v53, %v11119_v53  ;;  %v14689_v9 = vpop.eup %14688 }
0x15c9   :  { %13223 = vmatpush3.bf16.msra.mxu1 %v11154_v6  ;;  %13233 = vmatpush3.bf16.msra.mxu0 %v11234_v31  ;;  %v11133_v44 = vpack.c.bf16 %v7902_v27, %v7901_v46  ;;  %v14691_v24 = vpop.eup %14690  ;;  %v7903_v47 = vmul.f32 %v14681_v63, %v19499_v20  ;;  %14702 = vrcp.f32 %v19685_v52  ;;  %v7889_v4 = vmul.f32 %v14677_v23, %v19460_v48  ;;  %v20707_v27 = vld [vmem:[#allocation116_spill] sm:$0xff] }
0x15ca   :  { %13330 = vmatprep.subr.msk.bf16.mxu1 %vm11111_vm9, %v11138_v18  ;;  %13332 = vmatprep.subr.msk.bf16.mxu0 %vm11111_vm9, %v11140_v2  ;;  %v11394_v25 = vsel %vm11111_vm9, %v11140_v2, 0  ;;  %v14693_v57 = vpop.eup %14692  ;;  %v7905_v30 = vmul.f32 %v14689_v9, %v19526_v56  ;;  %14704 = vrcp.f32 %v19700_v1  ;;  %v20703_v20 = vpack.c.bf16 %v19628_v45, %v19625_v34  ;;  %v20711_v9 = vld [vmem:[#allocation117_spill] sm:$0xff] }
0x15cb   :  { %v11134_v51 = vpack.c.bf16 %v7904_v5, %v7903_v47  ;;  %v14695_v36 = vpop.eup %14694  ;;  %14706 = vrcp.f32 %v19687_v50  ;;  %v11127_v54 = vpack.c.bf16 %v7890_v37, %v7889_v4  ;;  %v7891_v1 = vmul.f32 %v14691_v24, %v19452_v11  ;;  %v20712_v24 = vld [vmem:[#allocation37_spill] sm:$0xff] }
0x15cc   :  { %13225 = vmatmul.mubr.msk.bf16.vlgmr.msra.gmra.mrb[240].mxu1 %vm7288_vm7, %v11122_v49  ;;  %13235 = vmatmul.mubr.msk.bf16.vlgmr.msra.gmra.mrb[0].mxu0 %vm7288_vm7, %v20701_v38  ;;  %v7906_v49 = vmul.f32 %v14687_v16, %v19559_v19  ;;  %v14697_v0 = vpop.eup %14696  ;;  %14708 = vrcp.f32 %v19705_v26  ;;  %v7892_v19 = vmul.f32 %v14693_v57, %v19503_v12  ;;  %v7908_v52 = vmul.f32 %v14695_v36, %v19563_v42  ;;  %v20709_v16 = vld [vmem:[#allocation111_spill] sm:$0xff]  ;;  %v20714_v36 = vld [vmem:[#allocation24_spill] sm:$0xff] }
0x15cd   :  { %13228 = vmatprep.mubr.msk.bf16.mxu1 %vm7288_vm7, %v20702_v21  ;;  %13263 = vmatpush3.bf16.msra.mxu1 %v11234_v31  ;;  %v7894_v50 = vmul.f32 %v14697_v0, %v19530_v40  ;;  %14710 = vrcp.f32 %v19707_v35  ;;  %v11314_v12 = vsel %vm11111_vm9, %v11139_v3, 0  ;;  %v20706_v31 = vld [vmem:[#allocation112_spill] sm:$0xff]  ;;  %v20713_v57 = vld [vmem:[#allocation51_spill] sm:$0xff] }
0x15ce   :  { %13253 = vmatpush3.bf16.msra.mxu0 %v11394_v25  ;;  %13254 = vmatprep.mubr.msk.bf16.mxu0 %vm7288_vm7, %v11133_v44  ;;  %v11135_v33 = vpack.c.bf16 %v7906_v49, %v7905_v30  ;;  %v14699_v48 = vpop.eup %14698  ;;  %v11128_v26 = vpack.c.bf16 %v7892_v19, %v7891_v1  ;;  %14712 = vrcp.f32 %v19709_v55  ;;  %v20710_v25 = vld [vmem:[#allocation20_spill] sm:$0xff] }
0x15cf   :  { %13331 = vmatprep.subr.msk.bf16.mxu1 %vm11111_vm9, %v11139_v3  ;;  %v7907_v34 = vmul.f32 %v14699_v48, %v19536_v10 }
0x15d0   :  { %v14701_v56 = vpop.eup %14700 }
0x15d1   :  { %v7893_v45 = vmul.f32 %v14701_v56, %v19480_v32  ;;  %v11136_v28 = vpack.c.bf16 %v7908_v52, %v7907_v34  ;;  %v20716_v56 = vld [vmem:[#allocation44_spill] sm:$0xff]  ;;  %v20717_v52 = vld [vmem:[#allocation27_spill] sm:$0xff] }
0x15d3   :  { %v14703_v17 = vpop.eup %14702  ;;  %v11129_v61 = vpack.c.bf16 %v7894_v50, %v7893_v45  ;;  %v20718_v45 = vld [vmem:[#allocation34_spill] sm:$0xff] }
0x15d4   :  { %13229 = vmatmul.mubr.msk.bf16.gmra.mrb[244].mxu1 %vm7288_vm7, %v20703_v20  ;;  %13255 = vmatmul.mubr.msk.bf16.vlgmr.msra.gmra.mrb[4].mxu0 %vm7288_vm7, %v11134_v51  ;;  %v14705_v60 = vpop.eup %14704  ;;  %v7896_v32 = vmul.f32 %v14703_v17, %v19522_v62 }
0x15d5   :  { %13238 = vmatprep.mubr.msk.bf16.mxu1 %vm7288_vm7, %v11127_v54  ;;  %13258 = vmatprep.mubr.msk.bf16.mxu0 %vm7288_vm7, %v11135_v33  ;;  %v14707_v11 = vpop.eup %14706  ;;  %v7898_v10 = vmul.f32 %v14705_v60, %v19540_v15  ;;  %v20715_v33 = vld [vmem:[#allocation17_spill] sm:$0xff] }
0x15d6   :  { %v14709_v40 = vpop.eup %14708  ;;  %v7895_v42 = vmul.f32 %v14707_v11, %v19476_v7  ;;  %v20704_v7 = vld [vmem:[#allocation26_spill] sm:$0xff] }
0x15d7   :  { %v7897_v35 = vmul.f32 %v14709_v40, %v19494_v14  ;;  %v14711_v23 = vpop.eup %14710  ;;  %v20705_v14 = vld [vmem:[#allocation115_spill] sm:$0xff]  ;;  %v20721_v40 = vld [vmem:[#allocation92_spill] sm:$0xff] }
0x15d8   :  { %v11130_v55 = vpack.c.bf16 %v7896_v32, %v7895_v42  ;;  %v14713_v29 = vpop.eup %14712  ;;  %v7900_v18 = vmul.f32 %v14711_v23, %v19555_v22  ;;  %v20723_v23 = vld [vmem:[#allocation95_spill] sm:$0xff] }
0x15d9   :  { %v11131_v8 = vpack.c.bf16 %v7898_v10, %v7897_v35  ;;  %v7899_v59 = vmul.f32 %v14713_v29, %v19518_v41  ;;  %v20708_v41 = vld [vmem:[#allocation113_spill] sm:$0xff]  ;;  %v20722_v35 = vld [vmem:[#allocation114_spill] sm:$0xff] }
0x15db   :  { %v11132_v58 = vpack.c.bf16 %v7900_v18, %v7899_v59  ;;  %v20724_v59 = vld [vmem:[#allocation56_spill] sm:$0xff] }
0x15dc   :  { %13239 = vmatmul.mubr.msk.bf16.vlgmr.msra.gmra.mrb[248].mxu1 %vm7288_vm7, %v11128_v26  ;;  %13259 = vmatmul.mubr.msk.bf16.gmra.mrb[8].mxu0 %vm7288_vm7, %v11136_v28  ;;  %v20719_v28 = vld [vmem:[#allocation91_spill] sm:$0xff] }
0x15dd   :  { %13243 = vmatpush3.bf16.msra.mxu1 %v11314_v12  ;;  %13244 = vmatprep.mubr.msk.bf16.mxu1 %vm7288_vm7, %v11129_v61  ;;  %v20720_v12 = vld [vmem:[#allocation50_spill] sm:$0xff] }
0x15e4   :  { %13245 = vmatmul.mubr.msk.bf16.vlgmr.msra.gmra.mrb[252].mxu1 %vm7288_vm7, %v11130_v55 }
0x15e5   :  { %13248 = vmatprep.mubr.msk.bf16.mxu1 %vm7288_vm7, %v11131_v8 }
0x15ec   :  { %13249 = vmatmul.mubr.msk.bf16.gmra.mrb[0].mxu1 %vm7288_vm7, %v11132_v58 }
0x169f   :  { %v13226_v62 = vpop.f32.mrb[240].mxu1  ;;  %v13236_v15 = vpop.f32.mrb[0].mxu0 }
0x16a0   :  { %v11463_v53 = vadd.f32 %v13226_v62, %v20704_v7  ;;  %v11471_v63 = vadd.f32 %v13236_v15, %v20705_v14  ;;  %v11190_v39 = vpop.f32.mrb[241].mxu1  ;;  %v11270_v6 = vpop.f32.mrb[1].mxu0  ;;  %v20725_v62 = vld [vmem:[#allocation89_spill] sm:$0xff]  ;;  %v20726_v14 = vld [vmem:[#allocation48_spill] sm:$0xff] }
0x16a1   :  { %v11461_v2 = vadd.f32 %v11190_v39, %v20706_v31  ;;  %v11469_v13 = vadd.f32 %v11270_v6, %v20707_v27  ;;  %v13227_v43 = vpop.f32.mrb[242].mxu1  ;;  %v13237_v46 = vpop.f32.mrb[2].mxu0  ;;  %v20727_v39 = vld [vmem:[#allocation90_spill] sm:$0xff] }
0x16a2   :  { %11495 = vst [vmem:[#allocation11 + $0x10] sm:$0xff] %v11463_v53  ;;  %11503 = vst [vmem:[#allocation11 + $0x50] sm:$0xff] %v11471_v63  ;;  %v11464_v22 = vadd.f32 %v13227_v43, %v20708_v41  ;;  %v11472_v38 = vadd.f32 %v13237_v46, %v20709_v16  ;;  %v11193_v44 = vpop.f32.mrb[243].mxu1  ;;  %v11273_v21 = vpop.f32.mrb[3].mxu0  ;;  %v20729_v43 = vld [vmem:[#allocation41_spill] sm:$0xff] }
0x16a3   :  { %11493 = vst [vmem:[#allocation11] sm:$0xff] %v11461_v2  ;;  %11501 = vst [vmem:[#allocation11 + $0x40] sm:$0xff] %v11469_v13  ;;  %v11462_v3 = vadd.f32 %v11193_v44, %v20710_v25  ;;  %v11470_v5 = vadd.f32 %v11273_v21, %v20711_v9  ;;  %v20728_v2 = vld [vmem:[#allocation54_spill] sm:$0xff]  ;;  %v20731_v44 = vld [vmem:[#allocation52_spill] sm:$0xff] }
0x16a4   :  { %11496 = vst [vmem:[#allocation11 + $0x18] sm:$0xff] %v11464_v22  ;;  %11504 = vst [vmem:[#allocation11 + $0x58] sm:$0xff] %v11472_v38  ;;  %v20730_v22 = vld [vmem:[#allocation70_spill] sm:$0xff] }
0x16a5   :  { %11494 = vst [vmem:[#allocation11 + $0x8] sm:$0xff] %v11462_v3  ;;  %11502 = vst [vmem:[#allocation11 + $0x48] sm:$0xff] %v11470_v5  ;;  %v20732_v3 = vld [vmem:[#allocation31_spill] sm:$0xff] }
0x16a7   :  { %v13230_v37 = vpop.f32.mrb[244].mxu1  ;;  %v13256_v49 = vpop.f32.mrb[4].mxu0 }
0x16a8   :  { %v11467_v47 = vadd.f32 %v13230_v37, %v20712_v24  ;;  %v11487_v4 = vadd.f32 %v13256_v49, %v20713_v57  ;;  %v11206_v30 = vpop.f32.mrb[245].mxu1  ;;  %v11430_v51 = vpop.f32.mrb[5].mxu0  ;;  %v20733_v37 = vld [vmem:[#allocation18_spill] sm:$0xff] }
0x16a9   :  { %v11465_v54 = vadd.f32 %v11206_v30, %v20714_v36  ;;  %v11485_v0 = vadd.f32 %v11430_v51, %v20715_v33  ;;  %v13231_v20 = vpop.f32.mrb[246].mxu1  ;;  %v13257_v48 = vpop.f32.mrb[6].mxu0  ;;  %v20735_v30 = vld [vmem:[#allocation45_spill] sm:$0xff] }
0x16aa   :  { %11499 = vst [vmem:[#allocation11 + $0x30] sm:$0xff] %v11467_v47  ;;  %11519 = vst [vmem:[#allocation11 + $0xd0] sm:$0xff] %v11487_v4  ;;  %v11468_v19 = vadd.f32 %v13231_v20, %v20716_v56  ;;  %v11488_v50 = vadd.f32 %v13257_v48, %v20717_v52  ;;  %v11209_v1 = vpop.f32.mrb[247].mxu1  ;;  %v11433_v34 = vpop.f32.mrb[7].mxu0  ;;  %v20734_v47 = vld [vmem:[#allocation22_spill] sm:$0xff] }
0x16ab   :  { %11497 = vst [vmem:[#allocation11 + $0x20] sm:$0xff] %v11465_v54  ;;  %11517 = vst [vmem:[#allocation11 + $0xc0] sm:$0xff] %v11485_v0  ;;  %v11466_v26 = vadd.f32 %v11209_v1, %v20718_v45  ;;  %v11486_v17 = vadd.f32 %v11433_v34, %v20719_v28 }
0x16ac   :  { %11500 = vst [vmem:[#allocation11 + $0x38] sm:$0xff] %v11468_v19  ;;  %11520 = vst [vmem:[#allocation11 + $0xd8] sm:$0xff] %v11488_v50 }
0x16ad   :  { %11498 = vst [vmem:[#allocation11 + $0x28] sm:$0xff] %v11466_v26  ;;  %11518 = vst [vmem:[#allocation11 + $0xc8] sm:$0xff] %v11486_v17 }
0x16af   :  { %v13240_v61 = vpop.f32.mrb[248].mxu1  ;;  %v13260_v60 = vpop.f32.mrb[8].mxu0 }
0x16b0   :  { %v11475_v11 = vadd.f32 %v13240_v61, %v20720_v12  ;;  %v11491_v32 = vadd.f32 %v13260_v60, %v20721_v40  ;;  %v11286_v10 = vpop.f32.mrb[249].mxu1  ;;  %v11446_v42 = vpop.f32.mrb[9].mxu0 }
0x16b1   :  { %v11473_v55 = vadd.f32 %v11286_v10, %v20722_v35  ;;  %v11489_v8 = vadd.f32 %v11446_v42, %v20723_v23  ;;  %v13241_v29 = vpop.f32.mrb[250].mxu1  ;;  %v13261_v18 = vpop.f32.mrb[10].mxu0 }
0x16b2   :  { %11507 = vst [vmem:[#allocation11 + $0x70] sm:$0xff] %v11475_v11  ;;  %11523 = vst [vmem:[#allocation11 + $0xf0] sm:$0xff] %v11491_v32  ;;  %v11476_v58 = vadd.f32 %v13241_v29, %v20724_v59  ;;  %v11492_v15 = vadd.f32 %v13261_v18, %v20725_v62  ;;  %v11289_v7 = vpop.f32.mrb[251].mxu1  ;;  %v11449_v53 = vpop.f32.mrb[11].mxu0 }
0x16b3   :  { %11505 = vst [vmem:[#allocation11 + $0x60] sm:$0xff] %v11473_v55  ;;  %11521 = vst [vmem:[#allocation11 + $0xe0] sm:$0xff] %v11489_v8  ;;  %v11474_v63 = vadd.f32 %v11289_v7, %v20726_v14  ;;  %v11490_v6 = vadd.f32 %v11449_v53, %v20727_v39 }
0x16b4   :  { %11508 = vst [vmem:[#allocation11 + $0x78] sm:$0xff] %v11476_v58  ;;  %11524 = vst [vmem:[#allocation11 + $0xf8] sm:$0xff] %v11492_v15 }
0x16b5   :  { %11506 = vst [vmem:[#allocation11 + $0x68] sm:$0xff] %v11474_v63  ;;  %11522 = vst [vmem:[#allocation11 + $0xe8] sm:$0xff] %v11490_v6 }
0x16b7   :  { %v13246_v31 = vpop.f32.mrb[252].mxu1 }
0x16b8   :  { %v11479_v27 = vadd.f32 %v13246_v31, %v20728_v2  ;;  %v11350_v13 = vpop.f32.mrb[253].mxu1 }
0x16b9   :  { %v11477_v46 = vadd.f32 %v11350_v13, %v20729_v43  ;;  %v13247_v41 = vpop.f32.mrb[254].mxu1 }
0x16ba   :  { %11511 = vst [vmem:[#allocation11 + $0x90] sm:$0xff] %v11479_v27  ;;  %v11480_v16 = vadd.f32 %v13247_v41, %v20730_v22  ;;  %v11353_v38 = vpop.f32.mrb[255].mxu1 }
0x16bb   :  { %11509 = vst [vmem:[#allocation11 + $0x80] sm:$0xff] %v11477_v46  ;;  %v11478_v21 = vadd.f32 %v11353_v38, %v20731_v44 }
0x16bc   :  { %11512 = vst [vmem:[#allocation11 + $0x98] sm:$0xff] %v11480_v16 }
0x16bd   :  { %11510 = vst [vmem:[#allocation11 + $0x88] sm:$0xff] %v11478_v21 }
0x16bf   :  { %v13250_v25 = vpop.f32.mrb[0].mxu1 }
0x16c0   :  { %v11483_v9 = vadd.f32 %v13250_v25, %v20732_v3  ;;  %v11366_v5 = vpop.f32.mrb[1].mxu1 }
0x16c1   :  { %v11481_v49 = vadd.f32 %v11366_v5, %v20733_v37  ;;  %v13251_v24 = vpop.f32.mrb[2].mxu1 }
0x16c2   :  { %11515 = vst [vmem:[#allocation11 + $0xb0] sm:$0xff] %v11483_v9  ;;  %v11484_v57 = vadd.f32 %v13251_v24, %v20734_v47  ;;  %v11369_v4 = vpop.f32.mrb[3].mxu1 }
0x16c3   :  { %11513 = vst [vmem:[#allocation11 + $0xa0] sm:$0xff] %v11481_v49  ;;  %v11482_v51 = vadd.f32 %v11369_v4, %v20735_v30 }
0x16c4   :  { %11516 = vst [vmem:[#allocation11 + $0xb8] sm:$0xff] %v11484_v57 }
0x16c5   :  { %11514 = vst [vmem:[#allocation11 + $0xa8] sm:$0xff] %v11482_v51 }
0x16c6   :  { %14880 = shalt.err (!%p14877_p2)
}
0x16c7   :  { %s14881_s16 = scalar_lea.hbm %s19844_s11, 4096 }
0x16c8   :  { %p14882_p3 = scmp.ne.s32.totalorder %s19844_s11, %s14881_s16  ;;  %p14885_p4 = scmp.lt.u32.totalorder %s14881_s16, %s19844_s11 }
0x16ca   :  { %p14887_p5 = pnand %p14885_p4, %p14882_p3 }
0x16cc   :  { %14890 = shalt.err (!%p14887_p5)
}
0x16cd   :  { %11536 = dma.vmem_to_hbm [thread:$0]  %s11531_s30, 4096, %s19844_s11, [#allocation4], %s14906_s9, %s14906_s9, %s14907_s13  }
0x16ce   :  { %14897 = dma.done.wait [#allocation4], 4096  }
0x16cf   :  { %14898 = vsyncadd [#allocation4], 4294963200 }
0x16d0   :  { %11540 = vsyncpa [#allocation3], 1 }
0x16d1   :  { %11541 = vsyncpa [#allocation6], 1 }
0x16d2   :  { %11542 = vsyncpa [#allocation9], 1 }
0x16d3   :  { %11543 = vsyncpa [#allocation4], 1 }

</bundles_post_ra>
